<compile_context>
chip_gen: v6e
topology: v6e:2x2x1
jax: 0.10.0
libtpu: 0.0.40
codegen_flags: <defaults>
</compile_context>

<pallas_src>
import jax
import jax.numpy as jnp
from jax import lax
from jax.experimental import pallas as pl
from jax.experimental.pallas import tpu as pltpu


def _basic_block_kernel(x_ref, w1_ref, w2_ref, sb_ref, out_ref, xp_ref):
    """Fused conv3x3 -> BN -> ReLU -> conv3x3 -> BN -> +identity -> ReLU.

    x_ref  : (H, W, C)      bf16  one NHWC image (unpadded)
    w1_ref : (3, 3C, C)     bf16  conv1 weights, kh folded into K (per kw tap)
    w2_ref : (3, 3C, C)     bf16  conv2 weights, same folding
    sb_ref : (4, C)         f32   [bn1_scale, bn1_bias, bn2_scale, bn2_bias]
    out_ref: (H, W, C)      bf16  output image
    xp_ref : (H+4, W+4, C)  bf16  VMEM scratch: zero-padded copy of the image
    """
    H, W, C = x_ref.shape

    # Zero-padded image in VMEM (2-pixel ring: conv1's own padding plus the
    # ring needed so conv2's halo rows/cols of the intermediate can be formed
    # and then masked). Only the inner ring must be zero; zeroing all is cheap.
    xp_ref[...] = jnp.zeros_like(xp_ref)
    xp_ref[2:H + 2, 2:W + 2, :] = x_ref[...]

    sb = sb_ref[...]
    s1, b1, s2, b2 = sb[0], sb[1], sb[2], sb[3]

    def tap(src, w_ref, kw, width):
        # (rows, width, 3C) x (3C, C) -> (rows, width, C), f32 accumulation.
        return lax.dot_general(
            src[:, kw:kw + width, :], w_ref[kw],
            dimension_numbers=(((2,), (0,)), ((), ())),
            preferred_element_type=jnp.float32)

    # ---- conv1 on the extended (H+2, W+2) window, kh folded into K = 3C ----
    x3 = jnp.concatenate(
        [xp_ref[kh:kh + H + 2, :, :] for kh in range(3)], axis=-1)  # (H+2, W+4, 3C)
    acc1 = tap(x3, w1_ref, 0, W + 2)
    acc1 = acc1 + tap(x3, w1_ref, 1, W + 2)
    acc1 = acc1 + tap(x3, w1_ref, 2, W + 2)

    # ---- bn1 + relu (f32 epilogue), bf16 cast, zero the out-of-image ring ---
    y1 = jnp.maximum(acc1 * s1 + b1, 0.0).astype(jnp.bfloat16)
    rows = lax.broadcasted_iota(jnp.int32, (H + 2, W + 2, 1), 0)
    cols = lax.broadcasted_iota(jnp.int32, (H + 2, W + 2, 1), 1)
    valid = (rows >= 1) & (rows <= H) & (cols >= 1) & (cols <= W)
    y1 = jnp.where(valid, y1, jnp.bfloat16(0))

    # ---- conv2, kh folded into K = 3C ---------------------------------------
    y3 = jnp.concatenate(
        [y1[kh:kh + H, :, :] for kh in range(3)], axis=-1)          # (H, W+2, 3C)
    acc2 = tap(y3, w2_ref, 0, W)
    acc2 = acc2 + tap(y3, w2_ref, 1, W)
    acc2 = acc2 + tap(y3, w2_ref, 2, W)

    # ---- bn2 + identity residual + relu, fused into the single bf16 store ---
    residual = x_ref[...].astype(jnp.float32)
    out_ref[...] = jnp.maximum(acc2 * s2 + b2 + residual, 0.0).astype(out_ref.dtype)


def _fold_bn(gamma, beta, mean, var, eps=1e-5):
    scale = gamma / jnp.sqrt(var + eps)
    bias = beta - mean * scale
    return scale, bias


def _fold_conv_weight(w_hwio):
    # (3, 3, Cin, Cout) HWIO -> (kw, kh*Cin, Cout) so each kw tap is K = 3*Cin.
    kh, kw, ci, co = w_hwio.shape
    return jnp.transpose(w_hwio, (1, 0, 2, 3)).reshape(kw, kh * ci, co)


def _vmem_bytes_estimate(H, W, C):
    bf, f32 = 2, 4
    pad = (H + 4) * (W + 4) * C * bf                      # xp scratch
    io = 2 * (H * W * C * bf) * 2                         # in + out, double-buffered
    wts = 2 * (3 * 3 * C * C * bf) * 2                    # w1f + w2f, double-buffered
    x3 = (H + 2) * (W + 4) * 3 * C * bf
    y1 = (H + 2) * (W + 2) * C * (f32 + bf)               # f32 acc1 + bf16 intermediate
    y3 = H * (W + 2) * 3 * C * bf
    acc2 = H * W * C * f32
    return pad + io + wts + x3 + y1 + y3 + acc2


def basic_block_pallas(x_nhwc, w1, w2, bn1_scale, bn1_bias, bn2_scale, bn2_bias):
    """Fused ResNet BasicBlock (stride=1, identity shortcut).

    x_nhwc : (N, H, W, C) activations (any float dtype; cast to bf16 once)
    w1, w2 : (3, 3, C, C) HWIO conv weights
    bn*_scale / bn*_bias : (C,) inference-folded BatchNorm parameters
    Returns (N, H, W, C) bf16 (lane-dense NHWC, ready for the next block).
    """
    N, H, W, C = x_nhwc.shape
    assert w1.shape == (3, 3, C, C) and w2.shape == (3, 3, C, C), \
        "identity shortcut requires inplanes == planes (stride=1)"
    assert C % 8 == 0
    # TODO(synk): pad channels to a multiple of 128 for full lane utilization
    # when C < 128 (e.g. the C=64 BasicBlock); C=128/256/512 blocks are native.

    est = _vmem_bytes_estimate(H, W, C)
    assert 2 * est <= 60 * 1024 * 1024, "whole-image tile too large for VMEM"
    # TODO(synk): spatial (row) tiling with halo recompute for large H*W images.
    vmem_limit = int(min(64 * 1024 * 1024, max(32 * 1024 * 1024, 2 * est)))

    xb = x_nhwc.astype(jnp.bfloat16)
    w1f = _fold_conv_weight(w1).astype(jnp.bfloat16)      # (3, 3C, C)
    w2f = _fold_conv_weight(w2).astype(jnp.bfloat16)      # (3, 3C, C)
    sb = jnp.stack([bn1_scale, bn1_bias, bn2_scale, bn2_bias]).astype(jnp.float32)

    return pl.pallas_call(
        _basic_block_kernel,
        out_shape=jax.ShapeDtypeStruct((N, H, W, C), jnp.bfloat16),
        grid=(N,),   # one whole image per step; N >= 2 feeds both v7x TCs
        in_specs=[
            pl.BlockSpec((None, H, W, C), lambda n: (n, 0, 0, 0)),
            pl.BlockSpec((3, 3 * C, C), lambda n: (0, 0, 0)),
            pl.BlockSpec((3, 3 * C, C), lambda n: (0, 0, 0)),
            pl.BlockSpec((4, C), lambda n: (0, 0)),
        ],
        out_specs=pl.BlockSpec((None, H, W, C), lambda n: (n, 0, 0, 0)),
        scratch_shapes=[pltpu.VMEM((H + 4, W + 4, C), jnp.bfloat16)],
        compiler_params=pltpu.CompilerParams(
            dimension_semantics=("parallel",),
            vmem_limit_bytes=vmem_limit),
    )(xb, w1f, w2f, sb)


def _reference_nchw(x_nchw, w1, s1, b1, w2, s2, b2):
    """Pure-JAX reference with the same bf16-operand / f32-accumulate convs."""
    dn = ("NCHW", "HWIO", "NCHW")

    def conv(x, w):
        return lax.conv_general_dilated(
            x.astype(jnp.bfloat16), w.astype(jnp.bfloat16),
            window_strides=(1, 1), padding="SAME", dimension_numbers=dn,
            preferred_element_type=jnp.float32)

    xb = x_nchw.astype(jnp.bfloat16)
    out = conv(xb, w1)
    out = out * s1.reshape(1, -1, 1, 1) + b1.reshape(1, -1, 1, 1)
    out = jnp.maximum(out, 0.0)
    out = conv(out, w2)
    out = out * s2.reshape(1, -1, 1, 1) + b2.reshape(1, -1, 1, 1)
    out = jnp.maximum(out + xb.astype(jnp.float32), 0.0)
    return out


if __name__ == "__main__":
    # BasicBlock(inplanes=128, planes=128, stride=1): lane-dense channel count.
    N, C, H, W = 2, 128, 16, 16
    key = jax.random.PRNGKey(0)
    k = jax.random.split(key, 10)

    x_nchw = jax.random.normal(k[0], (N, C, H, W), jnp.float32)

    wscale = 1.0 / jnp.sqrt(9.0 * C)
    w1 = jax.random.normal(k[1], (3, 3, C, C), jnp.float32) * wscale
    w2 = jax.random.normal(k[2], (3, 3, C, C), jnp.float32) * wscale

    gamma1 = 1.0 + 0.1 * jax.random.normal(k[3], (C,), jnp.float32)
    beta1 = 0.1 * jax.random.normal(k[4], (C,), jnp.float32)
    mean1 = 0.05 * jax.random.normal(k[5], (C,), jnp.float32)
    var1 = 1.0 + 0.1 * jnp.abs(jax.random.normal(k[6], (C,), jnp.float32))
    gamma2 = 1.0 + 0.1 * jax.random.normal(k[7], (C,), jnp.float32)
    beta2 = 0.1 * jax.random.normal(k[8], (C,), jnp.float32)
    mean2 = 0.05 * jax.random.normal(k[9], (C,), jnp.float32)
    var2 = jnp.ones((C,), jnp.float32)

    s1, b1 = _fold_bn(gamma1, beta1, mean1, var1)
    s2, b2 = _fold_bn(gamma2, beta2, mean2, var2)

    # One-time layout glue for the demo: the block itself consumes/produces
    # lane-dense NHWC bf16, so a real network keeps that layout between blocks.
    x_nhwc = jnp.transpose(x_nchw, (0, 2, 3, 1))

    out_nhwc = basic_block_pallas(x_nhwc, w1, w2, s1, b1, s2, b2)
    out_nhwc = jax.block_until_ready(out_nhwc)

    out_nchw = jnp.transpose(out_nhwc.astype(jnp.float32), (0, 3, 1, 2))
    ref = _reference_nchw(x_nchw, w1, s1, b1, w2, s2, b2)

    assert out_nchw.shape == (N, C, H, W)
    max_err = float(jnp.max(jnp.abs(out_nchw - ref)))
    assert jnp.allclose(out_nchw, ref, atol=3e-2, rtol=3e-2), max_err

    print("KERNEL_OK")
</pallas_src>

<mosaic_0001>
module attributes {stable_mosaic.version = 11 : i64} {
  func.func @_basic_block_kernel(%arg0: i32, %arg1: memref<1x16x16x128xbf16, #tpu.memory_space<vmem>>, %arg2: memref<3x384x128xbf16, #tpu.memory_space<vmem>>, %arg3: memref<3x384x128xbf16, #tpu.memory_space<vmem>>, %arg4: memref<4x128xf32, #tpu.memory_space<vmem>>, %arg5: memref<1x16x16x128xbf16, #tpu.memory_space<vmem>>, %arg6: memref<20x20x128xbf16, #tpu.memory_space<vmem>>) attributes {dimension_semantics = [#tpu.dimension_semantics<parallel>], iteration_bounds = array<i64: 2>, scalar_prefetch = 0 : i64, scratch_operands = 1 : i64, tpu.core_type = #tpu.core_type<tc>, window_params = [{transform_indices = @transform_0, window_bounds = array<i64: 1, 16, 16, 128>}, {pipeline_mode = #tpu.pipeline_mode<synchronous>, transform_indices = @transform_1, window_bounds = array<i64: 3, 384, 128>}, {pipeline_mode = #tpu.pipeline_mode<synchronous>, transform_indices = @transform_2, window_bounds = array<i64: 3, 384, 128>}, {pipeline_mode = #tpu.pipeline_mode<synchronous>, transform_indices = @transform_3, window_bounds = array<i64: 4, 128>}, {transform_indices = @transform_4, window_bounds = array<i64: 1, 16, 16, 128>}]} {
    %cst = arith.constant 0.000000e+00 : bf16
    %0 = vector.broadcast %cst : bf16 to vector<20x20x128xbf16>
    %c0 = arith.constant 0 : index
    %c0_0 = arith.constant 0 : index
    %c0_1 = arith.constant 0 : index
    %1 = vector.load %arg6[%c0, %c0_0, %c0_1] : memref<20x20x128xbf16, #tpu.memory_space<vmem>>, vector<20x20x128xbf16>
    tpu.vector_store %arg6[%c0, %c0_0, %c0_1], %0 {strides = array<i32>} : memref<20x20x128xbf16, #tpu.memory_space<vmem>>, vector<20x20x128xbf16>,
    %c0_2 = arith.constant 0 : index
    %c0_3 = arith.constant 0 : index
    %c0_4 = arith.constant 0 : index
    %c0_5 = arith.constant 0 : index
    %2 = vector.load %arg1[%c0_2, %c0_3, %c0_4, %c0_5] : memref<1x16x16x128xbf16, #tpu.memory_space<vmem>>, vector<1x16x16x128xbf16>
    %3 = vector.shape_cast %2 : vector<1x16x16x128xbf16> to vector<16x16x128xbf16>
    %c2 = arith.constant 2 : index
    %c2_6 = arith.constant 2 : index
    %c0_7 = arith.constant 0 : index
    %4 = vector.load %arg6[%c2, %c2_6, %c0_7] : memref<20x20x128xbf16, #tpu.memory_space<vmem>>, vector<16x16x128xbf16>
    tpu.vector_store %arg6[%c2, %c2_6, %c0_7], %3 {strides = array<i32>} : memref<20x20x128xbf16, #tpu.memory_space<vmem>>, vector<16x16x128xbf16>,
    %c0_8 = arith.constant 0 : index
    %c0_9 = arith.constant 0 : index
    %5 = vector.load %arg4[%c0_8, %c0_9] : memref<4x128xf32, #tpu.memory_space<vmem>>, vector<4x128xf32>
    %6 = vector.extract_strided_slice %5 {offsets = [0, 0], sizes = [1, 128], strides = [1, 1]} : vector<4x128xf32> to vector<1x128xf32>
    %7 = vector.shape_cast %6 : vector<1x128xf32> to vector<128xf32>
    %8 = vector.extract_strided_slice %5 {offsets = [1, 0], sizes = [1, 128], strides = [1, 1]} : vector<4x128xf32> to vector<1x128xf32>
    %9 = vector.shape_cast %8 : vector<1x128xf32> to vector<128xf32>
    %10 = vector.extract_strided_slice %5 {offsets = [2, 0], sizes = [1, 128], strides = [1, 1]} : vector<4x128xf32> to vector<1x128xf32>
    %11 = vector.shape_cast %10 : vector<1x128xf32> to vector<128xf32>
    %12 = vector.extract_strided_slice %5 {offsets = [3, 0], sizes = [1, 128], strides = [1, 1]} : vector<4x128xf32> to vector<1x128xf32>
    %13 = vector.shape_cast %12 : vector<1x128xf32> to vector<128xf32>
    %c0_10 = arith.constant 0 : index
    %c0_11 = arith.constant 0 : index
    %c0_12 = arith.constant 0 : index
    %14 = vector.load %arg6[%c0_10, %c0_11, %c0_12] : memref<20x20x128xbf16, #tpu.memory_space<vmem>>, vector<18x20x128xbf16>
    %c1 = arith.constant 1 : index
    %c0_13 = arith.constant 0 : index
    %c0_14 = arith.constant 0 : index
    %15 = vector.load %arg6[%c1, %c0_13, %c0_14] : memref<20x20x128xbf16, #tpu.memory_space<vmem>>, vector<18x20x128xbf16>
    %c2_15 = arith.constant 2 : index
    %c0_16 = arith.constant 0 : index
    %c0_17 = arith.constant 0 : index
    %16 = vector.load %arg6[%c2_15, %c0_16, %c0_17] : memref<20x20x128xbf16, #tpu.memory_space<vmem>>, vector<18x20x128xbf16>
    %17 = tpu.concatenate %14, %15, %16 in 2 : vector<18x20x128xbf16>, vector<18x20x128xbf16>, vector<18x20x128xbf16> -> vector<18x20x384xbf16>
    %18 = vector.extract_strided_slice %17 {offsets = [0, 0, 0], sizes = [18, 18, 384], strides = [1, 1, 1]} : vector<18x20x384xbf16> to vector<18x18x384xbf16>
    %c0_18 = arith.constant 0 : index
    %c0_19 = arith.constant 0 : index
    %c0_20 = arith.constant 0 : index
    %19 = vector.load %arg2[%c0_18, %c0_19, %c0_20] : memref<3x384x128xbf16, #tpu.memory_space<vmem>>, vector<1x384x128xbf16>
    %20 = vector.shape_cast %19 : vector<1x384x128xbf16> to vector<384x128xbf16>
    %cst_21 = arith.constant dense<0.000000e+00> : vector<18x18x128xf32>
    %21 = tpu.matmul %18, %20, %cst_21 {dimension_numbers = #tpu.dot_dimension_numbers<[2], [0], [0, 1], [1], [0, 0, 0, 1, 1, 1], [], []>} : vector<18x18x384xbf16>, vector<384x128xbf16>, vector<18x18x128xf32> -> vector<18x18x128xf32>
    %22 = vector.extract_strided_slice %17 {offsets = [0, 1, 0], sizes = [18, 18, 384], strides = [1, 1, 1]} : vector<18x20x384xbf16> to vector<18x18x384xbf16>
    %c1_22 = arith.constant 1 : index
    %c0_23 = arith.constant 0 : index
    %c0_24 = arith.constant 0 : index
    %23 = vector.load %arg2[%c1_22, %c0_23, %c0_24] : memref<3x384x128xbf16, #tpu.memory_space<vmem>>, vector<1x384x128xbf16>
    %24 = vector.shape_cast %23 : vector<1x384x128xbf16> to vector<384x128xbf16>
    %cst_25 = arith.constant dense<0.000000e+00> : vector<18x18x128xf32>
    %25 = tpu.matmul %22, %24, %cst_25 {dimension_numbers = #tpu.dot_dimension_numbers<[2], [0], [0, 1], [1], [0, 0, 0, 1, 1, 1], [], []>} : vector<18x18x384xbf16>, vector<384x128xbf16>, vector<18x18x128xf32> -> vector<18x18x128xf32>
    %26 = arith.addf %21, %25 : vector<18x18x128xf32>
    %27 = vector.extract_strided_slice %17 {offsets = [0, 2, 0], sizes = [18, 18, 384], strides = [1, 1, 1]} : vector<18x20x384xbf16> to vector<18x18x384xbf16>
    %c2_26 = arith.constant 2 : index
    %c0_27 = arith.constant 0 : index
    %c0_28 = arith.constant 0 : index
    %28 = vector.load %arg2[%c2_26, %c0_27, %c0_28] : memref<3x384x128xbf16, #tpu.memory_space<vmem>>, vector<1x384x128xbf16>
    %29 = vector.shape_cast %28 : vector<1x384x128xbf16> to vector<384x128xbf16>
    %cst_29 = arith.constant dense<0.000000e+00> : vector<18x18x128xf32>
    %30 = tpu.matmul %27, %29, %cst_29 {dimension_numbers = #tpu.dot_dimension_numbers<[2], [0], [0, 1], [1], [0, 0, 0, 1, 1, 1], [], []>} : vector<18x18x384xbf16>, vector<384x128xbf16>, vector<18x18x128xf32> -> vector<18x18x128xf32>
    %31 = arith.addf %26, %30 : vector<18x18x128xf32>
    %32 = vector.shape_cast %7 : vector<128xf32> to vector<1x1x128xf32>
    %33 = vector.broadcast %32 : vector<1x1x128xf32> to vector<18x18x128xf32>
    %34 = arith.mulf %31, %33 : vector<18x18x128xf32>
    %35 = vector.shape_cast %9 : vector<128xf32> to vector<1x1x128xf32>
    %36 = vector.broadcast %35 : vector<1x1x128xf32> to vector<18x18x128xf32>
    %37 = arith.addf %34, %36 : vector<18x18x128xf32>
    %cst_30 = arith.constant 0.000000e+00 : f32
    %38 = vector.broadcast %cst_30 : f32 to vector<18x18x128xf32>
    %39 = arith.maximumf %37, %38 : vector<18x18x128xf32>
    %40 = arith.truncf %39 : vector<18x18x128xf32> to vector<18x18x128xbf16>
    %41 = tpu.iota {dimensions = array<i32: 0>} : vector<18x18x1xi32>
    %42 = tpu.iota {dimensions = array<i32: 1>} : vector<18x18x1xi32>
    %c1_i32 = arith.constant 1 : i32
    %43 = vector.broadcast %c1_i32 : i32 to vector<18x18x1xi32>
    %44 = arith.cmpi sge, %41, %43 : vector<18x18x1xi32>
    %c16_i32 = arith.constant 16 : i32
    %45 = vector.broadcast %c16_i32 : i32 to vector<18x18x1xi32>
    %46 = arith.cmpi sle, %41, %45 : vector<18x18x1xi32>
    %47 = arith.andi %44, %46 : vector<18x18x1xi1>
    %c1_i32_31 = arith.constant 1 : i32
    %48 = vector.broadcast %c1_i32_31 : i32 to vector<18x18x1xi32>
    %49 = arith.cmpi sge, %42, %48 : vector<18x18x1xi32>
    %50 = arith.andi %47, %49 : vector<18x18x1xi1>
    %c16_i32_32 = arith.constant 16 : i32
    %51 = vector.broadcast %c16_i32_32 : i32 to vector<18x18x1xi32>
    %52 = arith.cmpi sle, %42, %51 : vector<18x18x1xi32>
    %53 = arith.andi %50, %52 : vector<18x18x1xi1>
    %cst_33 = arith.constant 0.000000e+00 : bf16
    %54 = vector.shape_cast %53 : vector<18x18x1xi1> to vector<18x18x1xi1>
    %55 = vector.broadcast %54 : vector<18x18x1xi1> to vector<18x18x128xi1>
    %56 = vector.broadcast %cst_33 : bf16 to vector<18x18x128xbf16>
    %57 = arith.select %55, %40, %56 : vector<18x18x128xi1>, vector<18x18x128xbf16>
    %58 = vector.extract_strided_slice %57 {offsets = [0, 0, 0], sizes = [16, 18, 128], strides = [1, 1, 1]} : vector<18x18x128xbf16> to vector<16x18x128xbf16>
    %59 = vector.extract_strided_slice %57 {offsets = [1, 0, 0], sizes = [16, 18, 128], strides = [1, 1, 1]} : vector<18x18x128xbf16> to vector<16x18x128xbf16>
    %60 = vector.extract_strided_slice %57 {offsets = [2, 0, 0], sizes = [16, 18, 128], strides = [1, 1, 1]} : vector<18x18x128xbf16> to vector<16x18x128xbf16>
    %61 = tpu.concatenate %58, %59, %60 in 2 : vector<16x18x128xbf16>, vector<16x18x128xbf16>, vector<16x18x128xbf16> -> vector<16x18x384xbf16>
    %62 = vector.extract_strided_slice %61 {offsets = [0, 0, 0], sizes = [16, 16, 384], strides = [1, 1, 1]} : vector<16x18x384xbf16> to vector<16x16x384xbf16>
    %c0_34 = arith.constant 0 : index
    %c0_35 = arith.constant 0 : index
    %c0_36 = arith.constant 0 : index
    %63 = vector.load %arg3[%c0_34, %c0_35, %c0_36] : memref<3x384x128xbf16, #tpu.memory_space<vmem>>, vector<1x384x128xbf16>
    %64 = vector.shape_cast %63 : vector<1x384x128xbf16> to vector<384x128xbf16>
    %cst_37 = arith.constant dense<0.000000e+00> : vector<16x16x128xf32>
    %65 = tpu.matmul %62, %64, %cst_37 {dimension_numbers = #tpu.dot_dimension_numbers<[2], [0], [0, 1], [1], [0, 0, 0, 1, 1, 1], [], []>} : vector<16x16x384xbf16>, vector<384x128xbf16>, vector<16x16x128xf32> -> vector<16x16x128xf32>
    %66 = vector.extract_strided_slice %61 {offsets = [0, 1, 0], sizes = [16, 16, 384], strides = [1, 1, 1]} : vector<16x18x384xbf16> to vector<16x16x384xbf16>
    %c1_38 = arith.constant 1 : index
    %c0_39 = arith.constant 0 : index
    %c0_40 = arith.constant 0 : index
    %67 = vector.load %arg3[%c1_38, %c0_39, %c0_40] : memref<3x384x128xbf16, #tpu.memory_space<vmem>>, vector<1x384x128xbf16>
    %68 = vector.shape_cast %67 : vector<1x384x128xbf16> to vector<384x128xbf16>
    %cst_41 = arith.constant dense<0.000000e+00> : vector<16x16x128xf32>
    %69 = tpu.matmul %66, %68, %cst_41 {dimension_numbers = #tpu.dot_dimension_numbers<[2], [0], [0, 1], [1], [0, 0, 0, 1, 1, 1], [], []>} : vector<16x16x384xbf16>, vector<384x128xbf16>, vector<16x16x128xf32> -> vector<16x16x128xf32>
    %70 = arith.addf %65, %69 : vector<16x16x128xf32>
    %71 = vector.extract_strided_slice %61 {offsets = [0, 2, 0], sizes = [16, 16, 384], strides = [1, 1, 1]} : vector<16x18x384xbf16> to vector<16x16x384xbf16>
    %c2_42 = arith.constant 2 : index
    %c0_43 = arith.constant 0 : index
    %c0_44 = arith.constant 0 : index
    %72 = vector.load %arg3[%c2_42, %c0_43, %c0_44] : memref<3x384x128xbf16, #tpu.memory_space<vmem>>, vector<1x384x128xbf16>
    %73 = vector.shape_cast %72 : vector<1x384x128xbf16> to vector<384x128xbf16>
    %cst_45 = arith.constant dense<0.000000e+00> : vector<16x16x128xf32>
    %74 = tpu.matmul %71, %73, %cst_45 {dimension_numbers = #tpu.dot_dimension_numbers<[2], [0], [0, 1], [1], [0, 0, 0, 1, 1, 1], [], []>} : vector<16x16x384xbf16>, vector<384x128xbf16>, vector<16x16x128xf32> -> vector<16x16x128xf32>
    %75 = arith.addf %70, %74 : vector<16x16x128xf32>
    %c0_46 = arith.constant 0 : index
    %c0_47 = arith.constant 0 : index
    %c0_48 = arith.constant 0 : index
    %c0_49 = arith.constant 0 : index
    %76 = vector.load %arg1[%c0_46, %c0_47, %c0_48, %c0_49] : memref<1x16x16x128xbf16, #tpu.memory_space<vmem>>, vector<1x16x16x128xbf16>
    %77 = vector.shape_cast %76 : vector<1x16x16x128xbf16> to vector<16x16x128xbf16>
    %78 = arith.extf %77 : vector<16x16x128xbf16> to vector<16x16x128xf32>
    %79 = vector.shape_cast %11 : vector<128xf32> to vector<1x1x128xf32>
    %80 = vector.broadcast %79 : vector<1x1x128xf32> to vector<16x16x128xf32>
    %81 = arith.mulf %75, %80 : vector<16x16x128xf32>
    %82 = vector.shape_cast %13 : vector<128xf32> to vector<1x1x128xf32>
    %83 = vector.broadcast %82 : vector<1x1x128xf32> to vector<16x16x128xf32>
    %84 = arith.addf %81, %83 : vector<16x16x128xf32>
    %85 = arith.addf %84, %78 : vector<16x16x128xf32>
    %cst_50 = arith.constant 0.000000e+00 : f32
    %86 = vector.broadcast %cst_50 : f32 to vector<16x16x128xf32>
    %87 = arith.maximumf %85, %86 : vector<16x16x128xf32>
    %88 = arith.truncf %87 : vector<16x16x128xf32> to vector<16x16x128xbf16>
    %c0_51 = arith.constant 0 : index
    %c0_52 = arith.constant 0 : index
    %c0_53 = arith.constant 0 : index
    %c0_54 = arith.constant 0 : index
    %89 = vector.load %arg5[%c0_51, %c0_52, %c0_53, %c0_54] : memref<1x16x16x128xbf16, #tpu.memory_space<vmem>>, vector<1x16x16x128xbf16>
    %90 = vector.shape_cast %89 : vector<1x16x16x128xbf16> to vector<16x16x128xbf16>
    %91 = vector.shape_cast %88 : vector<16x16x128xbf16> to vector<1x16x16x128xbf16>
    tpu.vector_store %arg5[%c0_51, %c0_52, %c0_53, %c0_54], %91 {strides = array<i32>} : memref<1x16x16x128xbf16, #tpu.memory_space<vmem>>, vector<1x16x16x128xbf16>,
    return
  }
  func.func @transform_0(%arg0: i32) -> (i32, i32, i32, i32) {
    %c0_i32 = arith.constant 0 : i32
    %c0_i32_0 = arith.constant 0 : i32
    %c0_i32_1 = arith.constant 0 : i32
    %c0_i32_2 = arith.constant 0 : i32
    return %arg0, %c0_i32, %c0_i32_0, %c0_i32_1 : i32, i32, i32, i32
  }
  func.func @transform_1(%arg0: i32) -> (i32, i32, i32) {
    %c0_i32 = arith.constant 0 : i32
    %c0_i32_0 = arith.constant 0 : i32
    %c0_i32_1 = arith.constant 0 : i32
    %c0_i32_2 = arith.constant 0 : i32
    return %c0_i32, %c0_i32_0, %c0_i32_1 : i32, i32, i32
  }
  func.func @transform_2(%arg0: i32) -> (i32, i32, i32) {
    %c0_i32 = arith.constant 0 : i32
    %c0_i32_0 = arith.constant 0 : i32
    %c0_i32_1 = arith.constant 0 : i32
    %c0_i32_2 = arith.constant 0 : i32
    return %c0_i32, %c0_i32_0, %c0_i32_1 : i32, i32, i32
  }
  func.func @transform_3(%arg0: i32) -> (i32, i32) {
    %c0_i32 = arith.constant 0 : i32
    %c0_i32_0 = arith.constant 0 : i32
    %c0_i32_1 = arith.constant 0 : i32
    return %c0_i32, %c0_i32_0 : i32, i32
  }
  func.func @transform_4(%arg0: i32) -> (i32, i32, i32, i32) {
    %c0_i32 = arith.constant 0 : i32
    %c0_i32_0 = arith.constant 0 : i32
    %c0_i32_1 = arith.constant 0 : i32
    %c0_i32_2 = arith.constant 0 : i32
    return %arg0, %c0_i32, %c0_i32_0, %c0_i32_1 : i32, i32, i32, i32
  }
}

</mosaic_0001>

<bundles_post_ra>
// kernel: tpu_custom_call.1
= control target key start
LH: loop header
LB: loop body
LE: loop exit
PB: predicated region body
PF: predicated region fallthrough
CT: control target
= control target key end

     0   :  { %9 = vsyncpa [#allocation4], 0  ;;  %s26083_s0 = inlined_call_operand.hbm [shape: bf16[2,16,16,128], index: 0, kind: input, shape index: {}]   ;;  %s26084_s1 = inlined_call_operand.hbm [shape: bf16[3,384,128], index: 1, kind: input, shape index: {}]   ;;  %s26085_s2 = inlined_call_operand.hbm [shape: bf16[3,384,128], index: 2, kind: input, shape index: {}]   ;;  %s26086_s3 = inlined_call_operand.vmem [shape: f32[4,128], index: 3, kind: input, shape index: {}]   ;;  %s26087_s4 = inlined_call_operand.hbm [shape: bf16[2,16,16,128], index: 4, kind: output, shape index: {}]  }
   0x1   :  { %11 = vsyncpa [#allocation4 + $0x1], 0 }
   0x2   :  { %12 = vsyncpa [#allocation7], 0 }
   0x3   :  { %13 = vsyncpa [#allocation5], 0 }
   0x4   :  { %15 = vsyncpa [#allocation5 + $0x1], 0  ;;  %s18545_s15 = smov 0   ;;  %s18547_s16 = smov 0  }
   0x5   :  { %s18549_s17 = smov 0   ;;  %s18551_s18 = smov 0  }
   0x6 LB: > { %s18566_s19 = sadd.s32 4294967295, %s18504_s18   ;;  %s16254_s20 = sadd.s32 4294967294, %s18504_s18   ;;  %s18504_s18 = sphi %s18551_s18, %s27461_s18   ;;  %s18500_s17 = sphi %s18549_s17, %s27460_s17   ;;  %s18496_s16 = sphi %s18547_s16, %s27459_s16   ;;  %s18492_s15 = sphi %s18545_s15, %s27458_s15  }
   0x7   : > { %p41_p0 = scmp.ne.s32.totalorder %s18496_s16, %s18492_s15  ;;  %p26088_p1 = scmp.eq.s32.totalorder %s18566_s19, 0 }
   0x8   : > { %p128_p2 = scmp.eq.s32.totalorder %s18566_s19, 1  ;;  %p134_p3 = scmp.eq.s32.totalorder %s16254_s20, 1 }
   0x9   : > { %p18575_p4 = por %p26088_p1, %p41_p0  ;;  %p16255_p5 = scmp.ge.s32.totalorder %s18504_s18, 1 }
   0xa   : > { %p18580_p6 = por %p134_p3, %p41_p0  ;;  %p141_p7 = scmp.lt.s32.totalorder %s18504_s18, 3 }
   0xb   : > { %s26535_s21 = scalar_select %p18575_p4, 1, 0 }
   0xc   : > { %s26536_s22 = scalar_select %p18580_p6, 1, 0 }
   0xd   : > { %p18585_p8 = pnand %p16255_p5, %p141_p7  ;;  %s18506_s24 = smov [#allocation6]  }
   0xe   : > { %s153_s25 = sshll.u32 %s18506_s24, 4  ;;  %s18507_s27 = smov [#allocation8]   ;;  %s154_s25 = int_to_ptr.vmem [resolvable:$true] %s153_s25 }
   0xf   : > { %s26537_s23 = scalar_select %p18585_p8, 1, 0 }
  0x10   : > { %p18037_p9 = pneg %p18585_p8  ;;  %s166_s28 = sshll.u32 %s18507_s27, 4  ;;  %s167_s28 = int_to_ptr.vmem [resolvable:$true] %s166_s28 }
  0x11   : > { %s18367_s29 = scalar_lea.vmem %s154_s25, 9216  ;;  %p18375_p5 = scmp.lt.s32.totalorder %s154_s25, %s154_s25 }
  0x12   : > { %p18594_p11 = pnand %p18037_p9, %p26088_p1  ;;  %p18368_p13 = scmp.ne.s32.totalorder %s154_s25, %s18367_s29 }
  0x13   : > { %p18376_p7 = scmp.lt.s32.totalorder %s18367_s29, %s18367_s29 }
  0x14   : > { %p18358_p12 = pneg %p18594_p11 }
  0x15   : > { %p18377_p10 = por %p18376_p7, %p18375_p5 }
  0x16   : > { %p18370_p0 = pnand %p18368_p13, %p18358_p12 }
  0x18   : > { %p18371_p3 = pneg %p18370_p0 }
  0x1a   : > { %p18378_p9 = pnand %p18377_p10, %p18371_p3 }
  0x1c   : > { %18381 = shalt.err (!%p18378_p9)
}
  0x1d   : > { %s18508_s30 = smov 64   ;;  %s18509_s5 = smov 4  }
  0x1e   : > { %18040 = dma.hbm_to_vmem [thread:$0]  (!%p18594_p11), %s26084_s1, 9216, %s154_s25, [#allocation7], %s18508_s30, %s18508_s30, %s18509_s5  }
  0x1f   : > { %s18393_s8 = scalar_lea.vmem %s167_s28, 9216  ;;  %p18401_p10 = scmp.lt.s32.totalorder %s167_s28, %s167_s28 }
  0x20   : > { %p18394_p13 = scmp.ne.s32.totalorder %s167_s28, %s18393_s8  ;;  %p18402_p3 = scmp.lt.s32.totalorder %s18393_s8, %s18393_s8 }
  0x22   : > { %p18396_p0 = pnand %p18394_p13, %p18358_p12  ;;  %p18403_p7 = por %p18402_p3, %p18401_p10 }
  0x24   : > { %p18397_p5 = pneg %p18396_p0 }
  0x26   : > { %p18404_p9 = pnand %p18403_p7, %p18397_p5 }
  0x28   : > { %18407 = shalt.err (!%p18404_p9)
}
  0x29   : > { %18043 = dma.hbm_to_vmem [thread:$0]  (!%p18594_p11), %s26085_s2, 9216, %s167_s28, [#allocation7], %s18508_s30, %s18508_s30, %s18509_s5  }
  0x2a   : > { %s18623_s11 = sadd.s32 1, %s18504_s18   ;;  %s28_s12 = sadd.s32 1, %s18500_s17 }
  0x2b   : > { %s25_s13 = ssub.s32 %s18504_s18, %s18623_s11  ;;  %p35_p12 = scmp.ne.s32.totalorder %s18500_s17, %s18496_s16 }
  0x2c   : > { %p26_p13 = scmp.eq.s32.totalorder %s25_s13, 0  ;;  %p36_p0 = scmp.eq.s32.totalorder %s18504_s18, 0 }
  0x2d   : > { %p18633_p5 = por %p128_p2, %p35_p12  ;;  %p18054_p10 = scmp.lt.s32.totalorder %s18504_s18, 2 }
  0x2e   : > { %s18639_s20 = scalar_select %p26_p13, %s18500_s17, %s28_s12  }
  0x2f   : > { %s26539_s14 = scalar_select %p18633_p5, 1, 0 }
  0x30   : > { %p37_p3 = por %p36_p0, %p35_p12  ;;  %s183_s24 = sand.u32 1, %s18500_s17  }
  0x31   : > { %s16259_s25 = sshll.u32 %s183_s24, 7  ;;  %s16878_s26 = sshll.u32 %s18504_s18, 11 }
  0x32   : > { %s18646_s29 = scalar_lea.hbm %s26083_s0, %s16878_s26  ;;  %s187_s6 = scalar_lea.vmem [#allocation3], %s16259_s25 }
  0x33   : > { %s194_s7 = sshll.u32 %s187_s6, 4  ;;  %p18650_p2 = pnand %p18054_p10, %p37_p3  ;;  %s18648_s7 = int_to_ptr.vmem [resolvable:$true] %s194_s7 }
  0x34   : > { %s18654_s9 = scalar_lea.sflag [#allocation4], %s183_s24  ;;  %s18408_s10 = scalar_lea.hbm %s18646_s29, 2048 }
  0x35   : > { %p18409_p11 = scmp.ne.s32.totalorder %s18646_s29, %s18408_s10  ;;  %p18410_p7 = pneg %p18650_p2 }
  0x36   : > { %s18413_s25 = scalar_lea.hbm %s26083_s0, 4096  ;;  %p18414_p13 = scmp.lt.s32.totalorder %s18646_s29, %s26083_s0 }
  0x37   : > { %p18411_p9 = pnand %p18410_p7, %p18409_p11  ;;  %p18415_p0 = scmp.lt.s32.totalorder %s18413_s25, %s18408_s10 }
  0x39   : > { %p18412_p12 = pneg %p18411_p9  ;;  %p18416_p10 = por %p18415_p0, %p18414_p13 }
  0x3b   : > { %p18417_p3 = pnand %p18416_p10, %p18412_p12 }
  0x3d   : > { %18420 = shalt.err (!%p18417_p3)
}
  0x3e   : > { %s18421_s24 = scalar_lea.vmem %s18648_s7, 2048  ;;  %s18510_s28 = smov [#allocation3]  }
  0x3f   : > { %p18422_p1 = scmp.ne.s32.totalorder %s18648_s7, %s18421_s24  ;;  %s18426_s6 = sshll.u32 %s18510_s28, 4  ;;  %s18427_s6 = int_to_ptr.vmem [resolvable:$false] %s18426_s6 }
  0x40   : > { %s18428_s12 = scalar_lea.vmem %s18427_s6, 4096  ;;  %p18429_p9 = scmp.lt.s32.totalorder %s18648_s7, %s18427_s6 }
  0x41   : > { %p18424_p6 = pnand %p18422_p1, %p18410_p7  ;;  %p18430_p5 = scmp.lt.s32.totalorder %s18428_s12, %s18421_s24 }
  0x43   : > { %p18425_p11 = pneg %p18424_p6  ;;  %p18431_p4 = por %p18430_p5, %p18429_p9 }
  0x45   : > { %p18432_p8 = pnand %p18431_p4, %p18425_p11 }
  0x47   : > { %18435 = shalt.err (!%p18432_p8)
}
  0x48   : > { %18047 = dma.hbm_to_vmem [thread:$0]  (!%p18650_p2), %s18646_s29, 2048, %s18648_s7, %s18654_s9, %s18508_s30, %s18508_s30, %s18509_s5  }
  0x49   : > { %p26541_p1 = scmp.ne.s32.totalorder %s26537_s23, 0 }
  0x4b   : > { %206 = sbr.rel (%p26541_p1) target bundleno = 1654 (0x676), region = 36 }
  0x50   : > { %s18681_s10 = sand.u32 1, %s18496_s16   ;;  %p26542_p4 = scmp.ne.s32.totalorder %s26535_s21, 0 }
  0x51   : > { %s16263_s13 = sshll.u32 %s18681_s10, 7  ;;  %s209_s25 = scalar_lea.sflag [#allocation4], %s18681_s10 }
  0x52   : > { %s18687_s8 = scalar_lea.vmem [#allocation3], %s16263_s13 }
  0x53   : > { %18479 = dma.done.wait (%p26542_p4), %s209_s25, 2048  }
  0x54   : > { %18481 = vsyncadd (%p26542_p4), %s209_s25, 4294965248  ;;  %p26543_p6 = scmp.eq.s32.totalorder %s18566_s19, 0 }
  0x56   : > { %18483 = dma.done.wait (%p26543_p6), [#allocation7], 18432   ;;  %p26544_p8 = pmov %p26543_p6 }
  0x57   : > { %v26095_v0 = vmov 0   ;;  %v26098_v1 = vmov 0.0   ;;  %vm18513_vm0 = vmmov 0   ;;  %v18102_v2 = vld [vmem:[#allocation6 + $0xf8] sm:$0xff]   ;;  %v18104_v4 = vld [vmem:[#allocation6 + $0xf0] sm:$0xff]   ;;  %v18106_v6 = vld [vmem:[#allocation6 + $0xe8] sm:$0xff]   ;;  %v1251_v21 = vlaneseq }
  0x58   : > { %18485 = vsyncadd (%p26544_p8), [#allocation7], 4294948864  ;;  %5909 = vmatprep.subr.bf16.mxu0 %v26095_v0  ;;  %248 = vst [vmem:[#allocation2] sm:$0xf] %v26095_v0  ;;  %17581 = vmatprep.subr.bf16.mxu1 %v26098_v1  ;;  %v18103_v3 = vld [vmem:[#allocation6 + $0x178] sm:$0xff]   ;;  %v18105_v5 = vld [vmem:[#allocation6 + $0x170] sm:$0xff]  }
  0x59   : > { %249 = vst [vmem:[#allocation2 + $0x4] sm:$0xf] %v26095_v0  ;;  %250 = vst [vmem:[#allocation2 + $0x8] sm:$0x3] %v26095_v0  ;;  %17597 = vmatprep.mubr.msk.bf16.mxu1 %vm18513_vm0, %v26098_v1  ;;  %5910 = vmatpush1.bf16.msra.mxu0 %v18102_v2  ;;  %v18107_v7 = vld [vmem:[#allocation6 + $0x168] sm:$0xff]   ;;  %vm372_vm1 = vcmask 1040384  }
  0x5a   : > { %251 = vst [vmem:[#allocation2 + $0xc] sm:$0xf] %v26095_v0  ;;  %252 = vst [vmem:[#allocation2 + $0x10] sm:$0xf] %v26095_v0  ;;  %5911 = vmatprep.subr.bf16.mxu0 %v26095_v0  ;;  %17582 = vmatpush3.bf16.msra.mxu1 %v18103_v3  ;;  %vm3009_vm2 = vsmask.f32 256 }
  0x5b   : > { %253 = vst [vmem:[#allocation2 + $0x14] sm:$0x3] %v26095_v0  ;;  %254 = vst [vmem:[#allocation2 + $0x18] sm:$0xf] %v26095_v0  ;;  %17583 = vmatprep.subr.bf16.mxu1 %v26098_v1  ;;  %v18108_v8 = vld [vmem:[#allocation6 + $0xe0] sm:$0xff]   ;;  %vm373_vm3 = vcmask 1044484  }
  0x5c   : > { %255 = vst [vmem:[#allocation2 + $0x1c] sm:$0xf] %v26095_v0  ;;  %256 = vst [vmem:[#allocation2 + $0x20] sm:$0x3] %v26095_v0  ;;  %v18109_v9 = vld [vmem:[#allocation6 + $0x160] sm:$0xff]   ;;  %v18110_v11 = vld [vmem:[#allocation6 + $0xd8] sm:$0xff]  }
  0x5d   : > { %257 = vst [vmem:[#allocation2 + $0x24] sm:$0xf] %v26095_v0  ;;  %258 = vst [vmem:[#allocation2 + $0x28] sm:$0xf] %v26095_v0  ;;  %5912 = vmatpush1.bf16.msra.mxu0 %v18104_v4  ;;  %vm3010_vm4 = vsmask.f32 1284 }
  0x5e   : > { %259 = vst [vmem:[#allocation2 + $0x2c] sm:$0x3] %v26095_v0  ;;  %260 = vst [vmem:[#allocation2 + $0x30] sm:$0xf] %v26095_v0  ;;  %5913 = vmatprep.subr.bf16.mxu0 %v26095_v0  ;;  %17584 = vmatpush3.bf16.msra.mxu1 %v18105_v5  ;;  %vm3012_vm6 = vsmask.f32 2312 }
  0x5f   : > { %261 = vst [vmem:[#allocation2 + $0x34] sm:$0xf] %v26095_v0  ;;  %262 = vst [vmem:[#allocation2 + $0x38] sm:$0x3] %v26095_v0  ;;  %17585 = vmatprep.subr.bf16.mxu1 %v26098_v1  ;;  %v18111_v12 = vld [vmem:[#allocation6 + $0x158] sm:$0xff]   ;;  %v18112_v13 = vld [vmem:[#allocation6 + $0xd0] sm:$0xff]  }
  0x60   : > { %263 = vst [vmem:[#allocation2 + $0x3c] sm:$0xf] %v26095_v0  ;;  %264 = vst [vmem:[#allocation2 + $0x40] sm:$0xf] %v26095_v0  ;;  %v18113_v14 = vld [vmem:[#allocation6 + $0x150] sm:$0xff]   ;;  %v18114_v25 = vld [vmem:[#allocation6 + $0xc8] sm:$0xff]  }
  0x61   : > { %265 = vst [vmem:[#allocation2 + $0x44] sm:$0x3] %v26095_v0  ;;  %266 = vst [vmem:[#allocation2 + $0x48] sm:$0xf] %v26095_v0  ;;  %5914 = vmatpush1.bf16.msra.mxu0 %v18106_v6  ;;  %v308_v15 = vld [vmem:[%s18687_s8] sm:$0xf] }
  0x62   : > { %267 = vst [vmem:[#allocation2 + $0x4c] sm:$0xf] %v26095_v0  ;;  %268 = vst [vmem:[#allocation2 + $0x50] sm:$0x3] %v26095_v0  ;;  %5915 = vmatprep.subr.bf16.mxu0 %v26095_v0  ;;  %17586 = vmatpush3.bf16.msra.mxu1 %v18107_v7  ;;  %v309_v16 = vld [vmem:[%s18687_s8 + $0x4] sm:$0xf] }
  0x63   : > { %269 = vst [vmem:[#allocation2 + $0x54] sm:$0xf] %v26095_v0  ;;  %270 = vst [vmem:[#allocation2 + $0x58] sm:$0xf] %v26095_v0  ;;  %17587 = vmatprep.subr.bf16.mxu1 %v26098_v1  ;;  %v375_v17 = vrot.slane %v308_v15, 7  ;;  %v377_v18 = vrot.slane %v309_v16, 7 }
  0x64   : > { %271 = vst [vmem:[#allocation2 + $0x5c] sm:$0x3] %v26095_v0  ;;  %272 = vst [vmem:[#allocation2 + $0x60] sm:$0xf] %v26095_v0  ;;  %v18514_v19 = vmov 1966171168  }
  0x65   : > { %273 = vst [vmem:[#allocation2 + $0x64] sm:$0xf] %v26095_v0  ;;  %274 = vst [vmem:[#allocation2 + $0x68] sm:$0x3] %v26095_v0  ;;  %5916 = vmatpush1.bf16.msra.mxu0 %v18108_v8  ;;  %v1249_v20 = vunpack.c.l.s4 %v18514_v19  ;;  %v376_v22 = vrot.slane %v375_v17, 4  ;;  %v379_v23 = vrot.slane %v377_v18, 4 }
  0x66   : > { %275 = vst [vmem:[#allocation2 + $0x6c] sm:$0xf] %v26095_v0  ;;  %276 = vst [vmem:[#allocation2 + $0x70] sm:$0xf] %v26095_v0  ;;  %5917 = vmatprep.subr.bf16.mxu0 %v26095_v0  ;;  %17588 = vmatpush3.bf16.msra.mxu1 %v18109_v9  ;;  %vm3014_vm8 = vsmask.f32 3340 }
  0x67   : > { %277 = vst [vmem:[#allocation2 + $0x74] sm:$0x3] %v26095_v0  ;;  %278 = vst [vmem:[#allocation2 + $0x78] sm:$0xf] %v26095_v0  ;;  %17589 = vmatprep.subr.bf16.mxu1 %v26098_v1  ;;  %vm3016_vm10 = vsmask.f32 4368  ;;  %v1250_v27 = vunpack.c.0.s8 %v1249_v20 }
  0x68   : > { %279 = vst [vmem:[#allocation2 + $0x7c] sm:$0xf] %v26095_v0  ;;  %280 = vst [vmem:[#allocation2 + $0x80] sm:$0x3] %v26095_v0  ;;  %vm3018_vm11 = vsmask.f32 5396 }
  0x69   : > { %281 = vst [vmem:[#allocation2 + $0x84] sm:$0xf] %v26095_v0  ;;  %282 = vst [vmem:[#allocation2 + $0x88] sm:$0xf] %v26095_v0  ;;  %5918 = vmatpush1.bf16.msra.mxu0 %v18110_v11  ;;  %v18786_v28 = vshrl.u32 %v1251_v21, 7  ;;  %v18115_v29 = vld [vmem:[#allocation6 + $0x148] sm:$0xff]  }
  0x6a   : > { %283 = vst [vmem:[#allocation2 + $0x8c] sm:$0x3] %v26095_v0  ;;  %284 = vst [vmem:[#allocation2 + $0x90] sm:$0xf] %v26095_v0  ;;  %5919 = vmatprep.subr.bf16.mxu0 %v26095_v0  ;;  %17590 = vmatpush3.bf16.msra.mxu1 %v18111_v12  ;;  %v310_v31 = vld [vmem:[%s18687_s8 + $0x8] sm:$0xf] }
  0x6b   : > { %285 = vst [vmem:[#allocation2 + $0x94] sm:$0xf] %v26095_v0  ;;  %286 = vst [vmem:[#allocation2 + $0x98] sm:$0x3] %v26095_v0  ;;  %17591 = vmatprep.subr.bf16.mxu1 %v26098_v1  ;;  %v18121_v32 = vld [vmem:[#allocation2] ss:$12 sps:$4 sm:$0xff]   ;;  %v18800_v39 = vsub.s32 %v1250_v27, %v18786_v28 }
  0x6c   : > { %287 = vst [vmem:[#allocation2 + $0x9c] sm:$0xf] %v26095_v0  ;;  %288 = vst [vmem:[#allocation2 + $0xa0] sm:$0xf] %v26095_v0  ;;  %v18122_v33 = vld [vmem:[#allocation2 + $0x4] ss:$12 sps:$4 sm:$0xff]  }
  0x6d   : > { %289 = vst [vmem:[#allocation2 + $0xa4] sm:$0x3] %v26095_v0  ;;  %290 = vst [vmem:[#allocation2 + $0xa8] sm:$0xf] %v26095_v0  ;;  %5920 = vmatpush1.bf16.msra.mxu0 %v18112_v13  ;;  %v311_v34 = vld [vmem:[%s18687_s8 + $0xc] sm:$0xf]  ;;  %v1254_v53 = vrot.slane %v18121_v32, %v18800_v39  ;;  %v1261_v54 = vrot.slane %v18122_v33, %v18800_v39 }
  0x6e   : > { %291 = vst [vmem:[#allocation2 + $0xac] sm:$0xf] %v26095_v0  ;;  %292 = vst [vmem:[#allocation2 + $0xb0] sm:$0x3] %v26095_v0  ;;  %5921 = vmatprep.subr.bf16.mxu0 %v26095_v0  ;;  %17592 = vmatpush3.bf16.msra.mxu1 %v18113_v14  ;;  %v380_v35 = vrot.slane %v310_v31, 7  ;;  %v382_v37 = vrot.slane %v311_v34, 7 }
  0x6f   : > { %293 = vst [vmem:[#allocation2 + $0xb4] sm:$0xf] %v26095_v0  ;;  %294 = vst [vmem:[#allocation2 + $0xb8] sm:$0xf] %v26095_v0  ;;  %17593 = vmatprep.subr.bf16.mxu1 %v26098_v1  ;;  %vm3020_vm13 = vsmask.f32 6424 }
  0x70   : > { %295 = vst [vmem:[#allocation2 + $0xbc] sm:$0x3] %v26095_v0  ;;  %296 = vst [vmem:[#allocation2 + $0xc0] sm:$0xf] %v26095_v0  ;;  %v18116_v38 = vld [vmem:[#allocation6 + $0xc0] sm:$0xff]   ;;  %v381_v40 = vrot.slane %v380_v35, 4 }
  0x71   : > { %297 = vst [vmem:[#allocation2 + $0xc4] sm:$0xf] %v26095_v0  ;;  %298 = vst [vmem:[#allocation2 + $0xc8] sm:$0x3] %v26095_v0  ;;  %5922 = vmatpush1.bf16.msra.mxu0 %v18114_v25  ;;  %v18117_v41 = vld [vmem:[#allocation6 + $0x140] sm:$0xff]   ;;  %v18118_v43 = vld [vmem:[#allocation6 + $0x138] sm:$0xff]  }
  0x72   : > { %299 = vst [vmem:[#allocation2 + $0xcc] sm:$0xf] %v26095_v0  ;;  %300 = vst [vmem:[#allocation2 + $0xd0] sm:$0xf] %v26095_v0  ;;  %5923 = vmatprep.subr.bf16.mxu0 %v26095_v0  ;;  %17594 = vmatpush3.bf16.msra.mxu1 %v18115_v29  ;;  %vm3022_vm14 = vsmask.f32 7452 }
  0x73   : > { %301 = vst [vmem:[#allocation2 + $0xd4] sm:$0x3] %v26095_v0  ;;  %302 = vst [vmem:[#allocation2 + $0xd8] sm:$0xf] %v26095_v0  ;;  %17595 = vmatprep.subr.bf16.mxu1 %v26098_v1  ;;  %v312_v46 = vld [vmem:[%s18687_s8 + $0x10] sm:$0xf] }
  0x74   : > { %303 = vst [vmem:[#allocation2 + $0xdc] sm:$0xf] %v26095_v0  ;;  %304 = vst [vmem:[#allocation2 + $0xe0] sm:$0x3] %v26095_v0  ;;  %v18808_v47 = vld [vmem:[%s18687_s8 + $0x14] sm:$0xf] }
  0x75   : > { %305 = vst [vmem:[#allocation2 + $0xe4] sm:$0xf] %v26095_v0  ;;  %306 = vst [vmem:[#allocation2 + $0xe8] sm:$0xf] %v26095_v0  ;;  %v384_v51 = vrot.slane %v382_v37, 4  ;;  %5924 = vmatpush1.bf16.msra.mxu0 %v18116_v38  ;;  %v385_v59 = vrot.slane %v312_v46, 7 }
  0x76   : > { %307 = vst [vmem:[#allocation2 + $0xec] sm:$0x3] %v26095_v0  ;;  %vm18767_vm5 = vmor %vm372_vm1, %vm373_vm3  ;;  %v18124_v30 = vld [vmem:[#allocation2 + $0x8] ss:$12 sps:$4 sm:$0x33]   ;;  %5925 = vmatprep.subr.bf16.mxu0 %v26095_v0  ;;  %17596 = vmatpush3.bf16.msra.mxu1 %v18117_v41  ;;  %v387_v61 = vrot.slane %v18808_v47, 7 }
  0x77   : > { %vm3011_vm7 = vmor %vm3009_vm2, %vm3010_vm4  ;;  %504 = vst [vmem:[#allocation2 + $0x18] sm:$0xe] %v375_v17  ;;  %v378_v26 = vsel %vm18767_vm5, %v376_v22, %v377_v18  ;;  %v383_v44 = vsel %vm18767_vm5, %v381_v40, %v382_v37  ;;  %v1319_v49 = vrot.slane %v18124_v30, %v18800_v39  ;;  %7880 = vmatprep.subr.bf16.mxu1 %v26095_v0  ;;  %v18125_v3 = vld [vmem:[#allocation6 + $0x130] sm:$0xff]   ;;  %v386_v8 = vrot.slane %v385_v59, 4  ;;  %v18126_v25 = vld [vmem:[#allocation6 + $0x128] sm:$0xff]   ;;  %s25829_s29 = scalar_lea.vmem [#allocation9], %s16263_s13 }
  0x78   : > { %vm18780_vm9 = vmor %vm3011_vm7, %vm3012_vm6  ;;  %506 = vst [vmem:[#allocation2 + $0x20] sm:$0x1] %v379_v23  ;;  %v18131_v50 = vld [vmem:[#allocation6 + $0x120] sm:$0xff]   ;;  %s16911_s7 = sshll.u32 %s18566_s19, 11  ;;  %s16162_s9 = sshll.u32 %s25829_s29, 4  ;;  %s26039_s9 = int_to_ptr.vmem [resolvable:$true] %s16162_s9 }
  0x79   : > { %26549 = vst [vmem:[#allocation13_spill] sm:$0xff] %v18786_v28  ;;  %505 = vst [vmem:[#allocation2 + $0x1c] sm:$0xf] %v378_v26  ;;  %5926 = vmatpush2.bf16.msra.mxu0 %v18118_v43  ;;  %v388_v19 = vsel %vm18767_vm5, %v386_v8, %v387_v61  ;;  %s26037_s24 = scalar_lea.hbm %s26087_s4, %s16911_s7  ;;  %s16149_s28 = scalar_lea.sflag [#allocation5], %s18681_s10 }
  0x7a   : > { %vm18795_vm12 = vmor %vm18780_vm9, %vm3014_vm8  ;;  %507 = vst [vmem:[#allocation2 + $0x24] sm:$0xe] %v380_v35  ;;  %5927 = vmatprep.subr.bf16.mxu0 %v26095_v0  ;;  %vm18516_vm8 = vmmov 1   ;;  %s18436_s6 = scalar_lea.vmem %s26039_s9, 2048  ;;  %p27455_p2 = scmp.ne.s32.totalorder %s26539_s14, 0 }
  0x7b   : > { %vm18814_vm15 = vmor %vm18795_vm12, %vm3016_vm10  ;;  %508 = vst [vmem:[#allocation2 + $0x28] sm:$0xf] %v383_v44  ;;  %p18437_p5 = scmp.ne.s32.totalorder %s26039_s9, %s18436_s6  ;;  %s18517_s19 = smov [#allocation9]  }
  0x7c   : > { %509 = vst [vmem:[#allocation2 + $0x2c] sm:$0x1] %v384_v51  ;;  %vm18825_vm1 = vmor %vm18814_vm15, %vm3018_vm11  ;;  %s18440_s12 = sshll.u32 %s18517_s19, 4  ;;  %s18441_s12 = int_to_ptr.vmem [resolvable:$false] %s18440_s12 }
  0x7d   : > { %510 = vst [vmem:[#allocation2 + $0x30] sm:$0xe] %v385_v59  ;;  %vm18848_vm2 = vmor %vm18825_vm1, %vm3020_vm13  ;;  %5928 = vmatpush2.bf16.msra.mxu0 %v18125_v3  ;;  %v18132_v59 = vld [vmem:[#allocation6 + $0x118] sm:$0xff]   ;;  %vm13965_vm13 = vsmask.f32 7424  ;;  %p18438_p7 = pnand %p18437_p5, %p27455_p2  ;;  %s18442_s13 = scalar_lea.vmem %s18441_s12, 4096 }
  0x7e   : > { %v662_v42 = vld [vmem:[#allocation2 + $0x18] sm:$0xf]  ;;  %511 = vst [vmem:[#allocation2 + $0x34] sm:$0xf] %v388_v19  ;;  %vm18896_vm3 = vmor %vm18848_vm2, %vm3022_vm14  ;;  %5929 = vmatprep.subr.bf16.mxu0 %v26095_v0  ;;  %vm15217_vm14 = vcmask 1046528   ;;  %p18443_p13 = scmp.lt.s32.totalorder %s26039_s9, %s18441_s12  ;;  %p18444_p0 = scmp.lt.s32.totalorder %s18442_s13, %s18436_s6 }
  0x7f   : > { %v18128_v45 = vld [vmem:[#allocation2 + $0xc] ss:$12 sps:$4 sm:$0xff]   ;;  %v18120_v48 = vld [vmem:[#allocation2 + $0x20] ss:$0 sps:$4 sm:$0x33]   ;;  %vm23216_vm4 = vmpackc.low %vm18513_vm0, %vm18513_vm0  ;;  %p18439_p12 = pneg %p18438_p7 }
  0x80   : > { %v663_v52 = vld [vmem:[#allocation2 + $0x1c] sm:$0xf]  ;;  %v1326_v58 = vrot.slane %v18120_v48, %v18800_v39  ;;  %v18836_v6 = vrot.slane %v18128_v45, %v18800_v39  ;;  %v18135_v9 = vld [vmem:[#allocation2 + $0x14] ss:$12 sps:$4 sm:$0x33]   ;;  %vm23450_vm9 = vmpackc.low %vm18516_vm8, %vm18516_vm8  ;;  %p18445_p10 = por %p18444_p0, %p18443_p13 }
  0x81   : > { %v18129_v55 = vld [vmem:[#allocation2 + $0x10] ss:$12 sps:$4 sm:$0xff]   ;;  %v16339_v56 = vcombine.low %v662_v42, %v663_v52  ;;  %v16377_v57 = vcombine.low %v663_v52, %v663_v52  ;;  %v18833_v4 = vld [vmem:[#allocation2 + $0x24] sm:$0xf]  ;;  %v18860_v20 = vrot.slane %v18135_v9, %v18800_v39  ;;  %5930 = vmatpush2.bf16.msra.mxu0 %v18126_v25 }
  0x82   : > { %v1327_v2 = vcombine.low %v1319_v49, %v1326_v58  ;;  %v1328_v5 = vcombine.high %v1319_v49, %v1326_v58  ;;  %v18839_v7 = vrot.slane %v18129_v55, %v18800_v39  ;;  %v666_v17 = vld [vmem:[#allocation2 + $0x28] sm:$0xf]  ;;  %5931 = vmatprep.subr.bf16.mxu0 %v26095_v0  ;;  %p18446_p3 = pnand %p18445_p10, %p18439_p12 }
  0x83   : > { %v1268_v62 = vrot.slane %v16339_v56, %v18800_v39  ;;  %v1275_v63 = vrot.slane %v16377_v57, %v18800_v39  ;;  %v16341_v27 = vcombine.low %v18833_v4, %v666_v17  ;;  %v16381_v29 = vcombine.low %v666_v17, %v666_v17 }
  0x84   : > { %v18843_v15 = vrot.slane %v1327_v2, %v18800_v39  ;;  %v18853_v18 = vrot.slane %v1328_v5, %v18800_v39  ;;  %v18930_v3 = vld [vmem:[#allocation2 + $0x30] sm:$0xf] }
  0x85   : > { %v1276_v11 = vcombine.low %v1254_v53, %v1268_v62  ;;  %v1277_v12 = vcombine.high %v1254_v53, %v1268_v62  ;;  %v1278_v13 = vcombine.low %v1261_v54, %v1275_v63  ;;  %v1279_v14 = vcombine.high %v1261_v54, %v1275_v63  ;;  %5932 = vmatpush2.bf16.msra.mxu0 %v18131_v50  ;;  %v18945_v16 = vld [vmem:[#allocation2 + $0x34] sm:$0xf] }
  0x86   : > { %26558 = vst [vmem:[#allocation14_spill] sm:$0xff] %v18853_v18  ;;  %v3086_v26 = vshll.u32 %v18843_v15, 16  ;;  %v3089_v30 = vshrl.u32 %v18843_v15, 16  ;;  %v1366_v2 = vrot.slane %v16341_v27, %v18800_v39  ;;  %v1373_v9 = vrot.slane %v16381_v29, %v18800_v39  ;;  %5933 = vmatprep.subr.bf16.mxu0 %v26095_v0 }
  0x87   : > { %v18863_v21 = vrot.slane %v1276_v11, %v18800_v39  ;;  %v18866_v22 = vrot.slane %v1278_v13, %v18800_v39  ;;  %v18869_v23 = vrot.slane %v1277_v12, %v18800_v39  ;;  %v18872_v24 = vrot.slane %v1279_v14, %v18800_v39 }
  0x88   : > { %v1374_v14 = vcombine.low %v18836_v6, %v1366_v2  ;;  %v1375_v19 = vcombine.high %v18836_v6, %v1366_v2  ;;  %v1376_v25 = vcombine.low %v18839_v7, %v1373_v9  ;;  %v18140_v2 = vld [vmem:[#allocation6 + $0x108] sm:$0xff]  }
  0x89   : > { %v18879_v31 = vcombine.high %v18863_v21, %v18863_v21  ;;  %v18883_v32 = vcombine.high %v18866_v22, %v18866_v22  ;;  %v18887_v33 = vcombine.high %v18869_v23, %v18869_v23  ;;  %v18891_v34 = vcombine.high %v18872_v24, %v18872_v24  ;;  %5934 = vmatpush2.bf16.msra.mxu0 %v18132_v59 }
  0x8a   : > { %v3025_v36 = vshrl.u32 %v18863_v21, 16  ;;  %v3030_v37 = vshll.u32 %v18869_v23, 16  ;;  %v3033_v38 = vshrl.u32 %v18869_v23, 16  ;;  %v3054_v40 = vshll.u32 %v18866_v22, 16  ;;  %5935 = vmatprep.subr.bf16.mxu0 %v26095_v0 }
  0x8b   : > { %26559 = vst [vmem:[#allocation15_spill] sm:$0xff] %v18879_v31  ;;  %26560 = vst [vmem:[#allocation16_spill] sm:$0xff] %v18883_v32  ;;  %v3038_v41 = vshll.u32 %v18879_v31, 16  ;;  %v3041_v42 = vshrl.u32 %v18879_v31, 16  ;;  %v3046_v43 = vshll.u32 %v18887_v33, 16  ;;  %v3049_v44 = vshrl.u32 %v18887_v33, 16 }
  0x8c   : > { %26561 = vst [vmem:[#allocation17_spill] sm:$0xff] %v18887_v33  ;;  %26562 = vst [vmem:[#allocation18_spill] sm:$0xff] %v18891_v34  ;;  %v3032_v45 = vsel %vm18896_vm3, %v3025_v36, %v3030_v37  ;;  %v3057_v46 = vshrl.u32 %v18866_v22, 16  ;;  %v3062_v48 = vshll.u32 %v18872_v24, 16  ;;  %v3065_v49 = vshrl.u32 %v18872_v24, 16 }
  0x8d   : > { %v3040_v51 = vsel %vm18896_vm3, %v3033_v38, %v3038_v41  ;;  %v3048_v52 = vsel %vm18896_vm3, %v3041_v42, %v3046_v43  ;;  %v3056_v53 = vsel %vm18896_vm3, %v3049_v44, %v3054_v40  ;;  %v3070_v54 = vshll.u32 %v18883_v32, 16  ;;  %v18139_v41 = vld [vmem:[#allocation6 + $0x110] sm:$0xff]  }
  0x8e   : > { %v3064_v55 = vsel %vm18896_vm3, %v3057_v46, %v3062_v48  ;;  %v3073_v56 = vshrl.u32 %v18883_v32, 16  ;;  %v3078_v57 = vshll.u32 %v18891_v34, 16  ;;  %v3081_v58 = vshrl.u32 %v18891_v34, 16  ;;  %5936 = vmatpush2.bf16.msra.mxu0 %v18139_v41 }
  0x8f   : > { %v3072_v60 = vsel %vm18896_vm3, %v3065_v49, %v3070_v54  ;;  %v4338_v62 = vcombine.low %v3032_v45, %v3040_v51  ;;  %v4339_v63 = vcombine.low %v3048_v52, %v3056_v53  ;;  %v18959_v36 = vrot.slane %v1374_v14, %v18800_v39  ;;  %v18133_v51 = vld [vmem:[#allocation2 + $0x2c] ss:$0 sps:$4 sm:$0x33]   ;;  %5937 = vmatprep.subr.bf16.mxu0 %v26095_v0 }
  0x90   : > { %v3080_v4 = vsel %vm18896_vm3, %v3073_v56, %v3078_v57  ;;  %v3088_v5 = vsel %vm18896_vm3, %v3081_v58, %v3086_v26  ;;  %v4340_v8 = vcombine.low %v3064_v55, %v3072_v60  ;;  %v1377_v26 = vcombine.high %v18839_v7, %v1373_v9  ;;  %v18136_v9 = vld [vmem:[#allocation2 + $0x18] ss:$12 sps:$4 sm:$0xff]  }
  0x91   : > { %v4341_v11 = vcombine.low %v3080_v4, %v3088_v5  ;;  %v18938_v12 = vrot.slane %v4338_v62, %v18800_v39  ;;  %v18941_v13 = vrot.slane %v4339_v63, %v18800_v39  ;;  %v3094_v37 = vshll.u32 %v18853_v18, 16 }
  0x92   : > { %v18948_v17 = vrot.slane %v4340_v8, %v18800_v39  ;;  %v18963_v38 = vrot.slane %v1376_v25, %v18800_v39  ;;  %v18966_v6 = vrot.slane %v1375_v19, %v18800_v39  ;;  %v18969_v40 = vrot.slane %v1377_v26, %v18800_v39  ;;  %v18137_v26 = vld [vmem:[#allocation2 + $0x1c] ss:$12 sps:$4 sm:$0xff]   ;;  %5938 = vmatpush2.bf16.msra.mxu0 %v18140_v2 }
  0x93   : > { %v18954_v27 = vrot.slane %v4341_v11, %v18800_v39  ;;  %v4370_v29 = vcombine.low %v18938_v12, %v18941_v13  ;;  %v16343_v7 = vcombine.low %v18930_v3, %v18945_v16  ;;  %v18980_v44 = vcombine.high %v18959_v36, %v18959_v36  ;;  %5939 = vmatprep.subr.bf16.mxu0 %v26095_v0 }
  0x94   : > { %v3096_v45 = vsel %vm18896_vm3, %v3089_v30, %v3094_v37  ;;  %v18989_v46 = vcombine.high %v18963_v38, %v18963_v38  ;;  %v18993_v48 = vcombine.high %v18966_v6, %v18966_v6  ;;  %v18997_v49 = vcombine.high %v18969_v40, %v18969_v40 }
  0x95   : > { %v4372_v42 = vcombine.low %v18948_v17, %v18954_v27  ;;  %v18976_v43 = vrot.slane %v4370_v29, %v18800_v39  ;;  %v3098_v50 = vshrl.u32 %v18959_v36, 16  ;;  %v3103_v30 = vshll.u32 %v18966_v6, 16  ;;  %v18148_v29 = vld [vmem:[#allocation6 + $0x38] sm:$0xff]  }
  0x96   : > { %v3106_v53 = vshrl.u32 %v18966_v6, 16  ;;  %v3111_v54 = vshll.u32 %v18980_v44, 16  ;;  %v3114_v55 = vshrl.u32 %v18980_v44, 16  ;;  %v3119_v56 = vshll.u32 %v18993_v48, 16 }
  0x97   : > { %v19001_v52 = vrot.slane %v4372_v42, %v18800_v39  ;;  %v3122_v57 = vshrl.u32 %v18993_v48, 16  ;;  %v3127_v58 = vshll.u32 %v18963_v38, 16  ;;  %v3105_v60 = vsel %vm18896_vm3, %v3098_v50, %v3103_v30 }
  0x98   : > { %v3113_v62 = vsel %vm18896_vm3, %v3106_v53, %v3111_v54  ;;  %v3130_v63 = vshrl.u32 %v18963_v38, 16  ;;  %v3121_v3 = vsel %vm18896_vm3, %v3114_v55, %v3119_v56  ;;  %v3135_v5 = vshll.u32 %v18969_v40, 16  ;;  %v18147_v55 = vld [vmem:[#allocation6 + $0x100] sm:$0xff]   ;;  %v18161_v56 = vld [vmem:[#allocation6 + $0x30] sm:$0xff]  }
  0x99   : > { %v4403_v59 = vcombine.high %v18976_v43, %v19001_v52  ;;  %v3129_v4 = vsel %vm18896_vm3, %v3122_v57, %v3127_v58  ;;  %v3138_v8 = vshrl.u32 %v18969_v40, 16  ;;  %v3143_v11 = vshll.u32 %v18989_v46, 16  ;;  %5940 = vmatpush2.bf16.msra.mxu0 %v18147_v55 }
  0x9a   : > { %v3146_v14 = vshrl.u32 %v18989_v46, 16  ;;  %v3151_v19 = vshll.u32 %v18997_v49, 16  ;;  %v4405_v25 = vcombine.low %v3096_v45, %v3105_v60  ;;  %v3137_v37 = vsel %vm18896_vm3, %v3130_v63, %v3135_v5  ;;  %17681 = vmatprep.subr.bf16.mxu0 %v26098_v1 }
  0x9b   : > { %17598 = vmatmul.mubr.bf16.vlgmr.msra.gmra.mxu1 %v4403_v59  ;;  %v4406_v41 = vcombine.low %v3113_v62, %v3121_v3  ;;  %v1424_v42 = vrot.slane %v18133_v51, %v18800_v39  ;;  %v16385_v50 = vcombine.low %v18945_v16, %v18945_v16  ;;  %v3145_v30 = vsel %vm18896_vm3, %v3138_v8, %v3143_v11  ;;  %v18168_v11 = vld [vmem:[#allocation6 + $0x28] sm:$0xff]  }
  0x9c   : > { %17601 = vmatprep.mubr.msk.bf16.mxu1 %vm18513_vm0, %v26098_v1  ;;  %v3153_v45 = vsel %vm18896_vm3, %v3146_v14, %v3151_v19  ;;  %v4407_v53 = vcombine.low %v3129_v4, %v3137_v37  ;;  %v19039_v54 = vrot.slane %v4405_v25, %v18800_v39  ;;  %v1450_v60 = vrot.slane %v18136_v9, %v18800_v39 }
  0x9d   : > { %v4408_v57 = vcombine.low %v3145_v30, %v3153_v45  ;;  %v19042_v58 = vrot.slane %v4406_v41, %v18800_v39  ;;  %v1425_v51 = vcombine.low %v18860_v20, %v1424_v42  ;;  %v1426_v16 = vcombine.high %v18860_v20, %v1424_v42  ;;  %7881 = vmatpush1.bf16.msra.mxu1 %v18148_v29 }
  0x9e   : > { %v19048_v59 = vrot.slane %v4407_v53, %v18800_v39  ;;  %v1457_v62 = vrot.slane %v18137_v26, %v18800_v39  ;;  %v1464_v63 = vrot.slane %v16343_v7, %v18800_v39  ;;  %7882 = vmatprep.subr.bf16.mxu1 %v26095_v0  ;;  %v1471_v5 = vrot.slane %v16385_v50, %v18800_v39 }
  0x9f   : > { %v19054_v2 = vrot.slane %v4408_v57, %v18800_v39  ;;  %v4437_v3 = vcombine.low %v19039_v54, %v19042_v58  ;;  %v19059_v20 = vrot.slane %v1425_v51, %v18800_v39  ;;  %v19062_v4 = vrot.slane %v1426_v16, %v18800_v39 }
  0xa0   : > { %v1472_v8 = vcombine.low %v1450_v60, %v1464_v63  ;;  %v1473_v9 = vcombine.high %v1450_v60, %v1464_v63  ;;  %v3154_v7 = vshrl.u32 %v18997_v49, 16  ;;  %v1474_v29 = vcombine.low %v1457_v62, %v1471_v5 }
  0xa1   : > { %26565 = vst [vmem:[#allocation19_spill] sm:$0xff] %v19059_v20  ;;  %26566 = vst [vmem:[#allocation20_spill] sm:$0xff] %v19062_v4  ;;  %v4439_v14 = vcombine.low %v19048_v59, %v19054_v2  ;;  %v19070_v19 = vrot.slane %v4437_v3, %v18800_v39  ;;  %v3159_v25 = vshll.u32 %v19059_v20, 16  ;;  %v3162_v26 = vshrl.u32 %v19059_v20, 16  ;;  %7883 = vmatpush1.bf16.msra.mxu1 %v18161_v56 }
  0xa2   : > { %v1475_v37 = vcombine.high %v1457_v62, %v1471_v5  ;;  %v19076_v41 = vrot.slane %v1472_v8, %v18800_v39  ;;  %v19079_v42 = vrot.slane %v1473_v9, %v18800_v39  ;;  %v3167_v45 = vshll.u32 %v19062_v4, 16  ;;  %7884 = vmatprep.subr.bf16.mxu1 %v26095_v0  ;;  %v314_v62 = vld [vmem:[%s18687_s8 + $0x18] sm:$0xf]  ;;  %v19119_v9 = vld [vmem:[%s18687_s8 + $0x1c] sm:$0xf] }
  0xa3   : > { %v19082_v50 = vrot.slane %v4439_v14, %v18800_v39  ;;  %v3161_v30 = vsel %vm18896_vm3, %v3154_v7, %v3159_v25  ;;  %v389_v53 = vrot.slane %v387_v61, 4  ;;  %v19091_v55 = vrot.slane %v1474_v29, %v18800_v39  ;;  %v18176_v7 = vld [vmem:[#allocation6 + $0x20] sm:$0xff]  }
  0xa4   : > { %26567 = vst [vmem:[#allocation21_spill] sm:$0xff] %v19076_v41  ;;  %26568 = vst [vmem:[#allocation22_spill] sm:$0xff] %v19079_v42  ;;  %v19094_v57 = vrot.slane %v1475_v37, %v18800_v39  ;;  %v19098_v56 = vcombine.high %v19076_v41, %v19076_v41  ;;  %v19102_v51 = vcombine.high %v19079_v42, %v19079_v42  ;;  %v3171_v16 = vshrl.u32 %v19076_v41, 16  ;;  %v18143_v37 = vld [vmem:[#allocation2 + $0x20] ss:$12 sps:$4 sm:$0x33]  }
  0xa5   : > { %26569 = vst [vmem:[#allocation23_spill] sm:$0xff] %v19091_v55  ;;  %v4470_v47 = vcombine.high %v19070_v19, %v19082_v50  ;;  %v3169_v61 = vsel %vm18896_vm3, %v3162_v26, %v3167_v45  ;;  %v3176_v60 = vshll.u32 %v19079_v42, 16  ;;  %512 = vst [vmem:[#allocation2 + $0x38] sm:$0x1] %v389_v53  ;;  %v19113_v63 = vcombine.high %v19091_v55, %v19091_v55  ;;  %v18144_v45 = vld [vmem:[#allocation2 + $0x24] ss:$12 sps:$4 sm:$0xff]  }
  0xa6   : > { %26570 = vst [vmem:[#allocation24_spill] sm:$0xff] %v19094_v57  ;;  %26571 = vst [vmem:[#allocation25_spill] sm:$0xff] %v19098_v56  ;;  %v3179_v3 = vshrl.u32 %v19079_v42, 16  ;;  %v3184_v5 = vshll.u32 %v19098_v56, 16  ;;  %v3187_v8 = vshrl.u32 %v19098_v56, 16  ;;  %7885 = vmatpush1.bf16.msra.mxu1 %v18168_v11  ;;  %v3192_v25 = vshll.u32 %v19102_v51, 16 }
  0xa7   : > { %26572 = vst [vmem:[#allocation26_spill] sm:$0xff] %v19102_v51  ;;  %26573 = vst [vmem:[#allocation27_spill] sm:$0xff] %v19113_v63  ;;  %17602 = vmatmul.mubr.bf16.gmra.mxu1 %v4470_v47  ;;  %v3178_v14 = vsel %vm18896_vm3, %v3171_v16, %v3176_v60  ;;  %v3195_v26 = vshrl.u32 %v19102_v51, 16  ;;  %v3200_v29 = vshll.u32 %v19091_v55, 16  ;;  %7886 = vmatprep.subr.bf16.mxu1 %v26095_v0  ;;  %v3203_v53 = vshrl.u32 %v19091_v55, 16 }
  0xa8   : > { %17605 = vmatprep.mubr.msk.bf16.mxu1 %vm18513_vm0, %v26098_v1  ;;  %v3186_v11 = vsel %vm18896_vm3, %v3179_v3, %v3184_v5  ;;  %v3208_v47 = vshll.u32 %v19094_v57, 16  ;;  %v3211_v16 = vshrl.u32 %v19094_v57, 16  ;;  %v18145_v60 = vld [vmem:[#allocation2 + $0x28] ss:$12 sps:$4 sm:$0xff]   ;;  %v3194_v28 = vsel %vm18896_vm3, %v3187_v8, %v3192_v25 }
  0xa9   : > { %v3202_v51 = vsel %vm18896_vm3, %v3195_v26, %v3200_v29  ;;  %v3216_v0 = vshll.u32 %v19113_v63, 16  ;;  %v4472_v56 = vcombine.low %v3161_v30, %v3169_v61  ;;  %v4473_v3 = vcombine.low %v3178_v14, %v3186_v11 }
  0xaa   : > { %v3210_v1 = vsel %vm18896_vm3, %v3203_v53, %v3208_v47  ;;  %v4474_v5 = vcombine.low %v3194_v28, %v3202_v51  ;;  %v390_v4 = vrot.slane %v314_v62, 7  ;;  %7887 = vmatpush1.bf16.msra.mxu1 %v18176_v7  ;;  %v392_v8 = vrot.slane %v19119_v9, 7 }
  0xab   : > { %v3218_v18 = vsel %vm18896_vm3, %v3211_v16, %v3216_v0  ;;  %v19144_v34 = vrot.slane %v4472_v56, %v18800_v39  ;;  %v19149_v25 = vcombine.high %v19094_v57, %v19094_v57  ;;  %v26575_v30 = vmov 0  }
  0xac   : > { %7888 = vmatprep.subr.bf16.mxu1 %v26575_v30  ;;  %v4475_v61 = vcombine.low %v3210_v1, %v3218_v18  ;;  %v19153_v28 = vrot.slane %v4473_v3, %v18800_v39  ;;  %v19156_v51 = vrot.slane %v4474_v5, %v18800_v39  ;;  %v391_v0 = vrot.slane %v390_v4, 4  ;;  %513 = vst [vmem:[#allocation2 + $0x3c] sm:$0xe] %v390_v4  ;;  %v18141_v56 = vld [vmem:[#allocation2 + $0x38] ss:$0 sps:$4 sm:$0x33]  }
  0xad   : > { %26574 = vst [vmem:[#allocation28_spill] sm:$0xff] %v19149_v25  ;;  %v1515_v62 = vrot.slane %v18143_v37, %v18800_v39  ;;  %v19160_v9 = vrot.slane %v18144_v45, %v18800_v39  ;;  %v19163_v7 = vrot.slane %v18145_v60, %v18800_v39  ;;  %v3219_v1 = vshrl.u32 %v19113_v63, 16  ;;  %v18152_v18 = vld [vmem:[#allocation2 + $0x2c] ss:$12 sps:$4 sm:$0x33]  }
  0xae   : > { %v19167_v14 = vrot.slane %v4475_v61, %v18800_v39  ;;  %v4504_v26 = vcombine.low %v19144_v34, %v19153_v28  ;;  %v393_v4 = vsel %vm18767_vm5, %v391_v0, %v392_v8  ;;  %v1522_v29 = vrot.slane %v18141_v56, %v18800_v39  ;;  %v316_v37 = vld [vmem:[%s18687_s8 + $0x20] sm:$0xf]  ;;  %v317_v45 = vld [vmem:[%s18687_s8 + $0x24] sm:$0xf] }
  0xaf   : > { %514 = vst [vmem:[#allocation2 + $0x40] sm:$0xf] %v393_v4  ;;  %v3224_v11 = vshll.u32 %v19149_v25, 16  ;;  %v3227_v53 = vshrl.u32 %v19149_v25, 16  ;;  %v4371_v47 = vcombine.high %v18938_v12, %v18941_v13  ;;  %v4373_v16 = vcombine.high %v18948_v17, %v18954_v27 }
  0xb0   : > { %v4506_v60 = vcombine.low %v19156_v51, %v19167_v14  ;;  %v19185_v3 = vrot.slane %v4504_v26, %v18800_v39  ;;  %v1523_v5 = vcombine.low %v1515_v62, %v1522_v29  ;;  %v1524_v61 = vcombine.high %v1515_v62, %v1522_v29  ;;  %v18149_v62 = vld [vmem:[#allocation6 + $0xb8] sm:$0xff]  }
  0xb1   : > { %v3226_v0 = vsel %vm18896_vm3, %v3219_v1, %v3224_v11  ;;  %v4387_v56 = vrot.slane %v4371_v47, %v18800_v39  ;;  %v4401_v4 = vrot.slane %v4373_v16, %v18800_v39  ;;  %v4402_v12 = vcombine.low %v18976_v43, %v19001_v52 }
  0xb2   : > { %v19194_v13 = vrot.slane %v4506_v60, %v18800_v39  ;;  %v19197_v17 = vrot.slane %v1523_v5, %v18800_v39  ;;  %v19200_v27 = vrot.slane %v1524_v61, %v18800_v39  ;;  %v394_v26 = vrot.slane %v392_v8, 4  ;;  %v318_v8 = vld [vmem:[%s18687_s8 + $0x28] sm:$0xf] }
  0xb3   : > { %v671_v1 = vld [vmem:[#allocation2 + $0x3c] sm:$0xf]  ;;  %v4404_v29 = vcombine.low %v4387_v56, %v4401_v4  ;;  %v395_v11 = vrot.slane %v316_v37, 7  ;;  %v397_v47 = vrot.slane %v317_v45, 7  ;;  %v19203_v16 = vrot.slane %v18152_v18, %v18800_v39 }
  0xb4   : > { %26576 = vst [vmem:[#allocation29_spill] sm:$0xff] %v19197_v17  ;;  %26577 = vst [vmem:[#allocation30_spill] sm:$0xff] %v19200_v27  ;;  %v4537_v43 = vcombine.high %v19185_v3, %v19194_v13  ;;  %v3232_v52 = vshll.u32 %v19197_v17, 16  ;;  %v3235_v60 = vshrl.u32 %v19197_v17, 16  ;;  %v3240_v5 = vshll.u32 %v19200_v27, 16  ;;  %v18186_v27 = vld [vmem:[#allocation6 + $0x18] sm:$0xff]  }
  0xb5   : > { %515 = vst [vmem:[#allocation2 + $0x44] sm:$0x1] %v394_v26  ;;  %v18153_v61 = vld [vmem:[#allocation2 + $0x30] ss:$12 sps:$4 sm:$0xff]   ;;  %5941 = vmatprep.mubr.bf16.mxu0 %v4404_v29  ;;  %v396_v56 = vrot.slane %v395_v11, 4  ;;  %v4438_v37 = vcombine.high %v19039_v54, %v19042_v58  ;;  %v4440_v18 = vcombine.high %v19048_v59, %v19054_v2  ;;  %v4469_v45 = vcombine.low %v19070_v19, %v19082_v50 }
  0xb6   : > { %516 = vst [vmem:[#allocation2 + $0x48] sm:$0xe] %v395_v11  ;;  %v319_v4 = vld [vmem:[%s18687_s8 + $0x2c] sm:$0xf]  ;;  %17606 = vmatmul.mubr.bf16.gmra.mxu1 %v4537_v43  ;;  %v672_v25 = vld [vmem:[#allocation2 + $0x40] sm:$0xf]  ;;  %v3234_v26 = vsel %vm18896_vm3, %v3227_v53, %v3232_v52  ;;  %v19222_v29 = vsel %vm18896_vm3, %v3235_v60, %v3240_v5  ;;  %5942 = vmatmul.mubr.bf16.vlgmr.msra.gmra.mxu0 %v4402_v12 }
  0xb7   : > { %v18154_v11 = vld [vmem:[#allocation2 + $0x34] ss:$12 sps:$4 sm:$0xff]   ;;  %v19225_v54 = vrot.slane %v18153_v61, %v18800_v39  ;;  %v26578_v58 = vmov 0.0   ;;  %v16345_v59 = vcombine.low %v671_v1, %v672_v25  ;;  %v16389_v2 = vcombine.low %v672_v25, %v672_v25  ;;  %17682 = vmatpush3.bf16.msra.mxu0 %v18149_v62  ;;  %7889 = vmatpush1.bf16.msra.mxu1 %v18186_v27  ;;  %v18187_v27 = vld [vmem:[#allocation6 + $0xa8] sm:$0xff]  }
  0xb8   : > { %17609 = vmatprep.mubr.msk.bf16.mxu1 %vm18513_vm0, %v26578_v58  ;;  %v4539_v19 = vcombine.low %v3226_v0, %v3234_v26  ;;  %v399_v50 = vrot.slane %v397_v47, 4  ;;  %v18169_v43 = vld [vmem:[#allocation6 + $0xb0] sm:$0xff]   ;;  %v398_v53 = vsel %vm18767_vm5, %v396_v56, %v397_v47  ;;  %v19232_v52 = vrot.slane %v18154_v11, %v18800_v39  ;;  %17683 = vmatprep.subr.bf16.mxu0 %v26578_v58 }
  0xb9   : > { %v4454_v12 = vrot.slane %v4438_v37, %v18800_v39  ;;  %v4468_v60 = vrot.slane %v4440_v18, %v18800_v39  ;;  %v1562_v1 = vrot.slane %v16345_v59, %v18800_v39  ;;  %v1569_v25 = vrot.slane %v16389_v2, %v18800_v39  ;;  %517 = vst [vmem:[#allocation2 + $0x4c] sm:$0xf] %v398_v53 }
  0xba   : > { %v19240_v0 = vrot.slane %v4539_v19, %v18800_v39  ;;  %v400_v62 = vrot.slane %v318_v8, 7  ;;  %518 = vst [vmem:[#allocation2 + $0x50] sm:$0x1] %v399_v50  ;;  %v402_v5 = vrot.slane %v319_v4, 7  ;;  %v4505_v61 = vcombine.high %v19144_v34, %v19153_v28  ;;  %7890 = vmatprep.subr.bf16.mxu1 %v26575_v30 }
  0xbb   : > { %v4471_v47 = vcombine.low %v4454_v12, %v4468_v60  ;;  %v4507_v56 = vcombine.high %v19156_v51, %v19167_v14  ;;  %v1570_v37 = vcombine.low %v19160_v9, %v1562_v1  ;;  %v1571_v18 = vcombine.high %v19160_v9, %v1562_v1  ;;  %17684 = vmatpush3.bf16.msra.mxu0 %v18169_v43 }
  0xbc   : > { %v1572_v26 = vcombine.low %v19163_v7, %v1569_v25  ;;  %v1573_v8 = vcombine.high %v19163_v7, %v1569_v25  ;;  %v18150_v11 = vld [vmem:[#allocation2 + $0x44] ss:$0 sps:$4 sm:$0x33]   ;;  %519 = vst [vmem:[#allocation2 + $0x54] sm:$0xe] %v400_v62  ;;  %v401_v4 = vrot.slane %v400_v62, 4  ;;  %v4521_v34 = vrot.slane %v4505_v61, %v18800_v39  ;;  %17685 = vmatprep.subr.bf16.mxu0 %v26578_v58 }
  0xbd   : > { %5949 = vmatprep.mubr.bf16.mxu0 %v4471_v47  ;;  %v4535_v28 = vrot.slane %v4507_v56, %v18800_v39  ;;  %v4536_v51 = vcombine.low %v19185_v3, %v19194_v13  ;;  %v19257_v9 = vrot.slane %v1570_v37, %v18800_v39  ;;  %v19263_v14 = vrot.slane %v1571_v18, %v18800_v39  ;;  %v674_v2 = vld [vmem:[#allocation2 + $0x48] sm:$0xf] }
  0xbe   : > { %v19260_v7 = vrot.slane %v1572_v26, %v18800_v39  ;;  %v19266_v59 = vrot.slane %v1573_v8, %v18800_v39  ;;  %v1620_v19 = vrot.slane %v18150_v11, %v18800_v39  ;;  %5950 = vmatmul.mubr.bf16.gmra.mxu0 %v4469_v45  ;;  %v403_v3 = vsel %vm18767_vm5, %v401_v4, %v402_v5  ;;  %v18159_v31 = vld [vmem:[#allocation2 + $0x3c] ss:$12 sps:$4 sm:$0xff]  }
  0xbf   : > { %26579 = vst [vmem:[#allocation31_spill] sm:$0xff] %v19257_v9  ;;  %26581 = vst [vmem:[#allocation33_spill] sm:$0xff] %v19263_v14  ;;  %v4538_v13 = vcombine.low %v4521_v34, %v4535_v28  ;;  %v404_v50 = vrot.slane %v402_v5, 4  ;;  %v19273_v43 = vcombine.high %v19257_v9, %v19257_v9  ;;  %v19277_v53 = vcombine.high %v19263_v14, %v19263_v14 }
  0xc0   : > { %26580 = vst [vmem:[#allocation32_spill] sm:$0xff] %v19260_v7  ;;  %26582 = vst [vmem:[#allocation34_spill] sm:$0xff] %v19266_v59  ;;  %v3244_v12 = vshrl.u32 %v19257_v9, 16  ;;  %v3249_v60 = vshll.u32 %v19263_v14, 16  ;;  %17686 = vmatpush3.bf16.msra.mxu0 %v18187_v27  ;;  %v3252_v45 = vshrl.u32 %v19263_v14, 16  ;;  %v3273_v1 = vshll.u32 %v19260_v7, 16 }
  0xc1   : > { %26583 = vst [vmem:[#allocation35_spill] sm:$0xff] %v19273_v43  ;;  %26584 = vst [vmem:[#allocation36_spill] sm:$0xff] %v19277_v53  ;;  %v3276_v25 = vshrl.u32 %v19260_v7, 16  ;;  %v3281_v62 = vshll.u32 %v19266_v59, 16  ;;  %v675_v47 = vld [vmem:[#allocation2 + $0x4c] sm:$0xf]  ;;  %5957 = vmatprep.mubr.bf16.mxu0 %v4538_v13  ;;  %17687 = vmatprep.subr.bf16.mxu0 %v26578_v58  ;;  %v19301_v34 = vcombine.high %v19260_v7, %v19260_v7 }
  0xc2   : > { %520 = vst [vmem:[#allocation2 + $0x58] sm:$0xf] %v403_v3  ;;  %521 = vst [vmem:[#allocation2 + $0x5c] sm:$0x1] %v404_v50  ;;  %v3251_v5 = vsel %vm18896_vm3, %v3244_v12, %v3249_v60  ;;  %v3257_v61 = vshll.u32 %v19273_v43, 16  ;;  %v3260_v56 = vshrl.u32 %v19273_v43, 16  ;;  %v16347_v11 = vcombine.low %v674_v2, %v675_v47 }
  0xc3   : > { %v3265_v37 = vshll.u32 %v19277_v53, 16  ;;  %v3268_v18 = vshrl.u32 %v19277_v53, 16  ;;  %v3283_v26 = vsel %vm18896_vm3, %v3276_v25, %v3281_v62  ;;  %v4540_v8 = vcombine.low %v19222_v29, %v3251_v5  ;;  %26585 = vst [vmem:[#allocation37_spill] sm:$0xff] %v19301_v34  ;;  %v18192_v50 = vld [vmem:[#allocation6 + $0x10] sm:$0xff]   ;;  %v18166_v14 = vld [vmem:[#allocation2 + $0x48] ss:$12 sps:$4 sm:$0xff]  }
  0xc4   : > { %v3259_v27 = vsel %vm18896_vm3, %v3252_v45, %v3257_v61  ;;  %v19305_v28 = vcombine.high %v19266_v59, %v19266_v59  ;;  %v1621_v2 = vcombine.low %v19203_v16, %v1620_v19  ;;  %v1622_v60 = vcombine.high %v19203_v16, %v1620_v19  ;;  %7891 = vmatpush1.bf16.msra.mxu1 %v18192_v50  ;;  %v18156_v32 = vld [vmem:[#allocation2 + $0x50] ss:$0 sps:$4 sm:$0x33]  }
  0xc5   : > { %v3267_v4 = vsel %vm18896_vm3, %v3260_v56, %v3265_v37  ;;  %v3275_v3 = vsel %vm18896_vm3, %v3268_v18, %v3273_v1  ;;  %v19310_v29 = vrot.slane %v4540_v8, %v18800_v39  ;;  %v16393_v45 = vcombine.low %v675_v47, %v675_v47  ;;  %7892 = vmatprep.subr.bf16.mxu1 %v26575_v30 }
  0xc6   : > { %26586 = vst [vmem:[#allocation38_spill] sm:$0xff] %v19305_v28  ;;  %v4541_v13 = vcombine.low %v3259_v27, %v3267_v4  ;;  %v4542_v12 = vcombine.low %v3275_v3, %v3283_v26  ;;  %v1660_v25 = vrot.slane %v16347_v11, %v18800_v39  ;;  %v19321_v1 = vrot.slane %v1621_v2, %v18800_v39 }
  0xc7   : > { %v4571_v5 = vcombine.low %v19240_v0, %v19310_v29  ;;  %v3284_v61 = vshrl.u32 %v19266_v59, 16  ;;  %5958 = vmatmul.mubr.bf16.gmra.mxu0 %v4536_v51  ;;  %v19328_v16 = vrot.slane %v1622_v60, %v18800_v39  ;;  %v1667_v19 = vrot.slane %v16393_v45, %v18800_v39 }
  0xc8   : > { %v19316_v62 = vrot.slane %v4541_v13, %v18800_v39  ;;  %26587 = vst [vmem:[#allocation39_spill] sm:$0xff] %v19321_v1  ;;  %v19325_v56 = vrot.slane %v4542_v12, %v18800_v39  ;;  %v1668_v47 = vcombine.low %v19225_v54, %v1660_v25  ;;  %v1669_v18 = vcombine.high %v19225_v54, %v1660_v25  ;;  %v677_v25 = vld [vmem:[#allocation2 + $0x54] sm:$0xf] }
  0xc9   : > { %26588 = vst [vmem:[#allocation40_spill] sm:$0xff] %v19328_v16  ;;  %v19334_v37 = vrot.slane %v4571_v5, %v18800_v39  ;;  %v3289_v51 = vshll.u32 %v19301_v34, 16  ;;  %v3292_v26 = vshrl.u32 %v19301_v34, 16  ;;  %v1670_v11 = vcombine.low %v19232_v52, %v1667_v19  ;;  %v678_v63 = vld [vmem:[#allocation2 + $0x58] sm:$0xf] }
  0xca   : > { %v4573_v8 = vcombine.low %v19316_v62, %v19325_v56  ;;  %v19343_v27 = vrot.slane %v1668_v47, %v18800_v39  ;;  %v3297_v4 = vshll.u32 %v19305_v28, 16  ;;  %v19347_v3 = vrot.slane %v1669_v18, %v18800_v39  ;;  %v18165_v34 = vld [vmem:[#allocation2 + $0x44] ss:$12 sps:$4 sm:$0x33]  }
  0xcb   : > { %v3291_v54 = vsel %vm18896_vm3, %v3284_v61, %v3289_v51  ;;  %v3300_v13 = vshrl.u32 %v19305_v28, 16  ;;  %v3305_v2 = vshll.u32 %v19321_v1, 16  ;;  %v19357_v12 = vrot.slane %v1670_v11, %v18800_v39  ;;  %v18158_v51 = vld [vmem:[#allocation2 + $0x38] ss:$12 sps:$4 sm:$0x33]  }
  0xcc   : > { %26589 = vst [vmem:[#allocation41_spill] sm:$0xff] %v19343_v27  ;;  %26590 = vst [vmem:[#allocation42_spill] sm:$0xff] %v19347_v3  ;;  %v19354_v50 = vrot.slane %v4573_v8, %v18800_v39  ;;  %v19361_v60 = vcombine.high %v19343_v27, %v19343_v27  ;;  %v3299_v45 = vsel %vm18896_vm3, %v3292_v26, %v3297_v4  ;;  %v3308_v47 = vshrl.u32 %v19321_v1, 16 }
  0xcd   : > { %26591 = vst [vmem:[#allocation43_spill] sm:$0xff] %v19357_v12  ;;  %v19367_v5 = vcombine.high %v19347_v3, %v19347_v3  ;;  %v3307_v61 = vsel %vm18896_vm3, %v3300_v13, %v3305_v2  ;;  %v3313_v18 = vshll.u32 %v19328_v16, 16  ;;  %v3317_v11 = vshrl.u32 %v19343_v27, 16 }
  0xce   : > { %26592 = vst [vmem:[#allocation44_spill] sm:$0xff] %v19361_v60  ;;  %v4604_v8 = vcombine.high %v19334_v37, %v19354_v50  ;;  %v3322_v26 = vshll.u32 %v19347_v3, 16  ;;  %v3325_v4 = vshrl.u32 %v19347_v3, 16  ;;  %v3330_v13 = vshll.u32 %v19361_v60, 16 }
  0xcf   : > { %26593 = vst [vmem:[#allocation45_spill] sm:$0xff] %v19367_v5  ;;  %v3315_v33 = vsel %vm18896_vm3, %v3308_v47, %v3313_v18  ;;  %v3333_v2 = vshrl.u32 %v19361_v60, 16  ;;  %v3338_v16 = vshll.u32 %v19367_v5, 16  ;;  %v3341_v28 = vshrl.u32 %v19367_v5, 16 }
  0xd0   : > { %17610 = vmatmul.mubr.bf16.gmra.mxu1 %v4604_v8  ;;  %v3324_v27 = vsel %vm18896_vm3, %v3317_v11, %v3322_v26  ;;  %v3346_v3 = vshll.u32 %v19357_v12, 16  ;;  %v4606_v1 = vcombine.low %v3291_v54, %v3299_v45  ;;  %v3332_v47 = vsel %vm18896_vm3, %v3325_v4, %v3330_v13 }
  0xd1   : > { %17613 = vmatprep.mubr.msk.bf16.mxu1 %vm18513_vm0, %v26578_v58  ;;  %v3340_v18 = vsel %vm18896_vm3, %v3333_v2, %v3338_v16  ;;  %v4607_v60 = vcombine.low %v3307_v61, %v3315_v33  ;;  %v16349_v59 = vcombine.low %v677_v25, %v678_v63  ;;  %v4608_v11 = vcombine.low %v3324_v27, %v3332_v47  ;;  %v18199_v16 = vld [vmem:[#allocation6 + $0x8] sm:$0xff]   ;;  %v18200_v25 = vld [vmem:[#allocation6 + $0xa0] sm:$0xff]  }
  0xd2   : > { %v3348_v8 = vsel %vm18896_vm3, %v3341_v28, %v3346_v3  ;;  %v19396_v26 = vrot.slane %v4606_v1, %v18800_v39  ;;  %v1671_v54 = vcombine.high %v19232_v52, %v1667_v19  ;;  %v19404_v4 = vcombine.high %v19357_v12, %v19357_v12  ;;  %7893 = vmatpush1.bf16.msra.mxu1 %v18199_v16 }
  0xd3   : > { %v4609_v45 = vcombine.low %v3340_v18, %v3348_v8  ;;  %v19400_v5 = vrot.slane %v4607_v60, %v18800_v39  ;;  %v1711_v33 = vrot.slane %v18158_v51, %v18800_v39  ;;  %v19408_v28 = vrot.slane %v4608_v11, %v18800_v39  ;;  %17688 = vmatpush3.bf16.msra.mxu0 %v18200_v25 }
  0xd4   : > { %26594 = vst [vmem:[#allocation46_spill] sm:$0xff] %v19404_v4  ;;  %v19411_v1 = vrot.slane %v1671_v54, %v18800_v39  ;;  %v1718_v52 = vrot.slane %v18156_v32, %v18800_v39  ;;  %v16397_v19 = vcombine.low %v678_v63, %v678_v63  ;;  %v1744_v60 = vrot.slane %v18159_v31, %v18800_v39 }
  0xd5   : > { %v19415_v27 = vrot.slane %v4609_v45, %v18800_v39  ;;  %v4638_v3 = vcombine.low %v19396_v26, %v19400_v5  ;;  %v1758_v61 = vrot.slane %v16349_v59, %v18800_v39  ;;  %7894 = vmatprep.subr.bf16.mxu1 %v26575_v30  ;;  %v3349_v11 = vshrl.u32 %v19357_v12, 16  ;;  %17689 = vmatprep.subr.bf16.mxu0 %v26578_v58  ;;  %v19477_v12 = vld [vmem:[%s18687_s8 + $0x34] sm:$0xf] }
  0xd6   : > { %26595 = vst [vmem:[#allocation47_spill] sm:$0xff] %v19411_v1  ;;  %v19423_v51 = vcombine.high %v19411_v1, %v19411_v1  ;;  %v1719_v13 = vcombine.low %v1711_v33, %v1718_v52  ;;  %v1720_v2 = vcombine.high %v1711_v33, %v1718_v52  ;;  %v19426_v32 = vrot.slane %v16397_v19, %v18800_v39 }
  0xd7   : > { %v4640_v63 = vcombine.low %v19408_v28, %v19415_v27  ;;  %v19431_v47 = vrot.slane %v4638_v3, %v18800_v39  ;;  %v1766_v31 = vcombine.low %v1744_v60, %v1758_v61  ;;  %v1767_v18 = vcombine.high %v1744_v60, %v1758_v61 }
  0xd8   : > { %26596 = vst [vmem:[#allocation48_spill] sm:$0xff] %v19423_v51  ;;  %v19435_v59 = vrot.slane %v1719_v13, %v18800_v39  ;;  %v19438_v8 = vrot.slane %v1720_v2, %v18800_v39  ;;  %v3354_v54 = vshll.u32 %v19411_v1, 16  ;;  %v3357_v25 = vshrl.u32 %v19411_v1, 16  ;;  %v18164_v1 = vld [vmem:[#allocation2 + $0x40] ss:$12 sps:$4 sm:$0xff]  }
  0xd9   : > { %v19444_v45 = vrot.slane %v4640_v63, %v18800_v39  ;;  %v19447_v33 = vrot.slane %v1766_v31, %v18800_v39  ;;  %v19450_v16 = vrot.slane %v1767_v18, %v18800_v39  ;;  %v3362_v19 = vshll.u32 %v19404_v4, 16  ;;  %v320_v31 = vld [vmem:[%s18687_s8 + $0x30] sm:$0xf] }
  0xda   : > { %26597 = vst [vmem:[#allocation49_spill] sm:$0xff] %v19435_v59  ;;  %26598 = vst [vmem:[#allocation50_spill] sm:$0xff] %v19438_v8  ;;  %v3356_v52 = vsel %vm18896_vm3, %v3349_v11, %v3354_v54  ;;  %v3365_v3 = vshrl.u32 %v19404_v4, 16  ;;  %v3370_v60 = vshll.u32 %v19423_v51, 16  ;;  %v3373_v63 = vshrl.u32 %v19423_v51, 16 }
  0xdb   : > { %26599 = vst [vmem:[#allocation51_spill] sm:$0xff] %v19447_v33  ;;  %26600 = vst [vmem:[#allocation52_spill] sm:$0xff] %v19450_v16  ;;  %v4671_v61 = vcombine.high %v19431_v47, %v19444_v45  ;;  %v19462_v13 = vcombine.high %v19447_v33, %v19447_v33  ;;  %v19466_v2 = vcombine.high %v19450_v16, %v19450_v16  ;;  %v3378_v54 = vshll.u32 %v19435_v59, 16 }
  0xdc   : > { %v3364_v18 = vsel %vm18896_vm3, %v3357_v25, %v3362_v19  ;;  %v3372_v11 = vsel %vm18896_vm3, %v3365_v3, %v3370_v60  ;;  %v3381_v4 = vshrl.u32 %v19435_v59, 16  ;;  %v3386_v53 = vshll.u32 %v19438_v8, 16  ;;  %v18162_v19 = vld [vmem:[#allocation2 + $0x5c] ss:$0 sps:$4 sm:$0x33]  }
  0xdd   : > { %26601 = vst [vmem:[#allocation53_spill] sm:$0xff] %v19462_v13  ;;  %26602 = vst [vmem:[#allocation54_spill] sm:$0xff] %v19466_v2  ;;  %17614 = vmatmul.mubr.bf16.gmra.mxu1 %v4671_v61  ;;  %v3390_v51 = vshrl.u32 %v19447_v33, 16  ;;  %v3395_v7 = vshll.u32 %v19450_v16, 16  ;;  %v3398_v25 = vshrl.u32 %v19450_v16, 16  ;;  %v3380_v3 = vsel %vm18896_vm3, %v3373_v63, %v3378_v54 }
  0xde   : > { %17617 = vmatprep.mubr.msk.bf16.mxu1 %vm18513_vm0, %v26578_v58  ;;  %v3403_v60 = vshll.u32 %v19462_v13, 16  ;;  %v3406_v61 = vshrl.u32 %v19462_v13, 16  ;;  %v3411_v8 = vshll.u32 %v19466_v2, 16  ;;  %v3388_v59 = vsel %vm18896_vm3, %v3381_v4, %v3386_v53 }
  0xdf   : > { %v3397_v16 = vsel %vm18896_vm3, %v3390_v51, %v3395_v7  ;;  %v4673_v33 = vcombine.low %v3356_v52, %v3364_v18  ;;  %v4674_v43 = vcombine.low %v3372_v11, %v3380_v3  ;;  %v405_v9 = vrot.slane %v320_v31, 7 }
  0xe0   : > { %v3405_v17 = vsel %vm18896_vm3, %v3398_v25, %v3403_v60  ;;  %v3413_v63 = vsel %vm18896_vm3, %v3406_v61, %v3411_v8  ;;  %v4675_v54 = vcombine.low %v3388_v59, %v3397_v16  ;;  %v26150_v53 = vrot.slane %v19477_v12, 7 }
  0xe1   : > { %v4676_v55 = vcombine.low %v3405_v17, %v3413_v63  ;;  %v19499_v13 = vrot.slane %v4673_v33, %v18800_v39  ;;  %v19502_v57 = vrot.slane %v4674_v43, %v18800_v39  ;;  %v406_v4 = vrot.slane %v405_v9, 4  ;;  %522 = vst [vmem:[#allocation2 + $0x60] sm:$0xe] %v405_v9 }
  0xe2   : > { %v19506_v7 = vrot.slane %v4675_v54, %v18800_v39  ;;  %v1751_v51 = vrot.slane %v18164_v1, %v18800_v39  ;;  %v1809_v8 = vrot.slane %v18165_v34, %v18800_v39  ;;  %v1816_v43 = vrot.slane %v18162_v19, %v18800_v39 }
  0xe3   : > { %v19511_v59 = vrot.slane %v4676_v55, %v18800_v39  ;;  %v4705_v17 = vcombine.low %v19499_v13, %v19502_v57  ;;  %v19517_v33 = vrot.slane %v18166_v14, %v18800_v39  ;;  %v408_v9 = vsel %vm18767_vm5, %v406_v4, %v26150_v53 }
  0xe4   : > { %v1768_v1 = vcombine.low %v1751_v51, %v19426_v32  ;;  %v1769_v34 = vcombine.high %v1751_v51, %v19426_v32  ;;  %v3414_v55 = vshrl.u32 %v19466_v2, 16  ;;  %523 = vst [vmem:[#allocation2 + $0x64] sm:$0xf] %v408_v9  ;;  %v1817_v14 = vcombine.low %v1809_v8, %v1816_v43  ;;  %v322_v9 = vld [vmem:[%s18687_s8 + $0x38] sm:$0xf] }
  0xe5   : > { %v4707_v16 = vcombine.low %v19506_v7, %v19511_v59  ;;  %v19529_v52 = vrot.slane %v4705_v17, %v18800_v39  ;;  %v1818_v31 = vcombine.high %v1809_v8, %v1816_v43  ;;  %v4572_v32 = vcombine.high %v19240_v0, %v19310_v29 }
  0xe6   : > { %v19532_v18 = vrot.slane %v1768_v1, %v18800_v39  ;;  %v19535_v11 = vrot.slane %v1769_v34, %v18800_v39  ;;  %v4574_v25 = vcombine.high %v19316_v62, %v19325_v56  ;;  %v19545_v3 = vrot.slane %v1817_v14, %v18800_v39 }
  0xe7   : > { %v19542_v19 = vrot.slane %v4707_v16, %v18800_v39  ;;  %v19548_v60 = vrot.slane %v1818_v31, %v18800_v39  ;;  %v4603_v61 = vcombine.low %v19334_v37, %v19354_v50  ;;  %v19579_v31 = vld [vmem:[%s18687_s8 + $0x3c] sm:$0xf] }
  0xe8   : > { %26603 = vst [vmem:[#allocation55_spill] sm:$0xff] %v19532_v18  ;;  %26604 = vst [vmem:[#allocation56_spill] sm:$0xff] %v19535_v11  ;;  %v19554_v63 = vcombine.high %v19532_v18, %v19532_v18  ;;  %v19558_v0 = vcombine.high %v19535_v11, %v19535_v11  ;;  %v3419_v29 = vshll.u32 %v19532_v18, 16  ;;  %v3422_v62 = vshrl.u32 %v19532_v18, 16  ;;  %v680_v54 = vld [vmem:[#allocation2 + $0x60] sm:$0xf] }
  0xe9   : > { %26605 = vst [vmem:[#allocation57_spill] sm:$0xff] %v19545_v3  ;;  %26606 = vst [vmem:[#allocation58_spill] sm:$0xff] %v19548_v60  ;;  %v4738_v56 = vcombine.high %v19529_v52, %v19542_v19  ;;  %v3427_v4 = vshll.u32 %v19535_v11, 16  ;;  %v3430_v37 = vshrl.u32 %v19535_v11, 16  ;;  %v3451_v50 = vshll.u32 %v19545_v3, 16 }
  0xea   : > { %26607 = vst [vmem:[#allocation59_spill] sm:$0xff] %v19554_v63  ;;  %26608 = vst [vmem:[#allocation60_spill] sm:$0xff] %v19558_v0  ;;  %v3421_v51 = vsel %vm18896_vm3, %v3414_v55, %v3419_v29  ;;  %v3435_v8 = vshll.u32 %v19554_v63, 16  ;;  %v3438_v17 = vshrl.u32 %v19554_v63, 16  ;;  %v3443_v43 = vshll.u32 %v19558_v0, 16 }
  0xeb   : > { %17618 = vmatmul.mubr.bf16.gmra.mxu1 %v4738_v56  ;;  %v3429_v1 = vsel %vm18896_vm3, %v3422_v62, %v3427_v4  ;;  %v3446_v34 = vshrl.u32 %v19558_v0, 16  ;;  %v3454_v16 = vshrl.u32 %v19545_v3, 16  ;;  %v3459_v14 = vshll.u32 %v19548_v60, 16  ;;  %v18172_v55 = vld [vmem:[#allocation2 + $0x4c] ss:$12 sps:$4 sm:$0xff]  }
  0xec   : > { %17621 = vmatprep.mubr.msk.bf16.mxu1 %vm18513_vm0, %v26578_v58  ;;  %v681_v29 = vld [vmem:[#allocation2 + $0x64] sm:$0xf]  ;;  %v3437_v53 = vsel %vm18896_vm3, %v3430_v37, %v3435_v8  ;;  %v3445_v56 = vsel %vm18896_vm3, %v3438_v17, %v3443_v43  ;;  %v4740_v62 = vcombine.low %v3421_v51, %v3429_v1  ;;  %v4588_v4 = vrot.slane %v4572_v32, %v18800_v39  ;;  %v18173_v0 = vld [vmem:[#allocation2 + $0x50] ss:$12 sps:$4 sm:$0x33]  }
  0xed   : > { %v18174_v3 = vld [vmem:[#allocation2 + $0x54] ss:$12 sps:$4 sm:$0xff]   ;;  %v16351_v11 = vcombine.low %v680_v54, %v681_v29  ;;  %v16401_v60 = vcombine.low %v681_v29, %v681_v29  ;;  %v3453_v63 = vsel %vm18896_vm3, %v3446_v34, %v3451_v50  ;;  %v3461_v2 = vsel %vm18896_vm3, %v3454_v16, %v3459_v14 }
  0xee   : > { %v4741_v18 = vcombine.low %v3437_v53, %v3445_v56  ;;  %v4742_v41 = vcombine.low %v3453_v63, %v3461_v2  ;;  %v19593_v37 = vrot.slane %v4740_v62, %v18800_v39  ;;  %v4602_v8 = vrot.slane %v4574_v25, %v18800_v39 }
  0xef   : > { %v1856_v51 = vrot.slane %v16351_v11, %v18800_v39  ;;  %v1863_v32 = vrot.slane %v16401_v60, %v18800_v39  ;;  %v26609_v54 = vrot.slane %v19477_v12, 7  ;;  %v410_v43 = vrot.slane %v322_v9, 7 }
  0xf0   : > { %v19601_v50 = vrot.slane %v4741_v18, %v18800_v39  ;;  %v19604_v1 = vrot.slane %v4742_v41, %v18800_v39  ;;  %v4605_v2 = vcombine.low %v4588_v4, %v4602_v8  ;;  %v26163_v53 = vrot.slane %v19579_v31, 7  ;;  %v18213_v8 = vld [vmem:[#allocation6] sm:$0xff]  }
  0xf1   : > { %v409_v17 = vrot.slane %v26609_v54, 4  ;;  %v1864_v63 = vcombine.low %v19517_v33, %v1856_v51  ;;  %v1865_v25 = vcombine.high %v19517_v33, %v1856_v51  ;;  %v411_v11 = vrot.slane %v410_v43, 4  ;;  %525 = vst [vmem:[#allocation2 + $0x6c] sm:$0xe] %v410_v43  ;;  %7895 = vmatpush1.bf16.msra.mxu1 %v18213_v8 }
  0xf2   : > { %v1849_v12 = vrot.slane %v18172_v55, %v18800_v39  ;;  %v4772_v60 = vcombine.low %v19593_v37, %v19601_v50  ;;  %5965 = vmatprep.mubr.bf16.mxu0 %v4605_v2  ;;  %v1907_v18 = vrot.slane %v18173_v0, %v18800_v39  ;;  %v19614_v41 = vrot.slane %v18174_v3, %v18800_v39 }
  0xf3   : > { %524 = vst [vmem:[#allocation2 + $0x68] sm:$0x1] %v409_v17  ;;  %v4639_v9 = vcombine.high %v19396_v26, %v19400_v5  ;;  %v19619_v34 = vrot.slane %v1864_v63, %v18800_v39  ;;  %v19622_v33 = vrot.slane %v1865_v25, %v18800_v39  ;;  %5966 = vmatmul.mubr.bf16.gmra.mxu0 %v4603_v61 }
  0xf4   : > { %v413_v16 = vsel %vm18767_vm5, %v411_v11, %v26163_v53  ;;  %v1866_v14 = vcombine.low %v1849_v12, %v1863_v32  ;;  %v19629_v0 = vrot.slane %v4772_v60, %v18800_v39  ;;  %v1867_v3 = vcombine.high %v1849_v12, %v1863_v32  ;;  %7896 = vmatprep.subr.bf16.mxu1 %v26575_v30 }
  0xf5   : > { %26610 = vst [vmem:[#allocation61_spill] sm:$0xff] %v19622_v33  ;;  %526 = vst [vmem:[#allocation2 + $0x70] sm:$0xf] %v413_v16  ;;  %v4641_v5 = vcombine.high %v19408_v28, %v19415_v27  ;;  %v19634_v26 = vrot.slane %v4639_v9, %v18800_v39  ;;  %v19638_v61 = vcombine.high %v19619_v34, %v19619_v34  ;;  %v3463_v55 = vshrl.u32 %v19619_v34, 16 }
  0xf6   : > { %v3468_v29 = vshll.u32 %v19622_v33, 16  ;;  %v3471_v56 = vshrl.u32 %v19622_v33, 16  ;;  %v19644_v62 = vrot.slane %v1866_v14, %v18800_v39  ;;  %v19647_v4 = vrot.slane %v1867_v3, %v18800_v39 }
  0xf7   : > { %26611 = vst [vmem:[#allocation62_spill] sm:$0xff] %v19638_v61  ;;  %v19651_v28 = vcombine.high %v19622_v33, %v19622_v33  ;;  %v19654_v27 = vrot.slane %v4641_v5, %v18800_v39  ;;  %v3476_v32 = vshll.u32 %v19638_v61, 16  ;;  %v3479_v54 = vshrl.u32 %v19638_v61, 16 }
  0xf8   : > { %26612 = vst [vmem:[#allocation63_spill] sm:$0xff] %v19644_v62  ;;  %26613 = vst [vmem:[#allocation64_spill] sm:$0xff] %v19647_v4  ;;  %v3470_v51 = vsel %vm18896_vm3, %v3463_v55, %v3468_v29  ;;  %v683_v43 = vld [vmem:[#allocation2 + $0x6c] sm:$0xf]  ;;  %v19664_v2 = vcombine.high %v19644_v62, %v19644_v62  ;;  %v19668_v63 = vcombine.high %v19647_v4, %v19647_v4  ;;  %v3492_v9 = vshll.u32 %v19644_v62, 16 }
  0xf9   : > { %26614 = vst [vmem:[#allocation65_spill] sm:$0xff] %v19651_v28  ;;  %v3484_v25 = vshll.u32 %v19651_v28, 16  ;;  %v3487_v11 = vshrl.u32 %v19651_v28, 16  ;;  %v3478_v12 = vsel %vm18896_vm3, %v3471_v56, %v3476_v32  ;;  %v3495_v16 = vshrl.u32 %v19644_v62, 16 }
  0xfa   : > { %26615 = vst [vmem:[#allocation66_spill] sm:$0xff] %v19664_v2  ;;  %26616 = vst [vmem:[#allocation67_spill] sm:$0xff] %v19668_v63  ;;  %v18170_v60 = vld [vmem:[#allocation2 + $0x68] ss:$0 sps:$4 sm:$0x33]   ;;  %v3500_v14 = vshll.u32 %v19647_v4, 16  ;;  %v4743_v3 = vcombine.low %v3470_v51, %v3478_v12 }
  0xfb   : > { %v3486_v5 = vsel %vm18896_vm3, %v3479_v54, %v3484_v25  ;;  %v3503_v55 = vshrl.u32 %v19647_v4, 16  ;;  %v3508_v29 = vshll.u32 %v19664_v2, 16  ;;  %v1914_v56 = vrot.slane %v18170_v60, %v18800_v39 }
  0xfc   : > { %v684_v8 = vld [vmem:[#allocation2 + $0x70] sm:$0xf]  ;;  %v3494_v32 = vsel %vm18896_vm3, %v3487_v11, %v3492_v9  ;;  %v3502_v17 = vsel %vm18896_vm3, %v3495_v16, %v3500_v14  ;;  %v3511_v53 = vshrl.u32 %v19664_v2, 16  ;;  %v19689_v51 = vrot.slane %v4743_v3, %v18800_v39  ;;  %v18178_v3 = vld [vmem:[#allocation2 + $0x58] ss:$12 sps:$4 sm:$0xff]  }
  0xfd   : > { %v16353_v12 = vcombine.low %v683_v43, %v684_v8  ;;  %v16405_v54 = vcombine.low %v684_v8, %v684_v8  ;;  %v3510_v25 = vsel %vm18896_vm3, %v3503_v55, %v3508_v29  ;;  %v1915_v28 = vcombine.low %v1907_v18, %v1914_v56 }
  0xfe   : > { %v1916_v61 = vcombine.high %v1907_v18, %v1914_v56  ;;  %v3516_v60 = vshll.u32 %v19668_v63, 16  ;;  %v3519_v62 = vshrl.u32 %v19668_v63, 16  ;;  %v4774_v11 = vcombine.low %v19604_v1, %v19689_v51 }
  0xff   : > { %v1954_v9 = vrot.slane %v16353_v12, %v18800_v39  ;;  %v1961_v16 = vrot.slane %v16405_v54, %v18800_v39  ;;  %v4807_v14 = vcombine.low %v3486_v5, %v3494_v32  ;;  %v19700_v43 = vrot.slane %v1915_v28, %v18800_v39 }
 0x100   : > { %v19703_v55 = vrot.slane %v1916_v61, %v18800_v39  ;;  %v3518_v18 = vsel %vm18896_vm3, %v3511_v53, %v3516_v60  ;;  %v4808_v29 = vcombine.low %v3502_v17, %v3510_v25  ;;  %v19708_v8 = vrot.slane %v4774_v11, %v18800_v39 }
 0x101   : > { %26617 = vst [vmem:[#allocation68_spill] sm:$0xff] %v19700_v43  ;;  %v1962_v56 = vcombine.low %v19614_v41, %v1954_v9  ;;  %v1963_v12 = vcombine.high %v19614_v41, %v1954_v9  ;;  %v19713_v5 = vrot.slane %v4807_v14, %v18800_v39  ;;  %v3524_v28 = vshll.u32 %v19700_v43, 16 }
 0x102   : > { %26618 = vst [vmem:[#allocation69_spill] sm:$0xff] %v19703_v55  ;;  %v3527_v32 = vshrl.u32 %v19700_v43, 16  ;;  %v3532_v61 = vshll.u32 %v19703_v55, 16  ;;  %v19719_v54 = vrot.slane %v4808_v29, %v18800_v39  ;;  %v4805_v53 = vcombine.high %v19629_v0, %v19708_v8 }
 0x103   : > { %v19724_v17 = vrot.slane %v1962_v56, %v18800_v39  ;;  %v19727_v41 = vrot.slane %v1963_v12, %v18800_v39  ;;  %v4672_v25 = vcombine.low %v19634_v26, %v19654_v27  ;;  %v3526_v60 = vsel %vm18896_vm3, %v3519_v62, %v3524_v28  ;;  %v18179_v56 = vld [vmem:[#allocation2 + $0x5c] ss:$12 sps:$4 sm:$0x33]  }
 0x104   : > { %v3534_v11 = vsel %vm18896_vm3, %v3527_v32, %v3532_v61  ;;  %v4839_v9 = vcombine.low %v19713_v5, %v19719_v54  ;;  %v26621_v14 = vrot.slane %v19579_v31, 7  ;;  %17622 = vmatmul.mubr.bf16.gmra.mxu1 %v4805_v53  ;;  %v4809_v63 = vcombine.low %v3518_v18, %v3526_v60 }
 0x105   : > { %26619 = vst [vmem:[#allocation70_spill] sm:$0xff] %v19724_v17  ;;  %26620 = vst [vmem:[#allocation71_spill] sm:$0xff] %v19727_v41  ;;  %v3536_v12 = vshrl.u32 %v19724_v17, 16  ;;  %v3541_v55 = vshll.u32 %v19727_v41, 16  ;;  %5973 = vmatprep.mubr.bf16.mxu0 %v4672_v25  ;;  %v1947_v26 = vrot.slane %v18178_v3, %v18800_v39  ;;  %17625 = vmatprep.mubr.msk.bf16.mxu1 %vm18513_vm0, %v26578_v58  ;;  %v3544_v3 = vshrl.u32 %v19727_v41, 16 }
 0x106   : > { %v414_v29 = vrot.slane %v26621_v14, 4  ;;  %v19745_v62 = vrot.slane %v4839_v9, %v18800_v39  ;;  %v26622_v31 = vcombine.low %v19431_v47, %v19444_v45  ;;  %v19752_v27 = vcombine.high %v19724_v17, %v19724_v17 }
 0x107   : > { %v19756_v18 = vcombine.high %v19727_v41, %v19727_v41  ;;  %v3543_v28 = vsel %vm18896_vm3, %v3536_v12, %v3541_v55  ;;  %v19762_v32 = vrot.slane %v4809_v63, %v18800_v39  ;;  %v1964_v61 = vcombine.low %v1947_v26, %v1961_v16  ;;  %v18182_v41 = vld [vmem:[#allocation2 + $0x60] ss:$12 sps:$4 sm:$0xff]  }
 0x108   : > { %5974 = vmatmul.mubr.bf16.gmra.mxu0 %v26622_v31  ;;  %527 = vst [vmem:[#allocation2 + $0x74] sm:$0x1] %v414_v29  ;;  %26623 = vst [vmem:[#allocation72_spill] sm:$0xff] %v19752_v27  ;;  %v1965_v47 = vcombine.high %v1947_v26, %v1961_v16  ;;  %v4810_v45 = vcombine.low %v3534_v11, %v3543_v28  ;;  %v2005_v53 = vrot.slane %v18179_v56, %v18800_v39 }
 0x109   : > { %26624 = vst [vmem:[#allocation73_spill] sm:$0xff] %v19756_v18  ;;  %v3549_v25 = vshll.u32 %v19752_v27, 16  ;;  %v3552_v60 = vshrl.u32 %v19752_v27, 16  ;;  %v19768_v9 = vrot.slane %v1964_v61, %v18800_v39  ;;  %v3557_v55 = vshll.u32 %v19756_v18, 16  ;;  %v18219_v27 = vld [vmem:[#allocation6 + $0x78] sm:$0xff]  }
 0x10a   : > { %v19771_v14 = vrot.slane %v1965_v47, %v18800_v39  ;;  %v3560_v63 = vshrl.u32 %v19756_v18, 16  ;;  %v19776_v29 = vrot.slane %v4810_v45, %v18800_v39  ;;  %v4706_v11 = vcombine.high %v19499_v13, %v19502_v57  ;;  %7897 = vmatpush2.bf16.msra.mxu1 %v18219_v27 }
 0x10b   : > { %26625 = vst [vmem:[#allocation74_spill] sm:$0xff] %v19768_v9  ;;  %v3551_v16 = vsel %vm18896_vm3, %v3544_v3, %v3549_v25  ;;  %v4708_v56 = vcombine.high %v19506_v7, %v19511_v59  ;;  %v19786_v12 = vcombine.high %v19768_v9, %v19768_v9  ;;  %v3559_v31 = vsel %vm18896_vm3, %v3552_v60, %v3557_v55  ;;  %v324_v60 = vld [vmem:[%s18687_s8 + $0x40] sm:$0xf]  ;;  %v325_v55 = vld [vmem:[%s18687_s8 + $0x44] sm:$0xf] }
 0x10c   : > { %26626 = vst [vmem:[#allocation75_spill] sm:$0xff] %v19771_v14  ;;  %v19790_v26 = vcombine.high %v19771_v14, %v19771_v14  ;;  %v3565_v3 = vshll.u32 %v19768_v9, 16  ;;  %v4841_v57 = vcombine.low %v19762_v32, %v19776_v29  ;;  %v3568_v13 = vshrl.u32 %v19768_v9, 16  ;;  %7898 = vmatprep.subr.bf16.mxu1 %v26575_v30 }
 0x10d   : > { %26627 = vst [vmem:[#allocation76_spill] sm:$0xff] %v19786_v12  ;;  %v3573_v7 = vshll.u32 %v19771_v14, 16  ;;  %v3576_v59 = vshrl.u32 %v19771_v14, 16  ;;  %v3581_v47 = vshll.u32 %v19786_v12, 16  ;;  %v4874_v45 = vcombine.low %v3551_v16, %v3559_v31 }
 0x10e   : > { %26628 = vst [vmem:[#allocation77_spill] sm:$0xff] %v19790_v26  ;;  %v3567_v61 = vsel %vm18896_vm3, %v3560_v63, %v3565_v3  ;;  %v4722_v25 = vrot.slane %v4706_v11, %v18800_v39  ;;  %v19807_v2 = vrot.slane %v4841_v57, %v18800_v39  ;;  %v3584_v9 = vshrl.u32 %v19786_v12, 16  ;;  %v18183_v3 = vld [vmem:[#allocation2 + $0x64] ss:$12 sps:$4 sm:$0xff]   ;;  %v18220_v57 = vld [vmem:[#allocation6 + $0x98] sm:$0xff]  }
 0x10f   : > { %v18177_v28 = vld [vmem:[#allocation2 + $0x74] ss:$0 sps:$4 sm:$0x33]   ;;  %v3575_v18 = vsel %vm18896_vm3, %v3568_v13, %v3573_v7  ;;  %v3589_v14 = vshll.u32 %v19790_v26, 16  ;;  %v3583_v16 = vsel %vm18896_vm3, %v3576_v59, %v3581_v47  ;;  %v3592_v11 = vshrl.u32 %v19790_v26, 16  ;;  %17690 = vmatpush3.bf16.msra.mxu0 %v18220_v57 }
 0x110   : > { %v2012_v63 = vrot.slane %v18177_v28, %v18800_v39  ;;  %v4875_v31 = vcombine.low %v3567_v61, %v3575_v18  ;;  %v4872_v13 = vcombine.high %v19745_v62, %v19807_v2  ;;  %v19822_v12 = vrot.slane %v4874_v45, %v18800_v39  ;;  %v18185_v61 = vld [vmem:[#allocation2 + $0x68] ss:$12 sps:$4 sm:$0x33]   ;;  %v326_v45 = vld [vmem:[%s18687_s8 + $0x48] sm:$0xf]  ;;  %17691 = vmatprep.subr.bf16.mxu0 %v26578_v58 }
 0x111   : > { %v3591_v7 = vsel %vm18896_vm3, %v3584_v9, %v3589_v14  ;;  %v4736_v28 = vrot.slane %v4708_v56, %v18800_v39  ;;  %v4737_v17 = vcombine.low %v19529_v52, %v19542_v19  ;;  %v415_v9 = vrot.slane %v324_v60, 7 }
 0x112   : > { %v2013_v43 = vcombine.low %v2005_v53, %v2012_v63  ;;  %v2014_v59 = vcombine.high %v2005_v53, %v2012_v63  ;;  %v4876_v47 = vcombine.low %v3583_v16, %v3591_v7  ;;  %v19826_v18 = vrot.slane %v4875_v31, %v18800_v39  ;;  %17626 = vmatmul.mubr.bf16.gmra.mxu1 %v4872_v13 }
 0x113   : > { %v4739_v26 = vcombine.low %v4722_v25, %v4736_v28  ;;  %v417_v14 = vrot.slane %v325_v55, 7  ;;  %17629 = vmatprep.mubr.msk.bf16.mxu1 %vm18513_vm0, %v26578_v58  ;;  %v327_v25 = vld [vmem:[%s18687_s8 + $0x4c] sm:$0xf]  ;;  %v416_v19 = vrot.slane %v415_v9, 4  ;;  %528 = vst [vmem:[#allocation2 + $0x78] sm:$0xe] %v415_v9  ;;  %v19846_v55 = vrot.slane %v18182_v41, %v18800_v39 }
 0x114   : > { %v19834_v53 = vrot.slane %v2013_v43, %v18800_v39  ;;  %v19837_v56 = vrot.slane %v2014_v59, %v18800_v39  ;;  %v4906_v27 = vcombine.low %v19822_v12, %v19826_v18  ;;  %v19843_v52 = vrot.slane %v4876_v47, %v18800_v39  ;;  %v329_v47 = vld [vmem:[%s18687_s8 + $0x54] sm:$0xf] }
 0x115   : > { %5981 = vmatprep.mubr.bf16.mxu0 %v4739_v26  ;;  %v419_v60 = vrot.slane %v417_v14, 4  ;;  %v19853_v31 = vrot.slane %v18183_v3, %v18800_v39  ;;  %v328_v26 = vld [vmem:[%s18687_s8 + $0x50] sm:$0xf]  ;;  %v418_v57 = vsel %vm18767_vm5, %v416_v19, %v417_v14  ;;  %v4773_v13 = vcombine.high %v19593_v37, %v19601_v50 }
 0x116   : > { %26629 = vst [vmem:[#allocation78_spill] sm:$0xff] %v19834_v53  ;;  %26630 = vst [vmem:[#allocation79_spill] sm:$0xff] %v19837_v56  ;;  %v3597_v43 = vshll.u32 %v19834_v53, 16  ;;  %v3600_v63 = vshrl.u32 %v19834_v53, 16  ;;  %v3605_v16 = vshll.u32 %v19837_v56, 16  ;;  %5982 = vmatmul.mubr.bf16.gmra.mxu0 %v4737_v17  ;;  %v19858_v41 = vrot.slane %v4906_v27, %v18800_v39 }
 0x117   : > { %530 = vst [vmem:[#allocation2 + $0x80] sm:$0x1] %v419_v60  ;;  %v4775_v17 = vcombine.high %v19604_v1, %v19689_v51  ;;  %529 = vst [vmem:[#allocation2 + $0x7c] sm:$0xf] %v418_v57  ;;  %v19871_v28 = vrot.slane %v18185_v61, %v18800_v39  ;;  %v420_v59 = vrot.slane %v326_v45, 7  ;;  %v4789_v14 = vrot.slane %v4773_v13, %v18800_v39 }
 0x118   : > { %v3599_v3 = vsel %vm18896_vm3, %v3592_v11, %v3597_v43  ;;  %v3607_v7 = vsel %vm18896_vm3, %v3600_v63, %v3605_v16  ;;  %v422_v50 = vrot.slane %v327_v25, 7  ;;  %v330_v27 = vld [vmem:[%s18687_s8 + $0x58] sm:$0xf]  ;;  %v4804_v1 = vcombine.low %v19629_v0, %v19708_v8 }
 0x119   : > { %v4877_v9 = vcombine.low %v3599_v3, %v3607_v7  ;;  %v4803_v37 = vrot.slane %v4775_v17, %v18800_v39  ;;  %v421_v51 = vrot.slane %v420_v59, 4  ;;  %531 = vst [vmem:[#allocation2 + $0x84] sm:$0xe] %v420_v59  ;;  %v4840_v11 = vcombine.high %v19713_v5, %v19719_v54  ;;  %v19899_v7 = vld [vmem:[%s18687_s8 + $0x60] sm:$0xf] }
 0x11a   : > { %v4842_v61 = vcombine.high %v19762_v32, %v19776_v29  ;;  %v424_v60 = vrot.slane %v422_v50, 4  ;;  %v425_v43 = vrot.slane %v328_v26, 7  ;;  %v686_v63 = vld [vmem:[#allocation2 + $0x78] sm:$0xf]  ;;  %v4907_v5 = vcombine.high %v19822_v12, %v19826_v18  ;;  %v19896_v12 = vld [vmem:[%s18687_s8 + $0x5c] sm:$0xf] }
 0x11b   : > { %v4905_v45 = vrot.slane %v4877_v9, %v18800_v39  ;;  %v4806_v19 = vcombine.low %v4789_v14, %v4803_v37  ;;  %v423_v25 = vsel %vm18767_vm5, %v421_v51, %v422_v50  ;;  %v18189_v16 = vld [vmem:[#allocation2 + $0x6c] ss:$12 sps:$4 sm:$0xff]   ;;  %v4856_v0 = vrot.slane %v4840_v11, %v18800_v39 }
 0x11c   : > { %v4870_v8 = vrot.slane %v4842_v61, %v18800_v39  ;;  %532 = vst [vmem:[#allocation2 + $0x88] sm:$0xf] %v423_v25  ;;  %v426_v32 = vrot.slane %v425_v43, 4  ;;  %v427_v29 = vrot.slane %v329_v47, 7  ;;  %533 = vst [vmem:[#allocation2 + $0x8c] sm:$0x1] %v424_v60  ;;  %v4871_v17 = vcombine.low %v19745_v62, %v19807_v2 }
 0x11d   : > { %v4908_v54 = vcombine.low %v19843_v52, %v4905_v45  ;;  %5989 = vmatprep.mubr.bf16.mxu0 %v4806_v19  ;;  %534 = vst [vmem:[#allocation2 + $0x90] sm:$0xe] %v425_v43  ;;  %v4909_v26 = vcombine.high %v19843_v52, %v4905_v45  ;;  %v4923_v3 = vrot.slane %v4907_v5, %v18800_v39  ;;  %v430_v18 = vrot.slane %v330_v27, 7 }
 0x11e   : > { %v18181_v57 = vld [vmem:[#allocation2 + $0x80] ss:$0 sps:$4 sm:$0x33]   ;;  %5990 = vmatmul.mubr.bf16.gmra.mxu0 %v4804_v1  ;;  %v4873_v13 = vcombine.low %v4856_v0, %v4870_v8  ;;  %v687_v47 = vld [vmem:[#allocation2 + $0x7c] sm:$0xf]  ;;  %v19905_v52 = vrot.slane %v18189_v16, %v18800_v39  ;;  %v428_v14 = vsel %vm18767_vm5, %v426_v32, %v427_v29  ;;  %v429_v27 = vrot.slane %v427_v29, 4 }
 0x11f   : > { %v19902_v59 = vrot.slane %v4908_v54, %v18800_v39  ;;  %v18190_v9 = vld [vmem:[#allocation2 + $0x70] ss:$12 sps:$4 sm:$0xff]   ;;  %v4937_v2 = vrot.slane %v4909_v26, %v18800_v39  ;;  %v16355_v62 = vcombine.low %v686_v63, %v687_v47  ;;  %v16409_v37 = vcombine.low %v687_v47, %v687_v47  ;;  %535 = vst [vmem:[#allocation2 + $0x94] sm:$0xf] %v428_v14  ;;  %v18227_v1 = vld [vmem:[#allocation6 + $0x70] sm:$0xff]  }
 0x120   : > { %v2110_v50 = vrot.slane %v18181_v57, %v18800_v39  ;;  %5997 = vmatprep.mubr.bf16.mxu0 %v4873_v13  ;;  %537 = vst [vmem:[#allocation2 + $0x9c] sm:$0xe] %v430_v18  ;;  %v19914_v11 = vrot.slane %v18190_v9, %v18800_v39  ;;  %v18196_v61 = vld [vmem:[#allocation2 + $0x78] ss:$12 sps:$4 sm:$0xff]   ;;  %536 = vst [vmem:[#allocation2 + $0x98] sm:$0x1] %v429_v27  ;;  %7899 = vmatpush2.bf16.msra.mxu1 %v18227_v1 }
 0x121   : > { %v4939_v51 = vcombine.high %v19858_v41, %v19902_v59  ;;  %v4940_v45 = vcombine.low %v4923_v3, %v4937_v2  ;;  %v2052_v60 = vrot.slane %v16355_v62, %v18800_v39  ;;  %v2059_v43 = vrot.slane %v16409_v37, %v18800_v39  ;;  %v689_v25 = vld [vmem:[#allocation2 + $0x84] sm:$0xf]  ;;  %7900 = vmatprep.subr.bf16.mxu1 %v26575_v30 }
 0x122   : > { %v2111_v63 = vcombine.low %v19871_v28, %v2110_v50  ;;  %v2112_v16 = vcombine.high %v19871_v28, %v2110_v50  ;;  %v19923_v0 = vrot.slane %v18196_v61, %v18800_v39  ;;  %v19925_v8 = vrot.slane %v430_v18, 4 }
 0x123   : > { %17630 = vmatmul.mubr.bf16.gmra.mxu1 %v4939_v51  ;;  %v26185_v54 = vrot.slane %v19899_v7, 7  ;;  %v2060_v32 = vcombine.low %v19846_v55, %v2052_v60  ;;  %v2061_v28 = vcombine.high %v19846_v55, %v2052_v60  ;;  %v2062_v29 = vcombine.low %v19853_v31, %v2059_v43  ;;  %v690_v57 = vld [vmem:[#allocation2 + $0x88] sm:$0xf] }
 0x124   : > { %17633 = vmatprep.mubr.msk.bf16.mxu1 %vm18513_vm0, %v26578_v58  ;;  %v2063_v26 = vcombine.high %v19853_v31, %v2059_v43  ;;  %v19937_v13 = vrot.slane %v2111_v63, %v18800_v39  ;;  %v16357_v3 = vcombine.low %v689_v25, %v690_v57  ;;  %v19940_v18 = vrot.slane %v2112_v16, %v18800_v39  ;;  %v18197_v56 = vld [vmem:[#allocation2 + $0x7c] ss:$12 sps:$4 sm:$0xff]  }
 0x125   : > { %v16413_v47 = vcombine.low %v690_v57, %v690_v57  ;;  %540 = vst [vmem:[#allocation2 + $0xa8] sm:$0xe] %v26185_v54  ;;  %v19945_v9 = vrot.slane %v2060_v32, %v18800_v39  ;;  %v19948_v55 = vrot.slane %v2062_v29, %v18800_v39  ;;  %v19951_v31 = vrot.slane %v2061_v28, %v18800_v39 }
 0x126   : > { %26631 = vst [vmem:[#allocation80_spill] sm:$0xff] %v19937_v13  ;;  %26632 = vst [vmem:[#allocation81_spill] sm:$0xff] %v19940_v18  ;;  %v19954_v14 = vrot.slane %v2063_v26, %v18800_v39  ;;  %5998 = vmatmul.mubr.bf16.gmra.mxu0 %v4871_v17  ;;  %v3670_v2 = vshll.u32 %v19937_v13, 16  ;;  %v2150_v62 = vrot.slane %v16357_v3, %v18800_v39  ;;  %v3673_v50 = vshrl.u32 %v19937_v13, 16 }
 0x127   : > { %26633 = vst [vmem:[#allocation82_spill] sm:$0xff] %v19945_v9  ;;  %26634 = vst [vmem:[#allocation83_spill] sm:$0xff] %v19948_v55  ;;  %v2157_v37 = vrot.slane %v16413_v47, %v18800_v39  ;;  %6005 = vmatprep.mubr.bf16.mxu0 %v4940_v45  ;;  %v19962_v27 = vcombine.high %v19945_v9, %v19945_v9  ;;  %v19966_v1 = vcombine.high %v19948_v55, %v19948_v55 }
 0x128   : > { %26635 = vst [vmem:[#allocation84_spill] sm:$0xff] %v19951_v31  ;;  %26636 = vst [vmem:[#allocation85_spill] sm:$0xff] %v19954_v14  ;;  %v19970_v17 = vcombine.high %v19951_v31, %v19951_v31  ;;  %v19974_v51 = vcombine.high %v19954_v14, %v19954_v14  ;;  %v3609_v61 = vshrl.u32 %v19945_v9, 16  ;;  %v3614_v45 = vshll.u32 %v19951_v31, 16 }
 0x129   : > { %26637 = vst [vmem:[#allocation86_spill] sm:$0xff] %v19962_v27  ;;  %26638 = vst [vmem:[#allocation87_spill] sm:$0xff] %v19966_v1  ;;  %v3617_v60 = vshrl.u32 %v19951_v31, 16  ;;  %v3638_v43 = vshll.u32 %v19948_v55, 16  ;;  %v3622_v63 = vshll.u32 %v19962_v27, 16  ;;  %v3625_v25 = vshrl.u32 %v19962_v27, 16 }
 0x12a   : > { %26639 = vst [vmem:[#allocation88_spill] sm:$0xff] %v19970_v17  ;;  %26640 = vst [vmem:[#allocation89_spill] sm:$0xff] %v19974_v51  ;;  %v3630_v16 = vshll.u32 %v19970_v17, 16  ;;  %v3633_v32 = vshrl.u32 %v19970_v17, 16  ;;  %v3616_v28 = vsel %vm18896_vm3, %v3609_v61, %v3614_v45  ;;  %v3641_v29 = vshrl.u32 %v19948_v55, 16 }
 0x12b   : > { %v3646_v26 = vshll.u32 %v19954_v14, 16  ;;  %v3649_v57 = vshrl.u32 %v19954_v14, 16  ;;  %v3624_v3 = vsel %vm18896_vm3, %v3617_v60, %v3622_v63  ;;  %v3654_v5 = vshll.u32 %v19966_v1, 16 }
 0x12c   : > { %v3632_v47 = vsel %vm18896_vm3, %v3625_v25, %v3630_v16  ;;  %v3640_v54 = vsel %vm18896_vm3, %v3633_v32, %v3638_v43  ;;  %v3657_v45 = vshrl.u32 %v19966_v1, 16  ;;  %v3662_v19 = vshll.u32 %v19974_v51, 16 }
 0x12d   : > { %v3648_v61 = vsel %vm18896_vm3, %v3641_v29, %v3646_v26  ;;  %v3665_v17 = vshrl.u32 %v19974_v51, 16  ;;  %v3656_v60 = vsel %vm18896_vm3, %v3649_v57, %v3654_v5  ;;  %v4941_v63 = vcombine.low %v3616_v28, %v3624_v3  ;;  %v18234_v57 = vld [vmem:[#allocation6 + $0x68] sm:$0xff]   ;;  %v18235_v3 = vld [vmem:[#allocation6 + $0x90] sm:$0xff]  }
 0x12e   : > { %v4942_v27 = vcombine.low %v3632_v47, %v3640_v54  ;;  %v2158_v25 = vcombine.low %v19905_v52, %v2150_v62  ;;  %v26641_v43 = vcombine.low %v19858_v41, %v19902_v59  ;;  %v3664_v16 = vsel %vm18896_vm3, %v3657_v45, %v3662_v19  ;;  %7901 = vmatpush2.bf16.msra.mxu1 %v18234_v57  ;;  %v18193_v57 = vld [vmem:[#allocation2 + $0x8c] ss:$0 sps:$4 sm:$0x33]  }
 0x12f   : > { %v3672_v32 = vsel %vm18896_vm3, %v3665_v17, %v3670_v2  ;;  %v4943_v29 = vcombine.low %v3648_v61, %v3656_v60  ;;  %v2159_v26 = vcombine.high %v19905_v52, %v2150_v62  ;;  %v20013_v5 = vrot.slane %v4941_v63, %v18800_v39  ;;  %17692 = vmatpush3.bf16.msra.mxu0 %v18235_v3 }
 0x130   : > { %6006 = vmatmul.mubr.bf16.gmra.mxu0 %v26641_v43  ;;  %v4944_v51 = vcombine.low %v3664_v16, %v3672_v32  ;;  %v20016_v54 = vrot.slane %v4942_v27, %v18800_v39  ;;  %v2160_v28 = vcombine.low %v19914_v11, %v2157_v37  ;;  %v2161_v59 = vcombine.high %v19914_v11, %v2157_v37 }
 0x131   : > { %v20020_v41 = vrot.slane %v4943_v29, %v18800_v39  ;;  %v20024_v19 = vrot.slane %v2158_v25, %v18800_v39  ;;  %v20027_v2 = vrot.slane %v2159_v26, %v18800_v39  ;;  %v3678_v17 = vshll.u32 %v19940_v18, 16  ;;  %v692_v29 = vld [vmem:[#allocation2 + $0x90] sm:$0xf]  ;;  %v693_v26 = vld [vmem:[#allocation2 + $0x94] sm:$0xf]  ;;  %7902 = vmatprep.subr.bf16.mxu1 %v26575_v30  ;;  %17693 = vmatprep.subr.bf16.mxu0 %v26578_v58 }
 0x132   : > { %v20030_v52 = vrot.slane %v4944_v51, %v18800_v39  ;;  %v4973_v62 = vcombine.low %v20013_v5, %v20016_v54  ;;  %v20035_v27 = vrot.slane %v2160_v28, %v18800_v39  ;;  %v20039_v11 = vrot.slane %v2161_v59, %v18800_v39  ;;  %v18195_v28 = vld [vmem:[#allocation2 + $0x74] ss:$12 sps:$4 sm:$0x33]  }
 0x133   : > { %26642 = vst [vmem:[#allocation90_spill] sm:$0xff] %v20024_v19  ;;  %26643 = vst [vmem:[#allocation91_spill] sm:$0xff] %v20027_v2  ;;  %v20043_v37 = vcombine.high %v20024_v19, %v20024_v19  ;;  %v20047_v51 = vcombine.high %v20027_v2, %v20027_v2  ;;  %v3682_v47 = vshrl.u32 %v20024_v19, 16  ;;  %v3680_v63 = vsel %vm18896_vm3, %v3673_v50, %v3678_v17 }
 0x134   : > { %26644 = vst [vmem:[#allocation92_spill] sm:$0xff] %v20035_v27  ;;  %26645 = vst [vmem:[#allocation93_spill] sm:$0xff] %v20039_v11  ;;  %v4975_v61 = vcombine.low %v20020_v41, %v20030_v52  ;;  %v20053_v45 = vrot.slane %v4973_v62, %v18800_v39  ;;  %v20057_v60 = vcombine.high %v20035_v27, %v20035_v27  ;;  %v3687_v43 = vshll.u32 %v20027_v2, 16 }
 0x135   : > { %26646 = vst [vmem:[#allocation94_spill] sm:$0xff] %v20043_v37  ;;  %26647 = vst [vmem:[#allocation95_spill] sm:$0xff] %v20047_v51  ;;  %v20063_v25 = vcombine.high %v20039_v11, %v20039_v11  ;;  %v3690_v16 = vshrl.u32 %v20027_v2, 16  ;;  %v3695_v32 = vshll.u32 %v20043_v37, 16  ;;  %v3698_v50 = vshrl.u32 %v20043_v37, 16 }
 0x136   : > { %26648 = vst [vmem:[#allocation96_spill] sm:$0xff] %v20057_v60  ;;  %v20070_v59 = vrot.slane %v4975_v61, %v18800_v39  ;;  %v3703_v62 = vshll.u32 %v20047_v51, 16  ;;  %v3706_v17 = vshrl.u32 %v20047_v51, 16  ;;  %v3689_v18 = vsel %vm18896_vm3, %v3682_v47, %v3687_v43 }
 0x137   : > { %26649 = vst [vmem:[#allocation97_spill] sm:$0xff] %v20063_v25  ;;  %v3697_v3 = vsel %vm18896_vm3, %v3690_v16, %v3695_v32  ;;  %v3711_v1 = vshll.u32 %v20035_v27, 16  ;;  %v3714_v61 = vshrl.u32 %v20035_v27, 16  ;;  %v3719_v37 = vshll.u32 %v20039_v11, 16 }
 0x138   : > { %v5006_v2 = vcombine.high %v20053_v45, %v20070_v59  ;;  %v3705_v51 = vsel %vm18896_vm3, %v3698_v50, %v3703_v62  ;;  %v3722_v13 = vshrl.u32 %v20039_v11, 16  ;;  %v3727_v43 = vshll.u32 %v20057_v60, 16 }
 0x139   : > { %v3713_v47 = vsel %vm18896_vm3, %v3706_v17, %v3711_v1  ;;  %v3730_v16 = vshrl.u32 %v20057_v60, 16  ;;  %v3735_v32 = vshll.u32 %v20063_v25, 16  ;;  %v3721_v27 = vsel %vm18896_vm3, %v3714_v61, %v3719_v37 }
 0x13a   : > { %17634 = vmatmul.mubr.bf16.gmra.mxu1 %v5006_v2  ;;  %v5008_v19 = vcombine.low %v3680_v63, %v3689_v18  ;;  %v5009_v55 = vcombine.low %v3697_v3, %v3705_v51  ;;  %v16359_v50 = vcombine.low %v692_v29, %v693_v26  ;;  %v3729_v62 = vsel %vm18896_vm3, %v3722_v13, %v3727_v43 }
 0x13b   : > { %17637 = vmatprep.mubr.msk.bf16.mxu1 %vm18513_vm0, %v26578_v58  ;;  %v3737_v1 = vsel %vm18896_vm3, %v3730_v16, %v3735_v32  ;;  %v5010_v17 = vcombine.low %v3713_v47, %v3721_v27  ;;  %v2201_v11 = vrot.slane %v18195_v28, %v18800_v39  ;;  %v2208_v37 = vrot.slane %v18193_v57, %v18800_v39 }
 0x13c   : > { %v5011_v60 = vcombine.low %v3729_v62, %v3737_v1  ;;  %v20103_v2 = vrot.slane %v5008_v19, %v18800_v39  ;;  %v20106_v18 = vrot.slane %v5009_v55, %v18800_v39  ;;  %v16417_v63 = vcombine.low %v693_v26, %v693_v26 }
 0x13d   : > { %v20110_v51 = vrot.slane %v5010_v17, %v18800_v39  ;;  %v2241_v13 = vrot.slane %v18197_v56, %v18800_v39  ;;  %v2248_v29 = vrot.slane %v16359_v50, %v18800_v39  ;;  %v2209_v28 = vcombine.low %v2201_v11, %v2208_v37 }
 0x13e   : > { %v20115_v27 = vrot.slane %v5011_v60, %v18800_v39  ;;  %v5040_v19 = vcombine.low %v20103_v2, %v20106_v18  ;;  %v2210_v3 = vcombine.high %v2201_v11, %v2208_v37  ;;  %v2255_v55 = vrot.slane %v16417_v63, %v18800_v39 }
 0x13f   : > { %v2256_v57 = vcombine.low %v19923_v0, %v2248_v29  ;;  %v2257_v61 = vcombine.high %v19923_v0, %v2248_v29  ;;  %v3738_v26 = vshrl.u32 %v20063_v25, 16  ;;  %v20129_v60 = vrot.slane %v2209_v28, %v18800_v39  ;;  %v18205_v25 = vld [vmem:[#allocation2 + $0x88] ss:$12 sps:$4 sm:$0xff]  }
 0x140   : > { %v5042_v56 = vcombine.low %v20110_v51, %v20115_v27  ;;  %v20126_v47 = vrot.slane %v5040_v19, %v18800_v39  ;;  %v20132_v43 = vrot.slane %v2210_v3, %v18800_v39  ;;  %v2258_v11 = vcombine.low %v2241_v13, %v2255_v55 }
 0x141   : > { %26650 = vst [vmem:[#allocation98_spill] sm:$0xff] %v20129_v60  ;;  %v2259_v16 = vcombine.high %v2241_v13, %v2255_v55  ;;  %v20135_v32 = vrot.slane %v2256_v57, %v18800_v39  ;;  %v20138_v0 = vrot.slane %v2257_v61, %v18800_v39  ;;  %v3743_v62 = vshll.u32 %v20129_v60, 16  ;;  %v18203_v57 = vld [vmem:[#allocation2 + $0x80] ss:$12 sps:$4 sm:$0x33]  }
 0x142   : > { %26651 = vst [vmem:[#allocation99_spill] sm:$0xff] %v20132_v43  ;;  %v20141_v50 = vrot.slane %v5042_v56, %v18800_v39  ;;  %v3746_v1 = vshrl.u32 %v20129_v60, 16  ;;  %v3751_v17 = vshll.u32 %v20132_v43, 16  ;;  %v20147_v37 = vrot.slane %v2258_v11, %v18800_v39 }
 0x143   : > { %26652 = vst [vmem:[#allocation100_spill] sm:$0xff] %v20135_v32  ;;  %26653 = vst [vmem:[#allocation101_spill] sm:$0xff] %v20138_v0  ;;  %v20150_v63 = vrot.slane %v2259_v16, %v18800_v39  ;;  %v20154_v13 = vcombine.high %v20135_v32, %v20135_v32  ;;  %v20158_v29 = vcombine.high %v20138_v0, %v20138_v0  ;;  %v3755_v55 = vshrl.u32 %v20135_v32, 16  ;;  %v18204_v32 = vld [vmem:[#allocation2 + $0x84] ss:$12 sps:$4 sm:$0xff]  }
 0x144   : > { %26654 = vst [vmem:[#allocation102_spill] sm:$0xff] %v20147_v37  ;;  %v5073_v19 = vcombine.high %v20126_v47, %v20141_v50  ;;  %v3745_v28 = vsel %vm18896_vm3, %v3738_v26, %v3743_v62  ;;  %v3753_v3 = vsel %vm18896_vm3, %v3746_v1, %v3751_v17  ;;  %v20169_v61 = vcombine.high %v20147_v37, %v20147_v37  ;;  %v18201_v17 = vld [vmem:[#allocation2 + $0x98] ss:$0 sps:$4 sm:$0x33]  }
 0x145   : > { %26655 = vst [vmem:[#allocation103_spill] sm:$0xff] %v20150_v63  ;;  %26656 = vst [vmem:[#allocation104_spill] sm:$0xff] %v20154_v13  ;;  %v3760_v56 = vshll.u32 %v20138_v0, 16  ;;  %v3763_v11 = vshrl.u32 %v20138_v0, 16  ;;  %v3768_v16 = vshll.u32 %v20154_v13, 16  ;;  %v3771_v43 = vshrl.u32 %v20154_v13, 16 }
 0x146   : > { %26657 = vst [vmem:[#allocation105_spill] sm:$0xff] %v20158_v29  ;;  %26658 = vst [vmem:[#allocation106_spill] sm:$0xff] %v20169_v61  ;;  %17638 = vmatmul.mubr.bf16.gmra.mxu1 %v5073_v19  ;;  %v3776_v26 = vshll.u32 %v20158_v29, 16  ;;  %v3779_v62 = vshrl.u32 %v20158_v29, 16  ;;  %v3784_v1 = vshll.u32 %v20147_v37, 16  ;;  %v3787_v13 = vshrl.u32 %v20147_v37, 16 }
 0x147   : > { %17641 = vmatprep.mubr.msk.bf16.mxu1 %vm18513_vm0, %v26578_v58  ;;  %v3762_v0 = vsel %vm18896_vm3, %v3755_v55, %v3760_v56  ;;  %v3770_v19 = vsel %vm18896_vm3, %v3763_v11, %v3768_v16  ;;  %v3792_v60 = vshll.u32 %v20150_v63, 16  ;;  %v3795_v9 = vshrl.u32 %v20150_v63, 16 }
 0x148   : > { %v3778_v29 = vsel %vm18896_vm3, %v3771_v43, %v3776_v26  ;;  %v3786_v14 = vsel %vm18896_vm3, %v3779_v62, %v3784_v1  ;;  %v3800_v31 = vshll.u32 %v20169_v61, 16  ;;  %v5075_v56 = vcombine.low %v3745_v28, %v3753_v3 }
 0x149   : > { %v3794_v55 = vsel %vm18896_vm3, %v3787_v13, %v3792_v60  ;;  %v5076_v53 = vcombine.low %v3762_v0, %v3770_v19  ;;  %v5077_v11 = vcombine.low %v3778_v29, %v3786_v14  ;;  %v26659_v37 = vrot.slane %v19896_v12, 7  ;;  %v333_v19 = vld [vmem:[%s18687_s8 + $0x64] sm:$0xf] }
 0x14a   : > { %v3802_v16 = vsel %vm18896_vm3, %v3795_v9, %v3800_v31  ;;  %v20203_v26 = vcombine.high %v20150_v63, %v20150_v63  ;;  %v2299_v62 = vrot.slane %v18203_v57, %v18800_v39  ;;  %v20207_v60 = vrot.slane %v5075_v56, %v18800_v39  ;;  %v18245_v31 = vld [vmem:[#allocation6 + $0x60] sm:$0xff]  }
 0x14b   : > { %v433_v43 = vsel %vm18767_vm5, %v19925_v8, %v26659_v37  ;;  %v5078_v1 = vcombine.low %v3794_v55, %v3802_v16  ;;  %v20210_v14 = vrot.slane %v5076_v53, %v18800_v39  ;;  %v20213_v9 = vrot.slane %v5077_v11, %v18800_v39  ;;  %7903 = vmatpush2.bf16.msra.mxu1 %v18245_v31  ;;  %v695_v11 = vld [vmem:[#allocation2 + $0x9c] sm:$0xf] }
 0x14c   : > { %26660 = vst [vmem:[#allocation107_spill] sm:$0xff] %v20203_v26  ;;  %538 = vst [vmem:[#allocation2 + $0xa0] sm:$0xf] %v433_v43  ;;  %v2306_v8 = vrot.slane %v18201_v17, %v18800_v39  ;;  %v20217_v0 = vrot.slane %v18204_v32, %v18800_v39  ;;  %v20220_v37 = vrot.slane %v18205_v25, %v18800_v39  ;;  %v3803_v13 = vshrl.u32 %v20169_v61, 16 }
 0x14d   : > { %v20224_v29 = vrot.slane %v5078_v1, %v18800_v39  ;;  %v5107_v53 = vcombine.low %v20207_v60, %v20210_v14  ;;  %v3808_v28 = vshll.u32 %v20203_v26, 16  ;;  %v3811_v3 = vshrl.u32 %v20203_v26, 16  ;;  %7904 = vmatprep.subr.bf16.mxu1 %v26575_v30  ;;  %v18210_v1 = vld [vmem:[#allocation2 + $0x90] ss:$12 sps:$4 sm:$0xff]  }
 0x14e   : > { %v2307_v57 = vcombine.low %v2299_v62, %v2306_v8  ;;  %v2308_v17 = vcombine.high %v2299_v62, %v2306_v8  ;;  %v4974_v32 = vcombine.high %v20013_v5, %v20016_v54  ;;  %v4976_v25 = vcombine.high %v20020_v41, %v20030_v52  ;;  %v18209_v62 = vld [vmem:[#allocation2 + $0x8c] ss:$12 sps:$4 sm:$0x33]  }
 0x14f   : > { %v5109_v55 = vcombine.low %v20213_v9, %v20224_v29  ;;  %v20239_v56 = vrot.slane %v5107_v53, %v18800_v39  ;;  %v3810_v16 = vsel %vm18896_vm3, %v3803_v13, %v3808_v28  ;;  %v5005_v43 = vcombine.low %v20053_v45, %v20070_v59 }
 0x150   : > { %v20246_v5 = vrot.slane %v2307_v57, %v18800_v39  ;;  %v20249_v54 = vrot.slane %v2308_v17, %v18800_v39  ;;  %v4990_v41 = vrot.slane %v4974_v32, %v18800_v39  ;;  %v5004_v52 = vrot.slane %v4976_v25, %v18800_v39 }
 0x151   : > { %v20254_v31 = vrot.slane %v5109_v55, %v18800_v39  ;;  %v26663_v8 = vrot.slane %v19896_v12, 7  ;;  %v26664_v45 = vrot.slane %v19899_v7, 7  ;;  %v437_v53 = vrot.slane %v333_v19, 7 }
 0x152   : > { %26661 = vst [vmem:[#allocation108_spill] sm:$0xff] %v20246_v5  ;;  %26662 = vst [vmem:[#allocation109_spill] sm:$0xff] %v20249_v54  ;;  %v3816_v57 = vshll.u32 %v20246_v5, 16  ;;  %v3819_v17 = vshrl.u32 %v20246_v5, 16  ;;  %v3824_v32 = vshll.u32 %v20249_v54, 16  ;;  %v5007_v25 = vcombine.low %v4990_v41, %v5004_v52  ;;  %v18252_v54 = vld [vmem:[#allocation6 + $0x50] sm:$0xff]  }
 0x153   : > { %v434_v13 = vrot.slane %v26663_v8, 4  ;;  %v436_v59 = vrot.slane %v26664_v45, 4  ;;  %v696_v28 = vld [vmem:[#allocation2 + $0xa0] sm:$0xf]  ;;  %v5140_v26 = vcombine.high %v20239_v56, %v20254_v31  ;;  %v20274_v41 = vrot.slane %v18209_v62, %v18800_v39 }
 0x154   : > { %v16361_v55 = vcombine.low %v695_v11, %v696_v28  ;;  %v16421_v61 = vcombine.low %v696_v28, %v696_v28  ;;  %v18211_v7 = vld [vmem:[#allocation2 + $0x94] ss:$12 sps:$4 sm:$0xff]   ;;  %v3818_v19 = vsel %vm18896_vm3, %v3811_v3, %v3816_v57  ;;  %v20271_v8 = vsel %vm18896_vm3, %v3819_v17, %v3824_v32  ;;  %6013 = vmatprep.mubr.bf16.mxu0 %v5007_v25  ;;  %v334_v3 = vld [vmem:[%s18687_s8 + $0x68] sm:$0xf]  ;;  %v18250_v32 = vld [vmem:[#allocation6 + $0x58] sm:$0xff]  }
 0x155   : > { %v438_v12 = vsel %vm18767_vm5, %v436_v59, %v437_v53  ;;  %539 = vst [vmem:[#allocation2 + $0xa4] sm:$0x1] %v434_v13  ;;  %v20277_v11 = vrot.slane %v18210_v1, %v18800_v39  ;;  %17642 = vmatmul.mubr.bf16.gmra.mxu1 %v5140_v26  ;;  %v5142_v45 = vcombine.low %v3810_v16, %v3818_v19  ;;  %v439_v59 = vrot.slane %v437_v53, 4 }
 0x156   : > { %541 = vst [vmem:[#allocation2 + $0xac] sm:$0xf] %v438_v12  ;;  %v2346_v52 = vrot.slane %v16361_v55, %v18800_v39  ;;  %v2353_v13 = vrot.slane %v16421_v61, %v18800_v39  ;;  %6014 = vmatmul.mubr.bf16.gmra.mxu0 %v5005_v43  ;;  %17645 = vmatprep.mubr.msk.bf16.mxu1 %vm18513_vm0, %v26578_v58  ;;  %v18217_v61 = vld [vmem:[#allocation2 + $0x9c] ss:$12 sps:$4 sm:$0xff]  }
 0x157   : > { %v20285_v28 = vrot.slane %v18211_v7, %v18800_v39  ;;  %v5041_v62 = vcombine.high %v20103_v2, %v20106_v18  ;;  %v5043_v26 = vcombine.high %v20110_v51, %v20115_v27  ;;  %v5072_v1 = vcombine.low %v20126_v47, %v20141_v50  ;;  %542 = vst [vmem:[#allocation2 + $0xb0] sm:$0x1] %v439_v59 }
 0x158   : > { %v2354_v16 = vcombine.low %v20217_v0, %v2346_v52  ;;  %v2355_v43 = vcombine.high %v20217_v0, %v2346_v52  ;;  %v2356_v53 = vcombine.low %v20220_v37, %v2353_v13  ;;  %v2357_v57 = vcombine.high %v20220_v37, %v2353_v13  ;;  %v698_v37 = vld [vmem:[#allocation2 + $0xa8] sm:$0xf]  ;;  %7905 = vmatpush2.bf16.msra.mxu1 %v18250_v32 }
 0x159   : > { %v20298_v17 = vrot.slane %v5142_v45, %v18800_v39  ;;  %v5057_v2 = vrot.slane %v5041_v62, %v18800_v39  ;;  %v5071_v18 = vrot.slane %v5043_v26, %v18800_v39  ;;  %v440_v51 = vrot.slane %v334_v3, 7  ;;  %7906 = vmatprep.subr.bf16.mxu1 %v26575_v30 }
 0x15a   : > { %v20303_v27 = vrot.slane %v2354_v16, %v18800_v39  ;;  %v20306_v47 = vrot.slane %v2356_v53, %v18800_v39  ;;  %v20309_v50 = vrot.slane %v2355_v43, %v18800_v39  ;;  %v20312_v0 = vrot.slane %v2357_v57, %v18800_v39 }
 0x15b   : > { %v5074_v55 = vcombine.low %v5057_v2, %v5071_v18  ;;  %v20314_v12 = vrot.slane %v440_v51, 4  ;;  %543 = vst [vmem:[#allocation2 + $0xb4] sm:$0xe] %v440_v51  ;;  %v20317_v7 = vrot.slane %v18217_v61, %v18800_v39 }
 0x15c   : > { %26665 = vst [vmem:[#allocation110_spill] sm:$0xff] %v20303_v27  ;;  %26666 = vst [vmem:[#allocation111_spill] sm:$0xff] %v20306_v47  ;;  %v18207_v25 = vld [vmem:[#allocation2 + $0xa4] ss:$0 sps:$4 sm:$0x33]   ;;  %v20323_v52 = vcombine.high %v20303_v27, %v20303_v27  ;;  %v20327_v13 = vcombine.high %v20309_v50, %v20309_v50  ;;  %v3828_v45 = vshrl.u32 %v20303_v27, 16  ;;  %7907 = vmatpush2.bf16.msra.mxu1 %v18252_v54 }
 0x15d   : > { %26667 = vst [vmem:[#allocation112_spill] sm:$0xff] %v20309_v50  ;;  %26668 = vst [vmem:[#allocation113_spill] sm:$0xff] %v20312_v0  ;;  %v3833_v3 = vshll.u32 %v20309_v50, 16  ;;  %v699_v59 = vld [vmem:[#allocation2 + $0xac] sm:$0xf]  ;;  %v3836_v62 = vshrl.u32 %v20309_v50, 16  ;;  %6021 = vmatprep.mubr.bf16.mxu0 %v5074_v55  ;;  %7908 = vmatprep.subr.bf16.mxu1 %v26575_v30 }
 0x15e   : > { %26669 = vst [vmem:[#allocation114_spill] sm:$0xff] %v20323_v52  ;;  %26670 = vst [vmem:[#allocation115_spill] sm:$0xff] %v20327_v13  ;;  %v3857_v26 = vshll.u32 %v20306_v47, 16  ;;  %v3860_v61 = vshrl.u32 %v20306_v47, 16  ;;  %v3865_v16 = vshll.u32 %v20312_v0, 16  ;;  %v3841_v53 = vshll.u32 %v20323_v52, 16  ;;  %6022 = vmatmul.mubr.bf16.gmra.mxu0 %v5072_v1 }
 0x15f   : > { %v3835_v43 = vsel %vm18896_vm3, %v3828_v45, %v3833_v3  ;;  %v3844_v57 = vshrl.u32 %v20323_v52, 16  ;;  %v3849_v2 = vshll.u32 %v20327_v13, 16  ;;  %v3852_v18 = vshrl.u32 %v20327_v13, 16  ;;  %v20433_v50 = vld [vmem:[%s18687_s8 + $0x6c] sm:$0xf] }
 0x160   : > { %v3867_v51 = vsel %vm18896_vm3, %v3860_v61, %v3865_v16  ;;  %v5143_v32 = vcombine.low %v20271_v8, %v3835_v43  ;;  %v16363_v55 = vcombine.low %v698_v37, %v699_v59  ;;  %v3843_v19 = vsel %vm18896_vm3, %v3836_v62, %v3841_v53  ;;  %v18251_v62 = vld [vmem:[#allocation6 + $0x88] sm:$0xff]  }
 0x161   : > { %v3851_v45 = vsel %vm18896_vm3, %v3844_v57, %v3849_v2  ;;  %v20351_v3 = vcombine.high %v20306_v47, %v20306_v47  ;;  %v20355_v1 = vcombine.high %v20312_v0, %v20312_v0  ;;  %v3859_v61 = vsel %vm18896_vm3, %v3852_v18, %v3857_v26  ;;  %17694 = vmatpush3.bf16.msra.mxu0 %v18251_v62  ;;  %v18216_v27 = vld [vmem:[#allocation2 + $0x98] ss:$12 sps:$4 sm:$0x33]  }
 0x162   : > { %v5144_v16 = vcombine.low %v3843_v19, %v3851_v45  ;;  %v20360_v8 = vrot.slane %v5143_v32, %v18800_v39  ;;  %v2404_v37 = vrot.slane %v18207_v25, %v18800_v39  ;;  %v5145_v43 = vcombine.low %v3859_v61, %v3867_v51  ;;  %17695 = vmatprep.subr.bf16.mxu0 %v26578_v58 }
 0x163   : > { %26671 = vst [vmem:[#allocation116_spill] sm:$0xff] %v20351_v3  ;;  %26672 = vst [vmem:[#allocation117_spill] sm:$0xff] %v20355_v1  ;;  %v16425_v53 = vcombine.low %v699_v59, %v699_v59  ;;  %v2444_v57 = vrot.slane %v16363_v55, %v18800_v39  ;;  %v3868_v2 = vshrl.u32 %v20312_v0, 16  ;;  %v18255_v55 = vld [vmem:[#allocation6 + $0x48] sm:$0xff]  }
 0x164   : > { %v20366_v13 = vrot.slane %v5144_v16, %v18800_v39  ;;  %v5174_v26 = vcombine.low %v20298_v17, %v20360_v8  ;;  %v2405_v19 = vcombine.low %v20274_v41, %v2404_v37  ;;  %v2406_v18 = vcombine.high %v20274_v41, %v2404_v37  ;;  %7909 = vmatpush2.bf16.msra.mxu1 %v18255_v55 }
 0x165   : > { %v20373_v25 = vrot.slane %v5145_v43, %v18800_v39  ;;  %v20376_v59 = vrot.slane %v16425_v53, %v18800_v39  ;;  %v2452_v51 = vcombine.low %v20277_v11, %v2444_v57  ;;  %v2453_v32 = vcombine.high %v20277_v11, %v2444_v57  ;;  %7910 = vmatprep.subr.bf16.mxu1 %v26575_v30 }
 0x166   : > { %v20381_v45 = vrot.slane %v5174_v26, %v18800_v39  ;;  %v20384_v61 = vrot.slane %v2405_v19, %v18800_v39  ;;  %v20387_v41 = vrot.slane %v2406_v18, %v18800_v39  ;;  %v3873_v16 = vshll.u32 %v20351_v3, 16 }
 0x167   : > { %v5176_v11 = vcombine.low %v20366_v13, %v20373_v25  ;;  %v2454_v54 = vcombine.low %v20285_v28, %v20376_v59  ;;  %v20397_v37 = vrot.slane %v2452_v51, %v18800_v39  ;;  %v20400_v62 = vrot.slane %v2453_v32, %v18800_v39 }
 0x168   : > { %26673 = vst [vmem:[#allocation118_spill] sm:$0xff] %v20384_v61  ;;  %26674 = vst [vmem:[#allocation119_spill] sm:$0xff] %v20387_v41  ;;  %v3875_v43 = vsel %vm18896_vm3, %v3868_v2, %v3873_v16  ;;  %v3876_v53 = vshrl.u32 %v20351_v3, 16  ;;  %v3881_v57 = vshll.u32 %v20355_v1, 16  ;;  %v3884_v26 = vshrl.u32 %v20355_v1, 16 }
 0x169   : > { %26675 = vst [vmem:[#allocation120_spill] sm:$0xff] %v20397_v37  ;;  %26676 = vst [vmem:[#allocation121_spill] sm:$0xff] %v20400_v62  ;;  %v20408_v19 = vrot.slane %v5176_v11, %v18800_v39  ;;  %v20411_v18 = vrot.slane %v2454_v54, %v18800_v39  ;;  %v20415_v51 = vcombine.high %v20397_v37, %v20397_v37  ;;  %v3889_v16 = vshll.u32 %v20384_v61, 16  ;;  %v18256_v54 = vld [vmem:[#allocation6 + $0x40] sm:$0xff]  }
 0x16a   : > { %v20419_v2 = vcombine.high %v20400_v62, %v20400_v62  ;;  %v3883_v32 = vsel %vm18896_vm3, %v3876_v53, %v3881_v57  ;;  %v3892_v11 = vshrl.u32 %v20384_v61, 16  ;;  %v3897_v1 = vshll.u32 %v20387_v41, 16  ;;  %7911 = vmatpush2.bf16.msra.mxu1 %v18256_v54 }
 0x16b   : > { %26677 = vst [vmem:[#allocation122_spill] sm:$0xff] %v20411_v18  ;;  %26678 = vst [vmem:[#allocation123_spill] sm:$0xff] %v20415_v51  ;;  %v5207_v0 = vcombine.high %v20381_v45, %v20408_v19  ;;  %v3901_v3 = vshrl.u32 %v20397_v37, 16  ;;  %v3906_v47 = vshll.u32 %v20400_v62, 16  ;;  %v3909_v55 = vshrl.u32 %v20400_v62, 16  ;;  %10791 = vmatprep.subr.bf16.mxu1 %v26575_v30 }
 0x16c   : > { %26679 = vst [vmem:[#allocation124_spill] sm:$0xff] %v20419_v2  ;;  %v3891_v53 = vsel %vm18896_vm3, %v3884_v26, %v3889_v16  ;;  %v3899_v57 = vsel %vm18896_vm3, %v3892_v11, %v3897_v1  ;;  %v3914_v41 = vshll.u32 %v20415_v51, 16  ;;  %v3917_v61 = vshrl.u32 %v20415_v51, 16  ;;  %v18214_v11 = vld [vmem:[#allocation2 + $0xb0] ss:$0 sps:$4 sm:$0x33]  }
 0x16d   : > { %17646 = vmatmul.mubr.bf16.gmra.mxu1 %v5207_v0  ;;  %v3908_v37 = vsel %vm18896_vm3, %v3901_v3, %v3906_v47  ;;  %v3922_v52 = vshll.u32 %v20419_v2, 16  ;;  %v3925_v62 = vshrl.u32 %v20419_v2, 16  ;;  %v3930_v5 = vshll.u32 %v20411_v18, 16 }
 0x16e   : > { %17649 = vmatprep.mubr.msk.bf16.mxu1 %vm18513_vm0, %v26578_v58  ;;  %v3916_v1 = vsel %vm18896_vm3, %v3909_v55, %v3914_v41  ;;  %v5209_v26 = vcombine.low %v3875_v43, %v3883_v32  ;;  %v5210_v16 = vcombine.low %v3891_v53, %v3899_v57  ;;  %v26255_v0 = vrot.slane %v20433_v50, 7 }
 0x16f   : > { %v3924_v47 = vsel %vm18896_vm3, %v3917_v61, %v3922_v52  ;;  %v3932_v3 = vsel %vm18896_vm3, %v3925_v62, %v3930_v5  ;;  %v5211_v2 = vcombine.low %v3908_v37, %v3916_v1  ;;  %v2455_v51 = vcombine.high %v20285_v28, %v20376_v59  ;;  %v18257_v1 = vld [vmem:[#allocation6 + $0x80] sm:$0xff]  }
 0x170   : > { %v5212_v63 = vcombine.low %v3924_v47, %v3932_v3  ;;  %v20459_v41 = vrot.slane %v5209_v26, %v18800_v39  ;;  %v20462_v43 = vrot.slane %v5210_v16, %v18800_v39  ;;  %v443_v52 = vsel %vm18767_vm5, %v20314_v12, %v26255_v0  ;;  %17696 = vmatpush3.bf16.msra.mxu0 %v18257_v1  ;;  %v20525_v0 = vld [vmem:[%s18687_s8 + $0x74] sm:$0xf] }
 0x171   : > { %v20470_v5 = vrot.slane %v5211_v2, %v18800_v39  ;;  %544 = vst [vmem:[#allocation2 + $0xb8] sm:$0xf] %v443_v52  ;;  %v20473_v28 = vrot.slane %v2455_v51, %v18800_v39  ;;  %v20477_v59 = vcombine.high %v20411_v18, %v20411_v18  ;;  %v2495_v61 = vrot.slane %v18216_v27, %v18800_v39  ;;  %v701_v52 = vld [vmem:[#allocation2 + $0xb4] sm:$0xf] }
 0x172   : > { %v20481_v37 = vrot.slane %v5212_v63, %v18800_v39  ;;  %v5241_v62 = vcombine.low %v20459_v41, %v20462_v43  ;;  %v2502_v12 = vrot.slane %v18214_v11, %v18800_v39  ;;  %v3933_v2 = vshrl.u32 %v20411_v18, 16  ;;  %17781 = vmatprep.subr.bf16.mxu0 %v26578_v58 }
 0x173   : > { %26680 = vst [vmem:[#allocation125_spill] sm:$0xff] %v20473_v28  ;;  %26681 = vst [vmem:[#allocation126_spill] sm:$0xff] %v20477_v59  ;;  %v20489_v51 = vcombine.high %v20473_v28, %v20473_v28  ;;  %v3938_v32 = vshll.u32 %v20473_v28, 16  ;;  %v3941_v54 = vshrl.u32 %v20473_v28, 16  ;;  %v3946_v27 = vshll.u32 %v20477_v59, 16 }
 0x174   : > { %v5243_v63 = vcombine.low %v20470_v5, %v20481_v37  ;;  %v20497_v55 = vrot.slane %v5241_v62, %v18800_v39  ;;  %v2503_v53 = vcombine.low %v2495_v61, %v2502_v12  ;;  %v2504_v57 = vcombine.high %v2495_v61, %v2502_v12 }
 0x175   : > { %26682 = vst [vmem:[#allocation127_spill] sm:$0xff] %v20489_v51  ;;  %v3940_v26 = vsel %vm18896_vm3, %v3933_v2, %v3938_v32  ;;  %v3948_v16 = vsel %vm18896_vm3, %v3941_v54, %v3946_v27  ;;  %v3949_v11 = vshrl.u32 %v20477_v59, 16  ;;  %v3954_v47 = vshll.u32 %v20489_v51, 16  ;;  %v18224_v59 = vld [vmem:[#allocation2 + $0xa4] ss:$12 sps:$4 sm:$0x33]  }
 0x176   : > { %v20506_v3 = vrot.slane %v5243_v63, %v18800_v39  ;;  %v20509_v62 = vrot.slane %v2503_v53, %v18800_v39  ;;  %v20512_v61 = vrot.slane %v2504_v57, %v18800_v39  ;;  %v3957_v12 = vshrl.u32 %v20489_v51, 16  ;;  %v336_v53 = vld [vmem:[%s18687_s8 + $0x70] sm:$0xf] }
 0x177   : > { %v3956_v2 = vsel %vm18896_vm3, %v3949_v11, %v3954_v47  ;;  %v5276_v32 = vcombine.low %v3940_v26, %v3948_v16  ;;  %v5110_v54 = vcombine.high %v20213_v9, %v20224_v29  ;;  %v26685_v27 = vcombine.high %v20207_v60, %v20210_v14  ;;  %v18223_v57 = vld [vmem:[#allocation2 + $0xa0] ss:$12 sps:$4 sm:$0xff]  }
 0x178   : > { %26683 = vst [vmem:[#allocation128_spill] sm:$0xff] %v20509_v62  ;;  %26684 = vst [vmem:[#allocation129_spill] sm:$0xff] %v20512_v61  ;;  %v5274_v1 = vcombine.high %v20497_v55, %v20506_v3  ;;  %v702_v11 = vld [vmem:[#allocation2 + $0xb8] sm:$0xf]  ;;  %v3962_v26 = vshll.u32 %v20509_v62, 16  ;;  %v3965_v9 = vshrl.u32 %v20509_v62, 16  ;;  %v5139_v62 = vcombine.low %v20239_v56, %v20254_v31 }
 0x179   : > { %v5124_v63 = vrot.slane %v26685_v27, %v18800_v39  ;;  %v3970_v29 = vshll.u32 %v20512_v61, 16  ;;  %v16365_v16 = vcombine.low %v701_v52, %v702_v11  ;;  %v16429_v60 = vcombine.low %v702_v11, %v702_v11  ;;  %v18225_v27 = vld [vmem:[#allocation2 + $0xa8] ss:$12 sps:$4 sm:$0xff]  }
 0x17a   : > { %v20534_v14 = vrot.slane %v5276_v32, %v18800_v39  ;;  %v5138_v47 = vrot.slane %v5110_v54, %v18800_v39  ;;  %17650 = vmatmul.mubr.bf16.gmra.mxu1 %v5274_v1  ;;  %v3964_v51 = vsel %vm18896_vm3, %v3957_v12, %v3962_v26  ;;  %v26686_v61 = vrot.slane %v20433_v50, 7 }
 0x17b   : > { %v3972_v18 = vsel %vm18896_vm3, %v3965_v9, %v3970_v29  ;;  %17653 = vmatprep.mubr.msk.bf16.mxu1 %vm18513_vm0, %v26578_v58  ;;  %v2542_v32 = vrot.slane %v16365_v16, %v18800_v39  ;;  %v2549_v54 = vrot.slane %v16429_v60, %v18800_v39  ;;  %v5277_v1 = vcombine.low %v3956_v2, %v3964_v51  ;;  %v20562_v2 = vpop.f32.mrf.mxu1 }
 0x17c   : > { %v444_v52 = vrot.slane %v26686_v61, 4  ;;  %v5141_v11 = vcombine.low %v5124_v63, %v5138_v47  ;;  %v445_v28 = vrot.slane %v336_v53, 7  ;;  %v26265_v12 = vrot.slane %v20525_v0, 7  ;;  %26687 = vst [vmem:[#allocation130_spill] sm:$0xff] %v20562_v2 }
 0x17d   : > { %v2535_v26 = vrot.slane %v18223_v57, %v18800_v39  ;;  %v20552_v56 = vrot.slane %v18224_v59, %v18800_v39  ;;  %v2550_v31 = vcombine.low %v20317_v7, %v2542_v32  ;;  %v2551_v50 = vcombine.high %v20317_v7, %v2542_v32 }
 0x17e   : > { %545 = vst [vmem:[#allocation2 + $0xbc] sm:$0x1] %v444_v52  ;;  %v20557_v61 = vrot.slane %v5277_v1, %v18800_v39  ;;  %6029 = vmatprep.mubr.bf16.mxu0 %v5141_v11  ;;  %v20560_v51 = vrot.slane %v18225_v27, %v18800_v39  ;;  %v446_v63 = vrot.slane %v445_v28, 4  ;;  %546 = vst [vmem:[#allocation2 + $0xc0] sm:$0xe] %v445_v28 }
 0x17f   : > { %6030 = vmatmul.mubr.bf16.gmra.mxu0 %v5139_v62  ;;  %v2552_v53 = vcombine.low %v2535_v26, %v2549_v54  ;;  %v2553_v57 = vcombine.high %v2535_v26, %v2549_v54  ;;  %v5175_v59 = vcombine.high %v20298_v17, %v20360_v8  ;;  %v20567_v9 = vrot.slane %v2550_v31, %v18800_v39  ;;  %v17599_v62 = vpop.f32.mrf.mxu1 }
 0x180   : > { %v20570_v7 = vrot.slane %v2551_v50, %v18800_v39  ;;  %v5308_v29 = vcombine.low %v20534_v14, %v20557_v61  ;;  %v5177_v16 = vcombine.high %v20366_v13, %v20373_v25  ;;  %v448_v28 = vsel %vm18767_vm5, %v446_v63, %v26265_v12 }
 0x181   : > { %26688 = vst [vmem:[#allocation131_spill] sm:$0xff] %v20567_v9  ;;  %v20581_v17 = vrot.slane %v2552_v53, %v18800_v39  ;;  %v20584_v8 = vrot.slane %v2553_v57, %v18800_v39  ;;  %v20587_v60 = vrot.slane %v5175_v59, %v18800_v39  ;;  %v20591_v47 = vcombine.high %v20567_v9, %v20567_v9  ;;  %v20619_v62 = vpop.f32.mrf.mxu1 }
 0x182   : > { %26689 = vst [vmem:[#allocation132_spill] sm:$0xff] %v20570_v7  ;;  %v20595_v13 = vcombine.high %v20570_v7, %v20570_v7  ;;  %v3974_v25 = vshrl.u32 %v20567_v9, 16  ;;  %v3979_v27 = vshll.u32 %v20570_v7, 16  ;;  %547 = vst [vmem:[#allocation2 + $0xc4] sm:$0xf] %v448_v28  ;;  %v3982_v52 = vshrl.u32 %v20570_v7, 16 }
 0x183   : > { %26690 = vst [vmem:[#allocation133_spill] sm:$0xff] %v20581_v17  ;;  %26691 = vst [vmem:[#allocation134_spill] sm:$0xff] %v20584_v8  ;;  %v20601_v32 = vrot.slane %v5308_v29, %v18800_v39  ;;  %v20605_v54 = vcombine.high %v20581_v17, %v20581_v17  ;;  %v20609_v1 = vcombine.high %v20584_v8, %v20584_v8  ;;  %v3987_v26 = vshll.u32 %v20591_v47, 16 }
 0x184   : > { %26692 = vst [vmem:[#allocation135_spill] sm:$0xff] %v20591_v47  ;;  %26693 = vst [vmem:[#allocation136_spill] sm:$0xff] %v20595_v13  ;;  %v3981_v11 = vsel %vm18896_vm3, %v3974_v25, %v3979_v27  ;;  %v3990_v31 = vshrl.u32 %v20591_v47, 16  ;;  %v3995_v50 = vshll.u32 %v20595_v13, 16  ;;  %v3998_v57 = vshrl.u32 %v20595_v13, 16 }
 0x185   : > { %26694 = vst [vmem:[#allocation137_spill] sm:$0xff] %v20605_v54  ;;  %26695 = vst [vmem:[#allocation138_spill] sm:$0xff] %v20609_v1  ;;  %v5278_v63 = vcombine.low %v3972_v18, %v3981_v11  ;;  %v18221_v53 = vld [vmem:[#allocation2 + $0xbc] ss:$0 sps:$4 sm:$0x33]   ;;  %v4003_v59 = vshll.u32 %v20581_v17, 16  ;;  %v3989_v28 = vsel %vm18896_vm3, %v3982_v52, %v3987_v26 }
 0x186   : > { %v4006_v29 = vshrl.u32 %v20581_v17, 16  ;;  %26696 = vst [vmem:[#allocation139_spill] sm:$0xff] %v20619_v62  ;;  %v3997_v25 = vsel %vm18896_vm3, %v3990_v31, %v3995_v50  ;;  %v4011_v27 = vshll.u32 %v20584_v8, 16  ;;  %v4014_v12 = vshrl.u32 %v20584_v8, 16  ;;  %v704_v2 = vld [vmem:[#allocation2 + $0xc0] sm:$0xf]  ;;  %v17600_v17 = vpop.f32.mrf.mxu1 }
 0x187   : > { %v5279_v18 = vcombine.low %v3989_v28, %v3997_v25  ;;  %v20628_v11 = vrot.slane %v5278_v63, %v18800_v39  ;;  %v2600_v13 = vrot.slane %v18221_v53, %v18800_v39  ;;  %v4005_v62 = vsel %vm18896_vm3, %v3998_v57, %v4003_v59  ;;  %v18231_v7 = vld [vmem:[#allocation2 + $0xb0] ss:$12 sps:$4 sm:$0x33]  }
 0x188   : > { %v4013_v52 = vsel %vm18896_vm3, %v4006_v29, %v4011_v27  ;;  %v4019_v26 = vshll.u32 %v20605_v54, 16  ;;  %v4022_v31 = vshrl.u32 %v20605_v54, 16  ;;  %v4027_v50 = vshll.u32 %v20609_v1, 16  ;;  %v20644_v17 = vpop.f32.mrf.mxu1 }
 0x189   : > { %v20639_v28 = vrot.slane %v5279_v18, %v18800_v39  ;;  %v705_v63 = vld [vmem:[#allocation2 + $0xc4] sm:$0xf]  ;;  %v2601_v25 = vcombine.low %v20552_v56, %v2600_v13  ;;  %v2602_v53 = vcombine.high %v20552_v56, %v2600_v13  ;;  %v4030_v57 = vshrl.u32 %v20609_v1, 16  ;;  %26697 = vst [vmem:[#allocation140_spill] sm:$0xff] %v20644_v17 }
 0x18a   : > { %v16367_v59 = vcombine.low %v704_v2, %v705_v63  ;;  %v16433_v29 = vcombine.low %v705_v63, %v705_v63  ;;  %v4021_v27 = vsel %vm18896_vm3, %v4014_v12, %v4019_v26  ;;  %v4029_v8 = vsel %vm18896_vm3, %v4022_v31, %v4027_v50  ;;  %v17603_v2 = vpop.f32.mrf.mxu1 }
 0x18b   : > { %v5310_v18 = vcombine.low %v20628_v11, %v20639_v28  ;;  %v20653_v54 = vrot.slane %v2601_v25, %v18800_v39  ;;  %v20656_v56 = vrot.slane %v2602_v53, %v18800_v39  ;;  %v5343_v13 = vcombine.low %v4005_v62, %v4013_v52 }
 0x18c   : > { %v2640_v63 = vrot.slane %v16367_v59, %v18800_v39  ;;  %v20660_v12 = vrot.slane %v16433_v29, %v18800_v39  ;;  %v5344_v26 = vcombine.low %v4021_v27, %v4029_v8  ;;  %v5205_v31 = vrot.slane %v5177_v16, %v18800_v39  ;;  %v20669_v62 = vpop.f32.mrf.mxu1  ;;  %v338_v8 = vld [vmem:[%s18687_s8 + $0x78] sm:$0xf]  ;;  %v339_v27 = vld [vmem:[%s18687_s8 + $0x7c] sm:$0xf] }
 0x18d   : > { %26698 = vst [vmem:[#allocation141_spill] sm:$0xff] %v20653_v54  ;;  %26699 = vst [vmem:[#allocation142_spill] sm:$0xff] %v20656_v56  ;;  %v20664_v50 = vrot.slane %v5310_v18, %v18800_v39  ;;  %v4035_v25 = vshll.u32 %v20653_v54, 16  ;;  %v4038_v53 = vshrl.u32 %v20653_v54, 16  ;;  %v4043_v17 = vshll.u32 %v20656_v56, 16 }
 0x18e   : > { %26700 = vst [vmem:[#allocation143_spill] sm:$0xff] %v20669_v62  ;;  %v2648_v52 = vcombine.low %v20560_v51, %v2640_v63  ;;  %v2649_v59 = vcombine.high %v20560_v51, %v2640_v63  ;;  %v20674_v29 = vrot.slane %v5343_v13, %v18800_v39  ;;  %v20677_v16 = vrot.slane %v5344_v26, %v18800_v39  ;;  %v18230_v51 = vld [vmem:[#allocation2 + $0xac] ss:$12 sps:$4 sm:$0xff]   ;;  %v17604_v63 = vpop.f32.mrf.mxu1 }
 0x18f   : > { %v5341_v18 = vcombine.high %v20601_v32, %v20664_v50  ;;  %v4037_v2 = vsel %vm18896_vm3, %v4030_v57, %v4035_v25  ;;  %v4045_v56 = vsel %vm18896_vm3, %v4038_v53, %v4043_v17  ;;  %v5208_v62 = vcombine.low %v20587_v60, %v5205_v31  ;;  %v18232_v53 = vld [vmem:[#allocation2 + $0xb4] ss:$12 sps:$4 sm:$0xff]  }
 0x190   : > { %v20689_v13 = vrot.slane %v2648_v52, %v18800_v39  ;;  %v20692_v26 = vrot.slane %v2649_v59, %v18800_v39  ;;  %v5345_v1 = vcombine.low %v4037_v2, %v4045_v56  ;;  %v5375_v54 = vcombine.low %v20674_v29, %v20677_v16  ;;  %v20700_v52 = vpop.f32.mrf.mxu1 }
 0x191   : > { %17654 = vmatmul.mubr.bf16.gmra.mxu1 %v5341_v18  ;;  %6037 = vmatprep.mubr.bf16.mxu0 %v5208_v62  ;;  %v5206_v57 = vcombine.low %v20381_v45, %v20408_v19  ;;  %v26703_v60 = vrot.slane %v20525_v0, 7  ;;  %v450_v31 = vrot.slane %v338_v8, 7  ;;  %v452_v25 = vrot.slane %v339_v27, 7  ;;  %26704 = vst [vmem:[#allocation146_spill] sm:$0xff] %v20700_v52 }
 0x192   : > { %26701 = vst [vmem:[#allocation144_spill] sm:$0xff] %v20689_v13  ;;  %26702 = vst [vmem:[#allocation145_spill] sm:$0xff] %v20692_v26  ;;  %17657 = vmatprep.mubr.msk.bf16.mxu1 %vm18513_vm0, %v26578_v58  ;;  %v20706_v56 = vcombine.high %v20689_v13, %v20689_v13  ;;  %v4047_v62 = vshrl.u32 %v20689_v13, 16  ;;  %v4052_v59 = vshll.u32 %v20692_v26, 16  ;;  %v4055_v45 = vshrl.u32 %v20692_v26, 16  ;;  %v17607_v18 = vpop.f32.mrf.mxu1 }
 0x193   : > { %v449_v17 = vrot.slane %v26703_v60, 4  ;;  %v20712_v19 = vrot.slane %v5345_v1, %v18800_v39  ;;  %v20715_v0 = vrot.slane %v5375_v54, %v18800_v39  ;;  %6038 = vmatmul.mubr.bf16.gmra.mxu0 %v5206_v57  ;;  %v451_v8 = vrot.slane %v450_v31, 4  ;;  %549 = vst [vmem:[#allocation2 + $0xcc] sm:$0xe] %v450_v31 }
 0x194   : > { %26705 = vst [vmem:[#allocation147_spill] sm:$0xff] %v20706_v56  ;;  %v2633_v27 = vrot.slane %v18230_v51, %v18800_v39  ;;  %v4054_v2 = vsel %vm18896_vm3, %v4047_v62, %v4052_v59  ;;  %v4060_v63 = vshll.u32 %v20706_v56, 16  ;;  %v20723_v60 = vcombine.high %v20692_v26, %v20692_v26  ;;  %v20735_v31 = vpop.f32.mrf.mxu1 }
 0x195   : > { %548 = vst [vmem:[#allocation2 + $0xc8] sm:$0x1] %v449_v17  ;;  %v20726_v1 = vrot.slane %v18231_v7, %v18800_v39  ;;  %v453_v54 = vsel %vm18767_vm5, %v451_v8, %v452_v25  ;;  %v20733_v17 = vrot.slane %v18232_v53, %v18800_v39  ;;  %26707 = vst [vmem:[#allocation149_spill] sm:$0xff] %v20735_v31  ;;  %v4063_v59 = vshrl.u32 %v20706_v56, 16  ;;  %v18237_v56 = vld [vmem:[#allocation2 + $0xb8] ss:$12 sps:$4 sm:$0xff]  }
 0x196   : > { %26706 = vst [vmem:[#allocation148_spill] sm:$0xff] %v20723_v60  ;;  %v2650_v57 = vcombine.low %v2633_v27, %v20660_v12  ;;  %v2651_v51 = vcombine.high %v2633_v27, %v20660_v12  ;;  %v4062_v62 = vsel %vm18896_vm3, %v4055_v45, %v4060_v63  ;;  %550 = vst [vmem:[#allocation2 + $0xd0] sm:$0xf] %v453_v54  ;;  %v4068_v7 = vshll.u32 %v20723_v60, 16  ;;  %v17608_v27 = vpop.f32.mrf.mxu1 }
 0x197   : > { %v4071_v10 = vshrl.u32 %v20723_v60, 16  ;;  %v5346_v8 = vcombine.low %v4054_v2, %v4062_v62  ;;  %v5242_v53 = vcombine.high %v20459_v41, %v20462_v43  ;;  %v5244_v63 = vcombine.high %v20470_v5, %v20481_v37 }
 0x198   : > { %v20743_v18 = vrot.slane %v2650_v57, %v18800_v39  ;;  %v20746_v12 = vrot.slane %v2651_v51, %v18800_v39  ;;  %v4070_v45 = vsel %vm18896_vm3, %v4063_v59, %v4068_v7  ;;  %v5273_v54 = vcombine.low %v20497_v55, %v20506_v3  ;;  %v20768_v62 = vpop.f32.mrf.mxu1 }
 0x199   : > { %v454_v2 = vrot.slane %v452_v25, 4  ;;  %v20757_v57 = vrot.slane %v5346_v8, %v18800_v39  ;;  %26712 = vst [vmem:[#allocation154_spill] sm:$0xff] %v20768_v62  ;;  %v5258_v3 = vrot.slane %v5242_v53, %v18800_v39  ;;  %v5272_v25 = vrot.slane %v5244_v63, %v18800_v39 }
 0x19a   : > { %26708 = vst [vmem:[#allocation150_spill] sm:$0xff] %v20743_v18  ;;  %26709 = vst [vmem:[#allocation151_spill] sm:$0xff] %v20746_v12  ;;  %v20761_v51 = vcombine.high %v20743_v18, %v20743_v18  ;;  %v20765_v41 = vcombine.high %v20746_v12, %v20746_v12  ;;  %v4076_v43 = vshll.u32 %v20743_v18, 16  ;;  %v707_v5 = vld [vmem:[#allocation2 + $0xcc] sm:$0xf]  ;;  %v4079_v37 = vshrl.u32 %v20743_v18, 16  ;;  %v17611_v62 = vpop.f32.mrf.mxu1 }
 0x19b   : > { %v4084_v55 = vshll.u32 %v20746_v12, 16  ;;  %551 = vst [vmem:[#allocation2 + $0xd4] sm:$0x1] %v454_v2  ;;  %v5377_v59 = vcombine.low %v20712_v19, %v20757_v57  ;;  %v4087_v27 = vshrl.u32 %v20746_v12, 16 }
 0x19c   : > { %26710 = vst [vmem:[#allocation152_spill] sm:$0xff] %v20761_v51  ;;  %26711 = vst [vmem:[#allocation153_spill] sm:$0xff] %v20765_v41  ;;  %v18228_v7 = vld [vmem:[#allocation2 + $0xc8] ss:$0 sps:$4 sm:$0x33]   ;;  %v4078_v8 = vsel %vm18896_vm3, %v4071_v10, %v4076_v43  ;;  %v4092_v60 = vshll.u32 %v20761_v51, 16  ;;  %v20791_v13 = vpop.f32.mrf.mxu1 }
 0x19d   : > { %v4086_v31 = vsel %vm18896_vm3, %v4079_v37, %v4084_v55  ;;  %v4095_v53 = vshrl.u32 %v20761_v51, 16  ;;  %v4100_v63 = vshll.u32 %v20765_v41, 16  ;;  %v4103_v2 = vshrl.u32 %v20765_v41, 16  ;;  %v708_v18 = vld [vmem:[#allocation2 + $0xd0] sm:$0xf]  ;;  %26713 = vst [vmem:[#allocation155_spill] sm:$0xff] %v20791_v13  ;;  %v20793_v37 = vpop.f32.mrf.mxu0 }
 0x19e   : > { %v20786_v52 = vrot.slane %v5377_v59, %v18800_v39  ;;  %v2698_v10 = vrot.slane %v18228_v7, %v18800_v39  ;;  %v4094_v43 = vsel %vm18896_vm3, %v4087_v27, %v4092_v60  ;;  %v5410_v12 = vcombine.low %v4070_v45, %v4078_v8  ;;  %v18238_v62 = vld [vmem:[#allocation2 + $0xbc] ss:$12 sps:$4 sm:$0x33]   ;;  %26714 = vst [vmem:[#allocation156_spill] sm:$0xff] %v20793_v37  ;;  %v17612_v45 = vpop.f32.mrf.mxu1 }
 0x19f   : > { %v16369_v55 = vcombine.low %v707_v5, %v708_v18  ;;  %v16437_v51 = vcombine.low %v708_v18, %v708_v18  ;;  %v4102_v41 = vsel %vm18896_vm3, %v4095_v53, %v4100_v63  ;;  %v5411_v26 = vcombine.low %v4086_v31, %v4094_v43  ;;  %v5945_v8 = vpop.f32.mrf.mxu0 }
 0x1a0   : > { %v5408_v59 = vcombine.high %v20715_v0, %v20786_v52  ;;  %v2699_v7 = vcombine.low %v20726_v1, %v2698_v10  ;;  %v2700_v47 = vcombine.high %v20726_v1, %v2698_v10  ;;  %v20802_v60 = vrot.slane %v5410_v12, %v18800_v39 }
 0x1a1   : > { %v2738_v27 = vrot.slane %v16369_v55, %v18800_v39  ;;  %v2745_v18 = vrot.slane %v16437_v51, %v18800_v39  ;;  %v20807_v5 = vrot.slane %v5411_v26, %v18800_v39  ;;  %v5275_v31 = vcombine.low %v5258_v3, %v5272_v25  ;;  %v20823_v25 = vpop.f32.mrf.mxu1 }
 0x1a2   : > { %17658 = vmatmul.mubr.bf16.gmra.mxu1 %v5408_v59  ;;  %v20810_v53 = vrot.slane %v2699_v7, %v18800_v39  ;;  %v20813_v63 = vrot.slane %v2700_v47, %v18800_v39  ;;  %v18236_v1 = vld [vmem:[#allocation2 + $0xd4] ss:$0 sps:$4 sm:$0x33]   ;;  %v2731_v12 = vrot.slane %v18237_v56, %v18800_v39  ;;  %v2789_v10 = vrot.slane %v18238_v62, %v18800_v39 }
 0x1a3   : > { %17661 = vmatprep.mubr.msk.bf16.mxu1 %vm18513_vm0, %v26578_v58  ;;  %v2746_v51 = vcombine.low %v20733_v17, %v2738_v27  ;;  %v2747_v26 = vcombine.high %v20733_v17, %v2738_v27  ;;  %v5442_v3 = vcombine.low %v20802_v60, %v20807_v5  ;;  %6045 = vmatprep.mubr.bf16.mxu0 %v5275_v31  ;;  %v17615_v45 = vpop.f32.mrf.mxu1 }
 0x1a4   : > { %26715 = vst [vmem:[#allocation157_spill] sm:$0xff] %v20810_v53  ;;  %26716 = vst [vmem:[#allocation158_spill] sm:$0xff] %v20813_v63  ;;  %v4108_v47 = vshll.u32 %v20810_v53, 16  ;;  %v4111_v43 = vshrl.u32 %v20810_v53, 16  ;;  %v4116_v56 = vshll.u32 %v20813_v63, 16  ;;  %6046 = vmatmul.mubr.bf16.gmra.mxu0 %v5273_v54  ;;  %v2748_v62 = vcombine.low %v2731_v12, %v2745_v18 }
 0x1a5   : > { %26717 = vst [vmem:[#allocation159_spill] sm:$0xff] %v20823_v25  ;;  %v20829_v55 = vrot.slane %v2746_v51, %v18800_v39  ;;  %v20832_v59 = vrot.slane %v2747_v26, %v18800_v39  ;;  %v20835_v17 = vrot.slane %v5442_v3, %v18800_v39  ;;  %v2749_v7 = vcombine.high %v2731_v12, %v2745_v18  ;;  %v20845_v51 = vpop.f32.mrf.mxu0  ;;  %v20852_v12 = vpop.f32.mrf.mxu1  ;;  %v711_v53 = vld [vmem:[#allocation2 + $0xdc] sm:$0xf] }
 0x1a6   : > { %v4110_v8 = vsel %vm18896_vm3, %v4103_v2, %v4108_v47  ;;  %v4118_v27 = vsel %vm18896_vm3, %v4111_v43, %v4116_v56  ;;  %v20842_v54 = vrot.slane %v2748_v62, %v18800_v39  ;;  %v2796_v31 = vrot.slane %v18236_v1, %v18800_v39  ;;  %26721 = vst [vmem:[#allocation163_spill] sm:$0xff] %v20845_v51 }
 0x1a7   : > { %26718 = vst [vmem:[#allocation160_spill] sm:$0xff] %v20829_v55  ;;  %26719 = vst [vmem:[#allocation161_spill] sm:$0xff] %v20832_v59  ;;  %v4120_v26 = vshrl.u32 %v20829_v55, 16  ;;  %v4125_v3 = vshll.u32 %v20832_v59, 16  ;;  %v5412_v63 = vcombine.low %v4102_v41, %v4110_v8  ;;  %v20850_v18 = vrot.slane %v2749_v7, %v18800_v39  ;;  %v5948_v56 = vpop.f32.mrf.mxu0  ;;  %v17616_v8 = vpop.f32.mrf.mxu1 }
 0x1a8   : > { %26720 = vst [vmem:[#allocation162_spill] sm:$0xff] %v20842_v54  ;;  %26723 = vst [vmem:[#allocation165_spill] sm:$0xff] %v20852_v12  ;;  %v20856_v2 = vcombine.high %v20829_v55, %v20829_v55  ;;  %v20860_v47 = vcombine.high %v20842_v54, %v20842_v54  ;;  %v20864_v1 = vcombine.high %v20832_v59, %v20832_v59  ;;  %v4128_v13 = vshrl.u32 %v20832_v59, 16  ;;  %v18241_v55 = vld [vmem:[#allocation2 + $0xc0] ss:$12 sps:$4 sm:$0xff]  }
 0x1a9   : > { %26722 = vst [vmem:[#allocation164_spill] sm:$0xff] %v20850_v18  ;;  %v2797_v43 = vcombine.low %v2789_v10, %v2796_v31  ;;  %v4127_v41 = vsel %vm18896_vm3, %v4120_v26, %v4125_v3  ;;  %v20869_v62 = vrot.slane %v5412_v63, %v18800_v39  ;;  %v20873_v7 = vcombine.high %v20850_v18, %v20850_v18  ;;  %v20880_v51 = vpop.f32.mrf.mxu0 }
 0x1aa   : > { %26724 = vst [vmem:[#allocation166_spill] sm:$0xff] %v20856_v2  ;;  %26725 = vst [vmem:[#allocation167_spill] sm:$0xff] %v20860_v47  ;;  %v2798_v45 = vcombine.high %v2789_v10, %v2796_v31  ;;  %v5413_v12 = vcombine.low %v4118_v27, %v4127_v41  ;;  %v4133_v56 = vshll.u32 %v20856_v2, 16  ;;  %v4136_v63 = vshrl.u32 %v20856_v2, 16 }
 0x1ab   : > { %26726 = vst [vmem:[#allocation168_spill] sm:$0xff] %v20864_v1  ;;  %26727 = vst [vmem:[#allocation169_spill] sm:$0xff] %v20873_v7  ;;  %v20876_v25 = vrot.slane %v2797_v43, %v18800_v39  ;;  %v4141_v3 = vshll.u32 %v20864_v1, 16  ;;  %v4144_v10 = vshrl.u32 %v20864_v1, 16  ;;  %v4149_v43 = vshll.u32 %v20842_v54, 16  ;;  %v5953_v8 = vpop.f32.mrf.mxu0  ;;  %v20923_v9 = vpop.f32.mrf.mxu1 }
 0x1ac   : > { %26729 = vst [vmem:[#allocation171_spill] sm:$0xff] %v20880_v51  ;;  %v20883_v26 = vrot.slane %v2798_v45, %v18800_v39  ;;  %v20889_v27 = vrot.slane %v5413_v12, %v18800_v39  ;;  %v4135_v31 = vsel %vm18896_vm3, %v4128_v13, %v4133_v56  ;;  %v4152_v41 = vshrl.u32 %v20842_v54, 16  ;;  %26732 = vst [vmem:[#allocation174_spill] sm:$0xff] %v20923_v9 }
 0x1ad   : > { %26728 = vst [vmem:[#allocation170_spill] sm:$0xff] %v20876_v25  ;;  %v4143_v45 = vsel %vm18896_vm3, %v4136_v63, %v4141_v3  ;;  %v4157_v51 = vshll.u32 %v20850_v18, 16  ;;  %v4160_v37 = vshrl.u32 %v20850_v18, 16  ;;  %v4165_v1 = vshll.u32 %v20860_v47, 16  ;;  %v20906_v8 = vpop.f32.mrf.mxu0 }
 0x1ae   : > { %26730 = vst [vmem:[#allocation172_spill] sm:$0xff] %v20883_v26  ;;  %v5444_v12 = vcombine.low %v20869_v62, %v20889_v27  ;;  %v4151_v13 = vsel %vm18896_vm3, %v4144_v10, %v4149_v43  ;;  %v4168_v56 = vshrl.u32 %v20860_v47, 16  ;;  %v4173_v54 = vshll.u32 %v20873_v7, 16  ;;  %26731 = vst [vmem:[#allocation173_spill] sm:$0xff] %v20906_v8 }
 0x1af   : > { %v4159_v63 = vsel %vm18896_vm3, %v4152_v41, %v4157_v51  ;;  %v4167_v3 = vsel %vm18896_vm3, %v4160_v37, %v4165_v1  ;;  %v4176_v18 = vshrl.u32 %v20873_v7, 16  ;;  %v4181_v59 = vshll.u32 %v20876_v25, 16  ;;  %v5956_v47 = vpop.f32.mrf.mxu0  ;;  %v710_v7 = vld [vmem:[#allocation2 + $0xd8] sm:$0xf] }
 0x1b0   : > { %v20915_v2 = vrot.slane %v5444_v12, %v18800_v39  ;;  %v4175_v10 = vsel %vm18896_vm3, %v4168_v56, %v4173_v54  ;;  %v4184_v43 = vshrl.u32 %v20876_v25, 16  ;;  %v4189_v8 = vshll.u32 %v20883_v26, 16  ;;  %v18248_v25 = vld [vmem:[#allocation2 + $0xd0] ss:$12 sps:$4 sm:$0xff]  }
 0x1b1   : > { %v4183_v51 = vsel %vm18896_vm3, %v4176_v18, %v4181_v59  ;;  %v5477_v41 = vcombine.low %v4135_v31, %v4143_v45  ;;  %v5478_v37 = vcombine.low %v4151_v13, %v4159_v63  ;;  %v5479_v1 = vcombine.low %v4167_v3, %v4175_v10  ;;  %v18242_v18 = vld [vmem:[#allocation2 + $0xc4] ss:$12 sps:$4 sm:$0xff]   ;;  %v18244_v31 = vld [vmem:[#allocation2 + $0xc8] ss:$12 sps:$4 sm:$0x33]   ;;  %v20933_v45 = vpop.f32.mrf.mxu0  ;;  %v17619_v10 = vpop.f32.mrf.mxu1 }
 0x1b2   : > { %v5475_v12 = vcombine.high %v20835_v17, %v20915_v2  ;;  %v4191_v54 = vsel %vm18896_vm3, %v4184_v43, %v4189_v8  ;;  %v5309_v47 = vcombine.high %v20534_v14, %v20557_v61  ;;  %v5311_v59 = vcombine.high %v20628_v11, %v20639_v28  ;;  %26733 = vst [vmem:[#allocation175_spill] sm:$0xff] %v20933_v45  ;;  %v18240_v8 = vld [vmem:[#allocation2 + $0xe0] ss:$0 sps:$4 sm:$0x33]  }
 0x1b3   : > { %v5480_v13 = vcombine.low %v4183_v51, %v4191_v54  ;;  %v20936_v56 = vrot.slane %v5477_v41, %v18800_v39  ;;  %v20939_v63 = vrot.slane %v5478_v37, %v18800_v39  ;;  %v20942_v3 = vrot.slane %v5479_v1, %v18800_v39  ;;  %v5961_v43 = vpop.f32.mrf.mxu0 }
 0x1b4   : > { %17662 = vmatmul.mubr.bf16.gmra.mxu1 %v5475_v12  ;;  %v5325_v14 = vrot.slane %v5309_v47, %v18800_v39  ;;  %v5339_v61 = vrot.slane %v5311_v59, %v18800_v39  ;;  %v5340_v11 = vcombine.low %v20601_v32, %v20664_v50  ;;  %v16371_v28 = vcombine.low %v710_v7, %v711_v53  ;;  %v20956_v12 = vpop.f32.mrf.mxu1 }
 0x1b5   : > { %17665 = vmatprep.mubr.msk.bf16.mxu1 %vm18513_vm0, %v26578_v58  ;;  %v20951_v51 = vrot.slane %v5480_v13, %v18800_v39  ;;  %v5509_v41 = vcombine.low %v20936_v56, %v20939_v63  ;;  %v16441_v37 = vcombine.low %v711_v53, %v711_v53  ;;  %v2822_v1 = vrot.slane %v18241_v55, %v18800_v39  ;;  %v20963_v7 = vpop.f32.mrf.mxu0 }
 0x1b6   : > { %26734 = vst [vmem:[#allocation176_spill] sm:$0xff] %v20956_v12  ;;  %v5342_v54 = vcombine.low %v5325_v14, %v5339_v61  ;;  %v2829_v47 = vrot.slane %v18242_v18, %v18800_v39  ;;  %v2836_v32 = vrot.slane %v16371_v28, %v18800_v39  ;;  %v20961_v50 = vrot.slane %v18244_v31, %v18800_v39  ;;  %v17620_v10 = vpop.f32.mrf.mxu1 }
 0x1b7   : > { %26735 = vst [vmem:[#allocation177_spill] sm:$0xff] %v20963_v7  ;;  %v5511_v59 = vcombine.low %v20942_v3, %v20951_v51  ;;  %v20968_v13 = vrot.slane %v5509_v41, %v18800_v39  ;;  %v2843_v53 = vrot.slane %v16441_v37, %v18800_v39  ;;  %v20972_v55 = vrot.slane %v18240_v8, %v18800_v39  ;;  %v5964_v28 = vpop.f32.mrf.mxu0 }
 0x1b8   : > { %6053 = vmatprep.mubr.bf16.mxu0 %v5342_v54  ;;  %v2844_v18 = vcombine.low %v2822_v1, %v2836_v32  ;;  %v2845_v14 = vcombine.high %v2822_v1, %v2836_v32  ;;  %v5376_v31 = vcombine.high %v20674_v29, %v20677_v16  ;;  %v5378_v61 = vcombine.high %v20712_v19, %v20757_v57 }
 0x1b9   : > { %v20979_v43 = vrot.slane %v5511_v59, %v18800_v39  ;;  %6054 = vmatmul.mubr.bf16.gmra.mxu0 %v5340_v11  ;;  %v2846_v41 = vcombine.low %v2829_v47, %v2843_v53  ;;  %v2847_v37 = vcombine.high %v2829_v47, %v2843_v53  ;;  %v2895_v8 = vcombine.low %v20961_v50, %v20972_v55  ;;  %v20991_v19 = vpop.f32.mrf.mxu0 }
 0x1ba   : > { %v20984_v54 = vrot.slane %v2844_v18, %v18800_v39  ;;  %v20987_v1 = vrot.slane %v2845_v14, %v18800_v39  ;;  %v5392_v29 = vrot.slane %v5376_v31, %v18800_v39  ;;  %v5406_v16 = vrot.slane %v5378_v61, %v18800_v39  ;;  %26738 = vst [vmem:[#allocation180_spill] sm:$0xff] %v20991_v19 }
 0x1bb   : > { %v5542_v57 = vcombine.high %v20968_v13, %v20979_v43  ;;  %v20996_v11 = vrot.slane %v2846_v41, %v18800_v39  ;;  %v20999_v47 = vrot.slane %v2847_v37, %v18800_v39  ;;  %v21002_v32 = vrot.slane %v2895_v8, %v18800_v39  ;;  %v5969_v14 = vpop.f32.mrf.mxu0 }
 0x1bc   : > { %26736 = vst [vmem:[#allocation178_spill] sm:$0xff] %v20984_v54  ;;  %26737 = vst [vmem:[#allocation179_spill] sm:$0xff] %v20987_v1  ;;  %v21006_v59 = vcombine.high %v20984_v54, %v20984_v54  ;;  %v21010_v53 = vcombine.high %v20987_v1, %v20987_v1  ;;  %v4193_v10 = vshrl.u32 %v20984_v54, 16  ;;  %v4198_v18 = vshll.u32 %v20987_v1, 16 }
 0x1bd   : > { %26739 = vst [vmem:[#allocation181_spill] sm:$0xff] %v20996_v11  ;;  %26740 = vst [vmem:[#allocation182_spill] sm:$0xff] %v20999_v47  ;;  %17666 = vmatmul.mubr.bf16.gmra.mxu1 %v5542_v57  ;;  %v21016_v31 = vcombine.high %v20996_v11, %v20996_v11  ;;  %v21020_v61 = vcombine.high %v20999_v47, %v20999_v47  ;;  %v4201_v28 = vshrl.u32 %v20987_v1, 16  ;;  %v4222_v41 = vshll.u32 %v20996_v11, 16  ;;  %v21031_v26 = vpop.f32.mrf.mxu0  ;;  %v713_v1 = vld [vmem:[#allocation2 + $0xe4] sm:$0xf] }
 0x1be   : > { %26741 = vst [vmem:[#allocation183_spill] sm:$0xff] %v21006_v59  ;;  %26742 = vst [vmem:[#allocation184_spill] sm:$0xff] %v21010_v53  ;;  %17669 = vmatprep.mubr.msk.bf16.mxu1 %vm18513_vm0, %v26578_v58  ;;  %v4200_v37 = vsel %vm18896_vm3, %v4193_v10, %v4198_v18  ;;  %v4206_v8 = vshll.u32 %v21006_v59, 16  ;;  %v4209_v57 = vshrl.u32 %v21006_v59, 16  ;;  %v4214_v14 = vshll.u32 %v21010_v53, 16 }
 0x1bf   : > { %26743 = vst [vmem:[#allocation185_spill] sm:$0xff] %v21016_v31  ;;  %26744 = vst [vmem:[#allocation186_spill] sm:$0xff] %v21020_v61  ;;  %v4217_v12 = vshrl.u32 %v21010_v53, 16  ;;  %v4225_v9 = vshrl.u32 %v20996_v11, 16  ;;  %v4230_v19 = vshll.u32 %v20999_v47, 16  ;;  %v4233_v7 = vshrl.u32 %v20999_v47, 16  ;;  %v5972_v54 = vpop.f32.mrf.mxu0 }
 0x1c0   : > { %26745 = vst [vmem:[#allocation187_spill] sm:$0xff] %v21031_v26  ;;  %v4208_v45 = vsel %vm18896_vm3, %v4201_v28, %v4206_v8  ;;  %v4216_v10 = vsel %vm18896_vm3, %v4209_v57, %v4214_v14  ;;  %v4238_v18 = vshll.u32 %v21016_v31, 16  ;;  %v4241_v59 = vshrl.u32 %v21016_v31, 16  ;;  %v714_v28 = vld [vmem:[#allocation2 + $0xe8] sm:$0xf] }
 0x1c1   : > { %v4224_v53 = vsel %vm18896_vm3, %v4217_v12, %v4222_v41  ;;  %v4232_v26 = vsel %vm18896_vm3, %v4225_v9, %v4230_v19  ;;  %v4246_v11 = vshll.u32 %v21020_v61, 16  ;;  %v4249_v47 = vshrl.u32 %v21020_v61, 16  ;;  %v18247_v54 = vld [vmem:[#allocation2 + $0xcc] ss:$12 sps:$4 sm:$0xff]  }
 0x1c2   : > { %v4240_v8 = vsel %vm18896_vm3, %v4233_v7, %v4238_v18  ;;  %v4254_v57 = vshll.u32 %v21002_v32, 16  ;;  %v5544_v14 = vcombine.low %v4200_v37, %v4208_v45  ;;  %v5545_v31 = vcombine.low %v4216_v10, %v4224_v53 }
 0x1c3   : > { %v4248_v12 = vsel %vm18896_vm3, %v4241_v59, %v4246_v11  ;;  %v5546_v41 = vcombine.low %v4232_v26, %v4240_v8  ;;  %v5409_v9 = vcombine.low %v5392_v29, %v5406_v16  ;;  %v5407_v19 = vcombine.low %v20715_v0, %v20786_v52 }
 0x1c4   : > { %v4256_v61 = vsel %vm18896_vm3, %v4249_v47, %v4254_v57  ;;  %v21059_v4 = vrot.slane %v5544_v14, %v18800_v39  ;;  %v21062_v7 = vrot.slane %v5545_v31, %v18800_v39  ;;  %v16373_v45 = vcombine.low %v713_v1, %v714_v28 }
 0x1c5   : > { %v5547_v53 = vcombine.low %v4248_v12, %v4256_v61  ;;  %v21065_v37 = vrot.slane %v5546_v41, %v18800_v39  ;;  %6061 = vmatprep.mubr.bf16.mxu0 %v5409_v9  ;;  %v2896_v26 = vcombine.high %v20961_v50, %v20972_v55  ;;  %v16445_v29 = vcombine.low %v714_v28, %v714_v28  ;;  %v21099_v41 = vpop.f32.mrf.mxu1 }
 0x1c6   : > { %v5576_v52 = vcombine.low %v21059_v4, %v21062_v7  ;;  %6062 = vmatmul.mubr.bf16.gmra.mxu0 %v5407_v19  ;;  %v2920_v0 = vrot.slane %v18247_v54, %v18800_v39  ;;  %v2927_v16 = vrot.slane %v18248_v25, %v18800_v39  ;;  %v2934_v11 = vrot.slane %v16373_v45, %v18800_v39 }
 0x1c7   : > { %v21075_v1 = vrot.slane %v5547_v53, %v18800_v39  ;;  %v21078_v47 = vrot.slane %v2896_v26, %v18800_v39  ;;  %v2941_v59 = vrot.slane %v16445_v29, %v18800_v39  ;;  %v4257_v50 = vshrl.u32 %v21002_v32, 16  ;;  %26748 = vst [vmem:[#allocation190_spill] sm:$0xff] %v21099_v41  ;;  %v17623_v29 = vpop.f32.mrf.mxu1 }
 0x1c8   : > { %v21083_v55 = vrot.slane %v5576_v52, %v18800_v39  ;;  %v2942_v31 = vcombine.low %v2920_v0, %v2934_v11  ;;  %v2943_v61 = vcombine.high %v2920_v0, %v2934_v11  ;;  %v5443_v25 = vcombine.high %v20802_v60, %v20807_v5  ;;  %v21112_v45 = vpop.f32.mrf.mxu0 }
 0x1c9   : > { %26746 = vst [vmem:[#allocation188_spill] sm:$0xff] %v21078_v47  ;;  %v5578_v10 = vcombine.low %v21065_v37, %v21075_v1  ;;  %v2944_v18 = vcombine.low %v2927_v16, %v2941_v59  ;;  %v2945_v28 = vcombine.high %v2927_v16, %v2941_v59  ;;  %v4262_v8 = vshll.u32 %v21078_v47, 16  ;;  %26751 = vst [vmem:[#allocation193_spill] sm:$0xff] %v21112_v45 }
 0x1ca   : > { %v21091_v57 = vrot.slane %v2942_v31, %v18800_v39  ;;  %v21094_v14 = vrot.slane %v2943_v61, %v18800_v39  ;;  %v5445_v54 = vcombine.high %v20869_v62, %v20889_v27  ;;  %v5459_v12 = vrot.slane %v5443_v25, %v18800_v39  ;;  %v5977_v59 = vpop.f32.mrf.mxu0 }
 0x1cb   : > { %v21102_v60 = vrot.slane %v5578_v10, %v18800_v39  ;;  %v21105_v5 = vrot.slane %v2944_v18, %v18800_v39  ;;  %v21108_v9 = vrot.slane %v2945_v28, %v18800_v39  ;;  %v4264_v19 = vsel %vm18896_vm3, %v4257_v50, %v4262_v8  ;;  %v18254_v10 = vld [vmem:[#allocation2 + $0xd4] ss:$12 sps:$4 sm:$0x33]   ;;  %v21140_v18 = vpop.f32.mrf.mxu1 }
 0x1cc   : > { %26747 = vst [vmem:[#allocation189_spill] sm:$0xff] %v21094_v14  ;;  %v21116_v62 = vcombine.high %v21091_v57, %v21091_v57  ;;  %v21120_v27 = vcombine.high %v21094_v14, %v21094_v14  ;;  %v4266_v53 = vshrl.u32 %v21091_v57, 16  ;;  %v4271_v26 = vshll.u32 %v21094_v14, 16  ;;  %26754 = vst [vmem:[#allocation196_spill] sm:$0xff] %v21140_v18  ;;  %v21146_v47 = vpop.f32.mrf.mxu0 }
 0x1cd   : > { %26749 = vst [vmem:[#allocation191_spill] sm:$0xff] %v21105_v5  ;;  %26750 = vst [vmem:[#allocation192_spill] sm:$0xff] %v21108_v9  ;;  %v5609_v52 = vcombine.high %v21083_v55, %v21102_v60  ;;  %v21128_v0 = vcombine.high %v21105_v5, %v21105_v5  ;;  %v21132_v16 = vcombine.high %v21108_v9, %v21108_v9  ;;  %v4274_v11 = vshrl.u32 %v21094_v14, 16  ;;  %v17624_v41 = vpop.f32.mrf.mxu1  ;;  %v18253_v14 = vld [vmem:[#allocation2 + $0xec] ss:$0 sps:$4 sm:$0x33]  }
 0x1ce   : > { %26752 = vst [vmem:[#allocation194_spill] sm:$0xff] %v21120_v27  ;;  %v4273_v50 = vsel %vm18896_vm3, %v4266_v53, %v4271_v26  ;;  %v4279_v31 = vshll.u32 %v21116_v62, 16  ;;  %v4282_v61 = vshrl.u32 %v21116_v62, 16  ;;  %v4287_v25 = vshll.u32 %v21120_v27, 16  ;;  %26755 = vst [vmem:[#allocation197_spill] sm:$0xff] %v21146_v47 }
 0x1cf   : > { %26753 = vst [vmem:[#allocation195_spill] sm:$0xff] %v21128_v0  ;;  %17670 = vmatmul.mubr.bf16.gmra.mxu1 %v5609_v52  ;;  %v4290_v28 = vshrl.u32 %v21120_v27, 16  ;;  %v4295_v8 = vshll.u32 %v21105_v5, 16  ;;  %v4298_v29 = vshrl.u32 %v21105_v5, 16  ;;  %v4303_v59 = vshll.u32 %v21108_v9, 16 }
 0x1d0   : > { %17673 = vmatprep.mubr.msk.bf16.mxu1 %vm18513_vm0, %v26578_v58  ;;  %v4281_v53 = vsel %vm18896_vm3, %v4274_v11, %v4279_v31  ;;  %v4289_v26 = vsel %vm18896_vm3, %v4282_v61, %v4287_v25  ;;  %v4306_v52 = vshrl.u32 %v21108_v9, 16  ;;  %v4311_v18 = vshll.u32 %v21128_v0, 16  ;;  %v5980_v11 = vpop.f32.mrf.mxu0 }
 0x1d1   : > { %v4297_v45 = vsel %vm18896_vm3, %v4290_v28, %v4295_v8  ;;  %v4305_v47 = vsel %vm18896_vm3, %v4298_v29, %v4303_v59  ;;  %v4314_v27 = vshrl.u32 %v21128_v0, 16  ;;  %v4319_v5 = vshll.u32 %v21132_v16, 16 }
 0x1d2   : > { %v4313_v31 = vsel %vm18896_vm3, %v4306_v52, %v4311_v18  ;;  %v5611_v61 = vcombine.low %v4264_v19, %v4273_v50  ;;  %v5612_v25 = vcombine.low %v4281_v53, %v4289_v26  ;;  %v5613_v9 = vcombine.low %v4297_v45, %v4305_v47 }
 0x1d3   : > { %v4321_v41 = vsel %vm18896_vm3, %v4314_v27, %v4319_v5  ;;  %v5473_v28 = vrot.slane %v5445_v54, %v18800_v39  ;;  %v5474_v8 = vcombine.low %v20835_v17, %v20915_v2  ;;  %v2985_v29 = vrot.slane %v18254_v10, %v18800_v39 }
 0x1d4   : > { %v5614_v59 = vcombine.low %v4313_v31, %v4321_v41  ;;  %v21171_v0 = vrot.slane %v5611_v61, %v18800_v39  ;;  %v21174_v11 = vrot.slane %v5612_v25, %v18800_v39  ;;  %v21177_v19 = vrot.slane %v5613_v9, %v18800_v39 }
 0x1d5   : > { %v5476_v47 = vcombine.low %v5459_v12, %v5473_v28  ;;  %v2992_v5 = vrot.slane %v18253_v14, %v18800_v39  ;;  %v5510_v54 = vcombine.high %v20936_v56, %v20939_v63  ;;  %v4322_v45 = vshrl.u32 %v21132_v16, 16  ;;  %v21193_v56 = vpop.f32.mrf.mxu1 }
 0x1d6   : > { %v21183_v17 = vrot.slane %v5614_v59, %v18800_v39  ;;  %v5643_v2 = vcombine.low %v21171_v0, %v21174_v11  ;;  %v5512_v27 = vcombine.high %v20942_v3, %v20951_v51  ;;  %v6309_v14 = vcombine.low %v18863_v21, %v18869_v23  ;;  %26756 = vst [vmem:[#allocation198_spill] sm:$0xff] %v21193_v56  ;;  %v21218_v28 = vpop.f32.mrf.mxu0  ;;  %v26775_v56 = vld [vmem:[#allocation34_spill] sm:$0xff] }
 0x1d7   : > { %6069 = vmatprep.mubr.bf16.mxu0 %v5476_v47  ;;  %v2993_v9 = vcombine.low %v2985_v29, %v2992_v5  ;;  %v2994_v50 = vcombine.high %v2985_v29, %v2992_v5  ;;  %v5526_v12 = vrot.slane %v5510_v54, %v18800_v39  ;;  %v16633_v3 = vcombine.high %v18863_v21, %v18869_v23  ;;  %v17627_v31 = vpop.f32.mrf.mxu1 }
 0x1d8   : > { %v5645_v63 = vcombine.low %v21177_v19, %v21183_v17  ;;  %v21198_v10 = vrot.slane %v5643_v2, %v18800_v39  ;;  %6070 = vmatmul.mubr.bf16.gmra.mxu0 %v5474_v8  ;;  %v5540_v18 = vrot.slane %v5512_v27, %v18800_v39  ;;  %v6311_v26 = vcombine.low %v18866_v22, %v18872_v24 }
 0x1d9   : > { %v21204_v51 = vrot.slane %v2993_v9, %v18800_v39  ;;  %v21207_v53 = vrot.slane %v2994_v50, %v18800_v39  ;;  %v16634_v52 = vcombine.high %v18866_v22, %v18872_v24  ;;  %v6319_v41 = vrot.slane %v6309_v14, %v18800_v39  ;;  %26758 = vst [vmem:[#allocation200_spill] sm:$0xff] %v21218_v28  ;;  %v21224_v5 = vpop.f32.mrf.mxu1  ;;  %v5985_v50 = vpop.f32.mrf.mxu0 }
 0x1da   : > { %v21214_v61 = vrot.slane %v5645_v63, %v18800_v39  ;;  %v5543_v25 = vcombine.low %v5526_v12, %v5540_v18  ;;  %v6326_v21 = vrot.slane %v16633_v3, %v18800_v39  ;;  %v6333_v47 = vrot.slane %v6311_v26, %v18800_v39  ;;  %26759 = vst [vmem:[#allocation201_spill] sm:$0xff] %v21224_v5 }
 0x1db   : > { %26757 = vst [vmem:[#allocation199_spill] sm:$0xff] %v21207_v53  ;;  %v4327_v8 = vshll.u32 %v21204_v51, 16  ;;  %v4330_v29 = vshrl.u32 %v21204_v51, 16  ;;  %v4335_v59 = vshll.u32 %v21207_v53, 16  ;;  %v5541_v2 = vcombine.low %v20968_v13, %v20979_v43  ;;  %v17628_v3 = vpop.f32.mrf.mxu1 }
 0x1dc   : > { %v5676_v54 = vcombine.high %v21198_v10, %v21214_v61  ;;  %6077 = vmatprep.mubr.bf16.mxu0 %v5543_v25  ;;  %v6340_v27 = vrot.slane %v16634_v52, %v18800_v39  ;;  %v6342_v9 = vcombine.high %v6319_v41, %v6326_v21  ;;  %v5577_v63 = vcombine.high %v21059_v4, %v21062_v7  ;;  %v21240_v52 = vpop.f32.mrf.mxu0 }
 0x1dd   : > { %v4329_v12 = vsel %vm18896_vm3, %v4322_v45, %v4327_v8  ;;  %v4337_v14 = vsel %vm18896_vm3, %v4330_v29, %v4335_v59  ;;  %v5579_v18 = vcombine.high %v21065_v37, %v21075_v1  ;;  %26760 = vst [vmem:[#allocation202_spill] sm:$0xff] %v21240_v52  ;;  %v6341_v45 = vcombine.low %v6319_v41, %v6326_v21 }
 0x1de   : > { %17674 = vmatmul.mubr.bf16.gmra.mxu1 %v5676_v54  ;;  %v5678_v26 = vcombine.low %v4329_v12, %v4337_v14  ;;  %v6344_v13 = vcombine.high %v6333_v47, %v6340_v27  ;;  %v6358_v43 = vrot.slane %v6342_v9, %v18800_v39  ;;  %v5593_v35 = vrot.slane %v5577_v63, %v18800_v39  ;;  %v5988_v25 = vpop.f32.mrf.mxu0 }
 0x1df   : > { %17677 = vmatprep.mubr.msk.bf16.mxu1 %vm18513_vm0, %v26578_v58  ;;  %v5607_v31 = vrot.slane %v5579_v18, %v18800_v39  ;;  %v6343_v7 = vcombine.low %v6333_v47, %v6340_v27  ;;  %v6376_v1 = vcombine.low %v18843_v15, %v18959_v36  ;;  %v6377_v29 = vcombine.low %v18966_v6, %v18980_v44 }
 0x1e0   : > { %v21247_v4 = vrot.slane %v5678_v26, %v18800_v39  ;;  %6078 = vmatmul.mubr.bf16.gmra.mxu0 %v5541_v2  ;;  %v6372_v37 = vrot.slane %v6344_v13, %v18800_v39  ;;  %v6378_v41 = vcombine.low %v18993_v48, %v18963_v38  ;;  %v6379_v21 = vcombine.low %v18969_v40, %v18989_v46  ;;  %v21263_v2 = vpop.f32.mrf.mxu0 }
 0x1e1   : > { %v5610_v8 = vcombine.low %v5593_v35, %v5607_v31  ;;  %v6386_v54 = vrot.slane %v6376_v1, %v18800_v39  ;;  %26761 = vst [vmem:[#allocation203_spill] sm:$0xff] %v21263_v2  ;;  %v6393_v27 = vrot.slane %v6377_v29, %v18800_v39  ;;  %v5644_v48 = vcombine.high %v21171_v0, %v21174_v11  ;;  %v26764_v31 = vld [vmem:[#allocation24_spill] sm:$0xff]  ;;  %v26781_v2 = vld [vmem:[#allocation43_spill] sm:$0xff] }
 0x1e2   : > { %v21260_v59 = vrot.slane %v21247_v4, %v18800_v39  ;;  %v6375_v47 = vcombine.low %v6358_v43, %v6372_v37  ;;  %v6400_v44 = vrot.slane %v6378_v41, %v18800_v39  ;;  %v6407_v9 = vrot.slane %v6379_v21, %v18800_v39  ;;  %v5993_v63 = vpop.f32.mrf.mxu0 }
 0x1e3   : > { %6085 = vmatprep.mubr.bf16.mxu0 %v5610_v8  ;;  %v5608_v50 = vcombine.low %v21083_v55, %v21102_v60  ;;  %v5646_v12 = vcombine.high %v21177_v19, %v21183_v17  ;;  %v6443_v14 = vcombine.low %v18997_v49, %v19059_v20  ;;  %v21279_v18 = vrot.slane %v6341_v45, %v18800_v39  ;;  %v26762_v60 = vld [vmem:[#allocation21_spill] sm:$0xff]  ;;  %v21294_v45 = vpop.f32.mrf.mxu1 }
 0x1e4   : > { %v5701_v46 = vcombine.high %v21260_v59, %v21260_v59  ;;  %v21282_v3 = vrot.slane %v6343_v7, %v18800_v39  ;;  %v6409_v0 = vcombine.high %v6386_v54, %v6393_v27  ;;  %v6411_v11 = vcombine.high %v6400_v44, %v6407_v9  ;;  %v21290_v17 = vpop.f32.mrf.mxu0  ;;  %v26765_v7 = vld [vmem:[#allocation23_spill] sm:$0xff] }
 0x1e5   : > { %v5660_v26 = vrot.slane %v5644_v48, %v18800_v39  ;;  %v5674_v55 = vrot.slane %v5646_v12, %v18800_v39  ;;  %v6444_v19 = vcombine.low %v26762_v60, %v19079_v42  ;;  %v16635_v49 = vcombine.high %v26762_v60, %v19079_v42  ;;  %26763 = vst [vmem:[#allocation21_spill] sm:$0xff] %v21290_v17  ;;  %v17631_v48 = vpop.f32.mrf.mxu1 }
 0x1e6   : > { %17678 = vmatmul.mubr.bf16.gmra.mxu1 %v5701_v46  ;;  %v6425_v13 = vrot.slane %v6409_v0, %v18800_v39  ;;  %v6439_v43 = vrot.slane %v6411_v11, %v18800_v39  ;;  %v6446_v37 = vcombine.low %v26765_v7, %v26764_v31  ;;  %v6453_v1 = vrot.slane %v6443_v14, %v18800_v39  ;;  %v5996_v8 = vpop.f32.mrf.mxu0  ;;  %v26769_v0 = vld [vmem:[#allocation35_spill] sm:$0xff]  ;;  %v26770_v11 = vld [vmem:[#allocation33_spill] sm:$0xff] }
 0x1e7   : > { %7912 = vmatprep.mubr.bf16.mxu1 %v6375_v47  ;;  %v5677_v35 = vcombine.low %v5660_v26, %v5674_v55  ;;  %v6460_v25 = vrot.slane %v6444_v19, %v18800_v39  ;;  %v6408_v29 = vcombine.low %v6386_v54, %v6393_v27  ;;  %v6410_v41 = vcombine.low %v6400_v44, %v6407_v9  ;;  %v26767_v27 = vld [vmem:[#allocation31_spill] sm:$0xff]  ;;  %v26768_v44 = vld [vmem:[#allocation29_spill] sm:$0xff]  ;;  %v26771_v26 = vld [vmem:[#allocation32_spill] sm:$0xff]  ;;  %v21316_v19 = vpop.f32.mrf.mxu1 }
 0x1e8   : > { %6086 = vmatmul.mubr.bf16.gmra.mxu0 %v5608_v50  ;;  %v6467_v21 = vrot.slane %v16635_v49, %v18800_v39  ;;  %v5686_v47 = vcombine.high %v21247_v4, %v21247_v4  ;;  %v6373_v46 = vcombine.low %v21279_v18, %v21282_v3  ;;  %v6442_v50 = vcombine.low %v6425_v13, %v6439_v43  ;;  %v21308_v63 = vpop.f32.mrf.mxu0  ;;  %v26772_v55 = vld [vmem:[#allocation36_spill] sm:$0xff] }
 0x1e9   : > { %6093 = vmatprep.mubr.bf16.mxu0 %v5677_v35  ;;  %v6474_v12 = vrot.slane %v6446_v37, %v18800_v39  ;;  %v16636_v14 = vcombine.high %v26765_v7, %v26764_v31  ;;  %26766 = vst [vmem:[#allocation204_spill] sm:$0xff] %v21308_v63  ;;  %v6476_v54 = vcombine.high %v6453_v1, %v6460_v25  ;;  %v18258_v43 = vld [vmem:[#allocation6 + $0x1b8] sm:$0xff]   ;;  %v26777_v63 = vld [vmem:[#allocation38_spill] sm:$0xff]  ;;  %v26815_v7 = vld [vmem:[#allocation93_spill] sm:$0xff] }
 0x1ea   : > { %v6511_v9 = vcombine.low %v26768_v44, %v26767_v27  ;;  %v6512_v4 = vcombine.low %v26770_v11, %v26769_v0  ;;  %v6513_v60 = vcombine.low %v26772_v55, %v26771_v26  ;;  %v5675_v49 = vcombine.low %v21198_v10, %v21214_v61  ;;  %v6001_v35 = vpop.f32.mrf.mxu0  ;;  %v17632_v0 = vpop.f32.mrf.mxu1  ;;  %v26801_v26 = vld [vmem:[#allocation75_spill] sm:$0xff]  ;;  %v26812_v44 = vld [vmem:[#allocation92_spill] sm:$0xff] }
 0x1eb   : > { %v6478_v13 = vcombine.high %v6467_v21, %v6474_v12  ;;  %v21321_v37 = vrot.slane %v6408_v29, %v18800_v39  ;;  %v21324_v8 = vrot.slane %v6410_v41, %v18800_v39  ;;  %v5700_v48 = vrot.slane %v5686_v47, %v18800_v39  ;;  %v18260_v47 = vld [vmem:[#allocation6 + $0x1b0] sm:$0xff]   ;;  %v26814_v31 = vld [vmem:[#allocation96_spill] sm:$0xff] }
 0x1ec   : > { %v6520_v55 = vrot.slane %v16636_v14, %v18800_v39  ;;  %v6527_v53 = vrot.slane %v6511_v9, %v18800_v39  ;;  %v6534_v5 = vrot.slane %v6512_v4, %v18800_v39  ;;  %v6541_v10 = vrot.slane %v6513_v60, %v18800_v39  ;;  %v21331_v61 = vpop.f32.mrf.mxu0  ;;  %v26774_v60 = vld [vmem:[#allocation37_spill] sm:$0xff] }
 0x1ed   : > { %26773 = vst [vmem:[#allocation35_spill] sm:$0xff] %v21331_v61  ;;  %v6492_v29 = vrot.slane %v6476_v54, %v18800_v39  ;;  %v6506_v41 = vrot.slane %v6478_v13, %v18800_v39  ;;  %v6475_v14 = vcombine.low %v6453_v1, %v6460_v25  ;;  %v6477_v9 = vcombine.low %v6467_v21, %v6474_v12 }
 0x1ee   : > { %7913 = vmatmul.mubr.bf16.vlgmr.msra.gmra.mxu1 %v6373_v46  ;;  %v6004_v35 = vpop.f32.mrf.mxu0  ;;  %v6440_v46 = vcombine.low %v21321_v37, %v21324_v8  ;;  %v6543_v4 = vcombine.high %v6520_v55, %v6527_v53  ;;  %v6545_v0 = vcombine.high %v6534_v5, %v6541_v10  ;;  %v6577_v61 = vcombine.low %v26775_v56, %v26774_v60  ;;  %v18261_v60 = vld [vmem:[#allocation6 + $0x1a8] sm:$0xff]  }
 0x1ef   : > { %7920 = vmatprep.mubr.bf16.mxu1 %v6442_v50  ;;  %10792 = vmatpush1.bf16.msra.mxu1 %v18258_v43  ;;  %v26776_v50 = vld [vmem:[#allocation39_spill] sm:$0xff]  ;;  %v6509_v13 = vcombine.low %v6492_v29, %v6506_v41  ;;  %v26778_v43 = vld [vmem:[#allocation42_spill] sm:$0xff]  ;;  %v26779_v35 = vld [vmem:[#allocation41_spill] sm:$0xff]  ;;  %v21349_v21 = vrot.slane %v6475_v14, %v18800_v39  ;;  %v21352_v12 = vrot.slane %v6477_v9, %v18800_v39 }
 0x1f0   : > { %6094 = vmatmul.mubr.bf16.gmra.mxu0 %v5675_v49  ;;  %v6578_v54 = vcombine.low %v26777_v63, %v26776_v50  ;;  %10793 = vmatprep.subr.bf16.mxu1 %v26575_v30  ;;  %v21342_v49 = vpop.f32.mrf.mxu0  ;;  %v6579_v17 = vcombine.low %v26779_v35, %v26778_v43  ;;  %v16637_v1 = vcombine.high %v26779_v35, %v26778_v43  ;;  %v26791_v50 = vld [vmem:[#allocation60_spill] sm:$0xff] }
 0x1f1   : > { %6101 = vmatprep.mubr.bf16.mxu0 %v5700_v48  ;;  %v6559_v63 = vrot.slane %v6543_v4, %v18800_v39  ;;  %v6573_v48 = vrot.slane %v6545_v0, %v18800_v39  ;;  %v6587_v29 = vrot.slane %v6577_v61, %v18800_v39  ;;  %v6507_v61 = vcombine.low %v21349_v21, %v21352_v12 }
 0x1f2   : > { %v6009_v25 = vpop.f32.mrf.mxu0  ;;  %v6594_v41 = vrot.slane %v6578_v54, %v18800_v39  ;;  %v6601_v14 = vrot.slane %v6579_v17, %v18800_v39  ;;  %v6608_v9 = vrot.slane %v16637_v1, %v18800_v39  ;;  %v26780_v54 = vld [vmem:[#allocation47_spill] sm:$0xff]  ;;  %v6982_v42 = vcombine.low %v26815_v7, %v26814_v31 }
 0x1f3   : > { %10794 = vmatpush1.bf16.msra.mxu1 %v18260_v47  ;;  %v6544_v25 = vcombine.low %v6534_v5, %v6541_v10  ;;  %v6576_v4 = vcombine.low %v6559_v63, %v6573_v48  ;;  %v16638_v1 = vcombine.high %v26781_v2, %v26780_v54  ;;  %v26784_v5 = vld [vmem:[#allocation53_spill] sm:$0xff]  ;;  %v6374_v63 = vcombine.high %v21279_v18, %v21282_v3  ;;  %v18259_v48 = vld [vmem:[#allocation6 + $0x238] sm:$0xff]  }
 0x1f4   : > { %10795 = vmatprep.subr.bf16.mxu1 %v26575_v30  ;;  %v21359_v47 = vpop.f32.mrf.mxu0  ;;  %v6610_v0 = vcombine.high %v6587_v29, %v6594_v41  ;;  %v6612_v17 = vcombine.high %v6601_v14, %v6608_v9 }
 0x1f6   : > { %7921 = vmatmul.mubr.bf16.gmra.mxu1 %v6440_v46  ;;  %v6012_v35 = vpop.f32.mrf.mxu0  ;;  %v6542_v46 = vcombine.low %v6520_v55, %v6527_v53  ;;  %v26785_v55 = vld [vmem:[#allocation52_spill] sm:$0xff]  ;;  %v6626_v28 = vrot.slane %v6610_v0, %v18800_v39 }
 0x1f7   : > { %7928 = vmatprep.mubr.bf16.mxu1 %v6509_v13  ;;  %v6644_v13 = vcombine.low %v26781_v2, %v26780_v54  ;;  %10796 = vmatpush1.bf16.msra.mxu1 %v18261_v60  ;;  %v26783_v35 = vld [vmem:[#allocation49_spill] sm:$0xff]  ;;  %v6647_v10 = vcombine.low %v26785_v55, %v26784_v5  ;;  %v21383_v60 = vrot.slane %v6544_v25, %v18800_v39  ;;  %v26786_v54 = vld [vmem:[#allocation55_spill] sm:$0xff]  ;;  %v26787_v2 = vld [vmem:[#allocation54_spill] sm:$0xff] }
 0x1f8   : > { %6102 = vmatmul.mubr.bf16.gmra.mxu0 %v21260_v59  ;;  %v26782_v59 = vld [vmem:[#allocation51_spill] sm:$0xff]  ;;  %10797 = vmatprep.subr.bf16.mxu1 %v26575_v30  ;;  %v21380_v52 = vrot.slane %v6542_v46, %v18800_v39  ;;  %v6640_v5 = vrot.slane %v6612_v17, %v18800_v39  ;;  %v6661_v55 = vrot.slane %v16638_v1, %v18800_v39  ;;  %v18263_v46 = vld [vmem:[#allocation6 + $0x1a0] sm:$0xff]  }
 0x1f9   : > { %17697 = vmatprep.mubr.msk.bf16.mxu0 %vm18513_vm0, %v26578_v58  ;;  %v6646_v53 = vcombine.low %v26783_v35, %v26782_v59  ;;  %v6654_v59 = vrot.slane %v6644_v13, %v18800_v39  ;;  %v6675_v3 = vrot.slane %v6647_v10, %v18800_v39  ;;  %v6611_v25 = vcombine.low %v6601_v14, %v6608_v9  ;;  %v26789_v13 = vld [vmem:[#allocation56_spill] sm:$0xff]  ;;  %v26790_v1 = vld [vmem:[#allocation57_spill] sm:$0xff] }
 0x1fa   : > { %v21387_v35 = vpop.f32.mrf.mxu1  ;;  %v6711_v0 = vcombine.low %v26787_v2, %v26786_v54  ;;  %v6714_v10 = vcombine.low %v19619_v34, %v19622_v33  ;;  %v6508_v54 = vcombine.high %v21349_v21, %v21352_v12 }
 0x1fb   : > { %v6668_v18 = vrot.slane %v6646_v53, %v18800_v39  ;;  %v6713_v53 = vcombine.low %v26791_v50, %v26790_v1  ;;  %10798 = vmatpush1.bf16.msra.mxu1 %v18263_v46  ;;  %v21412_v50 = vrot.slane %v6611_v25, %v18800_v39  ;;  %v6676_v25 = vcombine.low %v6654_v59, %v6661_v55 }
 0x1fc   : > { %v17635_v43 = vpop.f32.mrf.mxu1  ;;  %10799 = vmatprep.subr.bf16.mxu1 %v26575_v30  ;;  %v21418_v1 = vrot.slane %v6711_v0, %v18800_v39  ;;  %v6742_v46 = vrot.slane %v6714_v10, %v18800_v39  ;;  %v18265_v0 = vld [vmem:[#allocation6 + $0x228] sm:$0xff]  }
 0x1fd   : > { %v6643_v43 = vcombine.low %v6626_v28, %v6640_v5  ;;  %v6679_v14 = vcombine.high %v6668_v18, %v6675_v3  ;;  %v21424_v5 = vrot.slane %v6713_v53, %v18800_v39 }
 0x1fe   : > { %7929 = vmatmul.mubr.bf16.gmra.mxu1 %v6507_v61  ;;  %v6609_v61 = vcombine.low %v6587_v29, %v6594_v41  ;;  %v6574_v29 = vcombine.low %v21380_v52, %v21383_v60  ;;  %v21406_v2 = vpop.f32.mrf.mxu1  ;;  %v6677_v41 = vcombine.high %v6654_v59, %v6661_v55  ;;  %v26794_v55 = vld [vmem:[#allocation70_spill] sm:$0xff] }
 0x1ff   : > { %7936 = vmatprep.mubr.bf16.mxu1 %v6576_v4  ;;  %v26788_v4 = vld [vmem:[#allocation59_spill] sm:$0xff]  ;;  %v6746_v10 = vcombine.high %v21424_v5, %v6742_v46 }
 0x200   : > { %17698 = vmatmul.mubr.bf16.vlgmr.msra.gmra.mxu0 %v6374_v63  ;;  %v6712_v17 = vcombine.low %v26789_v13, %v26788_v4  ;;  %v18262_v63 = vld [vmem:[#allocation6 + $0x230] sm:$0xff]   ;;  %v21409_v9 = vrot.slane %v6609_v61, %v18800_v39  ;;  %v17636_v4 = vpop.f32.mrf.mxu1  ;;  %v6693_v61 = vrot.slane %v6677_v41, %v18800_v39 }
 0x201   : > { %17782 = vmatpush3.bf16.msra.mxu0 %v18259_v48  ;;  %17701 = vmatprep.mubr.msk.bf16.mxu0 %vm18513_vm0, %v26578_v58  ;;  %v6441_v48 = vcombine.high %v21321_v37, %v21324_v8  ;;  %v6707_v37 = vrot.slane %v6679_v14, %v18800_v39  ;;  %v18264_v8 = vld [vmem:[#allocation6 + $0x198] sm:$0xff]   ;;  %v6678_v4 = vcombine.low %v6668_v18, %v6675_v3 }
 0x202   : > { %17783 = vmatprep.subr.bf16.mxu0 %v26578_v58  ;;  %v21421_v28 = vrot.slane %v6712_v17, %v18800_v39  ;;  %v6641_v17 = vcombine.low %v21409_v9, %v21412_v50  ;;  %v26795_v14 = vld [vmem:[#allocation68_spill] sm:$0xff]  ;;  %10800 = vmatpush1.bf16.msra.mxu1 %v18264_v8  ;;  %v18266_v8 = vld [vmem:[#allocation6 + $0x190] sm:$0xff]  }
 0x203   : > { %v6781_v18 = vcombine.low %v26795_v14, %v26794_v55  ;;  %v21453_v13 = vrot.slane %v6678_v4, %v18800_v39  ;;  %v6774_v55 = vrot.slane %v6746_v10, %v18800_v39  ;;  %10801 = vmatprep.subr.bf16.mxu1 %v26575_v30 }
 0x204   : > { %v6744_v53 = vcombine.high %v21418_v1, %v21421_v28 }
 0x205   : > { %17784 = vmatpush3.bf16.msra.mxu0 %v18262_v63  ;;  %v16639_v63 = vcombine.high %v19619_v34, %v19622_v33  ;;  %v21450_v33 = vrot.slane %v6676_v25, %v18800_v39  ;;  %v6809_v12 = vrot.slane %v6781_v18, %v18800_v39  ;;  %v26796_v18 = vld [vmem:[#allocation72_spill] sm:$0xff] }
 0x206   : > { %7937 = vmatmul.mubr.bf16.gmra.mxu1 %v6574_v29  ;;  %v26792_v29 = vld [vmem:[#allocation64_spill] sm:$0xff]  ;;  %17785 = vmatprep.subr.bf16.mxu0 %v26578_v58  ;;  %v21445_v3 = vpop.f32.mrf.mxu1 }
 0x207   : > { %7944 = vmatprep.mubr.bf16.mxu1 %v6643_v43  ;;  %v26793_v43 = vld [vmem:[#allocation63_spill] sm:$0xff]  ;;  %v6708_v4 = vcombine.low %v21450_v33, %v21453_v13  ;;  %10802 = vmatpush1.bf16.msra.mxu1 %v18266_v8 }
 0x208   : > { %17702 = vmatmul.mubr.bf16.gmra.mxu0 %v6441_v48  ;;  %v6779_v41 = vcombine.low %v26793_v43, %v26792_v29  ;;  %v16640_v59 = vcombine.high %v26793_v43, %v26792_v29  ;;  %v6710_v48 = vcombine.low %v6693_v61, %v6707_v37  ;;  %v17639_v34 = vpop.f32.mrf.mxu1  ;;  %v6760_v29 = vrot.slane %v6744_v53, %v18800_v39  ;;  %v18268_v53 = vld [vmem:[#allocation6 + $0x220] sm:$0xff]   ;;  %v26800_v43 = vld [vmem:[#allocation76_spill] sm:$0xff] }
 0x209   : > { %17705 = vmatprep.mubr.msk.bf16.mxu0 %vm18513_vm0, %v26578_v58  ;;  %17786 = vmatpush3.bf16.msra.mxu0 %v18265_v0  ;;  %v6788_v61 = vrot.slane %v16639_v63, %v18800_v39  ;;  %v6745_v63 = vcombine.low %v21424_v5, %v6742_v46  ;;  %v26798_v34 = vld [vmem:[#allocation74_spill] sm:$0xff]  ;;  %v6847_v56 = vcombine.low %v26801_v26, %v26800_v43 }
 0x20a   : > { %v6795_v37 = vrot.slane %v6779_v41, %v18800_v39  ;;  %v6802_v21 = vrot.slane %v16640_v59, %v18800_v39  ;;  %v21462_v25 = vpop.f32.mrf.mxu1  ;;  %v6777_v10 = vcombine.low %v6760_v29, %v6774_v55  ;;  %10803 = vmatprep.subr.bf16.mxu1 %v26575_v30  ;;  %v6575_v5 = vcombine.high %v21380_v52, %v21383_v60  ;;  %v18267_v46 = vld [vmem:[#allocation6 + $0x188] sm:$0xff]  }
 0x20b   : > { %17787 = vmatprep.subr.bf16.mxu0 %v26578_v58  ;;  %v21487_v55 = vrot.slane %v6745_v63, %v18800_v39  ;;  %v21494_v60 = vrot.slane %v6847_v56, %v18800_v39  ;;  %10804 = vmatpush1.bf16.msra.mxu1 %v18267_v46 }
 0x20c   : > { %v17640_v0 = vpop.f32.mrf.mxu1  ;;  %v6811_v41 = vcombine.high %v6788_v61, %v6795_v37  ;;  %v6813_v59 = vcombine.high %v6802_v21, %v6809_v12  ;;  %v6812_v63 = vcombine.low %v6802_v21, %v6809_v12  ;;  %10805 = vmatprep.subr.bf16.mxu1 %v26575_v30  ;;  %v26806_v21 = vld [vmem:[#allocation85_spill] sm:$0xff]  ;;  %v26807_v12 = vld [vmem:[#allocation83_spill] sm:$0xff] }
 0x20d   : > { %v26799_v0 = vld [vmem:[#allocation73_spill] sm:$0xff]  ;;  %17788 = vmatpush3.bf16.msra.mxu0 %v18268_v53  ;;  %v6810_v53 = vcombine.low %v6788_v61, %v6795_v37 }
 0x20e   : > { %7945 = vmatmul.mubr.bf16.gmra.mxu1 %v6641_v17  ;;  %v6743_v17 = vcombine.low %v21418_v1, %v21421_v28  ;;  %v6846_v14 = vcombine.low %v26799_v0, %v26798_v34  ;;  %v26802_v1 = vld [vmem:[#allocation78_spill] sm:$0xff]  ;;  %v26803_v28 = vld [vmem:[#allocation77_spill] sm:$0xff]  ;;  %v6827_v43 = vrot.slane %v6811_v41, %v18800_v39  ;;  %v6841_v8 = vrot.slane %v6813_v59, %v18800_v39  ;;  %v26804_v59 = vld [vmem:[#allocation84_spill] sm:$0xff] }
 0x20f   : > { %7952 = vmatprep.mubr.bf16.mxu1 %v6710_v48  ;;  %v26797_v48 = vld [vmem:[#allocation71_spill] sm:$0xff]  ;;  %v6848_v27 = vcombine.low %v26803_v28, %v26802_v1  ;;  %v6914_v28 = vcombine.low %v26807_v12, %v26806_v21  ;;  %17789 = vmatprep.subr.bf16.mxu0 %v26578_v58 }
 0x210   : > { %17706 = vmatmul.mubr.bf16.gmra.mxu0 %v6508_v54  ;;  %v6845_v54 = vcombine.low %v26797_v48, %v26796_v18  ;;  %v21484_v29 = vrot.slane %v6743_v17, %v18800_v39  ;;  %v6862_v52 = vrot.slane %v6846_v14, %v18800_v39  ;;  %v18269_v17 = vld [vmem:[#allocation6 + $0x180] sm:$0xff]   ;;  %v6844_v56 = vcombine.low %v6827_v43, %v6841_v8  ;;  %v26810_v48 = vld [vmem:[#allocation94_spill] sm:$0xff] }
 0x211   : > { %17709 = vmatprep.mubr.msk.bf16.mxu0 %vm18513_vm0, %v26578_v58  ;;  %v6642_v8 = vcombine.high %v21409_v9, %v21412_v50  ;;  %10806 = vmatpush1.bf16.msra.mxu1 %v18269_v17  ;;  %v6936_v17 = vrot.slane %v6914_v28, %v18800_v39  ;;  %v26809_v28 = vld [vmem:[#allocation80_spill] sm:$0xff] }
 0x212   : > { %v6855_v18 = vrot.slane %v6845_v54, %v18800_v39  ;;  %v6775_v14 = vcombine.low %v21484_v29, %v21487_v55  ;;  %v26805_v54 = vld [vmem:[#allocation82_spill] sm:$0xff]  ;;  %10807 = vmatprep.subr.bf16.mxu1 %v26575_v30 }
 0x213   : > { %v16641_v0 = vcombine.high %v26805_v54, %v26804_v59 }
 0x214   : > { %v6878_v61 = vcombine.high %v6855_v18, %v6862_v52 }
 0x215   : > { %v21501_v41 = vpop.f32.mrf.mxu1 }
 0x216   : > { %7953 = vmatmul.mubr.bf16.gmra.mxu1 %v6708_v4  ;;  %v21497_v4 = vrot.slane %v6848_v27, %v18800_v39  ;;  %v6912_v27 = vcombine.low %v26805_v54, %v26804_v59  ;;  %v21522_v54 = vrot.slane %v6810_v53, %v18800_v39  ;;  %v21525_v59 = vrot.slane %v6812_v63, %v18800_v39  ;;  %v18271_v63 = vld [vmem:[#allocation6 + $0x218] sm:$0xff]  }
 0x217   : > { %7960 = vmatprep.mubr.bf16.mxu1 %v6777_v10  ;;  %v21503_v10 = vpop.f32.mrf.mxu0  ;;  %v17643_v46 = vpop.f32.mrf.mxu1  ;;  %v6894_v9 = vrot.slane %v6878_v61, %v18800_v39  ;;  %17790 = vmatpush3.bf16.msra.mxu0 %v18271_v63  ;;  %v7010_v63 = vrot.slane %v6982_v42, %v18800_v39 }
 0x218   : > { %17710 = vmatmul.mubr.bf16.gmra.mxu0 %v6575_v5  ;;  %v6880_v37 = vcombine.high %v21494_v60, %v21497_v4  ;;  %v16642_v5 = vcombine.high %v26807_v12, %v26806_v21  ;;  %v6922_v46 = vrot.slane %v6912_v27, %v18800_v39  ;;  %v18270_v21 = vld [vmem:[#allocation6 + $0x1f8] sm:$0xff]   ;;  %v6877_v27 = vcombine.low %v6855_v18, %v6862_v52  ;;  %v26813_v18 = vld [vmem:[#allocation95_spill] sm:$0xff] }
 0x219   : > { %17713 = vmatprep.mubr.msk.bf16.mxu0 %vm18513_vm0, %v26578_v58  ;;  %v6017_v43 = vpop.f32.mrf.mxu0  ;;  %v21528_v1 = vpop.f32.mrf.mxu1  ;;  %10808 = vmatpush2.bf16.msra.mxu1 %v18270_v21  ;;  %v6981_v52 = vcombine.low %v26813_v18, %v26812_v44  ;;  %v26820_v44 = vld [vmem:[#allocation100_spill] sm:$0xff] }
 0x21a   : > { %v6929_v43 = vrot.slane %v16641_v0, %v18800_v39  ;;  %v6908_v50 = vrot.slane %v6880_v37, %v18800_v39  ;;  %v6943_v53 = vrot.slane %v16642_v5, %v18800_v39  ;;  %v6879_v0 = vcombine.low %v21494_v60, %v21497_v4  ;;  %v26808_v37 = vld [vmem:[#allocation90_spill] sm:$0xff]  ;;  %10809 = vmatprep.subr.bf16.mxu1 %v26575_v30 }
 0x21b   : > { %v21530_v34 = vpop.f32.mrf.mxu0  ;;  %v17644_v12 = vpop.f32.mrf.mxu1  ;;  %v6979_v5 = vcombine.low %v26809_v28, %v26808_v37  ;;  %v6709_v60 = vcombine.high %v21450_v33, %v21453_v13  ;;  %v21558_v4 = vrot.slane %v6877_v27, %v18800_v39  ;;  %17791 = vmatprep.subr.bf16.mxu0 %v26578_v58  ;;  %v18272_v13 = vld [vmem:[#allocation6 + $0x1f0] sm:$0xff]  }
 0x21c   : > { %v6945_v61 = vcombine.high %v6922_v46, %v6929_v43  ;;  %v26811_v12 = vld [vmem:[#allocation91_spill] sm:$0xff]  ;;  %v6947_v11 = vcombine.high %v6936_v17, %v6943_v53  ;;  %v21564_v21 = vrot.slane %v6879_v0, %v18800_v39  ;;  %v6944_v0 = vcombine.low %v6922_v46, %v6929_v43 }
 0x21d   : > { %v6020_v26 = vpop.f32.mrf.mxu0  ;;  %10810 = vmatpush2.bf16.msra.mxu1 %v18272_v13 }
 0x21e   : > { %7961 = vmatmul.mubr.bf16.gmra.mxu1 %v6775_v14  ;;  %v6842_v14 = vcombine.low %v21522_v54, %v21525_v59  ;;  %v6980_v26 = vcombine.low %v26811_v12, %v26810_v48  ;;  %v6961_v31 = vrot.slane %v6945_v61, %v18800_v39  ;;  %v6946_v61 = vcombine.low %v6936_v17, %v6943_v53 }
 0x21f   : > { %7968 = vmatprep.mubr.bf16.mxu1 %v6844_v56  ;;  %v21542_v56 = vpop.f32.mrf.mxu0  ;;  %v6909_v42 = vcombine.low %v21558_v4, %v21564_v21  ;;  %v6776_v17 = vcombine.high %v21484_v29, %v21487_v55  ;;  %10811 = vmatprep.subr.bf16.mxu1 %v26575_v30 }
 0x220   : > { %17714 = vmatmul.mubr.bf16.gmra.mxu0 %v6642_v8  ;;  %v6911_v8 = vcombine.low %v6894_v9, %v6908_v50  ;;  %v6996_v33 = vrot.slane %v6980_v26, %v18800_v39  ;;  %v6975_v9 = vrot.slane %v6947_v11, %v18800_v39  ;;  %v7003_v50 = vrot.slane %v6981_v52, %v18800_v39  ;;  %v26817_v26 = vld [vmem:[#allocation98_spill] sm:$0xff]  ;;  %v26819_v11 = vld [vmem:[#allocation101_spill] sm:$0xff] }
 0x221   : > { %17717 = vmatprep.mubr.msk.bf16.mxu0 %vm18513_vm0, %v26578_v58  ;;  %v6025_v20 = vpop.f32.mrf.mxu0  ;;  %v7047_v52 = vcombine.low %v26820_v44, %v26819_v11 }
 0x222   : > { %v21568_v20 = vrot.slane %v6979_v5, %v18800_v39  ;;  %v18274_v5 = vld [vmem:[#allocation6 + $0x210] sm:$0xff]   ;;  %v6978_v43 = vcombine.low %v6961_v31, %v6975_v9  ;;  %v21606_v31 = vadd.f32 %v21387_v35, %v21503_v10 }
 0x223   : > { %v21561_v48 = vpop.f32.mrf.mxu0  ;;  %17792 = vmatpush3.bf16.msra.mxu0 %v18274_v5  ;;  %v21612_v55 = vrot.slane %v7047_v52, %v18800_v39  ;;  %v7013_v5 = vcombine.low %v7003_v50, %v7010_v63 }
 0x224   : > { %v7012_v53 = vcombine.high %v21568_v20, %v6996_v33  ;;  %26824 = vst [vmem:[#allocation38_spill] sm:$0xff] %v21606_v31  ;;  %17793 = vmatprep.subr.bf16.mxu0 %v26578_v58  ;;  %v26831_v31 = vld [vmem:[#allocation111_spill] sm:$0xff] }
 0x225   : > { %v6028_v27 = vpop.f32.mrf.mxu0 }
 0x226   : > { %7969 = vmatmul.mubr.bf16.gmra.mxu1 %v6842_v14  ;;  %v21576_v14 = vadd.f32 %v21294_v45, %v21342_v49  ;;  %v16643_v45 = vcombine.high %v26820_v44, %v26819_v11  ;;  %v26821_v49 = vld [vmem:[#allocation103_spill] sm:$0xff]  ;;  %v7014_v27 = vcombine.high %v7003_v50, %v7010_v63  ;;  %v21602_v44 = vadd.f32 %v21316_v19, %v21359_v47  ;;  %v18273_v47 = vld [vmem:[#allocation6 + $0x1e8] sm:$0xff]   ;;  %v26828_v50 = vld [vmem:[#allocation108_spill] sm:$0xff] }
 0x227   : > { %7976 = vmatprep.mubr.bf16.mxu1 %v6911_v8  ;;  %v26818_v8 = vld [vmem:[#allocation97_spill] sm:$0xff]  ;;  %v7028_v35 = vrot.slane %v7012_v53, %v18800_v39  ;;  %v26830_v53 = vld [vmem:[#allocation112_spill] sm:$0xff]  ;;  %10812 = vmatpush2.bf16.msra.mxu1 %v18273_v47 }
 0x228   : > { %26816 = vst [vmem:[#allocation36_spill] sm:$0xff] %v21576_v14  ;;  %17718 = vmatmul.mubr.bf16.gmra.mxu0 %v6709_v60  ;;  %v7046_v18 = vcombine.low %v26818_v8, %v26817_v26  ;;  %v26822_v60 = vld [vmem:[#allocation102_spill] sm:$0xff]  ;;  %v21595_v8 = vrot.slane %v6944_v0, %v18800_v39  ;;  %v21598_v14 = vrot.slane %v6946_v61, %v18800_v39  ;;  %26823 = vst [vmem:[#allocation37_spill] sm:$0xff] %v21602_v44  ;;  %v26832_v44 = vld [vmem:[#allocation115_spill] sm:$0xff] }
 0x229   : > { %17721 = vmatprep.mubr.msk.bf16.mxu0 %vm18513_vm0, %v26578_v58  ;;  %v7049_v46 = vcombine.low %v26822_v60, %v26821_v49  ;;  %v21616_v13 = vrot.slane %v16643_v45, %v18800_v39  ;;  %v7042_v10 = vrot.slane %v7014_v27, %v18800_v39  ;;  %v7011_v61 = vcombine.low %v21568_v20, %v6996_v33  ;;  %v26827_v33 = vld [vmem:[#allocation110_spill] sm:$0xff] }
 0x22a   : > { %v21609_v29 = vrot.slane %v7046_v18, %v18800_v39  ;;  %v6976_v0 = vcombine.low %v21595_v8, %v21598_v14  ;;  %v18277_v18 = vld [vmem:[#allocation6 + $0x208] sm:$0xff]   ;;  %v7114_v63 = vcombine.low %v26828_v50, %v26827_v33  ;;  %10813 = vmatprep.subr.bf16.mxu1 %v26575_v30 }
 0x22b   : > { %v21619_v19 = vrot.slane %v7049_v46, %v18800_v39  ;;  %v21636_v46 = vadd.f32 %v21406_v2, %v21530_v34  ;;  %17794 = vmatpush3.bf16.msra.mxu0 %v18277_v18  ;;  %v21656_v34 = vrot.slane %v7011_v61, %v18800_v39  ;;  %v18275_v61 = vld [vmem:[#allocation6 + $0x1e0] sm:$0xff]  }
 0x22c   : > { %v7079_v52 = vcombine.high %v21609_v29, %v21612_v55  ;;  %17795 = vmatprep.subr.bf16.mxu0 %v26578_v58  ;;  %v18280_v18 = vld [vmem:[#allocation6 + $0x200] sm:$0xff]   ;;  %10814 = vmatpush2.bf16.msra.mxu1 %v18275_v61 }
 0x22d   : > { %v21623_v9 = vpop.f32.mrf.mxu1  ;;  %26825 = vst [vmem:[#allocation41_spill] sm:$0xff] %v21636_v46  ;;  %v7081_v20 = vcombine.high %v21616_v13, %v21619_v19  ;;  %10815 = vmatprep.subr.bf16.mxu1 %v26575_v30 }
 0x22e   : > { %7977 = vmatmul.mubr.bf16.gmra.mxu1 %v6909_v42  ;;  %v16644_v42 = vcombine.high %v26822_v60, %v26821_v49  ;;  %v7045_v49 = vcombine.low %v7028_v35, %v7042_v10  ;;  %v7130_v10 = vrot.slane %v7114_v63, %v18800_v39 }
 0x22f   : > { %7984 = vmatprep.mubr.bf16.mxu1 %v6978_v43  ;;  %v17647_v45 = vpop.f32.mrf.mxu1  ;;  %v21640_v43 = vadd.f32 %v21445_v3, %v21542_v56  ;;  %v6843_v3 = vcombine.high %v21522_v54, %v21525_v59  ;;  %v21659_v56 = vrot.slane %v7013_v5, %v18800_v39  ;;  %v7109_v35 = vrot.slane %v7081_v20, %v18800_v39 }
 0x230   : > { %17722 = vmatmul.mubr.bf16.gmra.mxu0 %v6776_v17  ;;  %v26829_v17 = vld [vmem:[#allocation114_spill] sm:$0xff]  ;;  %v7116_v45 = vcombine.low %v26832_v44, %v26831_v31  ;;  %v7123_v44 = vrot.slane %v16644_v42, %v18800_v39  ;;  %v21670_v5 = vadd.f32 %v21462_v25, %v21561_v48  ;;  %v7080_v20 = vcombine.low %v21616_v13, %v21619_v19  ;;  %v26834_v25 = vld [vmem:[#allocation116_spill] sm:$0xff]  ;;  %v26835_v48 = vld [vmem:[#allocation113_spill] sm:$0xff] }
 0x231   : > { %17725 = vmatprep.mubr.msk.bf16.mxu0 %vm18513_vm0, %v26578_v58  ;;  %26826 = vst [vmem:[#allocation53_spill] sm:$0xff] %v21640_v43  ;;  %v7115_v27 = vcombine.low %v26830_v53, %v26829_v17  ;;  %v21650_v2 = vpop.f32.mrf.mxu1  ;;  %v7095_v17 = vrot.slane %v7079_v52, %v18800_v39  ;;  %v7043_v52 = vcombine.low %v21656_v34, %v21659_v56  ;;  %v26839_v43 = vld [vmem:[#allocation120_spill] sm:$0xff] }
 0x232   : > { %v7144_v54 = vrot.slane %v7116_v45, %v18800_v39  ;;  %26833 = vst [vmem:[#allocation54_spill] sm:$0xff] %v21670_v5  ;;  %v26836_v45 = vld [vmem:[#allocation118_spill] sm:$0xff]  ;;  %v26838_v5 = vld [vmem:[#allocation121_spill] sm:$0xff]  ;;  %v18276_v19 = vld [vmem:[#allocation6 + $0x1d8] sm:$0xff]   ;;  %17796 = vmatpush3.bf16.msra.mxu0 %v18280_v18 }
 0x233   : > { %v17648_v47 = vpop.f32.mrf.mxu1  ;;  %v7137_v59 = vrot.slane %v7115_v27, %v18800_v39  ;;  %v7112_v42 = vcombine.low %v7095_v17, %v7109_v35  ;;  %v7180_v27 = vcombine.low %v26835_v48, %v26834_v25  ;;  %v7182_v46 = vcombine.low %v26839_v43, %v26838_v5  ;;  %10816 = vmatpush2.bf16.msra.mxu1 %v18276_v19 }
 0x234   : > { %v21697_v35 = vrot.slane %v7080_v20, %v18800_v39  ;;  %v26841_v20 = vld [vmem:[#allocation122_spill] sm:$0xff]  ;;  %10817 = vmatprep.subr.bf16.mxu1 %v26575_v30 }
 0x235   : > { %v7148_v63 = vcombine.high %v7137_v59, %v7144_v54 }
 0x236   : > { %7985 = vmatmul.mubr.bf16.gmra.mxu1 %v6976_v0  ;;  %v7078_v0 = vcombine.low %v21609_v29, %v21612_v55  ;;  %v16645_v29 = vcombine.high %v26839_v43, %v26838_v5  ;;  %v6910_v55 = vcombine.high %v21558_v4, %v21564_v21  ;;  %v7204_v21 = vrot.slane %v7182_v46, %v18800_v39  ;;  %v26840_v5 = vld [vmem:[#allocation125_spill] sm:$0xff]  ;;  %v26842_v46 = vld [vmem:[#allocation131_spill] sm:$0xff] }
 0x237   : > { %7992 = vmatprep.mubr.bf16.mxu1 %v7045_v49  ;;  %v7146_v49 = vcombine.high %v7123_v44, %v7130_v10  ;;  %v7176_v43 = vrot.slane %v7148_v63, %v18800_v39  ;;  %v18278_v63 = vld [vmem:[#allocation6 + $0x1d0] sm:$0xff]  }
 0x238   : > { %17726 = vmatmul.mubr.bf16.gmra.mxu0 %v6843_v3  ;;  %v26837_v3 = vld [vmem:[#allocation117_spill] sm:$0xff]  ;;  %v21694_v17 = vrot.slane %v7078_v0, %v18800_v39  ;;  %v7211_v18 = vrot.slane %v16645_v29, %v18800_v39  ;;  %v7147_v0 = vcombine.low %v7137_v59, %v7144_v54  ;;  %v26844_v29 = vld [vmem:[#allocation135_spill] sm:$0xff]  ;;  %10818 = vmatpush2.bf16.msra.mxu1 %v18278_v63 }
 0x239   : > { %17729 = vmatprep.mubr.msk.bf16.mxu0 %vm18513_vm0, %v26578_v58  ;;  %v7181_v47 = vcombine.low %v26837_v3, %v26836_v45  ;;  %v7162_v61 = vrot.slane %v7146_v49, %v18800_v39  ;;  %v7190_v3 = vrot.slane %v7180_v27, %v18800_v39  ;;  %v7247_v45 = vcombine.low %v26841_v20, %v26840_v5  ;;  %v26843_v27 = vld [vmem:[#allocation128_spill] sm:$0xff] }
 0x23a   : > { %v21691_v13 = vpop.f32.mrf.mxu1  ;;  %v7110_v54 = vcombine.low %v21694_v17, %v21697_v35  ;;  %v7215_v33 = vcombine.high %v7204_v21, %v7211_v18  ;;  %10819 = vmatprep.subr.bf16.mxu1 %v26575_v30 }
 0x23b   : > { %v7197_v4 = vrot.slane %v7181_v47, %v18800_v39  ;;  %v7249_v47 = vcombine.low %v26843_v27, %v26842_v46  ;;  %v21727_v46 = vrot.slane %v7147_v0, %v18800_v39 }
 0x23c   : > { %v17651_v25 = vpop.f32.mrf.mxu1 }
 0x23d   : > { %v7179_v25 = vcombine.low %v7162_v61, %v7176_v43  ;;  %v7213_v48 = vcombine.high %v7190_v3, %v7197_v4  ;;  %v7271_v61 = vrot.slane %v7249_v47, %v18800_v39  ;;  %v7212_v63 = vcombine.low %v7190_v3, %v7197_v4  ;;  %v26854_v3 = vld [vmem:[#allocation145_spill] sm:$0xff]  ;;  %v26855_v4 = vld [vmem:[#allocation144_spill] sm:$0xff] }
 0x23e   : > { %7993 = vmatmul.mubr.bf16.gmra.mxu1 %v7043_v52  ;;  %v7145_v52 = vcombine.low %v7123_v44, %v7130_v10  ;;  %v21707_v31 = vpop.f32.mrf.mxu1  ;;  %v26845_v44 = vld [vmem:[#allocation132_spill] sm:$0xff]  ;;  %v7214_v47 = vcombine.low %v7204_v21, %v7211_v18  ;;  %v7044_v18 = vcombine.high %v21656_v34, %v21659_v56 }
 0x23f   : > { %8000 = vmatprep.mubr.bf16.mxu1 %v7112_v42  ;;  %v6031_v49 = vpop.f32.mrf.mxu0  ;;  %v16646_v42 = vcombine.high %v26841_v20, %v26840_v5  ;;  %v7250_v10 = vcombine.low %v26845_v44, %v26844_v29  ;;  %v21757_v44 = vrot.slane %v7212_v63, %v18800_v39 }
 0x240   : > { %17730 = vmatmul.mubr.bf16.gmra.mxu0 %v6910_v55  ;;  %v21718_v59 = vadd.f32 %v21501_v41, %v6031_v49  ;;  %v17652_v55 = vpop.f32.mrf.mxu1  ;;  %v21724_v5 = vrot.slane %v7145_v52, %v18800_v39  ;;  %v6977_v41 = vcombine.high %v21595_v8, %v21598_v14  ;;  %v7257_v49 = vrot.slane %v7247_v45, %v18800_v39 }
 0x241   : > { %17733 = vmatprep.mubr.msk.bf16.mxu0 %vm18513_vm0, %v26578_v58  ;;  %v6033_v19 = vpop.f32.mrf.mxu0  ;;  %v18279_v55 = vld [vmem:[#allocation6 + $0x1c8] sm:$0xff]   ;;  %v7278_v43 = vrot.slane %v7250_v10, %v18800_v39  ;;  %v7229_v14 = vrot.slane %v7213_v48, %v18800_v39  ;;  %v7243_v8 = vrot.slane %v7215_v33, %v18800_v39 }
 0x242   : > { %26846 = vst [vmem:[#allocation59_spill] sm:$0xff] %v21718_v59  ;;  %v7264_v19 = vrot.slane %v16646_v42, %v18800_v39  ;;  %v7177_v45 = vcombine.low %v21724_v5, %v21727_v46  ;;  %10820 = vmatpush2.bf16.msra.mxu1 %v18279_v55  ;;  %v18281_v42 = vld [vmem:[#allocation6 + $0x1c0] sm:$0xff]   ;;  %v26851_v33 = vld [vmem:[#allocation134_spill] sm:$0xff]  ;;  %v7317_v55 = vcombine.low %v26855_v4, %v26854_v3 }
 0x243   : > { %v6034_v29 = vpop.f32.mrf.mxu0  ;;  %v7282_v10 = vcombine.high %v7271_v61, %v7278_v43  ;;  %10821 = vmatprep.subr.bf16.mxu1 %v26575_v30  ;;  %v26853_v59 = vld [vmem:[#allocation138_spill] sm:$0xff]  ;;  %v7246_v21 = vcombine.low %v7229_v14, %v7243_v8  ;;  %v21760_v30 = vrot.slane %v7214_v47, %v18800_v39  ;;  %v7281_v8 = vcombine.low %v7271_v61, %v7278_v43  ;;  %v26859_v61 = vld [vmem:[#allocation157_spill] sm:$0xff] }
 0x244   : > { %v21736_v52 = vadd.f32 %v21528_v1, %v6034_v29  ;;  %v7280_v1 = vcombine.high %v7257_v49, %v7264_v19  ;;  %v26850_v29 = vld [vmem:[#allocation137_spill] sm:$0xff]  ;;  %v7345_v34 = vrot.slane %v7317_v55, %v18800_v39  ;;  %v7279_v56 = vcombine.low %v7257_v49, %v7264_v19  ;;  %v26858_v19 = vld [vmem:[#allocation160_spill] sm:$0xff] }
 0x245   : > { %v6036_v0 = vpop.f32.mrf.mxu0  ;;  %v7244_v63 = vcombine.low %v21757_v44, %v21760_v30  ;;  %v7384_v43 = vcombine.low %v26859_v61, %v26858_v19  ;;  %v7111_v55 = vcombine.high %v21694_v17, %v21697_v35 }
 0x246   : > { %26847 = vst [vmem:[#allocation60_spill] sm:$0xff] %v21736_v52  ;;  %8001 = vmatmul.mubr.bf16.gmra.mxu1 %v7110_v54  ;;  %v26848_v54 = vld [vmem:[#allocation133_spill] sm:$0xff]  ;;  %v7315_v0 = vcombine.low %v26851_v33, %v26850_v29  ;;  %v7310_v29 = vrot.slane %v7282_v10, %v18800_v39  ;;  %v16647_v10 = vcombine.high %v26855_v4, %v26854_v3  ;;  %v26868_v3 = vld [vmem:[#allocation170_spill] sm:$0xff] }
 0x247   : > { %8008 = vmatprep.mubr.bf16.mxu1 %v7179_v25  ;;  %v26849_v25 = vld [vmem:[#allocation136_spill] sm:$0xff]  ;;  %v26852_v52 = vld [vmem:[#allocation141_spill] sm:$0xff]  ;;  %10822 = vmatpush2.bf16.msra.mxu1 %v18281_v42 }
 0x248   : > { %17734 = vmatmul.mubr.bf16.gmra.mxu0 %v6977_v41  ;;  %v7314_v48 = vcombine.low %v26849_v25, %v26848_v54  ;;  %v7316_v41 = vcombine.low %v26853_v59, %v26852_v52  ;;  %v7296_v25 = vrot.slane %v7280_v1, %v18800_v39  ;;  %v7331_v52 = vrot.slane %v7315_v0, %v18800_v39  ;;  %v26857_v0 = vld [vmem:[#allocation150_spill] sm:$0xff]  ;;  %v26869_v54 = vld [vmem:[#allocation169_spill] sm:$0xff] }
 0x249   : > { %17737 = vmatprep.mubr.msk.bf16.mxu0 %vm18513_vm0, %v26578_v58  ;;  %v7391_v17 = vrot.slane %v16647_v10, %v18800_v39  ;;  %v26862_v10 = vld [vmem:[#allocation166_spill] sm:$0xff]  ;;  %v7451_v33 = vcombine.low %v26869_v54, %v26868_v3 }
 0x24a   : > { %v7324_v59 = vrot.slane %v7314_v48, %v18800_v39  ;;  %v7338_v14 = vrot.slane %v7316_v41, %v18800_v39  ;;  %v7313_v42 = vcombine.low %v7296_v25, %v7310_v29  ;;  %v26856_v48 = vld [vmem:[#allocation151_spill] sm:$0xff]  ;;  %v21785_v25 = vrot.slane %v7279_v56, %v18800_v39 }
 0x24b   : > { %v7382_v41 = vcombine.low %v26857_v0, %v26856_v48  ;;  %v16648_v49 = vcombine.high %v26857_v0, %v26856_v48  ;;  %v21788_v29 = vrot.slane %v7281_v8, %v18800_v39  ;;  %v7412_v8 = vrot.slane %v7384_v43, %v18800_v39 }
 0x24c   : > { %v7349_v47 = vcombine.high %v7338_v14, %v7345_v34 }
 0x24d   : > { %v7398_v35 = vrot.slane %v7382_v41, %v18800_v39  ;;  %v7405_v56 = vrot.slane %v16648_v49, %v18800_v39  ;;  %v26863_v41 = vld [vmem:[#allocation161_spill] sm:$0xff]  ;;  %v26864_v49 = vld [vmem:[#allocation162_spill] sm:$0xff] }
 0x24e   : > { %8009 = vmatmul.mubr.bf16.gmra.mxu1 %v7177_v45  ;;  %v7347_v45 = vcombine.high %v7324_v59, %v7331_v52  ;;  %v7377_v0 = vrot.slane %v7349_v47, %v18800_v39  ;;  %v7348_v47 = vcombine.low %v7338_v14, %v7345_v34 }
 0x24f   : > { %8016 = vmatprep.mubr.bf16.mxu1 %v7246_v21  ;;  %v7414_v14 = vcombine.high %v7391_v17, %v7398_v35  ;;  %v7416_v34 = vcombine.high %v7405_v56, %v7412_v8 }
 0x250   : > { %17738 = vmatmul.mubr.bf16.gmra.mxu0 %v7044_v18  ;;  %v7363_v48 = vrot.slane %v7347_v45, %v18800_v39  ;;  %v7346_v45 = vcombine.low %v7324_v59, %v7331_v52 }
 0x251   : > { %17741 = vmatprep.mubr.msk.bf16.mxu0 %vm18513_vm0, %v26578_v58  ;;  %v21772_v1 = vpop.f32.mrf.mxu1 }
 0x252   : > { %v7380_v59 = vcombine.low %v7363_v48, %v7377_v0  ;;  %v7479_v48 = vrot.slane %v7451_v33, %v18800_v39  ;;  %v7430_v0 = vrot.slane %v7414_v14, %v18800_v39 }
 0x253   : > { %v17655_v21 = vpop.f32.mrf.mxu1  ;;  %v6039_v18 = vpop.f32.mrf.mxu0 }
 0x254   : > { %v21791_v4 = vadd.f32 %v21623_v9, %v6039_v18  ;;  %v26865_v18 = vld [vmem:[#allocation168_spill] sm:$0xff] }
 0x255   : > { %v21795_v19 = vpop.f32.mrf.mxu1  ;;  %v6041_v61 = vpop.f32.mrf.mxu0  ;;  %v7449_v43 = vcombine.low %v26865_v18, %v26864_v49 }
 0x256   : > { %26860 = vst [vmem:[#allocation72_spill] sm:$0xff] %v21791_v4  ;;  %8017 = vmatmul.mubr.bf16.gmra.mxu1 %v7244_v63  ;;  %v7311_v63 = vcombine.low %v21785_v25, %v21788_v29  ;;  %v7448_v61 = vcombine.low %v26863_v41, %v26862_v10  ;;  %v21822_v10 = vrot.slane %v7348_v47, %v18800_v39 }
 0x257   : > { %8024 = vmatprep.mubr.bf16.mxu1 %v7313_v42  ;;  %v17656_v9 = vpop.f32.mrf.mxu1  ;;  %v6042_v21 = vpop.f32.mrf.mxu0  ;;  %v7415_v47 = vcombine.low %v7405_v56, %v7412_v8 }
 0x258   : > { %17742 = vmatmul.mubr.bf16.gmra.mxu0 %v7111_v55  ;;  %v21806_v42 = vadd.f32 %v21650_v2, %v6042_v21  ;;  %v26866_v55 = vld [vmem:[#allocation167_spill] sm:$0xff]  ;;  %v26867_v9 = vld [vmem:[#allocation164_spill] sm:$0xff]  ;;  %v7178_v2 = vcombine.high %v21724_v5, %v21727_v46  ;;  %v21819_v21 = vrot.slane %v7346_v45, %v18800_v39  ;;  %v7458_v18 = vrot.slane %v7448_v61, %v18800_v39 }
 0x259   : > { %17745 = vmatprep.mubr.msk.bf16.mxu0 %vm18513_vm0, %v26578_v58  ;;  %v7450_v4 = vcombine.low %v26867_v9, %v26866_v55  ;;  %v6044_v52 = vpop.f32.mrf.mxu0  ;;  %v7465_v55 = vrot.slane %v7449_v43, %v18800_v39  ;;  %v7444_v5 = vrot.slane %v7416_v34, %v18800_v39  ;;  %v7413_v45 = vcombine.low %v7391_v17, %v7398_v35  ;;  %v26870_v43 = vld [vmem:[#allocation179_spill] sm:$0xff]  ;;  %v26872_v34 = vld [vmem:[#allocation182_spill] sm:$0xff] }
 0x25a   : > { %26861 = vst [vmem:[#allocation73_spill] sm:$0xff] %v21806_v42  ;;  %v7378_v46 = vcombine.low %v21819_v21, %v21822_v10  ;;  %v7245_v35 = vcombine.high %v21757_v44, %v21760_v30  ;;  %v21850_v49 = vrot.slane %v7415_v47, %v18800_v39 }
 0x25b   : > { %v7472_v54 = vrot.slane %v7450_v4, %v18800_v39  ;;  %v26871_v4 = vld [vmem:[#allocation178_spill] sm:$0xff]  ;;  %v7447_v14 = vcombine.low %v7430_v0, %v7444_v5  ;;  %v21847_v3 = vrot.slane %v7413_v45, %v18800_v39 }
 0x25c   : > { %v7515_v52 = vcombine.low %v26871_v4, %v26870_v43  ;;  %v16649_v33 = vcombine.high %v26871_v4, %v26870_v43  ;;  %v26879_v43 = vld [vmem:[#allocation192_spill] sm:$0xff] }
 0x25d   : > { %v7483_v61 = vcombine.high %v7472_v54, %v7479_v48 }
 0x25e   : > { %8025 = vmatmul.mubr.bf16.gmra.mxu1 %v7311_v63  ;;  %v7481_v63 = vcombine.high %v7458_v18, %v7465_v55  ;;  %v7532_v30 = vrot.slane %v16649_v33, %v18800_v39  ;;  %v7482_v33 = vcombine.low %v7472_v54, %v7479_v48 }
 0x25f   : > { %8032 = vmatprep.mubr.bf16.mxu1 %v7380_v59  ;;  %v7511_v5 = vrot.slane %v7483_v61, %v18800_v39 }
 0x260   : > { %17746 = vmatmul.mubr.bf16.gmra.mxu0 %v7178_v2  ;;  %v26873_v2 = vld [vmem:[#allocation181_spill] sm:$0xff]  ;;  %v7497_v0 = vrot.slane %v7481_v63, %v18800_v39  ;;  %v7480_v63 = vcombine.low %v7458_v18, %v7465_v55  ;;  %v26878_v55 = vld [vmem:[#allocation195_spill] sm:$0xff]  ;;  %v21884_v48 = vrot.slane %v7482_v33, %v18800_v39 }
 0x261   : > { %17749 = vmatprep.mubr.msk.bf16.mxu0 %vm18513_vm0, %v26578_v58  ;;  %v7517_v42 = vcombine.low %v26873_v2, %v26872_v34  ;;  %v16650_v17 = vcombine.high %v26873_v2, %v26872_v34  ;;  %v7525_v34 = vrot.slane %v7515_v52, %v18800_v39  ;;  %v26877_v2 = vld [vmem:[#allocation194_spill] sm:$0xff]  ;;  %v7585_v9 = vcombine.low %v26879_v43, %v26878_v55 }
 0x262   : > { %v21838_v59 = vpop.f32.mrf.mxu1  ;;  %v7514_v52 = vcombine.low %v7497_v0, %v7511_v5  ;;  %v21881_v54 = vrot.slane %v7480_v63, %v18800_v39 }
 0x263   : > { %v7539_v45 = vrot.slane %v7517_v42, %v18800_v39  ;;  %v7546_v47 = vrot.slane %v16650_v17, %v18800_v39  ;;  %v7582_v42 = vcombine.low %v21002_v32, %v21091_v57 }
 0x264   : > { %v17659_v56 = vpop.f32.mrf.mxu1  ;;  %v6047_v8 = vpop.f32.mrf.mxu0  ;;  %v7512_v63 = vcombine.low %v21881_v54, %v21884_v48 }
 0x265   : > { %v21853_v4 = vadd.f32 %v21691_v13, %v6047_v8 }
 0x266   : > { %8033 = vmatmul.mubr.bf16.gmra.mxu1 %v7378_v46  ;;  %v21859_v44 = vpop.f32.mrf.mxu1  ;;  %v6049_v56 = vpop.f32.mrf.mxu0  ;;  %v7445_v46 = vcombine.low %v21847_v3, %v21850_v49 }
 0x267   : > { %26874 = vst [vmem:[#allocation76_spill] sm:$0xff] %v21853_v4  ;;  %8040 = vmatprep.mubr.bf16.mxu1 %v7447_v14  ;;  %v7548_v14 = vcombine.high %v7525_v34, %v7532_v30  ;;  %v26875_v56 = vld [vmem:[#allocation189_spill] sm:$0xff]  ;;  %v26876_v4 = vld [vmem:[#allocation191_spill] sm:$0xff] }
 0x268   : > { %17750 = vmatmul.mubr.bf16.gmra.mxu0 %v7245_v35  ;;  %v17660_v13 = vpop.f32.mrf.mxu1  ;;  %v6050_v8 = vpop.f32.mrf.mxu0  ;;  %v7550_v35 = vcombine.high %v7539_v45, %v7546_v47  ;;  %v7584_v18 = vcombine.low %v26877_v2, %v26876_v4 }
 0x269   : > { %17753 = vmatprep.mubr.msk.bf16.mxu0 %vm18513_vm0, %v26578_v58  ;;  %v21868_v61 = vadd.f32 %v21707_v31, %v6050_v8  ;;  %v7583_v13 = vcombine.low %v26875_v56, %v21116_v62  ;;  %v7312_v31 = vcombine.high %v21785_v25, %v21788_v29  ;;  %v7564_v0 = vrot.slane %v7548_v14, %v18800_v39 }
 0x26a   : > { %v6052_v17 = vpop.f32.mrf.mxu0  ;;  %v7592_v62 = vrot.slane %v7582_v42, %v18800_v39  ;;  %v7578_v2 = vrot.slane %v7550_v35, %v18800_v39  ;;  %v7606_v8 = vrot.slane %v7584_v18, %v18800_v39  ;;  %v7613_v25 = vrot.slane %v7585_v9, %v18800_v39 }
 0x26b   : > { %v7599_v5 = vrot.slane %v7583_v13, %v18800_v39  ;;  %v7547_v29 = vcombine.low %v7525_v34, %v7532_v30  ;;  %v7379_v42 = vcombine.high %v21819_v21, %v21822_v10 }
 0x26c   : > { %v7581_v33 = vcombine.low %v7564_v0, %v7578_v2  ;;  %v7616_v18 = vcombine.low %v7606_v8, %v7613_v25 }
 0x26d   : > { %v7615_v14 = vcombine.high %v7592_v62, %v7599_v5  ;;  %v21901_v35 = vrot.slane %v7547_v29, %v18800_v39  ;;  %v7614_v13 = vcombine.low %v7592_v62, %v7599_v5  ;;  %v26883_v62 = vld [vmem:[#allocation18_spill] sm:$0xff] }
 0x26e   : > { %8041 = vmatmul.mubr.bf16.gmra.mxu1 %v7445_v46  ;;  %v7549_v46 = vcombine.low %v7539_v45, %v7546_v47  ;;  %v7649_v47 = vcombine.low %v21132_v16, %v21204_v51  ;;  %v26881_v16 = vld [vmem:[#allocation17_spill] sm:$0xff]  ;;  %v9223_v5 = vcombine.low %v26883_v62, %v18843_v15 }
 0x26f   : > { %8048 = vmatprep.mubr.bf16.mxu1 %v7514_v52  ;;  %v7617_v52 = vcombine.high %v7606_v8, %v7613_v25  ;;  %v7631_v30 = vrot.slane %v7615_v14, %v18800_v39 }
 0x270   : > { %17754 = vmatmul.mubr.bf16.gmra.mxu0 %v7312_v31  ;;  %v21904_v9 = vrot.slane %v7549_v46, %v18800_v39  ;;  %v26880_v31 = vld [vmem:[#allocation15_spill] sm:$0xff]  ;;  %v9221_v46 = vcombine.low %v26881_v16, %v18866_v22  ;;  %v7656_v25 = vrot.slane %v7649_v47, %v18800_v39  ;;  %v16675_v16 = vcombine.high %v18959_v36, %v18966_v6 }
 0x271   : > { %17757 = vmatprep.mubr.msk.bf16.mxu0 %vm18513_vm0, %v26578_v58  ;;  %v7645_v45 = vrot.slane %v7617_v52, %v18800_v39  ;;  %v9220_v0 = vcombine.low %v18869_v23, %v26880_v31  ;;  %v7446_v23 = vcombine.high %v21847_v3, %v21850_v49  ;;  %v21931_v52 = vrot.slane %v7614_v13, %v18800_v39 }
 0x272   : > { %v7579_v10 = vcombine.low %v21901_v35, %v21904_v9  ;;  %v9251_v3 = vrot.slane %v9223_v5, %v18800_v39  ;;  %v7657_v49 = vcombine.high %v7656_v25, %v7656_v25 }
 0x273   : > { %v7648_v8 = vcombine.low %v7631_v30, %v7645_v45 }
 0x274   : > { %v21898_v17 = vpop.f32.mrf.mxu1 }
 0x276   : > { %8049 = vmatmul.mubr.bf16.gmra.mxu1 %v7512_v63  ;;  %v17663_v34 = vpop.f32.mrf.mxu1  ;;  %v26882_v63 = vld [vmem:[#allocation16_spill] sm:$0xff] }
 0x277   : > { %8056 = vmatprep.mubr.bf16.mxu1 %v7581_v33  ;;  %v9222_v33 = vcombine.low %v18872_v24, %v26882_v63  ;;  %v9230_v24 = vrot.slane %v9220_v0, %v18800_v39  ;;  %v9237_v34 = vrot.slane %v9221_v46, %v18800_v39  ;;  %v7671_v0 = vrot.slane %v7657_v49, %v18800_v39 }
 0x278   : > { %17758 = vmatmul.mubr.bf16.gmra.mxu0 %v7379_v42  ;;  %v21910_v21 = vpop.f32.mrf.mxu1  ;;  %v9289_v46 = vcombine.low %v18963_v38, %v18969_v40  ;;  %v16676_v63 = vcombine.high %v18963_v38, %v18969_v40 }
 0x279   : > { %17761 = vmatprep.mubr.msk.bf16.mxu0 %vm18513_vm0, %v26578_v58  ;;  %v6055_v55 = vpop.f32.mrf.mxu0  ;;  %v9244_v30 = vrot.slane %v9222_v33, %v18800_v39  ;;  %v7513_v33 = vcombine.high %v21881_v54, %v21884_v48  ;;  %v21972_v54 = vrot.slane %v7656_v25, %v18800_v39  ;;  %v9252_v48 = vcombine.low %v9230_v24, %v9237_v34 }
 0x27a   : > { %v17664_v2 = vpop.f32.mrf.mxu1  ;;  %v21919_v29 = vadd.f32 %v21772_v1, %v6055_v55  ;;  %v21934_v1 = vrot.slane %v7616_v18, %v18800_v39  ;;  %v26884_v55 = vld [vmem:[#allocation14_spill] sm:$0xff]  ;;  %v9318_v38 = vrot.slane %v16676_v63, %v18800_v39 }
 0x27b   : > { %v6057_v14 = vpop.f32.mrf.mxu0  ;;  %v9255_v18 = vcombine.high %v9244_v30, %v9251_v3  ;;  %v9287_v31 = vcombine.low %v26884_v55, %v18966_v6  ;;  %v9304_v6 = vrot.slane %v16675_v16, %v18800_v39  ;;  %v26889_v55 = vld [vmem:[#allocation23_spill] sm:$0xff]  ;;  %v26892_v16 = vld [vmem:[#allocation24_spill] sm:$0xff] }
 0x27d   : > { %v21936_v22 = vpop.f32.mrf.mxu1  ;;  %v6058_v42 = vpop.f32.mrf.mxu0  ;;  %v9297_v14 = vrot.slane %v9287_v31, %v18800_v39  ;;  %v26890_v31 = vld [vmem:[#allocation26_spill] sm:$0xff] }
 0x27e   : > { %8057 = vmatmul.mubr.bf16.gmra.mxu1 %v7579_v10  ;;  %v21940_v15 = vadd.f32 %v21795_v19, %v6058_v42  ;;  %v7646_v19 = vcombine.low %v21931_v52, %v21934_v1  ;;  %v9253_v10 = vcombine.high %v9230_v24, %v9237_v34  ;;  %v9254_v42 = vcombine.low %v9244_v30, %v9251_v3 }
 0x27f   : > { %8064 = vmatprep.mubr.bf16.mxu1 %v7648_v8  ;;  %v17667_v45 = vpop.f32.mrf.mxu1  ;;  %v6060_v47 = vpop.f32.mrf.mxu0  ;;  %v9283_v8 = vrot.slane %v9255_v18, %v18800_v39  ;;  %v7580_v34 = vcombine.high %v21901_v35, %v21904_v9  ;;  %v21990_v3 = vrot.slane %v9252_v48, %v18800_v39  ;;  %v18282_v48 = vld [vmem:[#allocation8 + $0x138] sm:$0xff]  }
 0x280   : > { %17762 = vmatmul.mubr.bf16.gmra.mxu0 %v7446_v23  ;;  %v9269_v5 = vrot.slane %v9253_v10, %v18800_v39  ;;  %v9311_v23 = vrot.slane %v9289_v46, %v18800_v39  ;;  %v26885_v45 = vld [vmem:[#allocation20_spill] sm:$0xff]  ;;  %v26888_v10 = vld [vmem:[#allocation22_spill] sm:$0xff]  ;;  %17173 = vmatprep.subr.bf16.mxu1 %v18282_v48 }
 0x281   : > { %v21945_v13 = vpop.f32.mrf.mxu1  ;;  %17765 = vmatprep.mubr.msk.bf16.mxu0 %vm18513_vm0, %v26578_v58 }
 0x282   : > { %v9286_v63 = vcombine.low %v9269_v5, %v9283_v8  ;;  %v9322_v24 = vcombine.high %v9311_v23, %v9318_v38 }
 0x283   : > { %v17668_v2 = vpop.f32.mrf.mxu1 }
 0x284   : > { %v26891_v2 = vld [vmem:[#allocation27_spill] sm:$0xff]  ;;  %v9350_v9 = vrot.slane %v9322_v24, %v18800_v39 }
 0x285   : > { %v9357_v46 = vcombine.low %v26892_v16, %v26891_v2  ;;  %v26896_v16 = vld [vmem:[#allocation33_spill] sm:$0xff] }
 0x286   : > { %8065 = vmatmul.mubr.bf16.gmra.mxu1 %v7646_v19  ;;  %v6063_v62 = vpop.f32.mrf.mxu0  ;;  %v26887_v19 = vld [vmem:[#allocation25_spill] sm:$0xff] }
 0x287   : > { %8072 = vmatprep.mubr.bf16.mxu1 %v7671_v0  ;;  %v21966_v36 = vadd.f32 %v21838_v59, %v6063_v62  ;;  %v26886_v59 = vld [vmem:[#allocation19_spill] sm:$0xff]  ;;  %v9355_v18 = vcombine.low %v26888_v10, %v26887_v19  ;;  %v9356_v0 = vcombine.low %v26890_v31, %v26889_v55  ;;  %v21993_v62 = vrot.slane %v9254_v42, %v18800_v39  ;;  %v26895_v55 = vld [vmem:[#allocation28_spill] sm:$0xff] }
 0x288   : > { %17766 = vmatmul.mubr.bf16.gmra.mxu0 %v7513_v33  ;;  %v6065_v40 = vpop.f32.mrf.mxu0  ;;  %v9354_v47 = vcombine.low %v26886_v59, %v26885_v45  ;;  %v9320_v33 = vcombine.high %v9297_v14, %v9304_v6  ;;  %v9385_v8 = vrot.slane %v9357_v46, %v18800_v39  ;;  %v9319_v45 = vcombine.low %v9297_v14, %v9304_v6  ;;  %v26897_v46 = vld [vmem:[#allocation30_spill] sm:$0xff]  ;;  %v26900_v6 = vld [vmem:[#allocation32_spill] sm:$0xff] }
 0x289   : > { %17769 = vmatprep.mubr.msk.bf16.mxu0 %vm18513_vm0, %v26578_v58  ;;  %v9378_v5 = vrot.slane %v9356_v0, %v18800_v39  ;;  %v9321_v59 = vcombine.low %v9311_v23, %v9318_v38  ;;  %v26899_v14 = vld [vmem:[#allocation34_spill] sm:$0xff]  ;;  %v18283_v38 = vld [vmem:[#allocation8 + $0xf8] sm:$0xff]  }
 0x28a   : > { %v6066_v49 = vpop.f32.mrf.mxu0  ;;  %v9364_v40 = vrot.slane %v9354_v47, %v18800_v39  ;;  %v9336_v35 = vrot.slane %v9320_v33, %v18800_v39  ;;  %v9284_v47 = vcombine.low %v21990_v3, %v21993_v62  ;;  %v26898_v33 = vld [vmem:[#allocation31_spill] sm:$0xff]  ;;  %v9424_v23 = vcombine.low %v26900_v6, %v26899_v14 }
 0x28b   : > { %v21985_v25 = vadd.f32 %v21859_v44, %v6066_v49  ;;  %v9371_v44 = vrot.slane %v9355_v18, %v18800_v39  ;;  %v9389_v10 = vcombine.high %v9378_v5, %v9385_v8  ;;  %v26894_v18 = vld [vmem:[#allocation29_spill] sm:$0xff]  ;;  %v16677_v24 = vcombine.high %v26898_v33, %v26896_v16  ;;  %v26904_v33 = vld [vmem:[#allocation44_spill] sm:$0xff] }
 0x28c   : > { %v6068_v30 = vpop.f32.mrf.mxu0  ;;  %v9421_v31 = vcombine.low %v26895_v55, %v26894_v18  ;;  %v9353_v2 = vcombine.low %v9336_v35, %v9350_v9  ;;  %v22021_v48 = vrot.slane %v9319_v45, %v18800_v39 }
 0x28d   : > { %26893 = vst [vmem:[#allocation77_spill] sm:$0xff] %v21985_v25  ;;  %v9387_v19 = vcombine.high %v9364_v40, %v9371_v44  ;;  %v9417_v9 = vrot.slane %v9389_v10, %v18800_v39  ;;  %v9386_v45 = vcombine.low %v9364_v40, %v9371_v44  ;;  %v26906_v44 = vld [vmem:[#allocation43_spill] sm:$0xff] }
 0x28e   : > { %8073 = vmatmul.mubr.bf16.gmra.mxu1 %v21972_v54  ;;  %v9431_v18 = vrot.slane %v9421_v31, %v18800_v39  ;;  %v16678_v31 = vcombine.high %v26900_v6, %v26899_v14 }
 0x28f   : > { %v22000_v49 = vpop.f32.mrf.mxu1  ;;  %10823 = vmatprep.mubr.bf16.mxu1 %v9286_v63  ;;  %v9422_v63 = vcombine.low %v26897_v46, %v26896_v16  ;;  %v9403_v35 = vrot.slane %v9387_v19, %v18800_v39  ;;  %v9445_v16 = vrot.slane %v16677_v24, %v18800_v39  ;;  %v26903_v46 = vld [vmem:[#allocation39_spill] sm:$0xff]  ;;  %v26905_v24 = vld [vmem:[#allocation42_spill] sm:$0xff] }
 0x290   : > { %17770 = vmatmul.mubr.bf16.gmra.mxu0 %v7580_v34  ;;  %v7647_v34 = vcombine.high %v21931_v52, %v21934_v1  ;;  %v9452_v52 = vrot.slane %v9424_v23, %v18800_v39  ;;  %v9490_v40 = vcombine.low %v26905_v24, %v26904_v33 }
 0x291   : > { %v17671_v42 = vpop.f32.mrf.mxu1  ;;  %17773 = vmatprep.mubr.msk.bf16.mxu0 %vm18513_vm0, %v26578_v58  ;;  %v9438_v55 = vrot.slane %v9422_v63, %v18800_v39 }
 0x292   : > { %v22024_v42 = vrot.slane %v9321_v59, %v18800_v39  ;;  %v9388_v59 = vcombine.low %v9378_v5, %v9385_v8  ;;  %v26907_v5 = vld [vmem:[#allocation45_spill] sm:$0xff]  ;;  %v9420_v8 = vcombine.low %v9403_v35, %v9417_v9  ;;  %v22061_v35 = vrot.slane %v16678_v31, %v18800_v39 }
 0x293   : > { %v22010_v0 = vpop.f32.mrf.mxu1  ;;  %v9454_v23 = vcombine.high %v9431_v18, %v9438_v55  ;;  %v9453_v31 = vcombine.low %v9431_v18, %v9438_v55  ;;  %v9455_v24 = vcombine.low %v9445_v16, %v9452_v52  ;;  %v26914_v18 = vld [vmem:[#allocation52_spill] sm:$0xff]  ;;  %v26915_v55 = vld [vmem:[#allocation50_spill] sm:$0xff] }
 0x294   : > { %v9351_v19 = vcombine.low %v22021_v48, %v22024_v42  ;;  %v22053_v14 = vrot.slane %v9388_v59, %v18800_v39 }
 0x295   : > { %v17672_v30 = vpop.f32.mrf.mxu1 }
 0x296   : > { %10824 = vmatmul.mubr.bf16.vlgmr.msra.gmra.mxu1 %v9284_v47  ;;  %v7672_v30 = vcombine.high %v21972_v54, %v21972_v54  ;;  %v22067_v54 = vrot.slane %v9490_v40, %v18800_v39  ;;  %v26910_v40 = vld [vmem:[#allocation46_spill] sm:$0xff] }
 0x297   : > { %10831 = vmatprep.mubr.bf16.mxu1 %v9353_v2  ;;  %17174 = vmatpush3.bf16.msra.mxu1 %v18283_v38  ;;  %v26902_v2 = vld [vmem:[#allocation40_spill] sm:$0xff]  ;;  %v9456_v38 = vcombine.high %v9445_v16, %v9452_v52  ;;  %v26916_v16 = vld [vmem:[#allocation51_spill] sm:$0xff] }
 0x298   : > { %v6071_v1 = vpop.f32.mrf.mxu0  ;;  %17774 = vmatmul.mubr.bf16.gmra.mxu0 %v7647_v34  ;;  %v9489_v63 = vcombine.low %v26903_v46, %v26902_v2  ;;  %v16679_v52 = vcombine.high %v26916_v16, %v26914_v18 }
 0x299   : > { %v22033_v47 = vadd.f32 %v21898_v17, %v6071_v1  ;;  %17777 = vmatprep.mubr.msk.bf16.mxu0 %vm18513_vm0, %v26578_v58  ;;  %v9491_v17 = vcombine.low %v26907_v5, %v26906_v44  ;;  %v22050_v1 = vrot.slane %v9386_v45, %v18800_v39  ;;  %v9484_v59 = vrot.slane %v9456_v38, %v18800_v39  ;;  %v26911_v44 = vld [vmem:[#allocation47_spill] sm:$0xff] }
 0x29a   : > { %v6073_v10 = vpop.f32.mrf.mxu0  ;;  %v22064_v9 = vrot.slane %v9489_v63, %v18800_v39  ;;  %v9555_v5 = vcombine.low %v26911_v44, %v26910_v40  ;;  %v9285_v44 = vcombine.high %v21990_v3, %v21993_v62 }
 0x29b   : > { %26901 = vst [vmem:[#allocation82_spill] sm:$0xff] %v22033_v47  ;;  %v22070_v45 = vrot.slane %v9491_v17, %v18800_v39  ;;  %v26912_v17 = vld [vmem:[#allocation49_spill] sm:$0xff] }
 0x29c   : > { %v6074_v34 = vpop.f32.mrf.mxu0 }
 0x29d   : > { %v22056_v6 = vadd.f32 %v21910_v21, %v6074_v34  ;;  %v9470_v21 = vrot.slane %v9454_v23, %v18800_v39 }
 0x29e   : > { %v22058_v10 = vpop.f32.mrf.mxu1  ;;  %v6076_v2 = vpop.f32.mrf.mxu0  ;;  %10832 = vmatmul.mubr.bf16.gmra.mxu1 %v9351_v19  ;;  %v9418_v19 = vcombine.low %v22050_v1, %v22053_v14 }
 0x29f   : > { %26908 = vst [vmem:[#allocation90_spill] sm:$0xff] %v22056_v6  ;;  %10839 = vmatprep.mubr.bf16.mxu1 %v9420_v8  ;;  %v26913_v8 = vld [vmem:[#allocation48_spill] sm:$0xff]  ;;  %v9557_v2 = vcombine.low %v26915_v55, %v26914_v18  ;;  %v22104_v6 = vrot.slane %v9455_v24, %v18800_v39  ;;  %v22107_v55 = vrot.slane %v9555_v5, %v18800_v39 }
 0x2a0   : > { %v17675_v46 = vpop.f32.mrf.mxu1  ;;  %v6079_v33 = vpop.f32.mrf.mxu0  ;;  %17778 = vmatmul.mubr.bf16.gmra.mxu0 %v7672_v30  ;;  %v9556_v23 = vcombine.low %v26913_v8, %v26912_v17  ;;  %v9521_v30 = vcombine.high %v22061_v35, %v22064_v9  ;;  %v22098_v8 = vrot.slane %v9453_v31, %v18800_v39  ;;  %v9586_v24 = vrot.slane %v16679_v52, %v18800_v39 }
 0x2a1   : > { %v22077_v63 = vadd.f32 %v21936_v22, %v6079_v33  ;;  %17797 = vmatprep.mubr.msk.bf16.mxu0 %vm18513_vm0, %v26578_v58  ;;  %v9523_v22 = vcombine.high %v22067_v54, %v22070_v45  ;;  %v9487_v46 = vcombine.low %v9470_v21, %v9484_v59  ;;  %v18284_v33 = vld [vmem:[#allocation8 + $0x130] sm:$0xff]   ;;  %v9522_v52 = vcombine.low %v22067_v54, %v22070_v45 }
 0x2a2   : > { %v22085_v38 = vpop.f32.mrf.mxu1  ;;  %v6081_v34 = vpop.f32.mrf.mxu0  ;;  %v22110_v21 = vrot.slane %v9556_v23, %v18800_v39  ;;  %17175 = vmatprep.subr.bf16.mxu1 %v18284_v33  ;;  %v9537_v62 = vrot.slane %v9521_v30, %v18800_v39  ;;  %v9520_v30 = vcombine.low %v22061_v35, %v22064_v9  ;;  %v26919_v33 = vld [vmem:[#allocation56_spill] sm:$0xff]  ;;  %v26923_v35 = vld [vmem:[#allocation62_spill] sm:$0xff]  ;;  %v26924_v9 = vld [vmem:[#allocation61_spill] sm:$0xff]  ;;  %v9352_v54 = vcombine.high %v22021_v48, %v22024_v42 }
 0x2a3   : > { %26909 = vst [vmem:[#allocation80_spill] sm:$0xff] %v22077_v63  ;;  %v18285_v34 = vld [vmem:[#allocation8 + $0xf0] sm:$0xff]   ;;  %v9551_v31 = vrot.slane %v9523_v22, %v18800_v39 }
 0x2a4   : > { %v17676_v40 = vpop.f32.mrf.mxu1  ;;  %v6082_v17 = vpop.f32.mrf.mxu0  ;;  %17176 = vmatpush3.bf16.msra.mxu1 %v18285_v34  ;;  %v26921_v34 = vld [vmem:[#allocation58_spill] sm:$0xff] }
 0x2a5   : > { %v22101_v63 = vadd.f32 %v21945_v13, %v6082_v17  ;;  %v9579_v13 = vrot.slane %v9557_v2, %v18800_v39  ;;  %v9554_v16 = vcombine.low %v9537_v62, %v9551_v31  ;;  %v26920_v40 = vld [vmem:[#allocation55_spill] sm:$0xff] }
 0x2a6   : > { %v22112_v59 = vpop.f32.mrf.mxu1  ;;  %v6084_v3 = vpop.f32.mrf.mxu0  ;;  %10840 = vmatmul.mubr.bf16.gmra.mxu1 %v9418_v19  ;;  %v9485_v19 = vcombine.low %v22098_v8, %v22104_v6  ;;  %v16680_v17 = vcombine.high %v26920_v40, %v26919_v33 }
 0x2a7   : > { %26917 = vst [vmem:[#allocation94_spill] sm:$0xff] %v22101_v63  ;;  %10847 = vmatprep.mubr.bf16.mxu1 %v9487_v46  ;;  %v9588_v46 = vcombine.high %v22107_v55, %v22110_v21  ;;  %v26922_v3 = vld [vmem:[#allocation57_spill] sm:$0xff] }
 0x2a8   : > { %v17679_v5 = vpop.f32.mrf.mxu1  ;;  %v6087_v18 = vpop.f32.mrf.mxu0  ;;  %17798 = vmatmul.mubr.bf16.vlgmr.msra.gmra.mxu0 %v9285_v44  ;;  %v9622_v44 = vcombine.low %v26920_v40, %v26919_v33  ;;  %v22147_v33 = vrot.slane %v9520_v30, %v18800_v39  ;;  %v22150_v40 = vrot.slane %v9522_v52, %v18800_v39  ;;  %v9589_v52 = vcombine.low %v9579_v13, %v9586_v24 }
 0x2a9   : > { %v22119_v23 = vadd.f32 %v22000_v49, %v6087_v18  ;;  %17801 = vmatprep.mubr.msk.bf16.mxu0 %vm18513_vm0, %v26578_v58  ;;  %v9590_v49 = vcombine.high %v9579_v13, %v9586_v24  ;;  %v9624_v5 = vcombine.low %v26922_v3, %v26921_v34  ;;  %v9625_v18 = vcombine.low %v26924_v9, %v26923_v35 }
 0x2aa   : > { %v6306_v22 = vpop.f32.mrf.mxu1  ;;  %v6089_v2 = vpop.f32.mrf.mxu0  ;;  %v9604_v34 = vrot.slane %v9588_v46, %v18800_v39  ;;  %v9632_v48 = vrot.slane %v9622_v44, %v18800_v39  ;;  %v9552_v44 = vcombine.low %v22147_v33, %v22150_v40  ;;  %v9553_v47 = vcombine.high %v22147_v33, %v22150_v40 }
 0x2ab   : > { %26918 = vst [vmem:[#allocation91_spill] sm:$0xff] %v22119_v23  ;;  %v9618_v3 = vrot.slane %v9590_v49, %v18800_v39  ;;  %v9646_v42 = vrot.slane %v9624_v5, %v18800_v39  ;;  %v9653_v35 = vrot.slane %v9625_v18, %v18800_v39  ;;  %v26927_v5 = vld [vmem:[#allocation63_spill] sm:$0xff]  ;;  %v26928_v18 = vld [vmem:[#allocation65_spill] sm:$0xff]  ;;  %v9419_v23 = vcombine.high %v22050_v1, %v22053_v14 }
 0x2ac   : > { %v17680_v62 = vpop.f32.mrf.mxu1  ;;  %v6090_v31 = vpop.f32.mrf.mxu0 }
 0x2ad   : > { %v22142_v45 = vadd.f32 %v22010_v0, %v6090_v31  ;;  %v9639_v0 = vrot.slane %v16680_v17, %v18800_v39  ;;  %v9621_v17 = vcombine.low %v9604_v34, %v9618_v3  ;;  %v9689_v62 = vcombine.low %v26928_v18, %v26927_v5  ;;  %v26929_v31 = vld [vmem:[#allocation66_spill] sm:$0xff] }
 0x2ae   : > { %v22144_v22 = vpop.f32.mrf.mxu1  ;;  %v6092_v2 = vpop.f32.mrf.mxu0  ;;  %10848 = vmatmul.mubr.bf16.gmra.mxu1 %v9485_v19  ;;  %v22186_v5 = vrot.slane %v9589_v52, %v18800_v39 }
 0x2af   : > { %26925 = vst [vmem:[#allocation95_spill] sm:$0xff] %v22142_v45  ;;  %10855 = vmatprep.mubr.bf16.mxu1 %v9554_v16  ;;  %v9587_v16 = vcombine.low %v22107_v55, %v22110_v21  ;;  %v9655_v2 = vcombine.high %v9632_v48, %v9639_v0  ;;  %v26933_v55 = vld [vmem:[#allocation71_spill] sm:$0xff]  ;;  %v26934_v21 = vld [vmem:[#allocation69_spill] sm:$0xff] }
 0x2b0   : > { %v7916_v19 = vpop.f32.mrf.mxu1  ;;  %v6095_v9 = vpop.f32.mrf.mxu0  ;;  %17802 = vmatmul.mubr.bf16.gmra.mxu0 %v9352_v54  ;;  %v9692_v13 = vcombine.low %v26934_v21, %v26933_v55  ;;  %v18286_v21 = vld [vmem:[#allocation8 + $0x128] sm:$0xff]  }
 0x2b1   : > { %v22159_v30 = vadd.f32 %v22058_v10, %v6095_v9  ;;  %17805 = vmatprep.mubr.msk.bf16.mxu0 %vm18513_vm0, %v26578_v58  ;;  %v26930_v10 = vld [vmem:[#allocation64_spill] sm:$0xff]  ;;  %v9657_v19 = vcombine.high %v9646_v42, %v9653_v35  ;;  %v22183_v3 = vrot.slane %v9587_v16, %v18800_v39  ;;  %v9671_v1 = vrot.slane %v9655_v2, %v18800_v39 }
 0x2b2   : > { %v22165_v46 = vpop.f32.mrf.mxu1  ;;  %v6097_v49 = vpop.f32.mrf.mxu0  ;;  %v9690_v54 = vcombine.low %v26930_v10, %v26929_v31  ;;  %v26931_v9 = vld [vmem:[#allocation68_spill] sm:$0xff]  ;;  %v22191_v31 = vrot.slane %v9689_v62, %v18800_v39  ;;  %v22202_v16 = vrot.slane %v9692_v13, %v18800_v39  ;;  %v9656_v62 = vcombine.low %v9646_v42, %v9653_v35  ;;  %v26941_v35 = vld [vmem:[#allocation78_spill] sm:$0xff]  ;;  %17177 = vmatprep.subr.bf16.mxu1 %v18286_v21 }
 0x2b3   : > { %26926 = vst [vmem:[#allocation96_spill] sm:$0xff] %v22159_v30  ;;  %v26932_v30 = vld [vmem:[#allocation67_spill] sm:$0xff]  ;;  %v9685_v14 = vrot.slane %v9657_v19, %v18800_v39  ;;  %v26937_v19 = vld [vmem:[#allocation70_spill] sm:$0xff]  ;;  %v26942_v21 = vld [vmem:[#allocation156_spill] sm:$0xff] }
 0x2b4   : > { %v9691_v45 = vcombine.low %v26932_v30, %v26931_v9  ;;  %v7919_v24 = vpop.f32.mrf.mxu1  ;;  %v6098_v49 = vpop.f32.mrf.mxu0  ;;  %v22194_v10 = vrot.slane %v9690_v54, %v18800_v39  ;;  %v16681_v13 = vcombine.high %v26937_v19, %v26933_v55  ;;  %v9486_v19 = vcombine.high %v22098_v8, %v22104_v6 }
 0x2b5   : > { %v22180_v34 = vadd.f32 %v22085_v38, %v6098_v49  ;;  %v18287_v24 = vld [vmem:[#allocation8 + $0xe8] sm:$0xff]  }
 0x2b6   : > { %v22188_v18 = vpop.f32.mrf.mxu1  ;;  %v6100_v30 = vpop.f32.mrf.mxu0  ;;  %10856 = vmatmul.mubr.bf16.gmra.mxu1 %v9552_v44  ;;  %v22199_v38 = vrot.slane %v9691_v45, %v18800_v39  ;;  %v9654_v44 = vcombine.low %v9632_v48, %v9639_v0  ;;  %v9619_v45 = vcombine.low %v22183_v3, %v22186_v5  ;;  %v26939_v48 = vld [vmem:[#allocation74_spill] sm:$0xff] }
 0x2b7   : > { %26935 = vst [vmem:[#allocation93_spill] sm:$0xff] %v22180_v34  ;;  %10863 = vmatprep.mubr.bf16.mxu1 %v9621_v17  ;;  %v9688_v30 = vcombine.low %v9671_v1, %v9685_v14  ;;  %17178 = vmatpush3.bf16.msra.mxu1 %v18287_v24  ;;  %v26943_v1 = vld [vmem:[#allocation130_spill] sm:$0xff]  ;;  %v22238_v24 = vrot.slane %v16681_v13, %v18800_v39  ;;  %v26954_v34 = vld [vmem:[#allocation171_spill] sm:$0xff] }
 0x2b8   : > { %v7924_v52 = vpop.f32.mrf.mxu1  ;;  %v6103_v9 = vpop.f32.mrf.mxu0  ;;  %17806 = vmatmul.mubr.bf16.gmra.mxu0 %v9419_v23  ;;  %v26938_v23 = vld [vmem:[#allocation75_spill] sm:$0xff]  ;;  %v6144_v14 = vadd.f32 %v26943_v1, %v26942_v21 }
 0x2b9   : > { %v22205_v54 = vadd.f32 %v22112_v59, %v6103_v9  ;;  %17809 = vmatprep.mubr.msk.bf16.mxu0 %vm18513_vm0, %v26578_v58  ;;  %v9757_v0 = vcombine.low %v26939_v48, %v26938_v23  ;;  %v16682_v42 = vcombine.high %v26939_v48, %v26938_v23  ;;  %v26940_v59 = vld [vmem:[#allocation79_spill] sm:$0xff]  ;;  %v9722_v52 = vcombine.high %v22191_v31, %v22194_v10 }
 0x2ba   : > { %v22211_v17 = vpop.f32.mrf.mxu1  ;;  %v6105_v2 = vpop.f32.mrf.mxu0  ;;  %v9759_v49 = vcombine.low %v26941_v35, %v26940_v59  ;;  %v9724_v9 = vcombine.high %v22199_v38, %v22202_v16  ;;  %v22231_v23 = vrot.slane %v9656_v62, %v18800_v39 }
 0x2bb   : > { %26936 = vst [vmem:[#allocation98_spill] sm:$0xff] %v22205_v54  ;;  %v22228_v54 = vrot.slane %v9654_v44, %v18800_v39  ;;  %v22241_v35 = vrot.slane %v9757_v0, %v18800_v39  ;;  %v22244_v6 = vrot.slane %v16682_v42, %v18800_v39  ;;  %v7915_v44 = vadd.f32 %v22144_v22, %v6144_v14  ;;  %v26949_v14 = vld [vmem:[#allocation83_spill] sm:$0xff] }
 0x2bc   : > { %v7927_v2 = vpop.f32.mrf.mxu1  ;;  %v6106_v55 = vpop.f32.mrf.mxu0  ;;  %v22247_v8 = vrot.slane %v9759_v49, %v18800_v39  ;;  %v9738_v62 = vrot.slane %v9722_v52, %v18800_v39  ;;  %v9721_v42 = vcombine.low %v22191_v31, %v22194_v10  ;;  %v9723_v22 = vcombine.low %v22199_v38, %v22202_v16  ;;  %v26948_v52 = vld [vmem:[#allocation84_spill] sm:$0xff]  ;;  %v26953_v38 = vld [vmem:[#allocation89_spill] sm:$0xff] }
 0x2bd   : > { %v9752_v2 = vrot.slane %v9724_v9, %v18800_v39  ;;  %v26945_v55 = vld [vmem:[#allocation139_spill] sm:$0xff]  ;;  %v9686_v0 = vcombine.low %v22228_v54, %v22231_v23  ;;  %v9789_v31 = vcombine.high %v22238_v24, %v22241_v35  ;;  %v9826_v16 = vcombine.low %v26953_v38, %v26809_v28 }
 0x2be   : > { %v22235_v48 = vpop.f32.mrf.mxu1  ;;  %v6107_v59 = vpop.f32.mrf.mxu0  ;;  %10864 = vmatmul.mubr.bf16.gmra.mxu1 %v9619_v45  ;;  %v26944_v45 = vld [vmem:[#allocation163_spill] sm:$0xff]  ;;  %v9791_v10 = vcombine.high %v22244_v6, %v22247_v8  ;;  %v22284_v25 = vrot.slane %v9721_v42, %v18800_v39  ;;  %v26956_v42 = vld [vmem:[#allocation173_spill] sm:$0xff] }
 0x2bf   : > { %10871 = vmatprep.mubr.bf16.mxu1 %v9688_v30  ;;  %v6147_v13 = vadd.f32 %v26945_v55, %v26944_v45  ;;  %v26947_v30 = vld [vmem:[#allocation86_spill] sm:$0xff]  ;;  %v26950_v59 = vld [vmem:[#allocation88_spill] sm:$0xff]  ;;  %v9805_v33 = vrot.slane %v9789_v31, %v18800_v39 }
 0x2c0   : > { %v7932_v21 = vpop.f32.mrf.mxu1  ;;  %v8114_v1 = vpop.f32.mrf.mxu0  ;;  %17810 = vmatmul.mubr.bf16.gmra.mxu0 %v9486_v19  ;;  %v9823_v9 = vcombine.low %v26948_v52, %v26947_v30  ;;  %v9824_v19 = vcombine.low %v26950_v59, %v26949_v14  ;;  %v9755_v52 = vcombine.low %v9738_v62, %v9752_v2  ;;  %v26955_v14 = vld [vmem:[#allocation140_spill] sm:$0xff]  ;;  %v9819_v40 = vrot.slane %v9791_v10, %v18800_v39 }
 0x2c1   : > { %v22258_v49 = vadd.f32 %v8114_v1, %v7915_v44  ;;  %17813 = vmatprep.mubr.msk.bf16.mxu0 %vm18513_vm0, %v26578_v58  ;;  %v26951_v44 = vld [vmem:[#allocation87_spill] sm:$0xff]  ;;  %v26952_v21 = vld [vmem:[#allocation85_spill] sm:$0xff]  ;;  %v7918_v30 = vadd.f32 %v22165_v46, %v6147_v13  ;;  %v6152_v59 = vadd.f32 %v26955_v14, %v26954_v34  ;;  %v22305_v2 = vrot.slane %v9826_v16, %v18800_v39 }
 0x2c2   : > { %v22268_v45 = vpop.f32.mrf.mxu1  ;;  %v17699_v55 = vpop.f32.mrf.mxu0  ;;  %v9825_v1 = vcombine.low %v26952_v21, %v26951_v44  ;;  %v22289_v44 = vrot.slane %v9723_v22, %v18800_v39  ;;  %v22292_v28 = vrot.slane %v9823_v9, %v18800_v39  ;;  %v22295_v46 = vrot.slane %v9824_v19, %v18800_v39  ;;  %v26957_v22 = vld [vmem:[#allocation143_spill] sm:$0xff] }
 0x2c3   : > { %26946 = vst [vmem:[#allocation97_spill] sm:$0xff] %v22258_v49  ;;  %v7923_v13 = vadd.f32 %v22188_v18, %v6152_v59  ;;  %v6155_v9 = vadd.f32 %v26957_v22, %v26956_v42  ;;  %v9788_v10 = vcombine.low %v22238_v24, %v22241_v35  ;;  %v9790_v18 = vcombine.low %v22244_v6, %v22247_v8  ;;  %v26959_v35 = vld [vmem:[#allocation92_spill] sm:$0xff]  ;;  %v18288_v22 = vld [vmem:[#allocation8 + $0x120] sm:$0xff]  }
 0x2c4   : > { %v7935_v63 = vpop.f32.mrf.mxu1  ;;  %v8117_v55 = vpop.f32.mrf.mxu0  ;;  %v22302_v62 = vrot.slane %v9825_v1, %v18800_v39  ;;  %v9753_v31 = vcombine.low %v22284_v25, %v22289_v44  ;;  %v9822_v16 = vcombine.low %v9805_v33, %v9819_v40  ;;  %v16683_v24 = vcombine.high %v26808_v37, %v26811_v12  ;;  %17179 = vmatprep.subr.bf16.mxu1 %v18288_v22  ;;  %v26971_v22 = vld [vmem:[#allocation200_spill] sm:$0xff] }
 0x2c5   : > { %v22286_v49 = vadd.f32 %v8117_v55, %v7918_v30  ;;  %v7926_v59 = vadd.f32 %v22211_v17, %v6155_v9  ;;  %v9892_v6 = vcombine.low %v26959_v35, %v26815_v7  ;;  %v16684_v8 = vcombine.high %v26959_v35, %v26815_v7  ;;  %v26960_v55 = vld [vmem:[#allocation175_spill] sm:$0xff]  ;;  %v26963_v17 = vld [vmem:[#allocation149_spill] sm:$0xff] }
 0x2c6   : > { %v22297_v34 = vpop.f32.mrf.mxu1  ;;  %v17700_v63 = vpop.f32.mrf.mxu0  ;;  %10872 = vmatmul.mubr.bf16.gmra.mxu1 %v9686_v0  ;;  %v9858_v30 = vcombine.high %v22302_v62, %v22305_v2  ;;  %v9620_v42 = vcombine.high %v22183_v3, %v22186_v5  ;;  %v22344_v37 = vrot.slane %v9788_v10, %v18800_v39  ;;  %v22358_v10 = vrot.slane %v16683_v24, %v18800_v39 }
 0x2c7   : > { %10879 = vmatprep.mubr.bf16.mxu1 %v9755_v52  ;;  %v26958_v52 = vld [vmem:[#allocation81_spill] sm:$0xff]  ;;  %v26961_v63 = vld [vmem:[#allocation146_spill] sm:$0xff]  ;;  %v22364_v35 = vrot.slane %v16684_v8, %v18800_v39 }
 0x2c8   : > { %v7940_v19 = vpop.f32.mrf.mxu1  ;;  %v8122_v21 = vpop.f32.mrf.mxu0  ;;  %17814 = vmatmul.mubr.bf16.gmra.mxu0 %v9553_v47  ;;  %v9856_v47 = vcombine.high %v22292_v28, %v22295_v46  ;;  %v9890_v14 = vcombine.low %v26958_v52, %v26811_v12  ;;  %v6160_v33 = vadd.f32 %v26961_v63, %v26960_v55  ;;  %v22347_v12 = vrot.slane %v9790_v18, %v18800_v39  ;;  %v26965_v63 = vld [vmem:[#allocation104_spill] sm:$0xff]  ;;  %v26966_v8 = vld [vmem:[#allocation105_spill] sm:$0xff] }
 0x2c9   : > { %v22310_v0 = vadd.f32 %v8122_v21, %v7923_v13  ;;  %17817 = vmatprep.mubr.msk.bf16.mxu0 %vm18513_vm0, %v26578_v58  ;;  %v26962_v19 = vld [vmem:[#allocation177_spill] sm:$0xff]  ;;  %v9886_v3 = vrot.slane %v9858_v30, %v18800_v39  ;;  %v22361_v18 = vrot.slane %v9892_v6, %v18800_v39  ;;  %v9958_v6 = vcombine.low %v26819_v11, %v26965_v63 }
 0x2ca   : > { %v22320_v1 = vpop.f32.mrf.mxu1  ;;  %v17703_v38 = vpop.f32.mrf.mxu0  ;;  %v6163_v9 = vadd.f32 %v26963_v17, %v26962_v19  ;;  %v9872_v52 = vrot.slane %v9856_v47, %v18800_v39  ;;  %v22354_v5 = vrot.slane %v9890_v14, %v18800_v39  ;;  %v18290_v47 = vld [vmem:[#allocation8 + $0x178] sm:$0xff]   ;;  %v9855_v14 = vcombine.low %v22292_v28, %v22295_v46 }
 0x2cb   : > { %v26969_v46 = vld [vmem:[#allocation180_spill] sm:$0xff]  ;;  %17881 = vmatprep.subr.bf16.mxu0 %v18290_v47  ;;  %v9687_v63 = vcombine.high %v22228_v54, %v22231_v23 }
 0x2cc   : > { %v7943_v40 = vpop.f32.mrf.mxu1  ;;  %v8125_v13 = vpop.f32.mrf.mxu0  ;;  %17882 = vmatpush3.bf16.msra.mxu0 %v18290_v47 }
 0x2cd   : > { %v22341_v21 = vadd.f32 %v8125_v13, %v7926_v59  ;;  %v7931_v59 = vadd.f32 %v22235_v48, %v6160_v33  ;;  %v9857_v48 = vcombine.low %v22302_v62, %v22305_v2  ;;  %v9959_v40 = vcombine.low %v26966_v8, %v26822_v60  ;;  %v26967_v13 = vld [vmem:[#allocation106_spill] sm:$0xff] }
 0x2ce   : > { %v22349_v7 = vpop.f32.mrf.mxu1  ;;  %v17704_v38 = vpop.f32.mrf.mxu0  ;;  %10880 = vmatmul.mubr.bf16.gmra.mxu1 %v9753_v31  ;;  %v18289_v31 = vld [vmem:[#allocation8 + $0xe0] sm:$0xff]   ;;  %v26970_v62 = vld [vmem:[#allocation154_spill] sm:$0xff]  ;;  %v9889_v60 = vcombine.low %v9872_v52, %v9886_v3  ;;  %v22398_v8 = vrot.slane %v9855_v14, %v18800_v39  ;;  %v22409_v52 = vrot.slane %v9958_v6, %v18800_v39  ;;  %v26974_v6 = vld [vmem:[#allocation187_spill] sm:$0xff] }
 0x2cf   : > { %10887 = vmatprep.mubr.bf16.mxu1 %v9822_v16  ;;  %v26964_v16 = vld [vmem:[#allocation99_spill] sm:$0xff]  ;;  %17180 = vmatpush3.bf16.msra.mxu1 %v18289_v31  ;;  %v6168_v2 = vadd.f32 %v26970_v62, %v26969_v46  ;;  %v9820_v38 = vcombine.low %v22344_v37, %v22347_v12  ;;  %v9925_v31 = vcombine.high %v22361_v18, %v22364_v35 }
 0x2d0   : > { %v7948_v55 = vpop.f32.mrf.mxu1  ;;  %v8130_v30 = vpop.f32.mrf.mxu0  ;;  %17818 = vmatmul.mubr.bf16.gmra.mxu0 %v9620_v42  ;;  %v9957_v24 = vcombine.low %v26817_v26, %v26964_v16  ;;  %v26968_v42 = vld [vmem:[#allocation103_spill] sm:$0xff]  ;;  %v26972_v26 = vld [vmem:[#allocation174_spill] sm:$0xff]  ;;  %v22412_v3 = vrot.slane %v9959_v40, %v18800_v39 }
 0x2d1   : > { %v22374_v33 = vadd.f32 %v8130_v30, %v7931_v59  ;;  %17821 = vmatprep.mubr.msk.bf16.mxu0 %vm18513_vm0, %v26578_v58  ;;  %v9960_v28 = vcombine.low %v26968_v42, %v26967_v13  ;;  %v6184_v19 = vadd.f32 %v26972_v26, %v26971_v22  ;;  %v7934_v59 = vadd.f32 %v22268_v45, %v6163_v9  ;;  %v26975_v46 = vld [vmem:[#allocation155_spill] sm:$0xff]  ;;  %v26976_v40 = vld [vmem:[#allocation202_spill] sm:$0xff]  ;;  %v26977_v22 = vld [vmem:[#allocation176_spill] sm:$0xff] }
 0x2d2   : > { %v22386_v17 = vpop.f32.mrf.mxu1  ;;  %v17707_v11 = vpop.f32.mrf.mxu0  ;;  %v9923_v55 = vcombine.high %v22354_v5, %v22358_v10  ;;  %v22401_v13 = vrot.slane %v9857_v48, %v18800_v39  ;;  %v22404_v45 = vrot.slane %v9957_v24, %v18800_v39  ;;  %v7939_v14 = vadd.f32 %v22297_v34, %v6168_v2 }
 0x2d3   : > { %v22415_v47 = vrot.slane %v9960_v28, %v18800_v39  ;;  %v9953_v42 = vrot.slane %v9925_v31, %v18800_v39  ;;  %v6171_v62 = vadd.f32 %v26975_v46, %v26974_v6  ;;  %v6187_v26 = vadd.f32 %v26977_v22, %v26976_v40  ;;  %v18291_v40 = vld [vmem:[#allocation8 + $0x118] sm:$0xff]   ;;  %v26984_v22 = vld [vmem:[#allocation193_spill] sm:$0xff] }
 0x2d4   : > { %v7951_v30 = vpop.f32.mrf.mxu1  ;;  %v8133_v16 = vpop.f32.mrf.mxu0  ;;  %v9939_v24 = vrot.slane %v9923_v55, %v18800_v39  ;;  %v9922_v34 = vcombine.low %v22354_v5, %v22358_v10  ;;  %v26980_v5 = vld [vmem:[#allocation109_spill] sm:$0xff]  ;;  %17181 = vmatprep.subr.bf16.mxu1 %v18291_v40 }
 0x2d5   : > { %v22406_v9 = vadd.f32 %v8133_v16, %v7934_v59  ;;  %v9990_v59 = vcombine.high %v22404_v45, %v22409_v52  ;;  %v26979_v30 = vld [vmem:[#allocation107_spill] sm:$0xff]  ;;  %v10025_v10 = vcombine.low %v26980_v5, %v26830_v53  ;;  %v26990_v40 = vld [vmem:[#allocation21_spill] sm:$0xff] }
 0x2d6   : > { %v7954_v54 = vpop.f32.mrf.mxu1  ;;  %v17708_v23 = vpop.f32.mrf.mxu0  ;;  %10888 = vmatmul.mubr.bf16.gmra.mxu1 %v9820_v38  ;;  %v9887_v38 = vcombine.low %v22398_v8, %v22401_v13  ;;  %v10024_v16 = vcombine.low %v26979_v30, %v26828_v50  ;;  %v9956_v46 = vcombine.low %v9939_v24, %v9953_v42  ;;  %v26987_v50 = vld [vmem:[#allocation190_spill] sm:$0xff] }
 0x2d7   : > { %26973 = vst [vmem:[#allocation101_spill] sm:$0xff] %v22406_v9  ;;  %v22418_v48 = vadd.f32 %v7954_v54, %v6184_v19  ;;  %10895 = vmatprep.mubr.bf16.mxu1 %v9889_v60  ;;  %v9924_v19 = vcombine.low %v22361_v18, %v22364_v35  ;;  %v9992_v60 = vcombine.high %v22412_v3, %v22415_v47  ;;  %v26982_v23 = vld [vmem:[#allocation113_spill] sm:$0xff] }
 0x2d8   : > { %v7956_v28 = vpop.f32.mrf.mxu1  ;;  %v8138_v11 = vpop.f32.mrf.mxu0  ;;  %17822 = vmatmul.mubr.bf16.gmra.mxu0 %v9687_v63  ;;  %v26981_v63 = vld [vmem:[#allocation110_spill] sm:$0xff]  ;;  %v7942_v35 = vadd.f32 %v22320_v1, %v6171_v62  ;;  %v10006_v24 = vrot.slane %v9990_v59, %v18800_v39 }
 0x2d9   : > { %v22430_v2 = vadd.f32 %v8138_v11, %v7939_v14  ;;  %17825 = vmatprep.mubr.msk.bf16.mxu0 %vm18513_vm0, %v26578_v58  ;;  %v16685_v54 = vcombine.high %v26981_v63, %v26830_v53  ;;  %v26983_v14 = vld [vmem:[#allocation111_spill] sm:$0xff]  ;;  %v9754_v53 = vcombine.high %v22284_v25, %v22289_v44  ;;  %v22458_v63 = vrot.slane %v9922_v34, %v18800_v39 }
 0x2da   : > { %v7957_v55 = vpop.f32.mrf.mxu1  ;;  %v17711_v31 = vpop.f32.mrf.mxu0  ;;  %v10027_v18 = vcombine.low %v26983_v14, %v26982_v23  ;;  %v26985_v28 = vld [vmem:[#allocation159_spill] sm:$0xff]  ;;  %v22463_v1 = vrot.slane %v9924_v19, %v18800_v39  ;;  %v10020_v42 = vrot.slane %v9992_v60, %v18800_v39  ;;  %v22471_v25 = vrot.slane %v10025_v10, %v18800_v39  ;;  %v18292_v60 = vld [vmem:[#allocation8 + $0xd8] sm:$0xff]  }
 0x2db   : > { %26978 = vst [vmem:[#allocation100_spill] sm:$0xff] %v22430_v2  ;;  %v22449_v6 = vadd.f32 %v7957_v55, %v6187_v26  ;;  %v6176_v11 = vadd.f32 %v26985_v28, %v26984_v22  ;;  %v26986_v31 = vld [vmem:[#allocation203_spill] sm:$0xff]  ;;  %v22474_v44 = vrot.slane %v16685_v54, %v18800_v39  ;;  %v26991_v22 = vld [vmem:[#allocation196_spill] sm:$0xff]  ;;  %v9989_v54 = vcombine.low %v22404_v45, %v22409_v52 }
 0x2dc   : > { %v6192_v30 = vadd.f32 %v26987_v50, %v26986_v31  ;;  %v7959_v2 = vpop.f32.mrf.mxu1  ;;  %v8141_v5 = vpop.f32.mrf.mxu0  ;;  %v22477_v34 = vrot.slane %v10027_v18, %v18800_v39  ;;  %v18293_v55 = vld [vmem:[#allocation8 + $0x170] sm:$0xff]   ;;  %v6195_v10 = vadd.f32 %v26991_v22, %v26990_v40  ;;  %17182 = vmatpush3.bf16.msra.mxu1 %v18292_v60  ;;  %v16686_v52 = vcombine.high %v26983_v14, %v26982_v23  ;;  %v26996_v60 = vld [vmem:[#allocation124_spill] sm:$0xff]  ;;  %v26998_v22 = vld [vmem:[#allocation198_spill] sm:$0xff] }
 0x2dd   : > { %v22460_v9 = vadd.f32 %v8141_v5, %v7942_v35  ;;  %v22468_v2 = vrot.slane %v10024_v16, %v18800_v39  ;;  %v7947_v19 = vadd.f32 %v22349_v7, %v6176_v11  ;;  %v26989_v35 = vld [vmem:[#allocation165_spill] sm:$0xff]  ;;  %v9991_v7 = vcombine.low %v22412_v3, %v22415_v47  ;;  %v26992_v3 = vld [vmem:[#allocation119_spill] sm:$0xff]  ;;  %v26993_v47 = vld [vmem:[#allocation118_spill] sm:$0xff]  ;;  %17883 = vmatprep.subr.bf16.mxu0 %v18293_v55 }
 0x2de   : > { %v7962_v62 = vpop.f32.mrf.mxu1  ;;  %v17712_v26 = vpop.f32.mrf.mxu0  ;;  %10896 = vmatmul.mubr.bf16.gmra.mxu1 %v9887_v38  ;;  %v26988_v38 = vld [vmem:[#allocation197_spill] sm:$0xff]  ;;  %v10023_v11 = vcombine.low %v10006_v24, %v10020_v42  ;;  %v10059_v45 = vcombine.high %v22474_v44, %v22477_v34  ;;  %v26994_v24 = vld [vmem:[#allocation123_spill] sm:$0xff]  ;;  %17884 = vmatpush3.bf16.msra.mxu0 %v18293_v55  ;;  %v9821_v23 = vcombine.high %v22344_v37, %v22347_v12  ;;  %v26997_v14 = vld [vmem:[#allocation204_spill] sm:$0xff] }
 0x2df   : > { %v22480_v59 = vadd.f32 %v7962_v62, %v6192_v30  ;;  %10903 = vmatprep.mubr.bf16.mxu1 %v9956_v46  ;;  %v6179_v16 = vadd.f32 %v26989_v35, %v26988_v38  ;;  %v9954_v46 = vcombine.low %v22458_v63, %v22463_v1  ;;  %v10057_v5 = vcombine.high %v22468_v2, %v22471_v25  ;;  %v26995_v42 = vld [vmem:[#allocation121_spill] sm:$0xff] }
 0x2e0   : > { %v7964_v28 = vpop.f32.mrf.mxu1  ;;  %v8146_v31 = vpop.f32.mrf.mxu0  ;;  %17826 = vmatmul.mubr.bf16.gmra.mxu0 %v9754_v53  ;;  %v10092_v53 = vcombine.low %v26993_v47, %v26992_v3  ;;  %v10094_v38 = vcombine.low %v26996_v60, %v26841_v20  ;;  %v10087_v55 = vrot.slane %v10059_v45, %v18800_v39  ;;  %v22526_v37 = vrot.slane %v16686_v52, %v18800_v39  ;;  %v27000_v47 = vld [vmem:[#allocation201_spill] sm:$0xff]  ;;  %v27001_v52 = vld [vmem:[#allocation126_spill] sm:$0xff] }
 0x2e1   : > { %v22490_v18 = vadd.f32 %v8146_v31, %v7947_v19  ;;  %17829 = vmatprep.mubr.msk.bf16.mxu0 %vm18513_vm0, %v26578_v58  ;;  %v7950_v62 = vadd.f32 %v22386_v17, %v6179_v16  ;;  %v10093_v19 = vcombine.low %v26995_v42, %v26994_v24  ;;  %v6200_v28 = vadd.f32 %v26998_v22, %v26997_v14 }
 0x2e2   : > { %v7965_v50 = vpop.f32.mrf.mxu1  ;;  %v17715_v30 = vpop.f32.mrf.mxu0  ;;  %v22518_v17 = vrot.slane %v9989_v54, %v18800_v39  ;;  %v10073_v20 = vrot.slane %v10057_v5, %v18800_v39  ;;  %v10122_v3 = vrot.slane %v10094_v38, %v18800_v39  ;;  %v10056_v5 = vcombine.low %v22468_v2, %v22471_v25  ;;  %v27004_v38 = vld [vmem:[#allocation132_spill] sm:$0xff]  ;;  %v27006_v2 = vld [vmem:[#allocation131_spill] sm:$0xff] }
 0x2e3   : > { %v22505_v26 = vadd.f32 %v7965_v50, %v6195_v10  ;;  %v22521_v50 = vrot.slane %v9991_v7, %v18800_v39  ;;  %v10108_v30 = vrot.slane %v10092_v53, %v18800_v39  ;;  %v10115_v54 = vrot.slane %v10093_v19, %v18800_v39  ;;  %v27003_v19 = vld [vmem:[#allocation127_spill] sm:$0xff] }
 0x2e4   : > { %v7967_v35 = vpop.f32.mrf.mxu1  ;;  %v8149_v40 = vpop.f32.mrf.mxu0  ;;  %v10058_v45 = vcombine.low %v22474_v44, %v22477_v34  ;;  %v10159_v60 = vcombine.low %v27003_v19, %v26843_v27  ;;  %v16687_v25 = vcombine.high %v27006_v2, %v27004_v38  ;;  %v9888_v27 = vcombine.high %v22398_v8, %v22401_v13 }
 0x2e5   : > { %v22515_v31 = vadd.f32 %v8149_v40, %v7950_v62  ;;  %v27005_v35 = vld [vmem:[#allocation129_spill] sm:$0xff]  ;;  %v10021_v34 = vcombine.low %v22518_v17, %v22521_v50  ;;  %v10124_v22 = vcombine.high %v22526_v37, %v10108_v30 }
 0x2e6   : > { %v7970_v16 = vpop.f32.mrf.mxu1  ;;  %v17716_v10 = vpop.f32.mrf.mxu0  ;;  %10904 = vmatmul.mubr.bf16.gmra.mxu1 %v9954_v46  ;;  %v26999_v46 = vld [vmem:[#allocation35_spill] sm:$0xff]  ;;  %v10160_v40 = vcombine.low %v27005_v35, %v27004_v38  ;;  %v22578_v8 = vrot.slane %v16687_v25, %v18800_v39  ;;  %v10125_v35 = vcombine.low %v10115_v54, %v10122_v3 }
 0x2e7   : > { %v22528_v12 = vadd.f32 %v7970_v16, %v6200_v28  ;;  %10911 = vmatprep.mubr.bf16.mxu1 %v10023_v11  ;;  %v6203_v7 = vadd.f32 %v27000_v47, %v26999_v46  ;;  %v27002_v11 = vld [vmem:[#allocation125_spill] sm:$0xff]  ;;  %v10126_v28 = vcombine.high %v10115_v54, %v10122_v3  ;;  %v22560_v46 = vrot.slane %v10056_v5, %v18800_v39  ;;  %v27007_v5 = vld [vmem:[#allocation36_spill] sm:$0xff] }
 0x2e8   : > { %v7972_v62 = vpop.f32.mrf.mxu1  ;;  %v8154_v24 = vpop.f32.mrf.mxu0  ;;  %17830 = vmatmul.mubr.bf16.gmra.mxu0 %v9821_v23  ;;  %v10158_v42 = vcombine.low %v27002_v11, %v27001_v52  ;;  %v22563_v47 = vrot.slane %v10058_v45, %v18800_v39  ;;  %v10140_v52 = vrot.slane %v10124_v22, %v18800_v39  ;;  %v27014_v3 = vld [vmem:[#allocation37_spill] sm:$0xff] }
 0x2e9   : > { %v22542_v53 = vadd.f32 %v8154_v24, %v22418_v48  ;;  %17833 = vmatprep.mubr.msk.bf16.mxu0 %vm18513_vm0, %v26578_v58  ;;  %v10090_v48 = vcombine.low %v10073_v20, %v10087_v55  ;;  %v22572_v20 = vrot.slane %v10159_v60, %v18800_v39  ;;  %v22575_v55 = vrot.slane %v10160_v40, %v18800_v39 }
 0x2ea   : > { %v7973_v23 = vpop.f32.mrf.mxu1  ;;  %v17719_v44 = vpop.f32.mrf.mxu0  ;;  %v22566_v62 = vrot.slane %v10158_v42, %v18800_v39  ;;  %v10088_v19 = vcombine.low %v22560_v46, %v22563_v47  ;;  %v10123_v60 = vcombine.low %v22526_v37, %v10108_v30  ;;  %v27011_v30 = vld [vmem:[#allocation141_spill] sm:$0xff] }
 0x2eb   : > { %v22554_v14 = vadd.f32 %v7973_v23, %v6203_v7  ;;  %v10193_v2 = vcombine.high %v22575_v55, %v22578_v8  ;;  %v27008_v44 = vld [vmem:[#allocation134_spill] sm:$0xff] }
 0x2ec   : > { %v7975_v16 = vpop.f32.mrf.mxu1  ;;  %v8157_v10 = vpop.f32.mrf.mxu0  ;;  %v10191_v40 = vcombine.high %v22566_v62, %v22572_v20 }
 0x2ed   : > { %v22569_v7 = vadd.f32 %v8157_v10, %v22449_v6  ;;  %v10154_v6 = vrot.slane %v10126_v28, %v18800_v39  ;;  %v27012_v28 = vld [vmem:[#allocation147_spill] sm:$0xff]  ;;  %v27013_v16 = vld [vmem:[#allocation145_spill] sm:$0xff] }
 0x2ee   : > { %v7978_v13 = vpop.f32.mrf.mxu1  ;;  %v17720_v24 = vpop.f32.mrf.mxu0  ;;  %10912 = vmatmul.mubr.bf16.gmra.mxu1 %v10021_v34  ;;  %v27009_v34 = vld [vmem:[#allocation133_spill] sm:$0xff]  ;;  %v10228_v54 = vcombine.low %v27013_v16, %v27012_v28 }
 0x2ef   : > { %v22581_v45 = vadd.f32 %v7978_v13, %v27007_v5  ;;  %10919 = vmatprep.mubr.bf16.mxu1 %v10090_v48  ;;  %v10225_v48 = vcombine.low %v27009_v34, %v27008_v44  ;;  %v16688_v37 = vcombine.high %v27009_v34, %v27008_v44  ;;  %v9955_v5 = vcombine.high %v22458_v63, %v22463_v1 }
 0x2f0   : > { %v7980_v11 = vpop.f32.mrf.mxu1  ;;  %v8162_v42 = vpop.f32.mrf.mxu0  ;;  %17834 = vmatmul.mubr.bf16.gmra.mxu0 %v9888_v27  ;;  %v10157_v27 = vcombine.low %v10140_v52, %v10154_v6  ;;  %v10207_v44 = vrot.slane %v10191_v40, %v18800_v39 }
 0x2f1   : > { %v22589_v38 = vadd.f32 %v8162_v42, %v22480_v59  ;;  %17837 = vmatprep.mubr.msk.bf16.mxu0 %vm18513_vm0, %v26578_v58  ;;  %v27010_v59 = vld [vmem:[#allocation142_spill] sm:$0xff]  ;;  %v22611_v11 = vrot.slane %v10123_v60, %v18800_v39  ;;  %v22622_v6 = vrot.slane %v10225_v48, %v18800_v39  ;;  %v10242_v63 = vrot.slane %v16688_v37, %v18800_v39 }
 0x2f2   : > { %v7981_v25 = vpop.f32.mrf.mxu1  ;;  %v17723_v23 = vpop.f32.mrf.mxu0  ;;  %v10227_v22 = vcombine.low %v27011_v30, %v27010_v59  ;;  %v27015_v60 = vld [vmem:[#allocation38_spill] sm:$0xff]  ;;  %v10190_v48 = vcombine.low %v22566_v62, %v22572_v20  ;;  %v10192_v37 = vcombine.low %v22575_v55, %v22578_v8  ;;  %v27022_v62 = vld [vmem:[#allocation153_spill] sm:$0xff] }
 0x2f3   : > { %v22606_v10 = vadd.f32 %v7981_v25, %v27014_v3  ;;  %v22617_v23 = vrot.slane %v10125_v35, %v18800_v39  ;;  %v10221_v25 = vrot.slane %v10193_v2, %v18800_v39  ;;  %v10258_v16 = vcombine.high %v22622_v6, %v10242_v63  ;;  %v27017_v3 = vld [vmem:[#allocation148_spill] sm:$0xff]  ;;  %v27023_v55 = vld [vmem:[#allocation158_spill] sm:$0xff] }
 0x2f4   : > { %v7983_v13 = vpop.f32.mrf.mxu1  ;;  %v8165_v24 = vpop.f32.mrf.mxu0  ;;  %v10249_v1 = vrot.slane %v10227_v22, %v18800_v39  ;;  %v10295_v8 = vcombine.low %v27023_v55, %v26863_v41 }
 0x2f5   : > { %v22614_v42 = vadd.f32 %v8165_v24, %v22505_v26  ;;  %v10256_v26 = vrot.slane %v10228_v54, %v18800_v39  ;;  %v10224_v28 = vcombine.low %v10207_v44, %v10221_v25  ;;  %v27018_v13 = vld [vmem:[#allocation41_spill] sm:$0xff]  ;;  %v10022_v25 = vcombine.high %v22518_v17, %v22521_v50 }
 0x2f6   : > { %v7986_v34 = vpop.f32.mrf.mxu1  ;;  %v17724_v52 = vpop.f32.mrf.mxu0  ;;  %10920 = vmatmul.mubr.bf16.gmra.mxu1 %v10088_v19  ;;  %v10155_v19 = vcombine.low %v22611_v11, %v22617_v23  ;;  %v27025_v17 = vld [vmem:[#allocation53_spill] sm:$0xff] }
 0x2f7   : > { %v22628_v59 = vadd.f32 %v7986_v34, %v27015_v60  ;;  %10927 = vmatprep.mubr.bf16.mxu1 %v10157_v27  ;;  %v10260_v54 = vcombine.high %v10249_v1, %v10256_v26  ;;  %v27020_v34 = vld [vmem:[#allocation151_spill] sm:$0xff]  ;;  %v27021_v60 = vld [vmem:[#allocation157_spill] sm:$0xff] }
 0x2f8   : > { %v7988_v35 = vpop.f32.mrf.mxu1  ;;  %v8170_v40 = vpop.f32.mrf.mxu0  ;;  %17838 = vmatmul.mubr.bf16.gmra.mxu0 %v9955_v5  ;;  %v27019_v5 = vld [vmem:[#allocation152_spill] sm:$0xff]  ;;  %v10294_v20 = vcombine.low %v27022_v62, %v27021_v60 }
 0x2f9   : > { %v22631_v2 = vadd.f32 %v8170_v40, %v22528_v12  ;;  %17841 = vmatprep.mubr.msk.bf16.mxu0 %vm18513_vm0, %v26578_v58  ;;  %v27016_v12 = vld [vmem:[#allocation150_spill] sm:$0xff]  ;;  %v10293_v52 = vcombine.low %v27020_v34, %v27019_v5  ;;  %v10288_v5 = vrot.slane %v10260_v54, %v18800_v39  ;;  %v10257_v54 = vcombine.low %v22622_v6, %v10242_v63  ;;  %v27026_v60 = vld [vmem:[#allocation160_spill] sm:$0xff] }
 0x2fa   : > { %v7989_v30 = vpop.f32.mrf.mxu1  ;;  %v17727_v22 = vpop.f32.mrf.mxu0  ;;  %v10292_v27 = vcombine.low %v27017_v3, %v27016_v12  ;;  %v22662_v3 = vrot.slane %v10192_v37, %v18800_v39  ;;  %v16689_v62 = vcombine.high %v27026_v60, %v26863_v41 }
 0x2fb   : > { %v22645_v24 = vadd.f32 %v7989_v30, %v27018_v13  ;;  %v22659_v30 = vrot.slane %v10190_v48, %v18800_v39  ;;  %v10274_v13 = vrot.slane %v10258_v16, %v18800_v39  ;;  %v22676_v48 = vrot.slane %v10294_v20, %v18800_v39  ;;  %v27029_v20 = vld [vmem:[#allocation162_spill] sm:$0xff] }
 0x2fc   : > { %v7991_v35 = vpop.f32.mrf.mxu1  ;;  %v8173_v44 = vpop.f32.mrf.mxu0  ;;  %v22667_v34 = vrot.slane %v10292_v27, %v18800_v39  ;;  %v10259_v27 = vcombine.low %v10249_v1, %v10256_v26  ;;  %v27032_v1 = vld [vmem:[#allocation54_spill] sm:$0xff]  ;;  %v22707_v60 = vrot.slane %v10257_v54, %v18800_v39 }
 0x2fd   : > { %v22656_v40 = vadd.f32 %v8173_v44, %v22554_v14  ;;  %v22673_v14 = vrot.slane %v10293_v52, %v18800_v39  ;;  %v27028_v52 = vld [vmem:[#allocation164_spill] sm:$0xff]  ;;  %v27031_v44 = vld [vmem:[#allocation170_spill] sm:$0xff]  ;;  %v10222_v41 = vcombine.low %v22659_v30, %v22662_v3  ;;  %v10291_v26 = vcombine.low %v10274_v13, %v10288_v5  ;;  %v18294_v13 = vld [vmem:[#allocation8 + $0x110] sm:$0xff]  }
 0x2fe   : > { %v7994_v22 = vpop.f32.mrf.mxu1  ;;  %v17728_v12 = vpop.f32.mrf.mxu0  ;;  %10928 = vmatmul.mubr.bf16.gmra.mxu1 %v10155_v19  ;;  %v22679_v19 = vrot.slane %v10295_v8, %v18800_v39  ;;  %v10360_v55 = vcombine.low %v27029_v20, %v27028_v52  ;;  %v16690_v8 = vcombine.high %v27029_v20, %v27028_v52  ;;  %v27030_v35 = vld [vmem:[#allocation172_spill] sm:$0xff]  ;;  %v22710_v52 = vrot.slane %v10259_v27, %v18800_v39  ;;  %v18295_v5 = vld [vmem:[#allocation8 + $0xd0] sm:$0xff]  }
 0x2ff   : > { %27024 = vst [vmem:[#allocation102_spill] sm:$0xff] %v22656_v40  ;;  %v22670_v50 = vadd.f32 %v7994_v22, %v27025_v17  ;;  %10935 = vmatprep.mubr.bf16.mxu1 %v10224_v28  ;;  %v10325_v22 = vcombine.high %v22667_v34, %v22673_v14  ;;  %v22713_v20 = vrot.slane %v16689_v62, %v18800_v39  ;;  %v27034_v62 = vld [vmem:[#allocation59_spill] sm:$0xff] }
 0x300   : > { %v7996_v37 = vpop.f32.mrf.mxu1  ;;  %v8178_v16 = vpop.f32.mrf.mxu0  ;;  %17842 = vmatmul.mubr.bf16.gmra.mxu0 %v10022_v25  ;;  %v10362_v25 = vcombine.low %v27031_v44, %v27030_v35  ;;  %v10327_v12 = vcombine.high %v22676_v48, %v22679_v19  ;;  %v22719_v44 = vrot.slane %v10360_v55, %v18800_v39  ;;  %17183 = vmatprep.subr.bf16.mxu1 %v18294_v13 }
 0x301   : > { %v22685_v28 = vadd.f32 %v8178_v16, %v22581_v45  ;;  %17845 = vmatprep.mubr.msk.bf16.mxu0 %vm18513_vm0, %v26578_v58  ;;  %v10089_v16 = vcombine.high %v22560_v46, %v22563_v47  ;;  %v18296_v47 = vld [vmem:[#allocation8 + $0x168] sm:$0xff]   ;;  %17184 = vmatpush3.bf16.msra.mxu1 %v18295_v5 }
 0x302   : > { %v7997_v6 = vpop.f32.mrf.mxu1  ;;  %v17731_v63 = vpop.f32.mrf.mxu0  ;;  %v22725_v46 = vrot.slane %v10362_v25, %v18800_v39  ;;  %v10355_v55 = vrot.slane %v10327_v12, %v18800_v39  ;;  %v10324_v25 = vcombine.low %v22667_v34, %v22673_v14  ;;  %17885 = vmatprep.subr.bf16.mxu0 %v18296_v47  ;;  %v27036_v34 = vld [vmem:[#allocation183_spill] sm:$0xff] }
 0x303   : > { %27027 = vst [vmem:[#allocation108_spill] sm:$0xff] %v22685_v28  ;;  %v22698_v45 = vadd.f32 %v7997_v6, %v27032_v1  ;;  %v22722_v6 = vrot.slane %v16690_v8, %v18800_v39  ;;  %v10289_v8 = vcombine.low %v22707_v60, %v22710_v52  ;;  %v27037_v14 = vld [vmem:[#allocation179_spill] sm:$0xff]  ;;  %17886 = vmatpush3.bf16.msra.mxu0 %v18296_v47 }
 0x304   : > { %v7999_v17 = vpop.f32.mrf.mxu1  ;;  %v8181_v37 = vpop.f32.mrf.mxu0  ;;  %v10426_v13 = vcombine.low %v27037_v14, %v27036_v34  ;;  %v22761_v34 = vrot.slane %v10324_v25, %v18800_v39 }
 0x305   : > { %v22716_v35 = vadd.f32 %v8181_v37, %v22606_v10  ;;  %v10341_v10 = vrot.slane %v10325_v22, %v18800_v39  ;;  %v10394_v22 = vcombine.high %v22722_v6, %v22725_v46 }
 0x306   : > { %v8002_v54 = vpop.f32.mrf.mxu1  ;;  %v17732_v27 = vpop.f32.mrf.mxu0  ;;  %10936 = vmatmul.mubr.bf16.gmra.mxu1 %v10222_v41  ;;  %v10326_v41 = vcombine.low %v22676_v48, %v22679_v19  ;;  %v27038_v48 = vld [vmem:[#allocation181_spill] sm:$0xff]  ;;  %v27039_v19 = vld [vmem:[#allocation184_spill] sm:$0xff] }
 0x307   : > { %27033 = vst [vmem:[#allocation114_spill] sm:$0xff] %v22716_v35  ;;  %v22728_v63 = vadd.f32 %v8002_v54, %v27034_v62  ;;  %10943 = vmatprep.mubr.bf16.mxu1 %v10291_v26  ;;  %v10392_v26 = vcombine.high %v22713_v20, %v22719_v44  ;;  %v10427_v5 = vcombine.low %v27039_v19, %v27038_v48  ;;  %v27041_v54 = vld [vmem:[#allocation182_spill] sm:$0xff] }
 0x308   : > { %v8004_v1 = vpop.f32.mrf.mxu1  ;;  %v8186_v17 = vpop.f32.mrf.mxu0  ;;  %17846 = vmatmul.mubr.bf16.gmra.mxu0 %v10089_v16  ;;  %v27042_v62 = vld [vmem:[#allocation186_spill] sm:$0xff]  ;;  %v10358_v35 = vcombine.low %v10341_v10, %v10355_v55  ;;  %v22767_v48 = vrot.slane %v10326_v41, %v18800_v39  ;;  %v10422_v47 = vrot.slane %v10394_v22, %v18800_v39  ;;  %v10391_v22 = vcombine.low %v22713_v20, %v22719_v44 }
 0x309   : > { %v22739_v37 = vadd.f32 %v8186_v17, %v22628_v59  ;;  %17849 = vmatprep.mubr.msk.bf16.mxu0 %vm18513_vm0, %v26578_v58  ;;  %v27040_v59 = vld [vmem:[#allocation185_spill] sm:$0xff]  ;;  %v10429_v1 = vcombine.low %v27042_v62, %v21002_v32  ;;  %v27043_v17 = vld [vmem:[#allocation60_spill] sm:$0xff]  ;;  %v10408_v32 = vrot.slane %v10392_v26, %v18800_v39  ;;  %v16691_v20 = vcombine.high %v21091_v57, %v26875_v56 }
 0x30a   : > { %v8005_v12 = vpop.f32.mrf.mxu1  ;;  %v17735_v16 = vpop.f32.mrf.mxu0  ;;  %v10428_v27 = vcombine.low %v27041_v54, %v27040_v59  ;;  %v10356_v26 = vcombine.low %v22761_v34, %v22767_v48  ;;  %v27045_v54 = vld [vmem:[#allocation188_spill] sm:$0xff]  ;;  %v27046_v62 = vld [vmem:[#allocation73_spill] sm:$0xff]  ;;  %v10495_v44 = vcombine.low %v26876_v4, %v26879_v43 }
 0x30b   : > { %27035 = vst [vmem:[#allocation112_spill] sm:$0xff] %v22739_v37  ;;  %v22756_v37 = vadd.f32 %v8005_v12, %v27043_v17  ;;  %v10156_v16 = vcombine.high %v22611_v11, %v22617_v23  ;;  %v22775_v11 = vrot.slane %v10427_v5, %v18800_v39  ;;  %v10425_v5 = vcombine.low %v10408_v32, %v10422_v47 }
 0x30c   : > { %v8007_v28 = vpop.f32.mrf.mxu1  ;;  %v8189_v40 = vpop.f32.mrf.mxu0  ;;  %v22778_v23 = vrot.slane %v10428_v27, %v18800_v39  ;;  %v10493_v27 = vcombine.low %v27045_v54, %v26875_v56  ;;  %v22815_v47 = vrot.slane %v10391_v22, %v18800_v39 }
 0x30d   : > { %v22764_v14 = vadd.f32 %v8189_v40, %v22645_v24  ;;  %v22772_v28 = vrot.slane %v10426_v13, %v18800_v39  ;;  %v10457_v24 = vrot.slane %v10429_v1, %v18800_v39  ;;  %v27044_v40 = vld [vmem:[#allocation72_spill] sm:$0xff]  ;;  %v10393_v13 = vcombine.low %v22722_v6, %v22725_v46 }
 0x30e   : > { %v8010_v12 = vpop.f32.mrf.mxu1  ;;  %v17736_v10 = vpop.f32.mrf.mxu0  ;;  %10944 = vmatmul.mubr.bf16.gmra.mxu1 %v10289_v8  ;;  %v16692_v6 = vcombine.high %v26876_v4, %v26879_v43  ;;  %v22823_v4 = vrot.slane %v10493_v27, %v18800_v39 }
 0x30f   : > { %v22782_v55 = vadd.f32 %v8010_v12, %v27044_v40  ;;  %10951 = vmatprep.mubr.bf16.mxu1 %v10358_v35  ;;  %v10459_v59 = vcombine.high %v22772_v28, %v22775_v11  ;;  %v22818_v57 = vrot.slane %v10393_v13, %v18800_v39  ;;  %v10517_v40 = vrot.slane %v10495_v44, %v18800_v39 }
 0x310   : > { %v8012_v25 = vpop.f32.mrf.mxu1  ;;  %v8194_v41 = vpop.f32.mrf.mxu0  ;;  %17850 = vmatmul.mubr.bf16.gmra.mxu0 %v10156_v16  ;;  %v10223_v16 = vcombine.high %v22659_v30, %v22662_v3  ;;  %v27047_v30 = vld [vmem:[#allocation76_spill] sm:$0xff]  ;;  %v10290_v44 = vcombine.high %v22707_v60, %v22710_v52 }
 0x311   : > { %v22785_v8 = vadd.f32 %v8194_v41, %v22670_v50  ;;  %17853 = vmatprep.mubr.msk.bf16.mxu0 %vm18513_vm0, %v26578_v58  ;;  %v10461_v50 = vcombine.high %v22778_v23, %v10457_v24  ;;  %v10475_v56 = vrot.slane %v10459_v59, %v18800_v39  ;;  %v10524_v25 = vrot.slane %v16692_v6, %v18800_v39 }
 0x312   : > { %v8013_v19 = vpop.f32.mrf.mxu1  ;;  %v17739_v35 = vpop.f32.mrf.mxu0  ;;  %v10460_v59 = vcombine.low %v22778_v23, %v10457_v24  ;;  %v18298_v23 = vld [vmem:[#allocation8 + $0xc8] sm:$0xff]  }
 0x313   : > { %v22801_v1 = vadd.f32 %v8013_v19, %v27046_v62  ;;  %v10489_v43 = vrot.slane %v10461_v50, %v18800_v39  ;;  %v10423_v35 = vcombine.low %v22815_v47, %v22818_v57  ;;  %v10528_v27 = vcombine.high %v10517_v40, %v10524_v25 }
 0x314   : > { %v8015_v46 = vpop.f32.mrf.mxu1  ;;  %v8197_v17 = vpop.f32.mrf.mxu0 }
 0x315   : > { %v22812_v32 = vadd.f32 %v8197_v17, %v22698_v45  ;;  %v10510_v45 = vrot.slane %v16691_v20, %v18800_v39  ;;  %v10492_v54 = vcombine.low %v10475_v56, %v10489_v43  ;;  %v18297_v46 = vld [vmem:[#allocation8 + $0x108] sm:$0xff]   ;;  %v10556_v52 = vrot.slane %v10528_v27, %v18800_v39 }
 0x316   : > { %v8018_v12 = vpop.f32.mrf.mxu1  ;;  %v17740_v10 = vpop.f32.mrf.mxu0  ;;  %10952 = vmatmul.mubr.bf16.gmra.mxu1 %v10356_v26  ;;  %17185 = vmatprep.subr.bf16.mxu1 %v18297_v46 }
 0x317   : > { %v22826_v3 = vadd.f32 %v8018_v12, %v27047_v30  ;;  %10959 = vmatprep.mubr.bf16.mxu1 %v10425_v5  ;;  %v10458_v5 = vcombine.low %v22772_v28, %v22775_v11  ;;  %17186 = vmatpush3.bf16.msra.mxu1 %v18298_v23  ;;  %v27050_v23 = vld [vmem:[#allocation97_spill] sm:$0xff] }
 0x318   : > { %v8020_v41 = vpop.f32.mrf.mxu1  ;;  %v8202_v26 = vpop.f32.mrf.mxu0  ;;  %17854 = vmatmul.mubr.bf16.gmra.mxu0 %v10223_v16 }
 0x319   : > { %v22832_v22 = vadd.f32 %v8202_v26, %v22728_v63  ;;  %17857 = vmatprep.mubr.msk.bf16.mxu0 %vm18513_vm0, %v26578_v58  ;;  %v10526_v63 = vcombine.high %v22823_v4, %v10510_v45  ;;  %v22851_v11 = vrot.slane %v10458_v5, %v18800_v39 }
 0x31a   : > { %v8021_v13 = vpop.f32.mrf.mxu1  ;;  %v17743_v19 = vpop.f32.mrf.mxu0 }
 0x31b   : > { %v22842_v50 = vadd.f32 %v8021_v13, %v21868_v61  ;;  %v22854_v61 = vrot.slane %v10460_v59, %v18800_v39  ;;  %v10542_v60 = vrot.slane %v10526_v63, %v18800_v39  ;;  %v10527_v13 = vcombine.low %v10517_v40, %v10524_v25  ;;  %v18299_v63 = vld [vmem:[#allocation8 + $0x160] sm:$0xff]  }
 0x31c   : > { %v8023_v62 = vpop.f32.mrf.mxu1  ;;  %v8205_v20 = vpop.f32.mrf.mxu0  ;;  %17887 = vmatprep.subr.bf16.mxu0 %v18299_v63 }
 0x31d   : > { %v22848_v6 = vadd.f32 %v8205_v20, %v22756_v37  ;;  %v27048_v37 = vld [vmem:[#allocation199_spill] sm:$0xff]  ;;  %v10490_v26 = vcombine.low %v22851_v11, %v22854_v61  ;;  %17888 = vmatpush3.bf16.msra.mxu0 %v18299_v63 }
 0x31e   : > { %v8026_v17 = vpop.f32.mrf.mxu1  ;;  %v17744_v28 = vpop.f32.mrf.mxu0  ;;  %10960 = vmatmul.mubr.bf16.gmra.mxu1 %v10423_v35  ;;  %v10560_v16 = vcombine.low %v21204_v51, %v27048_v37  ;;  %v10525_v51 = vcombine.low %v22823_v4, %v10510_v45  ;;  %v10559_v35 = vcombine.low %v10542_v60, %v10556_v52  ;;  %v22886_v45 = vrot.slane %v10527_v13, %v18800_v39  ;;  %v27051_v52 = vld [vmem:[#allocation77_spill] sm:$0xff] }
 0x31f   : > { %v22857_v24 = vadd.f32 %v8026_v17, %v21919_v29  ;;  %10967 = vmatprep.mubr.bf16.mxu1 %v10492_v54  ;;  %v18515_v29 = vmov 1983009808   ;;  %v10357_v54 = vcombine.high %v22761_v34, %v22767_v48  ;;  %v8321_v60 = vcombine.high %v27050_v23, %v27050_v23 }
 0x320   : > { %v8028_v12 = vpop.f32.mrf.mxu1  ;;  %v8210_v10 = vpop.f32.mrf.mxu0  ;;  %17858 = vmatmul.mubr.bf16.gmra.mxu0 %v10290_v44  ;;  %v8323_v43 = vunpack.c.l.s4 %v18515_v29  ;;  %v27049_v44 = vld [vmem:[#allocation13_spill] sm:$0xff]  ;;  %v10424_v29 = vcombine.high %v22815_v47, %v22818_v57  ;;  %v8372_v47 = vcombine.high %v22341_v21, %v22341_v21  ;;  %v27052_v57 = vld [vmem:[#allocation82_spill] sm:$0xff] }
 0x321   : > { %v22864_v56 = vadd.f32 %v8210_v10, %v22782_v55  ;;  %17861 = vmatprep.mubr.msk.bf16.mxu0 %vm18513_vm0, %v26578_v58  ;;  %v22875_v55 = vrot.slane %v10560_v16, %v18800_v39  ;;  %v8338_v16 = vcombine.high %v22286_v49, %v22286_v49  ;;  %vm13776_vm5 = vcmp.ge.s32.totalorder %v27049_v44, 1 }
 0x322   : > { %v8029_v30 = vpop.f32.mrf.mxu1  ;;  %v17747_v41 = vpop.f32.mrf.mxu0  ;;  %v8324_v62 = vunpack.c.0.s8 %v8323_v43  ;;  %v18300_v43 = vld [vmem:[#allocation8 + $0x100] sm:$0xff]   ;;  %vm23435_vm7 = vmpackc.low %vm13776_vm5, %vm13776_vm5 }
 0x323   : > { %v22872_v19 = vadd.f32 %v8029_v30, %v21940_v15  ;;  %v22883_v15 = vrot.slane %v10525_v51, %v18800_v39  ;;  %v10568_v34 = vcombine.high %v22875_v55, %v22875_v55  ;;  %v8355_v30 = vcombine.high %v22310_v0, %v22310_v0  ;;  %17187 = vmatprep.subr.bf16.mxu1 %v18300_v43 }
 0x324   : > { %v8031_v5 = vpop.f32.mrf.mxu1  ;;  %v8213_v59 = vpop.f32.mrf.mxu0  ;;  %v22899_v46 = vsub.s32 %v8324_v62, %v27049_v44 }
 0x325   : > { %v22880_v27 = vadd.f32 %v8213_v59, %v22801_v1  ;;  %v10557_v28 = vcombine.low %v22883_v15, %v22886_v45 }
 0x326   : > { %v8034_v20 = vpop.f32.mrf.mxu1  ;;  %v17748_v4 = vpop.f32.mrf.mxu0  ;;  %10968 = vmatmul.mubr.bf16.gmra.mxu1 %v10490_v26  ;;  %v18301_v26 = vld [vmem:[#allocation8 + $0xc0] sm:$0xff]   ;;  %v22920_v51 = vrot.slane %v27050_v23, %v22899_v46  ;;  %v22923_v5 = vrot.slane %v8321_v60, %v22899_v46  ;;  %v22939_v63 = vrot.slane %v22310_v0, %v22899_v46  ;;  %v10491_v0 = vcombine.high %v22851_v11, %v22854_v61  ;;  %v27054_v61 = vld [vmem:[#allocation90_spill] sm:$0xff] }
 0x327   : > { %v22889_v40 = vadd.f32 %v8034_v20, %v21966_v36  ;;  %10975 = vmatprep.mubr.bf16.mxu1 %v10559_v35  ;;  %17188 = vmatpush3.bf16.msra.mxu1 %v18301_v26  ;;  %v22942_v4 = vrot.slane %v8355_v30, %v22899_v46  ;;  %v22968_v11 = vrot.slane %v8372_v47, %v22899_v46  ;;  %v27055_v30 = vld [vmem:[#allocation100_spill] sm:$0xff] }
 0x328   : > { %v8036_v48 = vpop.f32.mrf.mxu1  ;;  %v8218_v1 = vpop.f32.mrf.mxu0  ;;  %17862 = vmatmul.mubr.bf16.gmra.mxu0 %v10357_v54  ;;  %v22935_v54 = vrot.slane %v8338_v16, %v22899_v46  ;;  %v8423_v26 = vcombine.high %v27055_v30, %v27055_v30 }
 0x329   : > { %v22894_v25 = vadd.f32 %v8218_v1, %v22826_v3  ;;  %17865 = vmatprep.mubr.msk.bf16.mxu0 %vm18513_vm0, %v26578_v58  ;;  %v10582_v3 = vrot.slane %v10568_v34, %v18800_v39  ;;  %v8389_v34 = vcombine.high %v22374_v33, %v22374_v33  ;;  %v22957_v1 = vrot.slane %v22341_v21, %v22899_v46 }
 0x32a   : > { %v8037_v17 = vpop.f32.mrf.mxu1  ;;  %v17751_v36 = vpop.f32.mrf.mxu0  ;;  %v10558_v21 = vcombine.high %v22883_v15, %v22886_v45  ;;  %v23142_v45 = vrot.slane %v22614_v42, %v22899_v46 }
 0x32b   : > { %v22906_v37 = vadd.f32 %v8037_v17, %v27051_v52  ;;  %v27053_v17 = vld [vmem:[#allocation101_spill] sm:$0xff]  ;;  %v22988_v43 = vrot.slane %v8389_v34, %v22899_v46  ;;  %v23011_v34 = vrot.slane %v27055_v30, %v22899_v46  ;;  %v12246_v30 = vsub.s32 0, %v27049_v44 }
 0x32c   : > { %v8039_v12 = vpop.f32.mrf.mxu1  ;;  %v8221_v10 = vpop.f32.mrf.mxu0  ;;  %v8406_v36 = vcombine.high %v27053_v17, %v27053_v17  ;;  %27073 = vst [vmem:[#allocation168_spill] sm:$0xff] %v23142_v45 }
 0x32d   : > { %v22916_v41 = vadd.f32 %v8221_v10, %v22842_v50  ;;  %v22932_v50 = vrot.slane %v22286_v49, %v22899_v46 }
 0x32e   : > { %v8042_v13 = vpop.f32.mrf.mxu1  ;;  %v17752_v35 = vpop.f32.mrf.mxu0  ;;  %10976 = vmatmul.mubr.bf16.gmra.mxu1 %v10557_v28  ;;  %v23002_v47 = vrot.slane %v8406_v36, %v22899_v46 }
 0x32f   : > { %v22928_v59 = vadd.f32 %v8042_v13, %v27052_v57  ;;  %10983 = vmatprep.mubr.bf16.mxu1 %v10582_v3 }
 0x330   : > { %v8044_v62 = vpop.f32.mrf.mxu1  ;;  %v8226_v20 = vpop.f32.mrf.mxu0  ;;  %17866 = vmatmul.mubr.bf16.gmra.mxu0 %v10424_v29 }
 0x331   : > { %v22947_v49 = vadd.f32 %v8226_v20, %v22857_v24  ;;  %17869 = vmatprep.mubr.msk.bf16.mxu0 %vm18513_vm0, %v26578_v58  ;;  %v22963_v24 = vrot.slane %v22875_v55, %v18800_v39  ;;  %v22983_v55 = vrot.slane %v22374_v33, %v22899_v46  ;;  %v22999_v33 = vrot.slane %v27053_v17, %v22899_v46 }
 0x332   : > { %v8045_v28 = vpop.f32.mrf.mxu1  ;;  %v17755_v23 = vpop.f32.mrf.mxu0  ;;  %v8440_v17 = vcombine.high %v22460_v9, %v22460_v9  ;;  %v23056_v39 = vrot.slane %v22490_v18, %v22899_v46 }
 0x333   : > { %v22971_v52 = vadd.f32 %v8045_v28, %v27054_v61  ;;  %v27056_v28 = vld [vmem:[#allocation80_spill] sm:$0xff]  ;;  %v8457_v61 = vcombine.high %v22490_v18, %v22490_v18 }
 0x334   : > { %v8047_v12 = vpop.f32.mrf.mxu1  ;;  %v8229_v10 = vpop.f32.mrf.mxu0  ;;  %v23052_v29 = vrot.slane %v8440_v17, %v22899_v46  ;;  %27060 = vst [vmem:[#allocation120_spill] sm:$0xff] %v23056_v39  ;;  %v27091_v39 = vmov 0  }
 0x335   : > { %v22993_v13 = vadd.f32 %v8229_v10, %v22872_v19  ;;  %v8474_v12 = vcombine.high %v22515_v31, %v22515_v31 }
 0x336   : > { %v8050_v57 = vpop.f32.mrf.mxu1  ;;  %v17756_v62 = vpop.f32.mrf.mxu0  ;;  %10984 = vmatmul.mubr.bf16.gmra.mxu1 %v22963_v24  ;;  %27059 = vst [vmem:[#allocation117_spill] sm:$0xff] %v23052_v29 }
 0x337   : > { %v23016_v36 = vadd.f32 %v8050_v57, %v27056_v28  ;;  %v23028_v57 = vrot.slane %v8423_v26, %v22899_v46  ;;  %v23032_v28 = vrot.slane %v22460_v9, %v22899_v46  ;;  %v8491_v9 = vcombine.high %v22542_v53, %v22542_v53 }
 0x338   : > { %v8052_v10 = vpop.f32.mrf.mxu1  ;;  %v8234_v62 = vpop.f32.mrf.mxu0  ;;  %17870 = vmatmul.mubr.bf16.gmra.mxu0 %v10491_v0  ;;  %v552_v0 = vld [vmem:[%s26086_s3] sm:$0xf]  ;;  %v23062_v26 = vrot.slane %v8457_v61, %v22899_v46  ;;  %v23069_v3 = vrot.slane %v8474_v12, %v22899_v46  ;;  %v8508_v61 = vcombine.high %v22569_v7, %v22569_v7 }
 0x339   : > { %27057 = vst [vmem:[#allocation115_spill] sm:$0xff] %v23028_v57  ;;  %27058 = vst [vmem:[#allocation116_spill] sm:$0xff] %v23032_v28  ;;  %v23035_v23 = vadd.f32 %v8234_v62, %v22889_v40  ;;  %17873 = vmatprep.mubr.msk.bf16.mxu0 %vm18513_vm0, %v26578_v58  ;;  %v12434_v40 = vsub.s32 1, %v27049_v44  ;;  %v27061_v10 = vld [vmem:[#allocation94_spill] sm:$0xff]  ;;  %v12247_v60 = vrot.slane %v552_v0, %v12246_v30 }
 0x33a   : > { %v8053_v19 = vpop.f32.mrf.mxu1  ;;  %v17759_v35 = vpop.f32.mrf.mxu0  ;;  %27062 = vst [vmem:[#allocation122_spill] sm:$0xff] %v23062_v26  ;;  %27064 = vst [vmem:[#allocation135_spill] sm:$0xff] %v23069_v3  ;;  %v23085_v12 = vrot.slane %v8491_v9, %v22899_v46  ;;  %v8525_v30 = vcombine.high %v22589_v38, %v22589_v38  ;;  %v27089_v3 = vld [vmem:[#allocation93_spill] sm:$0xff] }
 0x33b   : > { %v23059_v16 = vadd.f32 %v8053_v19, %v27061_v10  ;;  %v23066_v35 = vrot.slane %v22515_v31, %v22899_v46  ;;  %v23082_v31 = vrot.slane %v22542_v53, %v22899_v46  ;;  %v12435_v48 = vrot.slane %v552_v0, %v12434_v40  ;;  %v27068_v53 = vld [vmem:[#allocation91_spill] sm:$0xff] }
 0x33c   : > { %v8055_v62 = vpop.f32.mrf.mxu1  ;;  %v8237_v17 = vpop.f32.mrf.mxu0  ;;  %27066 = vst [vmem:[#allocation137_spill] sm:$0xff] %v23085_v12  ;;  %v23138_v15 = vrot.slane %v12247_v60, %v22899_v46 }
 0x33d   : > { %27063 = vst [vmem:[#allocation128_spill] sm:$0xff] %v23066_v35  ;;  %v23078_v10 = vadd.f32 %v8237_v17, %v22906_v37  ;;  %27065 = vst [vmem:[#allocation136_spill] sm:$0xff] %v23082_v31  ;;  %v23095_v17 = vrot.slane %v22569_v7, %v22899_v46  ;;  %v12249_v7 = vcombine.high %v12247_v60, %v12247_v60 }
 0x33e   : > { %v8058_v62 = vpop.f32.mrf.mxu1  ;;  %v17760_v18 = vpop.f32.mrf.mxu0  ;;  %v23110_v37 = vrot.slane %v8508_v61, %v22899_v46 }
 0x33f   : > { %27067 = vst [vmem:[#allocation138_spill] sm:$0xff] %v23095_v17  ;;  %v23098_v20 = vadd.f32 %v8058_v62, %v27068_v53  ;;  %v23114_v62 = vrot.slane %v22589_v38, %v22899_v46  ;;  %v8542_v53 = vcombine.high %v22614_v42, %v22614_v42  ;;  %v23147_v0 = vrot.slane %v12249_v7, %v22899_v46 }
 0x340   : > { %v8060_v40 = vpop.f32.mrf.mxu1  ;;  %v8242_v19 = vpop.f32.mrf.mxu0  ;;  %17874 = vmatmul.mubr.bf16.gmra.mxu0 %v10558_v21  ;;  %27069 = vst [vmem:[#allocation144_spill] sm:$0xff] %v23110_v37  ;;  %v23128_v21 = vrot.slane %v8525_v30, %v22899_v46  ;;  %v27074_v30 = vld [vmem:[#allocation102_spill] sm:$0xff]  ;;  %v23150_v17 = vrot.slane %v12435_v48, %v22899_v46  ;;  %v23166_v7 = vrot.slane %v22631_v2, %v22899_v46 }
 0x341   : > { %27070 = vst [vmem:[#allocation166_spill] sm:$0xff] %v23114_v62  ;;  %v23119_v18 = vadd.f32 %v8242_v19, %v22928_v59  ;;  %17877 = vmatprep.mubr.msk.bf16.mxu0 %vm18513_vm0, %v26578_v58  ;;  %v12437_v40 = vcombine.high %v12435_v48, %v12435_v48  ;;  %v8559_v59 = vcombine.high %v22631_v2, %v22631_v2  ;;  %v27072_v19 = vld [vmem:[#allocation95_spill] sm:$0xff]  ;;  %v27077_v48 = vld [vmem:[#allocation108_spill] sm:$0xff] }
 0x342   : > { %27071 = vst [vmem:[#allocation161_spill] sm:$0xff] %v23128_v21  ;;  %v8061_v38 = vpop.f32.mrf.mxu1  ;;  %v17763_v61 = vpop.f32.mrf.mxu0  ;;  %v23157_v42 = vrot.slane %v8542_v53, %v22899_v46  ;;  %27076 = vst [vmem:[#allocation169_spill] sm:$0xff] %v23166_v7  ;;  %v8593_v31 = vcombine.high %v27077_v48, %v27077_v48  ;;  %v23185_v2 = vcombine.high %v23138_v15, %v23138_v15 }
 0x343   : > { %v23135_v58 = vadd.f32 %v8061_v38, %v27072_v19  ;;  %v8576_v61 = vcombine.high %v27074_v30, %v27074_v30  ;;  %v23171_v60 = vrot.slane %v12437_v40, %v22899_v46  ;;  %v23174_v53 = vrot.slane %v8559_v59, %v22899_v46 }
 0x344   : > { %v8063_v9 = vpop.f32.mrf.mxu1  ;;  %v8245_v12 = vpop.f32.mrf.mxu0  ;;  %27075 = vst [vmem:[#allocation167_spill] sm:$0xff] %v23157_v42  ;;  %v27082_v62 = vcombine.high %v22963_v24, %v22963_v24 }
 0x345   : > { %v23160_v19 = vadd.f32 %v8245_v12, %v22971_v52  ;;  %27078 = vst [vmem:[#allocation178_spill] sm:$0xff] %v23174_v53  ;;  %v23178_v52 = vrot.slane %v27074_v30, %v22899_v46  ;;  %v27080_v12 = vld [vmem:[#allocation96_spill] sm:$0xff]  ;;  %v23190_v40 = vrot.slane %v8576_v61, %v22899_v46  ;;  %v23197_v30 = vcombine.high %v23147_v0, %v23147_v0  ;;  %v27084_v61 = vld [vmem:[#allocation114_spill] sm:$0xff] }
 0x346   : > { %v8066_v38 = vpop.f32.mrf.mxu1  ;;  %v17764_v37 = vpop.f32.mrf.mxu0  ;;  %v8610_v24 = vcombine.high %v27084_v61, %v27084_v61  ;;  %v23244_v29 = vrot.slane %v27084_v61, %v22899_v46 }
 0x347   : > { %27079 = vst [vmem:[#allocation189_spill] sm:$0xff] %v23178_v52  ;;  %v23181_v9 = vadd.f32 %v8066_v38, %v27080_v12  ;;  %27081 = vst [vmem:[#allocation191_spill] sm:$0xff] %v23190_v40  ;;  %v23201_v38 = vcombine.high %v23150_v17, %v23150_v17  ;;  %v18302_v12 = vld [vmem:[#allocation8 + $0x158] sm:$0xff]   ;;  %v23223_v37 = vrot.slane %v8593_v31, %v22899_v46  ;;  %v23251_v52 = vsel %vm23216_vm4, 65537, %v27091_v39 }
 0x348   : > { %v8068_v21 = vpop.f32.mrf.mxu1  ;;  %v8250_v59 = vpop.f32.mrf.mxu0  ;;  %17878 = vmatmul.mubr.bf16.gmra.mxu0 %v27082_v62  ;;  %17889 = vmatprep.subr.bf16.mxu0 %v18302_v12  ;;  %v8644_v31 = vcombine.high %v22764_v14, %v22764_v14  ;;  %27090 = vst [vmem:[#allocation192_spill] sm:$0xff] %v23244_v29  ;;  %v23290_v40 = vrot.slane %v22785_v8, %v22899_v46 }
 0x349   : > { %v23207_v21 = vrot.slane %v27077_v48, %v22899_v46  ;;  %v23212_v62 = vadd.f32 %v8250_v59, %v23016_v36  ;;  %27087 = vst [vmem:[#allocation195_spill] sm:$0xff] %v23223_v37  ;;  %v27088_v48 = vld [vmem:[#allocation112_spill] sm:$0xff]  ;;  %v23229_v36 = vcombine.high %v23171_v60, %v23171_v60  ;;  %17890 = vmatpush3.bf16.msra.mxu0 %v18302_v12 }
 0x34a   : > { %v8627_v42 = vcombine.high %v27088_v48, %v27088_v48  ;;  %v8069_v35 = vpop.f32.mrf.mxu1  ;;  %v17767_v26 = vpop.f32.mrf.mxu0  ;;  %v8661_v59 = vcombine.high %v22785_v8, %v22785_v8  ;;  %v23260_v12 = vrot.slane %v27088_v48, %v22899_v46  ;;  %v23276_v48 = vrot.slane %v22764_v14, %v22899_v46  ;;  %27097 = vst [vmem:[#allocation14_spill] sm:$0xff] %v23290_v40  ;;  %v18304_v40 = vld [vmem:[#allocation8 + $0x148] sm:$0xff]  }
 0x34b   : > { %27083 = vst [vmem:[#allocation194_spill] sm:$0xff] %v23207_v21  ;;  %v23238_v7 = vadd.f32 %v8069_v35, %v27089_v3  ;;  %v23256_v35 = vrot.slane %v8610_v24, %v22899_v46  ;;  %v8678_v26 = vcombine.high %v22812_v32, %v22812_v32  ;;  %v8695_v24 = vcombine.high %v22832_v22, %v22832_v22 }
 0x34c   : > { %v8071_v53 = vpop.f32.mrf.mxu1  ;;  %v8253_v28 = vpop.f32.mrf.mxu0  ;;  %27092 = vst [vmem:[#allocation15_spill] sm:$0xff] %v23260_v12  ;;  %v23268_v45 = vrot.slane %v8627_v42, %v22899_v46  ;;  %27094 = vst [vmem:[#allocation16_spill] sm:$0xff] %v23276_v48  ;;  %v8712_v14 = vcombine.high %v22848_v6, %v22848_v6  ;;  %v23303_v37 = vrot.slane %v22812_v32, %v22899_v46  ;;  %v27171_v48 = vld [vmem:[#allocation122_spill] sm:$0xff] }
 0x34d   : > { %v23263_v61 = vadd.f32 %v8253_v28, %v23059_v16  ;;  %v23279_v16 = vrot.slane %v8644_v31, %v22899_v46  ;;  %v27096_v28 = vld [vmem:[#allocation98_spill] sm:$0xff]  ;;  %v23311_v29 = vrot.slane %v8678_v26, %v22899_v46  ;;  %v23326_v26 = vrot.slane %v22848_v6, %v22899_v46 }
 0x34e   : > { %27093 = vst [vmem:[#allocation17_spill] sm:$0xff] %v23268_v45  ;;  %v8074_v3 = vpop.f32.mrf.mxu1  ;;  %v17768_v21 = vpop.f32.mrf.mxu0  ;;  %27099 = vst [vmem:[#allocation19_spill] sm:$0xff] %v23303_v37  ;;  %v8780_v6 = vcombine.high %v22916_v41, %v22916_v41 }
 0x34f   : > { %27095 = vst [vmem:[#allocation18_spill] sm:$0xff] %v23279_v16  ;;  %v23282_v53 = vadd.f32 %v8074_v3, %v27096_v28  ;;  %v23293_v21 = vrot.slane %v8661_v59, %v22899_v46  ;;  %v18303_v3 = vld [vmem:[#allocation8 + $0x150] sm:$0xff]   ;;  %27100 = vst [vmem:[#allocation25_spill] sm:$0xff] %v23311_v29  ;;  %v23318_v28 = vrot.slane %v8695_v24, %v22899_v46  ;;  %v13775_v24 = vadd.s32 16, %v27049_v44 }
 0x350   : > { %v8258_v31 = vpop.f32.mrf.mxu0  ;;  %v8076_v57 = vpop.f32.mrf.mxu1  ;;  %17891 = vmatprep.subr.bf16.mxu0 %v18303_v3  ;;  %27103 = vst [vmem:[#allocation26_spill] sm:$0xff] %v23326_v26 }
 0x351   : > { %27098 = vst [vmem:[#allocation20_spill] sm:$0xff] %v23293_v21  ;;  %v23306_v8 = vadd.f32 %v8258_v31, %v23098_v20  ;;  %v23315_v57 = vrot.slane %v22832_v22, %v22899_v46  ;;  %27102 = vst [vmem:[#allocation23_spill] sm:$0xff] %v23318_v28  ;;  %v8729_v22 = vcombine.high %v22864_v56, %v22864_v56  ;;  %17892 = vmatpush3.bf16.msra.mxu0 %v18303_v3 }
 0x352   : > { %v17771_v42 = vpop.f32.mrf.mxu0  ;;  %v8077_v12 = vpop.f32.mrf.mxu1  ;;  %v8746_v31 = vcombine.high %v22880_v27, %v22880_v27  ;;  %v8763_v3 = vcombine.high %v22894_v25, %v22894_v25  ;;  %17893 = vmatprep.subr.bf16.mxu0 %v18304_v40  ;;  %vm13787_vm0 = vcmp.le.s32.totalorder %v13775_v24, 16  ;;  %v8882_v24 = vcombine.high %v23160_v19, %v23160_v19 }
 0x353   : > { %27101 = vst [vmem:[#allocation22_spill] sm:$0xff] %v23315_v57  ;;  %v23335_v42 = vrot.slane %v8712_v14, %v22899_v46  ;;  %v23364_v14 = vrot.slane %v8729_v22, %v22899_v46  ;;  %v23386_v12 = vrot.slane %v22916_v41, %v22899_v46  ;;  %vm23422_vm6 = vmpackc.low %vm13787_vm0, %vm13787_vm0  ;;  %v27170_v57 = vld [vmem:[#allocation120_spill] sm:$0xff] }
 0x354   : > { %v8261_v20 = vpop.f32.mrf.mxu0  ;;  %v8078_v32 = vpop.f32.mrf.mxu1  ;;  %v23375_v28 = vrot.slane %v8746_v31, %v22899_v46  ;;  %v23382_v26 = vrot.slane %v8763_v3, %v22899_v46  ;;  %v23392_v31 = vrot.slane %v8780_v6, %v22899_v46  ;;  %v8814_v3 = vcombine.high %v22993_v13, %v22993_v13 }
 0x355   : > { %27104 = vst [vmem:[#allocation27_spill] sm:$0xff] %v23335_v42  ;;  %v23344_v59 = vadd.f32 %v8261_v20, %v23135_v58  ;;  %v23361_v20 = vrot.slane %v22864_v56, %v22899_v46  ;;  %27106 = vst [vmem:[#allocation29_spill] sm:$0xff] %v23364_v14  ;;  %v8797_v32 = vcombine.high %v22947_v49, %v22947_v49  ;;  %17894 = vmatpush3.bf16.msra.mxu0 %v18304_v40 }
 0x356   : > { %v17772_v37 = vpop.f32.mrf.mxu0  ;;  %v23355_v21 = vpop.f32.mrf.mxu1  ;;  %27108 = vst [vmem:[#allocation33_spill] sm:$0xff] %v23375_v28  ;;  %v23379_v56 = vrot.slane %v22894_v25, %v22899_v46  ;;  %27110 = vst [vmem:[#allocation31_spill] sm:$0xff] %v23382_v26  ;;  %v23396_v25 = vrot.slane %v22947_v49, %v22899_v46  ;;  %v23444_v49 = vrot.slane %v8814_v3, %v22899_v46  ;;  %v23477_v26 = vsel %vm23435_vm7, 65537, %v27091_v39 }
 0x357   : > { %27105 = vst [vmem:[#allocation24_spill] sm:$0xff] %v23361_v20  ;;  %v23372_v37 = vrot.slane %v22880_v27, %v22899_v46  ;;  %27111 = vst [vmem:[#allocation34_spill] sm:$0xff] %v23386_v12  ;;  %v23408_v40 = vrot.slane %v8797_v32, %v22899_v46  ;;  %v8848_v6 = vcombine.high %v23078_v10, %v23078_v10 }
 0x358   : > { %27109 = vst [vmem:[#allocation30_spill] sm:$0xff] %v23379_v56  ;;  %v8266_v58 = vpop.f32.mrf.mxu0  ;;  %v10827_v22 = vpop.f32.mrf.mxu1  ;;  %27112 = vst [vmem:[#allocation32_spill] sm:$0xff] %v23392_v31  ;;  %v23458_v28 = vrot.slane %v23035_v23, %v22899_v46  ;;  %v8865_v3 = vcombine.high %v23119_v18, %v23119_v18  ;;  %v23481_v32 = vrot.slane %v23078_v10, %v22899_v46 }
 0x359   : > { %27107 = vst [vmem:[#allocation28_spill] sm:$0xff] %v23372_v37  ;;  %v23389_v27 = vadd.f32 %v8266_v58, %v23181_v9  ;;  %27113 = vst [vmem:[#allocation40_spill] sm:$0xff] %v23396_v25  ;;  %v23416_v58 = vrot.slane %v22993_v13, %v22899_v46  ;;  %v8899_v25 = vcombine.high %v23212_v62, %v23212_v62 }
 0x35a   : > { %v17775_v22 = vpop.f32.mrf.mxu0  ;;  %v23400_v42 = vpop.f32.mrf.mxu1  ;;  %27114 = vst [vmem:[#allocation39_spill] sm:$0xff] %v23408_v40  ;;  %27120 = vst [vmem:[#allocation42_spill] sm:$0xff] %v23444_v49  ;;  %v23498_v10 = vrot.slane %v23119_v18, %v22899_v46  ;;  %v8916_v18 = vcombine.high %v23263_v61, %v23263_v61 }
 0x35b   : > { %27115 = vst [vmem:[#allocation44_spill] sm:$0xff] %v23416_v58  ;;  %v8831_v22 = vcombine.high %v23035_v23, %v23035_v23  ;;  %27123 = vst [vmem:[#allocation43_spill] sm:$0xff] %v23458_v28  ;;  %v23489_v58 = vsel %vm23450_vm9, 65537, %v27091_v39 }
 0x35c   : > { %v8269_v41 = vpop.f32.mrf.mxu0  ;;  %v10830_v44 = vpop.f32.mrf.mxu1  ;;  %27125 = vst [vmem:[#allocation46_spill] sm:$0xff] %v23481_v32  ;;  %27127 = vst [vmem:[#allocation49_spill] sm:$0xff] %v23498_v10 }
 0x35d   : > { %v23433_v9 = vadd.f32 %v8269_v41, %v23238_v7  ;;  %v18305_v41 = vld [vmem:[#allocation8 + $0x140] sm:$0xff]   ;;  %v23470_v31 = vrot.slane %v8831_v22, %v22899_v46  ;;  %v23518_v7 = vrot.slane %v8882_v24, %v22899_v46  ;;  %v23535_v24 = vrot.slane %v23263_v61, %v22899_v46 }
 0x35e   : > { %v17776_v13 = vpop.f32.mrf.mxu0  ;;  %v23448_v12 = vpop.f32.mrf.mxu1  ;;  %17895 = vmatprep.subr.bf16.mxu0 %v18305_v41 }
 0x35f   : > { %v23465_v13 = vsel %vm23422_vm6, 65537, %v27091_v39  ;;  %27124 = vst [vmem:[#allocation45_spill] sm:$0xff] %v23470_v31  ;;  %17896 = vmatpush3.bf16.msra.mxu0 %v18305_v41  ;;  %27130 = vst [vmem:[#allocation50_spill] sm:$0xff] %v23518_v7  ;;  %v8933_v41 = vcombine.high %v23306_v8, %v23306_v8  ;;  %v8984_v61 = vcombine.high %v23433_v9, %v23433_v9 }
 0x360   : > { %v8274_v40 = vpop.f32.mrf.mxu0  ;;  %v10835_v23 = vpop.f32.mrf.mxu1  ;;  %27133 = vst [vmem:[#allocation55_spill] sm:$0xff] %v23535_v24 }
 0x361   : > { %v8275_v22 = vadd.f32 %v8274_v40, %v23282_v53  ;;  %v23494_v23 = vrot.slane %v8848_v6, %v22899_v46  ;;  %v23507_v40 = vrot.slane %v8865_v3, %v22899_v46  ;;  %v23511_v6 = vrot.slane %v23160_v19, %v22899_v46 }
 0x362   : > { %v17779_v56 = vpop.f32.mrf.mxu0  ;;  %v23500_v37 = vpop.f32.mrf.mxu1  ;;  %v23528_v53 = vrot.slane %v23212_v62, %v22899_v46  ;;  %v8950_v19 = vcombine.high %v23344_v59, %v23344_v59  ;;  %v8967_v62 = vcombine.high %v23389_v27, %v23389_v27 }
 0x363   : > { %27126 = vst [vmem:[#allocation47_spill] sm:$0xff] %v23494_v23  ;;  %27128 = vst [vmem:[#allocation48_spill] sm:$0xff] %v23507_v40  ;;  %v23531_v56 = vrot.slane %v8899_v25, %v22899_v46  ;;  %v23565_v23 = vrot.slane %v23344_v59, %v22899_v46  ;;  %v23581_v59 = vrot.slane %v23389_v27, %v22899_v46 }
 0x364   : > { %27129 = vst [vmem:[#allocation52_spill] sm:$0xff] %v23511_v6  ;;  %v8277_v39 = vpop.f32.mrf.mxu0  ;;  %v10838_v44 = vpop.f32.mrf.mxu1  ;;  %27131 = vst [vmem:[#allocation51_spill] sm:$0xff] %v23528_v53  ;;  %v23577_v7 = vrot.slane %v8950_v19, %v22899_v46  ;;  %v23588_v6 = vrot.slane %v23433_v9, %v22899_v46  ;;  %v23602_v9 = vrot.slane %v8984_v61, %v22899_v46 }
 0x365   : > { %27132 = vst [vmem:[#allocation56_spill] sm:$0xff] %v23531_v56  ;;  %v23552_v44 = vrot.slane %v8916_v18, %v22899_v46  ;;  %v23556_v39 = vrot.slane %v23306_v8, %v22899_v46  ;;  %27137 = vst [vmem:[#allocation61_spill] sm:$0xff] %v23565_v23 }
 0x366   : > { %v17780_v3 = vpop.f32.mrf.mxu0  ;;  %v23545_v31 = vpop.f32.mrf.mxu1  ;;  %27138 = vst [vmem:[#allocation63_spill] sm:$0xff] %v23577_v7  ;;  %27139 = vst [vmem:[#allocation65_spill] sm:$0xff] %v23581_v59  ;;  %v27145_v59 = vcombine.high %v22923_v5, %v22923_v5 }
 0x367   : > { %27134 = vst [vmem:[#allocation58_spill] sm:$0xff] %v23552_v44  ;;  %27135 = vst [vmem:[#allocation57_spill] sm:$0xff] %v23556_v39  ;;  %v23561_v3 = vrot.slane %v8933_v41, %v22899_v46 }
 0x368   : > { %v11025_v25 = vpop.f32.mrf.mxu0  ;;  %v10843_v18 = vpop.f32.mrf.mxu1  ;;  %27141 = vst [vmem:[#allocation64_spill] sm:$0xff] %v23588_v6  ;;  %27142 = vst [vmem:[#allocation68_spill] sm:$0xff] %v23602_v9 }
 0x369   : > { %27136 = vst [vmem:[#allocation62_spill] sm:$0xff] %v23561_v3  ;;  %v11026_v41 = vadd.f32 %v11025_v25, %v23355_v21  ;;  %v23584_v18 = vrot.slane %v8967_v62, %v22899_v46 }
 0x36a   : > { %v17799_v8 = vpop.f32.mrf.mxu0  ;;  %v23590_v56 = vpop.f32.mrf.mxu1 }
 0x36b   : > { %27140 = vst [vmem:[#allocation66_spill] sm:$0xff] %v23584_v18  ;;  %v11232_v25 = vcombine.high %v11026_v41, %v11026_v41  ;;  %v11239_v27 = vrot.slane %v11026_v41, %v22899_v46  ;;  %v23605_v8 = vrot.slane %v8275_v22, %v22899_v46 }
 0x36c   : > { %v11028_v24 = vpop.f32.mrf.mxu0  ;;  %v10846_v21 = vpop.f32.mrf.mxu1 }
 0x36d   : > { %27143 = vst [vmem:[#allocation67_spill] sm:$0xff] %v23605_v8  ;;  %v11246_v44 = vrot.slane %v11232_v25, %v22899_v46  ;;  %v11247_v19 = vcombine.high %v11239_v27, %v11239_v27  ;;  %v12082_v39 = vadd.f32 %v11239_v27, %v22920_v51  ;;  %v11029_v41 = vadd.f32 %v11028_v24, %v23400_v42 }
 0x36e   : > { %v17800_v21 = vpop.f32.mrf.mxu0  ;;  %v23618_v23 = vpop.f32.mrf.mxu1  ;;  %v27144_v27 = vcombine.high %v22920_v51, %v22920_v51 }
 0x36f   : > { %v11248_v25 = vcombine.high %v11246_v44, %v11246_v44  ;;  %v12084_v24 = vadd.f32 %v11246_v44, %v22923_v5  ;;  %v12270_v62 = vmul.f32 %v23138_v15, %v12082_v39  ;;  %v11249_v18 = vcombine.high %v11029_v41, %v11029_v41 }
 0x370   : > { %v12083_v42 = vadd.f32 %v11247_v19, %v27144_v27  ;;  %v11256_v21 = vrot.slane %v11029_v41, %v22899_v46  ;;  %v11033_v22 = vpop.f32.mrf.mxu0  ;;  %v10851_v6 = vpop.f32.mrf.mxu1 }
 0x371   : > { %v12085_v51 = vadd.f32 %v11248_v25, %v27145_v59  ;;  %v12272_v44 = vmul.f32 %v23147_v0, %v12084_v24  ;;  %v12458_v39 = vadd.f32 %v23150_v17, %v12270_v62  ;;  %v11263_v27 = vrot.slane %v11249_v18, %v22899_v46  ;;  %v23641_v6 = vld [vmem:[#allocation8 + $0xb8] sm:$0xff]  }
 0x372   : > { %v12271_v19 = vmul.f32 %v23185_v2, %v12083_v42  ;;  %v11264_v10 = vcombine.high %v11256_v21, %v11256_v21  ;;  %v12086_v61 = vadd.f32 %v11256_v21, %v22932_v50  ;;  %v11034_v9 = vadd.f32 %v11033_v22, %v23448_v12  ;;  %v17803_v41 = vpop.f32.mrf.mxu0  ;;  %v23639_v8 = vpop.f32.mrf.mxu1  ;;  %17929 = vmatprep.subr.bf16.mxu1 %v23641_v6 }
 0x373   : > { %v12273_v5 = vmul.f32 %v23197_v30, %v12085_v51  ;;  %v12460_v25 = vadd.f32 %v23171_v60, %v12272_v44  ;;  %v12620_v42 = vmax.f32 %v12458_v39, 0.0  ;;  %v11265_v62 = vcombine.high %v11263_v27, %v11263_v27 }
 0x374   : > { %v12459_v59 = vadd.f32 %v23201_v38, %v12271_v19  ;;  %v27146_v18 = vcombine.high %v22932_v50, %v22932_v50  ;;  %v12088_v21 = vadd.f32 %v11263_v27, %v22935_v54  ;;  %v12274_v12 = vmul.f32 %v23138_v15, %v12086_v61  ;;  %v11036_v22 = vpop.f32.mrf.mxu0  ;;  %v10854_v41 = vpop.f32.mrf.mxu1 }
 0x375   : > { %v12461_v51 = vadd.f32 %v23229_v36, %v12273_v5  ;;  %v12622_v19 = vmax.f32 %v12460_v25, 0.0  ;;  %v11266_v3 = vcombine.high %v11034_v9, %v11034_v9  ;;  %v27147_v44 = vcombine.high %v22935_v54, %v22935_v54 }
 0x376   : > { %v12087_v24 = vadd.f32 %v11264_v10, %v27146_v18  ;;  %v12621_v7 = vmax.f32 %v12459_v59, 0.0  ;;  %v12276_v10 = vmul.f32 %v23147_v0, %v12088_v21  ;;  %v12462_v27 = vadd.f32 %v23150_v17, %v12274_v12  ;;  %v17804_v61 = vpop.f32.mrf.mxu0  ;;  %v23659_v18 = vpop.f32.mrf.mxu1 }
 0x377   : > { %v12089_v39 = vadd.f32 %v11265_v62, %v27147_v44  ;;  %v12623_v41 = vmax.f32 %v12461_v51, 0.0  ;;  %v11273_v5 = vrot.slane %v11034_v9, %v22899_v46  ;;  %v11280_v59 = vrot.slane %v11266_v3, %v22899_v46 }
 0x378   : > { %v12275_v50 = vmul.f32 %v23185_v2, %v12087_v24  ;;  %v12944_v53 = vcombine.low %v12620_v42, %v12621_v7  ;;  %v12464_v62 = vadd.f32 %v23171_v60, %v12276_v10  ;;  %v12624_v24 = vmax.f32 %v12462_v27, 0.0  ;;  %v11041_v44 = vpop.f32.mrf.mxu0  ;;  %v10859_v21 = vpop.f32.mrf.mxu1 }
 0x379   : > { %v12277_v25 = vmul.f32 %v23197_v30, %v12089_v39  ;;  %v12945_v40 = vcombine.low %v12622_v19, %v12623_v41  ;;  %v11281_v61 = vcombine.high %v11273_v5, %v11273_v5  ;;  %v11282_v32 = vcombine.high %v11280_v59, %v11280_v59 }
 0x37a   : > { %v12463_v54 = vadd.f32 %v23201_v38, %v12275_v50  ;;  %v12952_v12 = vrot.slane %v12944_v53, %v22899_v46  ;;  %v12626_v9 = vmax.f32 %v12464_v62, 0.0  ;;  %v12090_v3 = vadd.f32 %v11273_v5, %v22939_v63  ;;  %v17807_v51 = vpop.f32.mrf.mxu0  ;;  %v23669_v39 = vpop.f32.mrf.mxu1 }
 0x37b   : > { %v12465_v7 = vadd.f32 %v23229_v36, %v12277_v25  ;;  %v12959_v50 = vrot.slane %v12945_v40, %v22899_v46  ;;  %v27148_v10 = vcombine.high %v22939_v63, %v22939_v63  ;;  %v12092_v19 = vadd.f32 %v11280_v59, %v22942_v4 }
 0x37c   : > { %v12625_v42 = vmax.f32 %v12463_v54, 0.0  ;;  %v27149_v53 = vcombine.high %v22942_v4, %v22942_v4  ;;  %v27150_v25 = vcombine.low %v23251_v52, %v23251_v52  ;;  %v27151_v5 = vmov 0  ;;  %v11044_v21 = vpop.f32.mrf.mxu0 }
 0x37d   : > { %v12091_v27 = vadd.f32 %v11281_v61, %v27148_v10  ;;  %v12627_v54 = vmax.f32 %v12465_v7, 0.0  ;;  %v12278_v40 = vmul.f32 %v23138_v15, %v12090_v3  ;;  %v11037_v63 = vadd.f32 %v11036_v22, %v23500_v37  ;;  %v10862_v61 = vpop.f32.mrf.mxu1 }
 0x37e   : > { %v12093_v41 = vadd.f32 %v11282_v32, %v27149_v53  ;;  %vm23682_vm10 = vcmp.ne.s16.totalorder %v27150_v25, 0  ;;  %v12961_v62 = vcombine.low %v12624_v24, %v12625_v42  ;;  %v12960_v59 = vcombine.low %v12952_v12, %v12959_v50  ;;  %v17808_v24 = vpop.f32.mrf.mxu0 }
 0x37f   : > { %v27152_v5 = vsel %vm23682_vm10, 4294967295, %v27151_v5  ;;  %v12279_v51 = vmul.f32 %v23138_v15, %v12091_v27  ;;  %v12280_v4 = vmul.f32 %v23185_v2, %v12092_v19  ;;  %v12962_v52 = vcombine.low %v12626_v9, %v12627_v54  ;;  %v23693_v42 = vpop.f32.mrf.mxu1 }
 0x380   : > { %27153 = vst [vmem:[#allocation71_spill] sm:$0xff] %v27152_v5  ;;  %v12281_v32 = vmul.f32 %v23147_v0, %v12093_v41  ;;  %v12969_v10 = vrot.slane %v12961_v62, %v22899_v46  ;;  %v12466_v53 = vadd.f32 %v23150_v17, %v12278_v40  ;;  %v11283_v7 = vcombine.high %v11037_v63, %v11037_v63  ;;  %v23702_v41 = vpop.f32.mrf.mxu0 }
 0x381   : > { %v12467_v37 = vadd.f32 %v23150_v17, %v12279_v51  ;;  %v12468_v22 = vadd.f32 %v23201_v38, %v12280_v4  ;;  %v11290_v3 = vrot.slane %v11037_v63, %v22899_v46  ;;  %v12976_v50 = vrot.slane %v12962_v52, %v22899_v46  ;;  %v10867_v25 = vpop.f32.mrf.mxu1 }
 0x382   : > { %v12469_v12 = vadd.f32 %v23171_v60, %v12281_v32  ;;  %v12628_v27 = vmax.f32 %v12466_v53, 0.0  ;;  %v11297_v9 = vrot.slane %v11283_v7, %v22899_v46  ;;  %v11042_v19 = vadd.f32 %v11041_v44, %v23545_v31  ;;  %v17811_v52 = vpop.f32.mrf.mxu0 }
 0x383   : > { %v12629_v54 = vmax.f32 %v12467_v37, 0.0  ;;  %v12630_v62 = vmax.f32 %v12468_v22, 0.0  ;;  %v11298_v40 = vcombine.high %v11290_v3, %v11290_v3  ;;  %v12094_v61 = vadd.f32 %v11290_v3, %v22957_v1  ;;  %v23707_v53 = vpop.f32.mrf.mxu1 }
 0x384   : > { %v12977_v51 = vcombine.low %v12969_v10, %v12976_v50  ;;  %v12984_v4 = vrot.slane %v12628_v27, %v22899_v46  ;;  %v11299_v32 = vcombine.high %v11297_v9, %v11297_v9  ;;  %v12096_v63 = vadd.f32 %v11297_v9, %v22968_v11  ;;  %v23719_v9 = vpop.f32.mrf.mxu0 }
 0x385   : > { %v12985_v7 = vcombine.low %v12629_v54, %v12630_v62  ;;  %v27154_v31 = vcombine.high %v22957_v1, %v22957_v1  ;;  %v12282_v24 = vmul.f32 %v23197_v30, %v12094_v61  ;;  %v12631_v37 = vmax.f32 %v12469_v12, 0.0  ;;  %v10870_v25 = vpop.f32.mrf.mxu1 }
 0x386   : > { %v23713_v22 = vpack.c.bf16 %v12977_v51, %v12960_v59  ;;  %v13737_v3 = vpack.c.bf16 %v12984_v4, %v12984_v4  ;;  %v27156_v10 = vcombine.high %v22968_v11, %v22968_v11  ;;  %v12284_v27 = vmul.f32 %v23185_v2, %v12096_v63  ;;  %v17812_v51 = vpop.f32.mrf.mxu0 }
 0x387   : > { %v12095_v44 = vadd.f32 %v11298_v40, %v27154_v31  ;;  %v12993_v54 = vrot.slane %v12985_v7, %v22899_v46  ;;  %v12470_v62 = vadd.f32 %v23229_v36, %v12282_v24  ;;  %v11300_v40 = vcombine.high %v11042_v19, %v11042_v19  ;;  %v23731_v4 = vpop.f32.mrf.mxu1 }
 0x388   : > { %27155 = vst [vmem:[#allocation69_spill] sm:$0xff] %v23713_v22  ;;  %v12097_v50 = vadd.f32 %v11299_v32, %v27156_v10  ;;  %v23726_v59 = vsel %vm23682_vm10, %v13737_v3, 0  ;;  %v12472_v11 = vadd.f32 %v23201_v38, %v12284_v27  ;;  %v11307_v61 = vrot.slane %v11042_v19, %v22899_v46  ;;  %v23738_v10 = vpop.f32.mrf.mxu0 }
 0x389   : > { %v12283_v1 = vmul.f32 %v23138_v15, %v12095_v44  ;;  %27157 = vst [vmem:[#allocation70_spill] sm:$0xff] %v23726_v59  ;;  %v12632_v63 = vmax.f32 %v12470_v62, 0.0  ;;  %v11314_v52 = vrot.slane %v11300_v40, %v22899_v46  ;;  %v11045_v7 = vadd.f32 %v11044_v21, %v23590_v56 }
 0x38a   : > { %v12285_v12 = vmul.f32 %v23147_v0, %v12097_v50  ;;  %v12634_v44 = vmax.f32 %v12472_v11, 0.0  ;;  %v11315_v24 = vcombine.high %v11307_v61, %v11307_v61  ;;  %v12098_v3 = vadd.f32 %v11307_v61, %v22983_v55  ;;  %v10875_v50 = vpop.f32.mrf.mxu1 }
 0x38b   : > { %v12471_v32 = vadd.f32 %v23150_v17, %v12283_v1  ;;  %v12986_v27 = vcombine.low %v12631_v37, %v12632_v63  ;;  %v11316_v25 = vcombine.high %v11314_v52, %v11314_v52  ;;  %v12100_v51 = vadd.f32 %v11314_v52, %v22988_v43 }
 0x38c   : > { %v12473_v31 = vadd.f32 %v23171_v60, %v12285_v12  ;;  %v27158_v1 = vcombine.high %v22983_v55, %v22983_v55  ;;  %v12286_v56 = vmul.f32 %v23197_v30, %v12098_v3  ;;  %v11317_v40 = vcombine.high %v11045_v7, %v11045_v7  ;;  %v17815_v12 = vpop.f32.mrf.mxu0  ;;  %v23745_v11 = vpop.f32.mrf.mxu1 }
 0x38d   : > { %v12633_v19 = vmax.f32 %v12471_v32, 0.0  ;;  %v13000_v61 = vrot.slane %v12986_v27, %v22899_v46  ;;  %v27159_v37 = vcombine.high %v22988_v43, %v22988_v43  ;;  %v12288_v63 = vmul.f32 %v23138_v15, %v12100_v51 }
 0x38e   : > { %v12099_v62 = vadd.f32 %v11315_v24, %v27158_v1  ;;  %v12635_v21 = vmax.f32 %v12473_v31, 0.0  ;;  %v12474_v55 = vadd.f32 %v23229_v36, %v12286_v56  ;;  %v11324_v24 = vrot.slane %v11045_v7, %v22899_v46  ;;  %v23756_v3 = vpop.f32.mrf.mxu0  ;;  %v10878_v50 = vpop.f32.mrf.mxu1 }
 0x38f   : > { %v13002_v28 = vcombine.low %v12633_v19, %v12634_v44  ;;  %v12101_v32 = vadd.f32 %v11316_v25, %v27159_v37  ;;  %v11331_v31 = vrot.slane %v11317_v40, %v22899_v46  ;;  %v23758_v1 = vcombine.low %v12993_v54, %v13000_v61 }
 0x390   : > { %v12287_v52 = vmul.f32 %v23138_v15, %v12099_v62  ;;  %v12476_v19 = vadd.f32 %v23150_v17, %v12288_v63  ;;  %v12636_v25 = vmax.f32 %v12474_v55, 0.0  ;;  %v11332_v51 = vcombine.high %v11324_v24, %v11324_v24  ;;  %v17816_v7 = vpop.f32.mrf.mxu0  ;;  %v23766_v56 = vpop.f32.mrf.mxu1 }
 0x391   : > { %v13010_v44 = vrot.slane %v13002_v28, %v22899_v46  ;;  %v12289_v43 = vmul.f32 %v23185_v2, %v12101_v32  ;;  %v11333_v62 = vcombine.high %v11331_v31, %v11331_v31  ;;  %v12102_v54 = vadd.f32 %v11324_v24, %v22999_v33 }
 0x392   : > { %v23764_v27 = vadd.f32 %v23150_v17, %v12287_v52  ;;  %v12638_v12 = vmax.f32 %v12476_v19, 0.0  ;;  %v12104_v28 = vadd.f32 %v11331_v31, %v23002_v47  ;;  %v13003_v37 = vcombine.low %v12635_v21, %v12636_v25  ;;  %v23778_v50 = vpop.f32.mrf.mxu0  ;;  %v10883_v7 = vpop.f32.mrf.mxu1 }
 0x393   : > { %v12477_v40 = vadd.f32 %v23201_v38, %v12289_v43  ;;  %v27160_v32 = vcombine.high %v22999_v33, %v22999_v33  ;;  %v27161_v52 = vcombine.high %v23002_v47, %v23002_v47  ;;  %v12290_v19 = vmul.f32 %v23147_v0, %v12102_v54 }
 0x394   : > { %v12292_v24 = vmul.f32 %v23138_v15, %v12104_v28  ;;  %v11050_v31 = vadd.f32 %v23702_v41, %v23618_v23  ;;  %v13017_v21 = vrot.slane %v13003_v37, %v22899_v46  ;;  %v11053_v47 = vadd.f32 %v23719_v9, %v23639_v8 }
 0x395   : > { %v12103_v63 = vadd.f32 %v11332_v51, %v27160_v32  ;;  %v12105_v55 = vadd.f32 %v11333_v62, %v27161_v52  ;;  %v12639_v43 = vmax.f32 %v12477_v40, 0.0  ;;  %v17819_v51 = vpop.f32.mrf.mxu0  ;;  %v23789_v62 = vpop.f32.mrf.mxu1  ;;  %v12478_v54 = vadd.f32 %v23171_v60, %v12290_v19 }
 0x396   : > { %v12480_v28 = vadd.f32 %v23150_v17, %v12292_v24  ;;  %v11334_v32 = vcombine.high %v11050_v31, %v11050_v31  ;;  %v23793_v52 = vcombine.low %v13010_v44, %v13017_v21  ;;  %v11341_v37 = vrot.slane %v11050_v31, %v22899_v46  ;;  %v27162_v51 = vld [vmem:[#allocation115_spill] sm:$0xff] }
 0x397   : > { %v12291_v33 = vmul.f32 %v23197_v30, %v12103_v63  ;;  %v12293_v25 = vmul.f32 %v23185_v2, %v12105_v55  ;;  %v13026_v40 = vcombine.low %v12638_v12, %v12639_v43  ;;  %v23798_v63 = vpop.f32.mrf.mxu0  ;;  %v10886_v8 = vpop.f32.mrf.mxu1  ;;  %v12640_v55 = vmax.f32 %v12478_v54, 0.0 }
 0x398   : > { %v12642_v12 = vmax.f32 %v12480_v28, 0.0  ;;  %v11348_v7 = vrot.slane %v11334_v32, %v22899_v46  ;;  %v11349_v24 = vcombine.high %v11341_v37, %v11341_v37  ;;  %v12106_v44 = vadd.f32 %v11341_v37, %v23011_v34 }
 0x399   : > { %v12479_v23 = vadd.f32 %v23229_v36, %v12291_v33  ;;  %v12481_v41 = vadd.f32 %v23201_v38, %v12293_v25  ;;  %v13034_v9 = vrot.slane %v13026_v40, %v22899_v46  ;;  %v17820_v21 = vpop.f32.mrf.mxu0  ;;  %v23803_v33 = vpop.f32.mrf.mxu1  ;;  %v11351_v61 = vcombine.high %v11053_v47, %v11053_v47 }
 0x39a   : > { %v11350_v25 = vcombine.high %v11348_v7, %v11348_v7  ;;  %v12108_v31 = vadd.f32 %v11348_v7, %v27162_v51  ;;  %v11358_v8 = vrot.slane %v11053_v47, %v22899_v46  ;;  %v27163_v54 = vcombine.high %v23011_v34, %v23011_v34 }
 0x39b   : > { %v12641_v43 = vmax.f32 %v12479_v23, 0.0  ;;  %v12643_v19 = vmax.f32 %v12481_v41, 0.0  ;;  %v12294_v32 = vmul.f32 %v23147_v0, %v12106_v44  ;;  %v23811_v23 = vpop.f32.mrf.mxu0  ;;  %v10891_v41 = vpop.f32.mrf.mxu1  ;;  %v27164_v37 = vcombine.high %v27162_v51, %v27162_v51 }
 0x39c   : > { %v12107_v28 = vadd.f32 %v11349_v24, %v27163_v54  ;;  %v12296_v7 = vmul.f32 %v23138_v15, %v12108_v31  ;;  %v11365_v14 = vrot.slane %v11351_v61, %v22899_v46  ;;  %v11366_v47 = vcombine.high %v11358_v8, %v11358_v8  ;;  %v27165_v31 = vld [vmem:[#allocation116_spill] sm:$0xff] }
 0x39d   : > { %v13027_v49 = vcombine.low %v12640_v55, %v12641_v43  ;;  %v13043_v40 = vcombine.low %v12642_v12, %v12643_v19  ;;  %v12109_v21 = vadd.f32 %v11350_v25, %v27164_v37  ;;  %v12482_v43 = vadd.f32 %v23171_v60, %v12294_v32  ;;  %v17823_v19 = vpop.f32.mrf.mxu0  ;;  %v23822_v24 = vpop.f32.mrf.mxu1 }
 0x39e   : > { %v12295_v34 = vmul.f32 %v23197_v30, %v12107_v28  ;;  %v23826_v25 = vadd.f32 %v23150_v17, %v12296_v7  ;;  %v11367_v51 = vcombine.high %v11365_v14, %v11365_v14  ;;  %v12110_v61 = vadd.f32 %v11358_v8, %v27165_v31  ;;  %v27167_v7 = vld [vmem:[#allocation117_spill] sm:$0xff] }
 0x39f   : > { %v13041_v55 = vrot.slane %v13027_v49, %v22899_v46  ;;  %v13051_v12 = vrot.slane %v13043_v40, %v22899_v46  ;;  %v12297_v44 = vmul.f32 %v23138_v15, %v12109_v21  ;;  %v12644_v41 = vmax.f32 %v12482_v43, 0.0  ;;  %v23833_v32 = vpop.f32.mrf.mxu0  ;;  %v10894_v37 = vpop.f32.mrf.mxu1 }
 0x3a0   : > { %v12483_v49 = vadd.f32 %v23229_v36, %v12295_v34  ;;  %v27166_v40 = vcombine.high %v27165_v31, %v27165_v31  ;;  %v12112_v20 = vadd.f32 %v11365_v14, %v27167_v7  ;;  %v27168_v8 = vcombine.high %v27167_v7, %v27167_v7 }
 0x3a1   : > { %v13042_v54 = vcombine.low %v13034_v9, %v13041_v55  ;;  %v12485_v19 = vadd.f32 %v23150_v17, %v12297_v44  ;;  %v12298_v34 = vmul.f32 %v23185_v2, %v12110_v61  ;;  %v17824_v31 = vpop.f32.mrf.mxu0  ;;  %v11061_v7 = vadd.f32 %v23756_v3, %v23669_v39 }
 0x3a2   : > { %v12111_v28 = vadd.f32 %v11366_v47, %v27166_v40  ;;  %v12113_v9 = vadd.f32 %v11367_v51, %v27168_v8  ;;  %v12645_v55 = vmax.f32 %v12483_v49, 0.0  ;;  %v11058_v47 = vadd.f32 %v23738_v10, %v23659_v18  ;;  %v23845_v40 = vpop.f32.mrf.mxu1 }
 0x3a3   : > { %v12300_v44 = vmul.f32 %v23197_v30, %v12112_v20  ;;  %v12647_v14 = vmax.f32 %v12485_v19, 0.0  ;;  %v12486_v49 = vadd.f32 %v23201_v38, %v12298_v34  ;;  %v23853_v8 = vpop.f32.mrf.mxu0 }
 0x3a4   : > { %v12299_v43 = vmul.f32 %v23147_v0, %v12111_v28  ;;  %v12301_v37 = vmul.f32 %v23138_v15, %v12113_v9  ;;  %v13044_v51 = vcombine.low %v12644_v41, %v12645_v55  ;;  %v11368_v28 = vcombine.high %v11058_v47, %v11058_v47  ;;  %v10899_v18 = vpop.f32.mrf.mxu1 }
 0x3a5   : > { %v12488_v10 = vadd.f32 %v23229_v36, %v12300_v44  ;;  %v11375_v20 = vrot.slane %v11058_v47, %v22899_v46  ;;  %v11385_v9 = vcombine.high %v11061_v7, %v11061_v7  ;;  %v12648_v21 = vmax.f32 %v12486_v49, 0.0  ;;  %v17827_v41 = vpop.f32.mrf.mxu0 }
 0x3a6   : > { %v12487_v61 = vadd.f32 %v23171_v60, %v12299_v43  ;;  %v12489_v31 = vadd.f32 %v23150_v17, %v12301_v37  ;;  %v13058_v19 = vrot.slane %v13044_v51, %v22899_v46  ;;  %v11382_v3 = vrot.slane %v11368_v28, %v22899_v46  ;;  %v23860_v55 = vpop.f32.mrf.mxu1 }
 0x3a7   : > { %27169 = vst [vmem:[#allocation75_spill] sm:$0xff] %v23860_v55  ;;  %v12650_v34 = vmax.f32 %v12488_v10, 0.0  ;;  %v11383_v43 = vcombine.high %v11375_v20, %v11375_v20  ;;  %v12114_v18 = vadd.f32 %v11375_v20, %v27170_v57  ;;  %v13067_v16 = vcombine.low %v12647_v14, %v12648_v21  ;;  %v23864_v45 = vpop.f32.mrf.mxu0 }
 0x3a8   : > { %v12649_v39 = vmax.f32 %v12487_v61, 0.0  ;;  %v12651_v29 = vmax.f32 %v12489_v31, 0.0  ;;  %v13059_v44 = vcombine.low %v13051_v12, %v13058_v19  ;;  %v11384_v37 = vcombine.high %v11382_v3, %v11382_v3  ;;  %v10902_v51 = vpop.f32.mrf.mxu1 }
 0x3a9   : > { %v12116_v47 = vadd.f32 %v11382_v3, %v27171_v48  ;;  %v27172_v61 = vcombine.high %v27170_v57, %v27170_v57  ;;  %v12302_v41 = vmul.f32 %v23185_v2, %v12114_v18  ;;  %v11392_v10 = vrot.slane %v11061_v7, %v22899_v46  ;;  %v17828_v20 = vpop.f32.mrf.mxu0 }
 0x3aa   : > { %v13068_v49 = vcombine.low %v12649_v39, %v12650_v34  ;;  %v23871_v55 = vpack.c.bf16 %v13059_v44, %v13042_v54  ;;  %v13075_v12 = vrot.slane %v13067_v16, %v22899_v46  ;;  %v27174_v21 = vcombine.high %v27171_v48, %v27171_v48  ;;  %v23878_v19 = vpop.f32.mrf.mxu1  ;;  %v27175_v48 = vld [vmem:[#allocation128_spill] sm:$0xff] }
 0x3ab   : > { %v12115_v28 = vadd.f32 %v11383_v43, %v27172_v61  ;;  %v12304_v31 = vmul.f32 %v23197_v30, %v12116_v47  ;;  %v12490_v3 = vadd.f32 %v23201_v38, %v12302_v41  ;;  %v11399_v54 = vrot.slane %v11385_v9, %v22899_v46  ;;  %v23887_v18 = vpop.f32.mrf.mxu0 }
 0x3ac   : > { %27173 = vst [vmem:[#allocation74_spill] sm:$0xff] %v23871_v55  ;;  %v12117_v14 = vadd.f32 %v11384_v37, %v27174_v21  ;;  %v13082_v57 = vrot.slane %v13068_v49, %v22899_v46  ;;  %v11400_v34 = vcombine.high %v11392_v10, %v11392_v10  ;;  %v12118_v43 = vadd.f32 %v11392_v10, %v27175_v48  ;;  %v10907_v44 = vpop.f32.mrf.mxu1  ;;  %v27177_v21 = vld [vmem:[#allocation135_spill] sm:$0xff] }
 0x3ad   : > { %v12303_v39 = vmul.f32 %v23147_v0, %v12115_v28  ;;  %v12492_v16 = vadd.f32 %v23229_v36, %v12304_v31  ;;  %v12652_v51 = vmax.f32 %v12490_v3, 0.0  ;;  %v11401_v49 = vcombine.high %v11399_v54, %v11399_v54  ;;  %v17831_v31 = vpop.f32.mrf.mxu0 }
 0x3ae   : > { %v12305_v7 = vmul.f32 %v23138_v15, %v12117_v14  ;;  %v13083_v37 = vcombine.low %v13075_v12, %v13082_v57  ;;  %v27176_v9 = vcombine.high %v27175_v48, %v27175_v48  ;;  %v12120_v14 = vadd.f32 %v11399_v54, %v27177_v21  ;;  %v23897_v10 = vpop.f32.mrf.mxu1 }
 0x3af   : > { %v12491_v47 = vadd.f32 %v23171_v60, %v12303_v39  ;;  %v12654_v28 = vmax.f32 %v12492_v16, 0.0  ;;  %27178 = vst [vmem:[#allocation79_spill] sm:$0xff] %v23897_v10  ;;  %v13084_v44 = vcombine.low %v12651_v29, %v12652_v51  ;;  %v27179_v12 = vcombine.high %v27177_v21, %v27177_v21 }
 0x3b0   : > { %v23891_v61 = vadd.f32 %v23150_v17, %v12305_v7  ;;  %v12119_v41 = vadd.f32 %v11400_v34, %v27176_v9  ;;  %v12306_v39 = vmul.f32 %v23138_v15, %v12118_v43  ;;  %v12308_v7 = vmul.f32 %v23147_v0, %v12120_v14  ;;  %v23909_v34 = vpop.f32.mrf.mxu0  ;;  %v10910_v48 = vpop.f32.mrf.mxu1 }
 0x3b1   : > { %v12653_v20 = vmax.f32 %v12491_v47, 0.0  ;;  %v12121_v57 = vadd.f32 %v11401_v49, %v27179_v12  ;;  %v11066_v16 = vadd.f32 %v23778_v50, %v23693_v42  ;;  %v11069_v54 = vadd.f32 %v23798_v63, %v23707_v53 }
 0x3b2   : > { %v12307_v3 = vmul.f32 %v23185_v2, %v12119_v41  ;;  %v13092_v47 = vrot.slane %v13084_v44, %v22899_v46  ;;  %v12494_v43 = vadd.f32 %v23150_v17, %v12306_v39  ;;  %v12496_v9 = vadd.f32 %v23171_v60, %v12308_v7  ;;  %v17832_v50 = vpop.f32.mrf.mxu0  ;;  %v23917_v21 = vpop.f32.mrf.mxu1 }
 0x3b3   : > { %v13085_v29 = vcombine.low %v12653_v20, %v12654_v28  ;;  %v12309_v51 = vmul.f32 %v23197_v30, %v12121_v57  ;;  %v11402_v41 = vcombine.high %v11066_v16, %v11066_v16  ;;  %v11409_v42 = vrot.slane %v11066_v16, %v22899_v46  ;;  %27180 = vst [vmem:[#allocation78_spill] sm:$0xff] %v23917_v21  ;;  %v27181_v16 = vld [vmem:[#allocation136_spill] sm:$0xff] }
 0x3b4   : > { %v12495_v49 = vadd.f32 %v23201_v38, %v12307_v3  ;;  %v12656_v28 = vmax.f32 %v12494_v43, 0.0  ;;  %v11419_v14 = vcombine.high %v11069_v54, %v11069_v54  ;;  %v12658_v20 = vmax.f32 %v12496_v9, 0.0  ;;  %v23922_v57 = vpop.f32.mrf.mxu0  ;;  %v10915_v39 = vpop.f32.mrf.mxu1 }
 0x3b5   : > { %v13099_v53 = vrot.slane %v13085_v29, %v22899_v46  ;;  %v12497_v63 = vadd.f32 %v23229_v36, %v12309_v51  ;;  %v11416_v44 = vrot.slane %v11402_v41, %v22899_v46  ;;  %v11417_v12 = vcombine.high %v11409_v42, %v11409_v42  ;;  %v27186_v39 = vld [vmem:[#allocation137_spill] sm:$0xff] }
 0x3b6   : > { %v12657_v31 = vmax.f32 %v12495_v49, 0.0  ;;  %v12122_v48 = vadd.f32 %v11409_v42, %v27181_v16  ;;  %v11426_v50 = vrot.slane %v11069_v54, %v22899_v46  ;;  %v27182_v29 = vcombine.low %v23477_v26, %v23489_v58  ;;  %v17835_v26 = vpop.f32.mrf.mxu0  ;;  %v23944_v58 = vpop.f32.mrf.mxu1 }
 0x3b7   : > { %v13100_v3 = vcombine.low %v13092_v47, %v13099_v53  ;;  %v12659_v7 = vmax.f32 %v12497_v63, 0.0  ;;  %v11418_v49 = vcombine.high %v11416_v44, %v11416_v44  ;;  %v27185_v9 = vcombine.high %v27181_v16, %v27181_v16  ;;  %27190 = vst [vmem:[#allocation156_spill] sm:$0xff] %v23944_v58 }
 0x3b8   : > { %vm23929_vm11 = vcmp.ne.s16.totalorder %v27182_v29, 0  ;;  %v13108_v43 = vcombine.low %v12656_v28, %v12657_v31  ;;  %v12124_v47 = vadd.f32 %v11416_v44, %v27186_v39  ;;  %v27187_v42 = vcombine.low %v23465_v13, %v23465_v13 }
 0x3b9   : > { %v12123_v41 = vadd.f32 %v11417_v12, %v27185_v9  ;;  %v23946_v53 = vpack.c.bf16 %v13100_v3, %v13083_v37  ;;  %v13109_v63 = vcombine.low %v12658_v20, %v12659_v7  ;;  %v12310_v28 = vmul.f32 %v23138_v15, %v12122_v48  ;;  %v23956_v9 = vpop.f32.mrf.mxu0 }
 0x3ba   : > { %vm23940_vm12 = vcmp.ne.s16.totalorder %v27187_v42, 0  ;;  %v11433_v31 = vrot.slane %v11419_v14, %v22899_v46  ;;  %v13116_v12 = vrot.slane %v13108_v43, %v22899_v46  ;;  %v27192_v44 = vcombine.high %v27186_v39, %v27186_v39  ;;  %v10918_v42 = vpop.f32.mrf.mxu1 }
 0x3bb   : > { %27191 = vst [vmem:[#allocation130_spill] sm:$0xff] %v23946_v53  ;;  %v12311_v16 = vmul.f32 %v23185_v2, %v12123_v41  ;;  %v12312_v29 = vmul.f32 %v23147_v0, %v12124_v47  ;;  %v13123_v37 = vrot.slane %v13109_v63, %v22899_v46  ;;  %v12498_v20 = vadd.f32 %v23150_v17, %v12310_v28  ;;  %v17836_v41 = vpop.f32.mrf.mxu0  ;;  %v27195_v28 = vld [vmem:[#allocation144_spill] sm:$0xff] }
 0x3bc   : > { %v12125_v13 = vadd.f32 %v11418_v49, %v27192_v44  ;;  %v11434_v3 = vcombine.high %v11426_v50, %v11426_v50  ;;  %v11435_v7 = vcombine.high %v11433_v31, %v11433_v31  ;;  %v27193_v49 = vld [vmem:[#allocation138_spill] sm:$0xff]  ;;  %v23964_v26 = vpop.f32.mrf.mxu1  ;;  %v12128_v58 = vadd.f32 %v11433_v31, %v27195_v28 }
 0x3bd   : > { %v12499_v48 = vadd.f32 %v23201_v38, %v12311_v16  ;;  %v12500_v43 = vadd.f32 %v23171_v60, %v12312_v29  ;;  %v12126_v39 = vadd.f32 %v11426_v50, %v27193_v49  ;;  %v13124_v47 = vcombine.low %v13116_v12, %v13123_v37  ;;  %v23974_v50 = vpop.f32.mrf.mxu0 }
 0x3be   : > { %v12313_v14 = vmul.f32 %v23197_v30, %v12125_v13  ;;  %v12660_v44 = vmax.f32 %v12498_v20, 0.0  ;;  %v27194_v63 = vcombine.high %v27193_v49, %v27193_v49  ;;  %v27196_v16 = vcombine.high %v27195_v28, %v27195_v28  ;;  %v10923_v41 = vpop.f32.mrf.mxu1 }
 0x3bf   : > { %v12661_v13 = vmax.f32 %v12499_v48, 0.0  ;;  %v12662_v10 = vmax.f32 %v12500_v43, 0.0  ;;  %v12314_v12 = vmul.f32 %v23138_v15, %v12126_v39  ;;  %v12316_v20 = vmul.f32 %v23185_v2, %v12128_v58  ;;  %v17839_v49 = vpop.f32.mrf.mxu0 }
 0x3c0   : > { %v12127_v42 = vadd.f32 %v11434_v3, %v27194_v63  ;;  %v12501_v21 = vadd.f32 %v23229_v36, %v12313_v14  ;;  %v12129_v29 = vadd.f32 %v11435_v7, %v27196_v16  ;;  %v27197_v31 = vmax.f32 %v23764_v27, 0.0  ;;  %v23987_v63 = vpop.f32.mrf.mxu1 }
 0x3c1   : > { %v13125_v48 = vcombine.low %v12660_v44, %v12661_v13  ;;  %v23985_v7 = vpack.c.bf16 %v23793_v52, %v23758_v1  ;;  %v23990_v39 = vadd.f32 %v23150_v17, %v12314_v12  ;;  %v24003_v52 = vpop.f32.mrf.mxu0  ;;  %v13974_v49 = vshll.u32 %v23726_v59, 16 }
 0x3c2   : > { %v12315_v37 = vmul.f32 %v23138_v15, %v12127_v42  ;;  %v13025_v3 = vrot.slane %v27197_v31, %v22899_v46  ;;  %v12663_v14 = vmax.f32 %v12501_v21, 0.0  ;;  %v12317_v43 = vmul.f32 %v23147_v0, %v12129_v29  ;;  %v10926_v13 = vpop.f32.mrf.mxu1 }
 0x3c3   : > { %27198 = vst [vmem:[#allocation163_spill] sm:$0xff] %v23985_v7  ;;  %v12504_v42 = vadd.f32 %v23201_v38, %v12316_v20  ;;  %v13133_v44 = vrot.slane %v13125_v48, %v22899_v46  ;;  %v24001_v1 = vsel %vm23929_vm11, %v23985_v7, 0 }
 0x3c4   : > { %v12503_v58 = vadd.f32 %v23150_v17, %v12315_v37  ;;  %v13739_v27 = vpack.c.bf16 %v13025_v3, %v13025_v3  ;;  %v13126_v21 = vcombine.low %v12662_v10, %v12663_v14  ;;  %v23996_v28 = vadd.f32 %v23171_v60, %v12317_v43  ;;  %27199 = vst [vmem:[#allocation139_spill] sm:$0xff] %v24001_v1  ;;  %v17840_v3 = vpop.f32.mrf.mxu0  ;;  %v24014_v14 = vpop.f32.mrf.mxu1 }
 0x3c5   : > { %v12666_v41 = vmax.f32 %v12504_v42, 0.0  ;;  %v13979_v37 = vshrl.u32 %v24001_v1, 16  ;;  %v13981_v20 = vshll.u32 %v24001_v1, 16  ;;  %27201 = vst [vmem:[#allocation84_spill] sm:$0xff] %v24014_v14  ;;  %v24021_v43 = vsel %vm23682_vm10, %v23713_v22, 0 }
 0x3c6   : > { %v12665_v29 = vmax.f32 %v12503_v58, 0.0  ;;  %v24008_v10 = vsel %vm23940_vm12, %v13739_v27, 0  ;;  %v13140_v12 = vrot.slane %v13126_v21, %v22899_v46  ;;  %27202 = vst [vmem:[#allocation83_spill] sm:$0xff] %v24021_v43  ;;  %v11074_v58 = vadd.f32 %v23811_v23, %v23731_v4  ;;  %v24027_v3 = vpop.f32.mrf.mxu0  ;;  %v10931_v16 = vpop.f32.mrf.mxu1 }
 0x3c7   : > { %27200 = vst [vmem:[#allocation86_spill] sm:$0xff] %v24008_v10  ;;  %v13986_v31 = vshll.u32 %v24008_v10, 16  ;;  %v13983_v27 = vrot.slane %v13981_v20, 1  ;;  %v13967_v13 = vshrl.u32 %v24021_v43, 16  ;;  %v13976_v10 = vrot.slane %v13974_v49, 1 }
 0x3c8   : > { %v24016_v48 = vcombine.low %v12665_v29, %v12666_v41  ;;  %v13141_v42 = vcombine.low %v13133_v44, %v13140_v12  ;;  %v13969_v41 = vshll.u32 %v24021_v43, 16  ;;  %v11436_v1 = vcombine.high %v11074_v58, %v11074_v58  ;;  %v17843_v44 = vpop.f32.mrf.mxu0  ;;  %v24036_v12 = vpop.f32.mrf.mxu1 }
 0x3c9   : > { %v13988_v21 = vrot.slane %v13986_v31, 1  ;;  %v13984_v59 = vor.u32 %v13983_v27, %v13979_v37  ;;  %v11443_v4 = vrot.slane %v11074_v58, %v22899_v46  ;;  %v12667_v23 = vmax.f32 %v23996_v28, 0.0  ;;  %27204 = vst [vmem:[#allocation87_spill] sm:$0xff] %v24036_v12  ;;  %v27206_v58 = vld [vmem:[#allocation166_spill] sm:$0xff] }
 0x3ca   : > { %v24032_v22 = vpack.c.bf16 %v13141_v42, %v13124_v47  ;;  %v13971_v20 = vrot.slane %v13969_v41, 1  ;;  %v11450_v16 = vrot.slane %v11436_v1, %v22899_v46  ;;  %v11077_v31 = vadd.f32 %v23833_v32, %v23745_v11  ;;  %v24053_v27 = vpop.f32.mrf.mxu0  ;;  %v10934_v1 = vpop.f32.mrf.mxu1 }
 0x3cb   : > { %v27205_v49 = vmax.f32 %v23826_v25, 0.0  ;;  %v24045_v47 = vsel %vm13965_vm13, %v13984_v59, %v13988_v21  ;;  %v11451_v37 = vcombine.high %v11443_v4, %v11443_v4  ;;  %v12130_v42 = vadd.f32 %v11443_v4, %v27206_v58  ;;  %v27208_v25 = vld [vmem:[#allocation161_spill] sm:$0xff] }
 0x3cc   : > { %27203 = vst [vmem:[#allocation88_spill] sm:$0xff] %v24032_v22  ;;  %v24051_v28 = vsel %vm23929_vm11, %v23871_v55, 0  ;;  %14376 = vmatprep.mubr.bf16.mxu1 %v24045_v47  ;;  %v13972_v11 = vor.u32 %v13971_v20, %v13967_v13  ;;  %v11452_v32 = vcombine.high %v11450_v16, %v11450_v16  ;;  %v12132_v41 = vadd.f32 %v11450_v16, %v27208_v25  ;;  %v18307_v55 = vld [vmem:[#allocation8 + $0xb0] sm:$0xff]   ;;  %v17844_v7 = vpop.f32.mrf.mxu0  ;;  %v24062_v5 = vpop.f32.mrf.mxu1 }
 0x3cd   : > { %v13066_v29 = vrot.slane %v27205_v49, %v22899_v46  ;;  %27207 = vst [vmem:[#allocation85_spill] sm:$0xff] %v24051_v28  ;;  %v11453_v44 = vcombine.high %v11077_v31, %v11077_v31  ;;  %v27209_v59 = vcombine.high %v27206_v58, %v27206_v58  ;;  %v12318_v4 = vmul.f32 %v23197_v30, %v12130_v42  ;;  %v27212_v42 = vld [vmem:[#allocation168_spill] sm:$0xff] }
 0x3ce   : > { %v11460_v49 = vrot.slane %v11077_v31, %v22899_v46  ;;  %27210 = vst [vmem:[#allocation89_spill] sm:$0xff] %v24062_v5  ;;  %v13977_v1 = vsel %vm13965_vm13, %v13972_v11, %v13976_v10  ;;  %v27211_v13 = vcombine.high %v27208_v25, %v27208_v25  ;;  %v12320_v16 = vmul.f32 %v23185_v2, %v12132_v41  ;;  %v10939_v5 = vpop.f32.mrf.mxu1  ;;  %v27213_v25 = vld [vmem:[#allocation167_spill] sm:$0xff] }
 0x3cf   : > { %v12131_v21 = vadd.f32 %v11451_v37, %v27209_v59  ;;  %v13741_v43 = vpack.c.bf16 %v13066_v29, %v13066_v29  ;;  %v11467_v58 = vrot.slane %v11453_v44, %v22899_v46  ;;  %14377 = vmatmul.mubr.bf16.vlgmr.msra.gmra.mxu1 %v13977_v1  ;;  %v12506_v31 = vadd.f32 %v23229_v36, %v12318_v4  ;;  %v24073_v59 = vpop.f32.mrf.mxu0 }
 0x3d0   : > { %v12133_v20 = vadd.f32 %v11452_v32, %v27211_v13  ;;  %v11468_v29 = vcombine.high %v11460_v49, %v11460_v49  ;;  %v12134_v7 = vadd.f32 %v11460_v49, %v27212_v42  ;;  %v12508_v11 = vadd.f32 %v23201_v38, %v12320_v16  ;;  %17930 = vmatpush3.bf16.msra.mxu1 %v23641_v6  ;;  %v18308_v13 = vld [vmem:[#allocation8 + $0xa8] sm:$0xff]  }
 0x3d1   : > { %v12319_v37 = vmul.f32 %v23138_v15, %v12131_v21  ;;  %v11469_v32 = vcombine.high %v11467_v58, %v11467_v58  ;;  %v12136_v41 = vadd.f32 %v11467_v58, %v27213_v25  ;;  %v12668_v21 = vmax.f32 %v12506_v31, 0.0  ;;  %17931 = vmatprep.subr.bf16.mxu1 %v18307_v55  ;;  %v17847_v5 = vpop.f32.mrf.mxu0 }
 0x3d2   : > { %v12321_v10 = vmul.f32 %v23147_v0, %v12133_v20  ;;  %v27214_v4 = vcombine.high %v27212_v42, %v27212_v42  ;;  %v12322_v49 = vmul.f32 %v23197_v30, %v12134_v7  ;;  %v24084_v20 = vpop.f32.mrf.mxu1  ;;  %v12670_v12 = vmax.f32 %v12508_v11, 0.0 }
 0x3d3   : > { %v12507_v44 = vadd.f32 %v23150_v17, %v12319_v37  ;;  %v27215_v6 = vcombine.high %v27213_v25, %v27213_v25  ;;  %v12324_v37 = vmul.f32 %v23138_v15, %v12136_v41  ;;  %v13150_v14 = vcombine.low %v12667_v23, %v12668_v21  ;;  %v24093_v7 = vpop.f32.mrf.mxu0 }
 0x3d4   : > { %v12135_v1 = vadd.f32 %v11468_v29, %v27214_v4  ;;  %v12509_v16 = vadd.f32 %v23171_v60, %v12321_v10  ;;  %v12510_v42 = vadd.f32 %v23229_v36, %v12322_v49  ;;  %v10942_v4 = vpop.f32.mrf.mxu1  ;;  %v24099_v25 = vsel %vm23940_vm12, %v13741_v43, 0  ;;  %17932 = vmatpush3.bf16.msra.mxu1 %v18307_v55 }
 0x3d5   : > { %v12137_v58 = vadd.f32 %v11469_v32, %v27215_v6  ;;  %v12669_v31 = vmax.f32 %v12507_v44, 0.0  ;;  %v12512_v10 = vadd.f32 %v23150_v17, %v12324_v37  ;;  %27216 = vst [vmem:[#allocation171_spill] sm:$0xff] %v24099_v25  ;;  %v13164_v32 = vrot.slane %v13150_v14, %v22899_v46  ;;  %17933 = vmatprep.subr.bf16.mxu1 %v18308_v13  ;;  %v17848_v21 = vpop.f32.mrf.mxu0 }
 0x3d6   : > { %v12323_v29 = vmul.f32 %v23138_v15, %v12135_v1  ;;  %v12671_v11 = vmax.f32 %v12509_v16, 0.0  ;;  %v12672_v44 = vmax.f32 %v12510_v42, 0.0  ;;  %v24105_v1 = vpop.f32.mrf.mxu1  ;;  %v13991_v16 = vshrl.u32 %v24051_v28, 16 }
 0x3d7   : > { %v12325_v5 = vmul.f32 %v23185_v2, %v12137_v58  ;;  %v13166_v23 = vcombine.low %v12669_v31, %v12670_v12  ;;  %v12674_v6 = vmax.f32 %v12512_v10, 0.0  ;;  %v13993_v43 = vshll.u32 %v24051_v28, 16  ;;  %v24115_v31 = vpop.f32.mrf.mxu0 }
 0x3d8   : > { %v24103_v41 = vadd.f32 %v23150_v17, %v12323_v29  ;;  %v27217_v55 = vrot.slane %v24016_v48, %v22899_v46  ;;  %v13167_v37 = vcombine.low %v12671_v11, %v12672_v44  ;;  %v10947_v29 = vpop.f32.mrf.mxu1  ;;  %v11082_v10 = vadd.f32 %v23853_v8, %v23766_v56  ;;  %17934 = vmatpush3.bf16.msra.mxu1 %v18308_v13  ;;  %v18309_v56 = vld [vmem:[#allocation8 + $0xa0] sm:$0xff]  }
 0x3d9   : > { %v12513_v49 = vadd.f32 %v23201_v38, %v12325_v5  ;;  %v13174_v12 = vrot.slane %v13166_v23, %v22899_v46  ;;  %v13995_v4 = vrot.slane %v13993_v43, 1  ;;  %v13998_v5 = vshll.u32 %v24099_v25, 16  ;;  %v17851_v23 = vpop.f32.mrf.mxu0  ;;  %17935 = vmatprep.subr.bf16.mxu1 %v18309_v56 }
 0x3da   : > { %v13165_v14 = vcombine.low %v27217_v55, %v13164_v32  ;;  %v13181_v21 = vrot.slane %v13167_v37, %v22899_v46  ;;  %v11085_v48 = vadd.f32 %v23864_v45, %v23789_v62  ;;  %v12655_v32 = vmax.f32 %v23891_v61, 0.0 }
 0x3db   : > { %v12675_v42 = vmax.f32 %v12513_v49, 0.0  ;;  %v24127_v11 = vsel %vm23929_vm11, %v23946_v53, 0  ;;  %v13996_v49 = vor.u32 %v13995_v4, %v13991_v16  ;;  %v14000_v43 = vrot.slane %v13998_v5, 1  ;;  %v24133_v62 = vpop.f32.mrf.mxu0  ;;  %v27220_v4 = vld [vmem:[#allocation169_spill] sm:$0xff] }
 0x3dc   : > { %27218 = vst [vmem:[#allocation140_spill] sm:$0xff] %v24127_v11  ;;  %v11470_v55 = vcombine.high %v11082_v10, %v11082_v10  ;;  %v13182_v8 = vcombine.low %v13174_v12, %v13181_v21  ;;  %v11477_v13 = vrot.slane %v11082_v10, %v22899_v46  ;;  %v11487_v37 = vcombine.high %v11085_v48, %v11085_v48 }
 0x3dd   : > { %v24129_v44 = vcombine.low %v12674_v6, %v12675_v42  ;;  %v11494_v45 = vrot.slane %v11085_v48, %v22899_v46  ;;  %v24138_v29 = vsel %vm13965_vm13, %v13996_v49, %v14000_v43  ;;  %v13107_v16 = vrot.slane %v12655_v32, %v22899_v46  ;;  %v17852_v21 = vpop.f32.mrf.mxu0  ;;  %v24148_v48 = vpop.f32.mrf.mxu1  ;;  %v27222_v49 = vld [vmem:[#allocation178_spill] sm:$0xff]  ;;  %17936 = vmatpush3.bf16.msra.mxu1 %v18309_v56 }
 0x3de   : > { %v11484_v6 = vrot.slane %v11470_v55, %v22899_v46  ;;  %v24142_v42 = vpack.c.bf16 %v13182_v8, %v13165_v14  ;;  %14384 = vmatprep.mubr.bf16.mxu1 %v24138_v29  ;;  %17897 = vmatprep.mubr.bf16.mxu0 %v24138_v29  ;;  %v11485_v12 = vcombine.high %v11477_v13, %v11477_v13 }
 0x3df   : > { %v12138_v5 = vadd.f32 %v11477_v13, %v27220_v4  ;;  %27221 = vst [vmem:[#allocation143_spill] sm:$0xff] %v24148_v48  ;;  %14385 = vmatmul.mubr.bf16.gmra.mxu1 %v24045_v47  ;;  %v11501_v14 = vrot.slane %v11487_v37, %v22899_v46  ;;  %v11502_v32 = vcombine.high %v11494_v45, %v11494_v45  ;;  %v27224_v13 = vld [vmem:[#allocation189_spill] sm:$0xff]  ;;  %v24158_v21 = vpop.f32.mrf.mxu0  ;;  %v10950_v25 = vpop.f32.mrf.mxu1 }
 0x3e0   : > { %27219 = vst [vmem:[#allocation173_spill] sm:$0xff] %v24142_v42  ;;  %v11486_v23 = vcombine.high %v11484_v6, %v11484_v6  ;;  %v12140_v43 = vadd.f32 %v11484_v6, %v27222_v49  ;;  %v27223_v55 = vcombine.high %v27220_v4, %v27220_v4  ;;  %v12142_v61 = vadd.f32 %v11494_v45, %v27224_v13 }
 0x3e1   : > { %v12326_v58 = vmul.f32 %v23147_v0, %v12138_v5  ;;  %v13743_v10 = vpack.c.bf16 %v13107_v16, %v13107_v16  ;;  %v27225_v6 = vcombine.high %v27222_v49, %v27222_v49  ;;  %v11503_v28 = vcombine.high %v11501_v14, %v11501_v14  ;;  %v27227_v16 = vld [vmem:[#allocation191_spill] sm:$0xff]  ;;  %v17855_v25 = vpop.f32.mrf.mxu0 }
 0x3e2   : > { %v12139_v8 = vadd.f32 %v11485_v12, %v27223_v55  ;;  %v12328_v37 = vmul.f32 %v23138_v15, %v12140_v43  ;;  %v27226_v4 = vcombine.high %v27224_v13, %v27224_v13  ;;  %v12144_v55 = vadd.f32 %v11501_v14, %v27227_v16 }
 0x3e3   : > { %v12141_v47 = vadd.f32 %v11486_v23, %v27225_v6  ;;  %v12514_v45 = vadd.f32 %v23171_v60, %v12326_v58  ;;  %v12330_v56 = vmul.f32 %v23147_v0, %v12142_v61  ;;  %v27228_v49 = vcombine.high %v27227_v16, %v27227_v16  ;;  %v24180_v6 = vpop.f32.mrf.mxu0 }
 0x3e4   : > { %v12143_v12 = vadd.f32 %v11502_v32, %v27226_v4  ;;  %v12327_v5 = vmul.f32 %v23197_v30, %v12139_v8  ;;  %v12516_v23 = vadd.f32 %v23150_v17, %v12328_v37  ;;  %v12332_v58 = vmul.f32 %v23138_v15, %v12144_v55  ;;  %v24192_v55 = vpop.f32.mrf.mxu1 }
 0x3e5   : > { %v12329_v53 = vmul.f32 %v23185_v2, %v12141_v47  ;;  %v12145_v43 = vadd.f32 %v11503_v28, %v27228_v49  ;;  %v12676_v8 = vmax.f32 %v12514_v45, 0.0  ;;  %v12518_v14 = vadd.f32 %v23171_v60, %v12330_v56  ;;  %v17856_v45 = vpop.f32.mrf.mxu0  ;;  %27230 = vst [vmem:[#allocation92_spill] sm:$0xff] %v24192_v55 }
 0x3e6   : > { %v12331_v13 = vmul.f32 %v23197_v30, %v12143_v12  ;;  %v12515_v32 = vadd.f32 %v23229_v36, %v12327_v5  ;;  %v12678_v47 = vmax.f32 %v12516_v23, 0.0  ;;  %v24186_v28 = vadd.f32 %v23150_v17, %v12332_v58  ;;  %v10955_v58 = vpop.f32.mrf.mxu1 }
 0x3e7   : > { %v12517_v61 = vadd.f32 %v23201_v38, %v12329_v53  ;;  %v12333_v37 = vmul.f32 %v23138_v15, %v12145_v43  ;;  %v12680_v12 = vmax.f32 %v12518_v14, 0.0  ;;  %v24190_v5 = vsel %vm23940_vm12, %v13743_v10, 0  ;;  %v24202_v10 = vpop.f32.mrf.mxu0 }
 0x3e8   : > { %v12519_v4 = vadd.f32 %v23229_v36, %v12331_v13  ;;  %v12677_v16 = vmax.f32 %v12515_v32, 0.0  ;;  %27229 = vst [vmem:[#allocation81_spill] sm:$0xff] %v24190_v5  ;;  %v14005_v23 = vshll.u32 %v24127_v11, 16  ;;  %v14010_v13 = vshll.u32 %v24190_v5, 16  ;;  %v24207_v43 = vpop.f32.mrf.mxu1 }
 0x3e9   : > { %v12679_v56 = vmax.f32 %v12517_v61, 0.0  ;;  %v24195_v53 = vadd.f32 %v23150_v17, %v12333_v37  ;;  %v11090_v32 = vadd.f32 %v23887_v18, %v23803_v33  ;;  %v27231_v18 = vshrl.u32 %v24127_v11, 16 }
 0x3ea   : > { %v12681_v25 = vmax.f32 %v12519_v4, 0.0  ;;  %v13191_v49 = vcombine.low %v12676_v8, %v12677_v16  ;;  %v14007_v61 = vrot.slane %v14005_v23, 1  ;;  %v14012_v55 = vrot.slane %v14010_v13, 1  ;;  %v17859_v16 = vpop.f32.mrf.mxu0  ;;  %v10958_v58 = vpop.f32.mrf.mxu1 }
 0x3eb   : > { %v13207_v14 = vcombine.low %v12678_v47, %v12679_v56  ;;  %v12683_v37 = vmax.f32 %v24195_v53, 0.0  ;;  %v11504_v48 = vcombine.high %v11090_v32, %v11090_v32  ;;  %v11511_v8 = vrot.slane %v11090_v32, %v22899_v46 }
 0x3ec   : > { %v13208_v45 = vcombine.low %v12680_v12, %v12681_v25  ;;  %v13205_v4 = vrot.slane %v13191_v49, %v22899_v46  ;;  %v14008_v47 = vor.u32 %v14007_v61, %v27231_v18  ;;  %v11093_v12 = vadd.f32 %v23909_v34, %v23822_v24  ;;  %v27233_v49 = vld [vmem:[#allocation194_spill] sm:$0xff]  ;;  %v24220_v32 = vpop.f32.mrf.mxu0 }
 0x3ed   : > { %v13215_v5 = vrot.slane %v13207_v14, %v22899_v46  ;;  %v27232_v56 = vrot.slane %v24129_v44, %v22899_v46  ;;  %v11518_v25 = vrot.slane %v11504_v48, %v22899_v46  ;;  %v11519_v23 = vcombine.high %v11511_v8, %v11511_v8  ;;  %v27235_v48 = vld [vmem:[#allocation195_spill] sm:$0xff] }
 0x3ee   : > { %v13222_v33 = vrot.slane %v13208_v45, %v22899_v46  ;;  %v12146_v13 = vadd.f32 %v11511_v8, %v27233_v49  ;;  %v24223_v45 = vsel %vm13965_vm13, %v14008_v47, %v14012_v55  ;;  %v11521_v61 = vcombine.high %v11093_v12, %v11093_v12  ;;  %v17860_v55 = vpop.f32.mrf.mxu0 }
 0x3ef   : > { %v13206_v53 = vcombine.low %v27232_v56, %v13205_v4  ;;  %v11528_v16 = vrot.slane %v11093_v12, %v22899_v46  ;;  %14392 = vmatprep.mubr.bf16.mxu1 %v24223_v45  ;;  %17898 = vmatmul.mubr.bf16.vlgmr.msra.gmra.mxu0 %v24223_v45  ;;  %v11520_v24 = vcombine.high %v11518_v25, %v11518_v25 }
 0x3f0   : > { %v13223_v14 = vcombine.low %v13215_v5, %v13222_v33  ;;  %v27234_v34 = vcombine.high %v27233_v49, %v27233_v49  ;;  %v12148_v4 = vadd.f32 %v11518_v25, %v27235_v48  ;;  %v24235_v5 = vsel %vm23929_vm11, %v24032_v22, 0  ;;  %14393 = vmatmul.mubr.bf16.gmra.mxu1 %v24138_v29  ;;  %v27239_v49 = vld [vmem:[#allocation192_spill] sm:$0xff] }
 0x3f1   : > { %27236 = vst [vmem:[#allocation175_spill] sm:$0xff] %v24235_v5  ;;  %v12334_v33 = vmul.f32 %v23185_v2, %v12146_v13  ;;  %v11535_v18 = vrot.slane %v11521_v61, %v22899_v46  ;;  %v11536_v47 = vcombine.high %v11528_v16, %v11528_v16  ;;  %v27238_v12 = vcombine.high %v27235_v48, %v27235_v48 }
 0x3f2   : > { %v12147_v44 = vadd.f32 %v11519_v23, %v27234_v34  ;;  %v24237_v8 = vpack.c.bf16 %v13223_v14, %v13206_v53  ;;  %v12336_v23 = vmul.f32 %v23197_v30, %v12148_v4  ;;  %v12150_v58 = vadd.f32 %v11528_v16, %v27239_v49  ;;  %v24248_v34 = vpop.f32.mrf.mxu0 }
 0x3f3   : > { %v12149_v56 = vadd.f32 %v11520_v24, %v27238_v12  ;;  %v12522_v53 = vadd.f32 %v23201_v38, %v12334_v33  ;;  %v11537_v13 = vcombine.high %v11535_v18, %v11535_v18  ;;  %v27240_v29 = vcombine.high %v27239_v49, %v27239_v49 }
 0x3f4   : > { %27237 = vst [vmem:[#allocation146_spill] sm:$0xff] %v24237_v8  ;;  %v12335_v25 = vmul.f32 %v23147_v0, %v12147_v44  ;;  %v12152_v61 = vadd.f32 %v11535_v18, %v23256_v35  ;;  %v12524_v44 = vadd.f32 %v23229_v36, %v12336_v23  ;;  %v12338_v4 = vmul.f32 %v23185_v2, %v12150_v58  ;;  %v17863_v16 = vpop.f32.mrf.mxu0 }
 0x3f5   : > { %v12151_v14 = vadd.f32 %v11536_v47, %v27240_v29  ;;  %v12337_v48 = vmul.f32 %v23138_v15, %v12149_v56  ;;  %v12684_v55 = vmax.f32 %v12522_v53, 0.0  ;;  %v27241_v33 = vcombine.high %v23256_v35, %v23256_v35 }
 0x3f6   : > { %v12523_v24 = vadd.f32 %v23171_v60, %v12335_v25  ;;  %v12340_v47 = vmul.f32 %v23197_v30, %v12152_v61  ;;  %v12686_v56 = vmax.f32 %v12524_v44, 0.0  ;;  %v12526_v25 = vadd.f32 %v23201_v38, %v12338_v4 }
 0x3f7   : > { %v12153_v12 = vadd.f32 %v11537_v13, %v27241_v33  ;;  %v12339_v11 = vmul.f32 %v23147_v0, %v12151_v14  ;;  %v12525_v18 = vadd.f32 %v23150_v17, %v12337_v48  ;;  %v13231_v29 = vcombine.low %v12683_v37, %v12684_v55  ;;  %v24275_v37 = vpop.f32.mrf.mxu1 }
 0x3f8   : > { %v12685_v49 = vmax.f32 %v12523_v24, 0.0  ;;  %v12528_v53 = vadd.f32 %v23229_v36, %v12340_v47  ;;  %v12688_v13 = vmax.f32 %v12526_v25, 0.0  ;;  %v11098_v14 = vadd.f32 %v23922_v57, %v23845_v40 }
 0x3f9   : > { %v12341_v23 = vmul.f32 %v23138_v15, %v12153_v12  ;;  %v12527_v58 = vadd.f32 %v23171_v60, %v12339_v11  ;;  %v12687_v35 = vmax.f32 %v12525_v18, 0.0  ;;  %v13239_v61 = vrot.slane %v13231_v29, %v22899_v46  ;;  %v10963_v25 = vpop.f32.mrf.mxu1 }
 0x3fa   : > { %v13232_v16 = vcombine.low %v12685_v49, %v12686_v56  ;;  %v12690_v44 = vmax.f32 %v12528_v53, 0.0  ;;  %v11538_v55 = vcombine.high %v11098_v14, %v11098_v14  ;;  %v11545_v33 = vrot.slane %v11098_v14, %v22899_v46  ;;  %v18310_v49 = vld [vmem:[#allocation8 + $0x98] sm:$0xff]   ;;  %v24284_v56 = vpop.f32.mrf.mxu0 }
 0x3fb   : > { %v24273_v48 = vadd.f32 %v23150_v17, %v12341_v23  ;;  %v12689_v24 = vmax.f32 %v12527_v58, 0.0  ;;  %v13248_v11 = vcombine.low %v12687_v35, %v12688_v13  ;;  %v27242_v47 = vmax.f32 %v23990_v39, 0.0  ;;  %v27243_v35 = vld [vmem:[#allocation15_spill] sm:$0xff]  ;;  %17937 = vmatprep.subr.bf16.mxu1 %v18310_v49 }
 0x3fc   : > { %v13246_v4 = vrot.slane %v13232_v16, %v22899_v46  ;;  %v14015_v57 = vshrl.u32 %v24235_v5, 16  ;;  %v14017_v18 = vshll.u32 %v24235_v5, 16  ;;  %v11552_v58 = vrot.slane %v11538_v55, %v22899_v46  ;;  %v27246_v5 = vld [vmem:[#allocation75_spill] sm:$0xff]  ;;  %17938 = vmatpush3.bf16.msra.mxu1 %v18310_v49  ;;  %v18312_v49 = vld [vmem:[#allocation8 + $0x38] sm:$0xff]  }
 0x3fd   : > { %v13249_v12 = vcombine.low %v12689_v24, %v12690_v44  ;;  %v13148_v40 = vrot.slane %v27242_v47, %v22899_v46  ;;  %v13256_v23 = vrot.slane %v13248_v11, %v22899_v46  ;;  %v11553_v53 = vcombine.high %v11545_v33, %v11545_v33  ;;  %v17864_v24 = vpop.f32.mrf.mxu0  ;;  %v24290_v44 = vpop.f32.mrf.mxu1 }
 0x3fe   : > { %v13247_v29 = vcombine.low %v13239_v61, %v13246_v4  ;;  %v12154_v13 = vadd.f32 %v11545_v33, %v27243_v35  ;;  %v14019_v14 = vrot.slane %v14017_v18, 1  ;;  %v11554_v47 = vcombine.high %v11552_v58, %v11552_v58  ;;  %v27245_v4 = vld [vmem:[#allocation17_spill] sm:$0xff] }
 0x3ff   : > { %v13263_v16 = vrot.slane %v13249_v12, %v22899_v46  ;;  %v13745_v39 = vpack.c.bf16 %v13148_v40, %v13148_v40  ;;  %v27244_v25 = vcombine.high %v27243_v35, %v27243_v35  ;;  %v12156_v11 = vadd.f32 %v11552_v58, %v27245_v4  ;;  %v10966_v24 = vpop.f32.mrf.mxu1 }
 0x400   : > { %v11101_v55 = vadd.f32 %v23956_v9, %v27246_v5  ;;  %v12342_v33 = vmul.f32 %v23138_v15, %v12154_v13  ;;  %v14020_v18 = vor.u32 %v14019_v14, %v14015_v57  ;;  %v27248_v22 = vcombine.high %v27245_v4, %v27245_v4  ;;  %v18311_v5 = vld [vmem:[#allocation8 + $0x78] sm:$0xff]  }
 0x401   : > { %v12155_v61 = vadd.f32 %v11553_v53, %v27244_v25  ;;  %v13264_v12 = vcombine.low %v13256_v23, %v13263_v16  ;;  %v24301_v40 = vsel %vm23940_vm12, %v13745_v39, 0  ;;  %v12344_v58 = vmul.f32 %v23147_v0, %v12156_v11  ;;  %v24309_v23 = vpop.f32.mrf.mxu0  ;;  %17309 = vmatprep.subr.bf16.mxu0 %v18311_v5  ;;  %v27252_v5 = vld [vmem:[#allocation18_spill] sm:$0xff] }
 0x402   : > { %27247 = vst [vmem:[#allocation177_spill] sm:$0xff] %v24301_v40  ;;  %v12157_v35 = vadd.f32 %v11554_v47, %v27248_v22  ;;  %v14022_v9 = vshll.u32 %v24301_v40, 16  ;;  %v12530_v13 = vadd.f32 %v23150_v17, %v12342_v33  ;;  %v11555_v57 = vcombine.high %v11101_v55, %v11101_v55  ;;  %17310 = vmatpush3.bf16.msra.mxu0 %v18312_v49 }
 0x403   : > { %v12343_v53 = vmul.f32 %v23185_v2, %v12155_v61  ;;  %v24311_v16 = vpack.c.bf16 %v13264_v12, %v13247_v29  ;;  %v11562_v39 = vrot.slane %v11101_v55, %v22899_v46  ;;  %v12532_v47 = vadd.f32 %v23171_v60, %v12344_v58  ;;  %v17867_v61 = vpop.f32.mrf.mxu0  ;;  %v27250_v29 = vld [vmem:[#allocation16_spill] sm:$0xff] }
 0x404   : > { %v12345_v14 = vmul.f32 %v23197_v30, %v12157_v35  ;;  %v14024_v25 = vrot.slane %v14022_v9, 1  ;;  %v12692_v4 = vmax.f32 %v12530_v13, 0.0  ;;  %v11569_v11 = vrot.slane %v11555_v57, %v22899_v46 }
 0x405   : > { %27249 = vst [vmem:[#allocation149_spill] sm:$0xff] %v24311_v16  ;;  %v12531_v22 = vadd.f32 %v23201_v38, %v12343_v53  ;;  %v11570_v24 = vcombine.high %v11562_v39, %v11562_v39  ;;  %v12158_v12 = vadd.f32 %v11562_v39, %v27250_v29  ;;  %v12694_v55 = vmax.f32 %v12532_v47, 0.0 }
 0x406   : > { %v12533_v33 = vadd.f32 %v23229_v36, %v12345_v14  ;;  %v24322_v35 = vsel %vm13965_vm13, %v14020_v18, %v14024_v25  ;;  %v11571_v53 = vcombine.high %v11569_v11, %v11569_v11  ;;  %v27251_v58 = vcombine.high %v27250_v29, %v27250_v29 }
 0x407   : > { %v12693_v40 = vmax.f32 %v12531_v22, 0.0  ;;  %14400 = vmatprep.mubr.bf16.mxu1 %v24322_v35  ;;  %17901 = vmatprep.mubr.bf16.mxu0 %v24322_v35  ;;  %v12160_v13 = vadd.f32 %v11569_v11, %v27252_v5  ;;  %v24333_v49 = vsel %vm23929_vm11, %v24142_v42, 0  ;;  %v12346_v18 = vmul.f32 %v23138_v15, %v12158_v12 }
 0x408   : > { %v12159_v9 = vadd.f32 %v11570_v24, %v27251_v58  ;;  %27253 = vst [vmem:[#allocation99_spill] sm:$0xff] %v24333_v49  ;;  %v12695_v57 = vmax.f32 %v12533_v33, 0.0  ;;  %14401 = vmatmul.mubr.bf16.gmra.mxu1 %v24223_v45  ;;  %v11106_v14 = vadd.f32 %v23974_v50, %v23878_v19  ;;  %v27254_v22 = vcombine.high %v27252_v5, %v27252_v5  ;;  %v24355_v58 = vpop.f32.mrf.mxu0 }
 0x409   : > { %v13272_v39 = vcombine.low %v12692_v4, %v12693_v40  ;;  %v12348_v61 = vmul.f32 %v23147_v0, %v12160_v13  ;;  %v27255_v11 = vmax.f32 %v24103_v41, 0.0  ;;  %v24347_v40 = vpop.f32.mrf.mxu1  ;;  %v12534_v29 = vadd.f32 %v23150_v17, %v12346_v18  ;;  %27257 = vst [vmem:[#allocation105_spill] sm:$0xff] %v24355_v58 }
 0x40a   : > { %v12161_v47 = vadd.f32 %v11571_v53, %v27254_v22  ;;  %v12347_v25 = vmul.f32 %v23185_v2, %v12159_v9  ;;  %27256 = vst [vmem:[#allocation104_spill] sm:$0xff] %v24347_v40  ;;  %v13273_v45 = vcombine.low %v12694_v55, %v12695_v57  ;;  %v11572_v19 = vcombine.high %v11106_v14, %v11106_v14  ;;  %v27260_v40 = vld [vmem:[#allocation20_spill] sm:$0xff] }
 0x40b   : > { %v13189_v24 = vrot.slane %v27255_v11, %v22899_v46  ;;  %v13280_v4 = vrot.slane %v13272_v39, %v22899_v46  ;;  %v12536_v33 = vadd.f32 %v23171_v60, %v12348_v61  ;;  %v11579_v53 = vrot.slane %v11106_v14, %v22899_v46  ;;  %v10971_v41 = vpop.f32.mrf.mxu1  ;;  %v27259_v14 = vld [vmem:[#allocation14_spill] sm:$0xff] }
 0x40c   : > { %v12349_v50 = vmul.f32 %v23197_v30, %v12161_v47  ;;  %v12535_v12 = vadd.f32 %v23201_v38, %v12347_v25  ;;  %v13287_v9 = vrot.slane %v13273_v45, %v22899_v46  ;;  %v12696_v5 = vmax.f32 %v12534_v29, 0.0  ;;  %v17868_v47 = vpop.f32.mrf.mxu0 }
 0x40d   : > { %v11586_v55 = vrot.slane %v11572_v19, %v22899_v46  ;;  %v13747_v13 = vpack.c.bf16 %v13189_v24, %v13189_v24  ;;  %v12698_v18 = vmax.f32 %v12536_v33, 0.0  ;;  %v11587_v22 = vcombine.high %v11579_v53, %v11579_v53  ;;  %v24360_v25 = vpop.f32.mrf.mxu1 }
 0x40e   : > { %v12537_v57 = vadd.f32 %v23229_v36, %v12349_v50  ;;  %v12697_v39 = vmax.f32 %v12535_v12, 0.0  ;;  %27258 = vst [vmem:[#allocation106_spill] sm:$0xff] %v24360_v25  ;;  %v13288_v61 = vcombine.low %v13280_v4, %v13287_v9  ;;  %v12162_v42 = vadd.f32 %v11579_v53, %v27259_v14  ;;  %v24371_v50 = vpop.f32.mrf.mxu0 }
 0x40f   : > { %v11588_v11 = vcombine.high %v11586_v55, %v11586_v55  ;;  %v12164_v41 = vadd.f32 %v11586_v55, %v27260_v40  ;;  %v27261_v29 = vcombine.high %v27259_v14, %v27259_v14  ;;  %v24369_v19 = vsel %vm23940_vm12, %v13747_v13, 0  ;;  %v10974_v12 = vpop.f32.mrf.mxu1 }
 0x410   : > { %v12699_v58 = vmax.f32 %v12537_v57, 0.0  ;;  %v13289_v45 = vcombine.low %v12696_v5, %v12697_v39  ;;  %27262 = vst [vmem:[#allocation103_spill] sm:$0xff] %v24369_v19  ;;  %v27263_v4 = vcombine.high %v27260_v40, %v27260_v40  ;;  %v12350_v53 = vmul.f32 %v23138_v15, %v12162_v42 }
 0x411   : > { %v12163_v24 = vadd.f32 %v11587_v22, %v27261_v29  ;;  %v12352_v9 = vmul.f32 %v23185_v2, %v12164_v41  ;;  %v14027_v5 = vshrl.u32 %v24333_v49, 16  ;;  %v14029_v13 = vshll.u32 %v24333_v49, 16  ;;  %v17871_v22 = vpop.f32.mrf.mxu0  ;;  %v18314_v41 = vld [vmem:[#allocation8 + $0x30] sm:$0xff]  }
 0x412   : > { %v12165_v33 = vadd.f32 %v11588_v11, %v27263_v4  ;;  %v13290_v55 = vcombine.low %v12698_v18, %v12699_v58  ;;  %v13297_v57 = vrot.slane %v13289_v45, %v22899_v46  ;;  %v24384_v14 = vadd.f32 %v23150_v17, %v12350_v53  ;;  %v18313_v11 = vld [vmem:[#allocation8 + $0x70] sm:$0xff]  }
 0x413   : > { %v12351_v39 = vmul.f32 %v23138_v15, %v12163_v24  ;;  %v12540_v40 = vadd.f32 %v23201_v38, %v12352_v9  ;;  %v14034_v42 = vshll.u32 %v24369_v19, 16  ;;  %v14031_v45 = vrot.slane %v14029_v13, 1  ;;  %v27264_v29 = vld [vmem:[#allocation79_spill] sm:$0xff]  ;;  %17311 = vmatprep.subr.bf16.mxu0 %v18313_v11 }
 0x414   : > { %v12353_v47 = vmul.f32 %v23147_v0, %v12165_v33  ;;  %v13304_v58 = vrot.slane %v13290_v55, %v22899_v46  ;;  %v11109_v24 = vadd.f32 %v24003_v52, %v27264_v29  ;;  %17312 = vmatpush3.bf16.msra.mxu0 %v18314_v41  ;;  %v27266_v52 = vmax.f32 %v24186_v28, 0.0  ;;  %v27268_v11 = vld [vmem:[#allocation19_spill] sm:$0xff] }
 0x415   : > { %v12539_v18 = vadd.f32 %v23150_v17, %v12351_v39  ;;  %v12702_v33 = vmax.f32 %v12540_v40, 0.0  ;;  %v14036_v53 = vrot.slane %v14034_v42, 1  ;;  %v14032_v19 = vor.u32 %v14031_v45, %v14027_v5  ;;  %v27265_v39 = vld [vmem:[#allocation78_spill] sm:$0xff] }
 0x416   : > { %v12541_v12 = vadd.f32 %v23171_v60, %v12353_v47  ;;  %v13305_v9 = vcombine.low %v13297_v57, %v13304_v58  ;;  %v11589_v49 = vcombine.high %v11109_v24, %v11109_v24  ;;  %v11596_v55 = vrot.slane %v11109_v24, %v22899_v46 }
 0x417   : > { %v12701_v22 = vmax.f32 %v12539_v18, 0.0  ;;  %v11114_v13 = vadd.f32 %v24027_v3, %v27265_v39  ;;  %v13230_v47 = vrot.slane %v27266_v52, %v22899_v46  ;;  %v24405_v57 = vsel %vm13965_vm13, %v14032_v19, %v14036_v53  ;;  %v27273_v39 = vld [vmem:[#allocation22_spill] sm:$0xff] }
 0x418   : > { %v12703_v25 = vmax.f32 %v12541_v12, 0.0  ;;  %v24400_v29 = vpack.c.bf16 %v13305_v9, %v13288_v61  ;;  %v11603_v5 = vrot.slane %v11589_v49, %v22899_v46  ;;  %14408 = vmatprep.mubr.bf16.mxu1 %v24405_v57  ;;  %17902 = vmatmul.mubr.bf16.gmra.mxu0 %v24405_v57  ;;  %v11604_v42 = vcombine.high %v11596_v55, %v11596_v55  ;;  %v27270_v49 = vld [vmem:[#allocation25_spill] sm:$0xff] }
 0x419   : > { %v24402_v40 = vcombine.low %v12701_v22, %v12702_v33  ;;  %v12166_v3 = vadd.f32 %v11596_v55, %v27268_v11  ;;  %v11606_v41 = vcombine.high %v11114_v13, %v11114_v13  ;;  %v24414_v28 = vsel %vm23929_vm11, %v24237_v8, 0  ;;  %14409 = vmatmul.mubr.bf16.gmra.mxu1 %v24322_v35 }
 0x41a   : > { %27267 = vst [vmem:[#allocation180_spill] sm:$0xff] %v24400_v29  ;;  %27269 = vst [vmem:[#allocation154_spill] sm:$0xff] %v24414_v28  ;;  %v11605_v19 = vcombine.high %v11603_v5, %v11603_v5  ;;  %v12168_v58 = vadd.f32 %v11603_v5, %v27270_v49  ;;  %v11613_v18 = vrot.slane %v11114_v13, %v22899_v46 }
 0x41b   : > { %v13321_v61 = vrot.slane %v24402_v40, %v22899_v46  ;;  %v27271_v45 = vcombine.high %v27268_v11, %v27268_v11  ;;  %v12354_v12 = vmul.f32 %v23197_v30, %v12166_v3  ;;  %v11620_v33 = vrot.slane %v11606_v41, %v22899_v46  ;;  %v24434_v3 = vpop.f32.mrf.mxu1  ;;  %v18315_v41 = vld [vmem:[#allocation8 + $0x90] sm:$0xff]  }
 0x41c   : > { %v13749_v53 = vpack.c.bf16 %v13230_v47, %v13230_v47  ;;  %v27272_v9 = vcombine.high %v27270_v49, %v27270_v49  ;;  %v12356_v35 = vmul.f32 %v23185_v2, %v12168_v58  ;;  %v11621_v55 = vcombine.high %v11613_v18, %v11613_v18  ;;  %27275 = vst [vmem:[#allocation200_spill] sm:$0xff] %v24434_v3  ;;  %v24436_v47 = vpop.f32.mrf.mxu0 }
 0x41d   : > { %v12167_v24 = vadd.f32 %v11604_v42, %v27271_v45  ;;  %v12170_v52 = vadd.f32 %v11613_v18, %v27273_v39  ;;  %v12542_v40 = vadd.f32 %v23229_v36, %v12354_v12  ;;  %v11622_v5 = vcombine.high %v11620_v33, %v11620_v33  ;;  %v27274_v42 = vld [vmem:[#allocation23_spill] sm:$0xff]  ;;  %17939 = vmatprep.subr.bf16.mxu1 %v18315_v41  ;;  %v10979_v8 = vpop.f32.mrf.mxu1 }
 0x41e   : > { %v12169_v22 = vadd.f32 %v11605_v19, %v27272_v9  ;;  %v12172_v11 = vadd.f32 %v11620_v33, %v27274_v42  ;;  %v12544_v19 = vadd.f32 %v23201_v38, %v12356_v35  ;;  %v27276_v58 = vcombine.high %v27273_v39, %v27273_v39  ;;  %17940 = vmatpush3.bf16.msra.mxu1 %v18315_v41 }
 0x41f   : > { %v12355_v13 = vmul.f32 %v23138_v15, %v12167_v24  ;;  %v12358_v45 = vmul.f32 %v23197_v30, %v12170_v52  ;;  %v12704_v12 = vmax.f32 %v12542_v40, 0.0  ;;  %v27277_v33 = vcombine.high %v27274_v42, %v27274_v42 }
 0x420   : > { %v12357_v49 = vmul.f32 %v23147_v0, %v12169_v22  ;;  %v12171_v18 = vadd.f32 %v11621_v55, %v27276_v58  ;;  %v12360_v4 = vmul.f32 %v23138_v15, %v12172_v11  ;;  %v17872_v22 = vpop.f32.mrf.mxu0  ;;  %v12706_v3 = vmax.f32 %v12544_v19, 0.0  ;;  %v24461_v19 = vpop.f32.mrf.mxu1 }
 0x421   : > { %v12543_v24 = vadd.f32 %v23150_v17, %v12355_v13  ;;  %v12173_v9 = vadd.f32 %v11622_v5, %v27277_v33  ;;  %v12546_v55 = vadd.f32 %v23229_v36, %v12358_v45  ;;  %v13314_v13 = vcombine.low %v12703_v25, %v12704_v12 }
 0x422   : > { %v12545_v35 = vadd.f32 %v23171_v60, %v12357_v49  ;;  %v12359_v39 = vmul.f32 %v23138_v15, %v12171_v18  ;;  %v12548_v42 = vadd.f32 %v23150_v17, %v12360_v4  ;;  %v24459_v49 = vsel %vm23940_vm12, %v13749_v53, 0  ;;  %v24468_v33 = vpop.f32.mrf.mxu0 }
 0x423   : > { %v12705_v52 = vmax.f32 %v12543_v24, 0.0  ;;  %v12361_v40 = vmul.f32 %v23185_v2, %v12173_v9  ;;  %v12708_v8 = vmax.f32 %v12546_v55, 0.0  ;;  %27278 = vst [vmem:[#allocation174_spill] sm:$0xff] %v24459_v49  ;;  %v13328_v58 = vrot.slane %v13314_v13, %v22899_v46  ;;  %v10982_v9 = vpop.f32.mrf.mxu1 }
 0x424   : > { %v24455_v5 = vadd.f32 %v23150_v17, %v12359_v39  ;;  %v12707_v11 = vmax.f32 %v12545_v35, 0.0  ;;  %v12710_v18 = vmax.f32 %v12548_v42, 0.0  ;;  %v14039_v24 = vshrl.u32 %v24414_v28, 16  ;;  %v18316_v42 = vld [vmem:[#allocation8 + $0x68] sm:$0xff]  }
 0x425   : > { %v13330_v41 = vcombine.low %v12705_v52, %v12706_v3  ;;  %v12549_v25 = vadd.f32 %v23201_v38, %v12361_v40  ;;  %v14041_v12 = vshll.u32 %v24414_v28, 16  ;;  %v13329_v53 = vcombine.low %v13321_v61, %v13328_v58  ;;  %v27279_v52 = vld [vmem:[#allocation156_spill] sm:$0xff]  ;;  %17313 = vmatprep.subr.bf16.mxu0 %v18316_v42 }
 0x426   : > { %v13331_v4 = vcombine.low %v12707_v11, %v12708_v8  ;;  %v14046_v39 = vshll.u32 %v24459_v49, 16  ;;  %v11117_v13 = vadd.f32 %v24053_v27, %v27279_v52  ;;  %v11122_v40 = vadd.f32 %v24073_v59, %v23964_v26  ;;  %v18317_v11 = vld [vmem:[#allocation8 + $0x28] sm:$0xff]   ;;  %v17875_v8 = vpop.f32.mrf.mxu0  ;;  %v27286_v26 = vld [vmem:[#allocation29_spill] sm:$0xff] }
 0x427   : > { %v13338_v22 = vrot.slane %v13330_v41, %v22899_v46  ;;  %v12711_v35 = vmax.f32 %v12549_v25, 0.0  ;;  %v14043_v55 = vrot.slane %v14041_v12, 1  ;;  %v12691_v58 = vmax.f32 %v24273_v48, 0.0  ;;  %17314 = vmatpush3.bf16.msra.mxu0 %v18317_v11 }
 0x428   : > { %v13345_v3 = vrot.slane %v13331_v4, %v22899_v46  ;;  %v14048_v61 = vrot.slane %v14046_v39, 1  ;;  %v24483_v41 = vsel %vm23929_vm11, %v24311_v16, 0  ;;  %v11623_v12 = vcombine.high %v11117_v13, %v11117_v13  ;;  %v27281_v39 = vld [vmem:[#allocation26_spill] sm:$0xff] }
 0x429   : > { %v24477_v45 = vcombine.low %v12710_v18, %v12711_v35  ;;  %27280 = vst [vmem:[#allocation187_spill] sm:$0xff] %v24483_v41  ;;  %v14044_v4 = vor.u32 %v14043_v55, %v14039_v24  ;;  %v11630_v27 = vrot.slane %v11117_v13, %v22899_v46  ;;  %v11640_v59 = vcombine.high %v11122_v40, %v11122_v40 }
 0x42a   : > { %v13346_v25 = vcombine.low %v13338_v22, %v13345_v3  ;;  %v11647_v18 = vrot.slane %v11122_v40, %v22899_v46  ;;  %v13271_v9 = vrot.slane %v12691_v58, %v22899_v46  ;;  %v11637_v24 = vrot.slane %v11623_v12, %v22899_v46  ;;  %v24501_v40 = vpop.f32.mrf.mxu1 }
 0x42b   : > { %v24493_v35 = vsel %vm13965_vm13, %v14044_v4, %v14048_v61  ;;  %v11638_v22 = vcombine.high %v11630_v27, %v11630_v27  ;;  %v12174_v3 = vadd.f32 %v11630_v27, %v27281_v39  ;;  %v11654_v55 = vrot.slane %v11640_v59, %v22899_v46  ;;  %v27283_v61 = vld [vmem:[#allocation27_spill] sm:$0xff] }
 0x42c   : > { %v24490_v48 = vpack.c.bf16 %v13346_v25, %v13329_v53  ;;  %14416 = vmatprep.mubr.bf16.mxu1 %v24493_v35  ;;  %17905 = vmatprep.mubr.bf16.mxu0 %v24493_v35  ;;  %v11655_v52 = vcombine.high %v11647_v18, %v11647_v18  ;;  %v24503_v53 = vpop.f32.mrf.mxu0  ;;  %v11639_v42 = vcombine.high %v11637_v24, %v11637_v24  ;;  %v27284_v25 = vld [vmem:[#allocation24_spill] sm:$0xff]  ;;  %v10987_v28 = vpop.f32.mrf.mxu1 }
 0x42d   : > { %v27282_v11 = vcombine.high %v27281_v39, %v27281_v39  ;;  %v12176_v58 = vadd.f32 %v11637_v24, %v27283_v61  ;;  %14417 = vmatmul.mubr.bf16.gmra.mxu1 %v24405_v57  ;;  %v12178_v4 = vadd.f32 %v11647_v18, %v27284_v25  ;;  %v12362_v12 = vmul.f32 %v23147_v0, %v12174_v3 }
 0x42e   : > { %v11656_v27 = vcombine.high %v11654_v55, %v11654_v55  ;;  %v27285_v59 = vcombine.high %v27284_v25, %v27284_v25  ;;  %v12180_v49 = vadd.f32 %v11654_v55, %v27286_v26  ;;  %v17876_v16 = vpop.f32.mrf.mxu0  ;;  %v10988_v28 = vpop.f32.mrf.mxu1 }
 0x42f   : > { %v12175_v8 = vadd.f32 %v11638_v22, %v27282_v11  ;;  %v27287_v22 = vcombine.high %v27283_v61, %v27283_v61  ;;  %v12364_v57 = vmul.f32 %v23138_v15, %v12176_v58  ;;  %v12366_v18 = vmul.f32 %v23147_v0, %v12178_v4 }
 0x430   : > { %v12179_v13 = vadd.f32 %v11655_v52, %v27285_v59  ;;  %v12550_v3 = vadd.f32 %v23171_v60, %v12362_v12  ;;  %v27288_v11 = vcombine.high %v27286_v26, %v27286_v26  ;;  %v12368_v16 = vmul.f32 %v23138_v15, %v12180_v49 }
 0x431   : > { %v12177_v39 = vadd.f32 %v11639_v42, %v27287_v22  ;;  %v12363_v24 = vmul.f32 %v23197_v30, %v12175_v8  ;;  %v12552_v8 = vadd.f32 %v23150_v17, %v12364_v57  ;;  %v12554_v58 = vadd.f32 %v23171_v60, %v12366_v18 }
 0x432   : > { %v12181_v52 = vadd.f32 %v11656_v27, %v27288_v11  ;;  %v12367_v55 = vmul.f32 %v23197_v30, %v12179_v13  ;;  %v12712_v25 = vmax.f32 %v12550_v3, 0.0  ;;  %v24535_v26 = vadd.f32 %v23150_v17, %v12368_v16  ;;  %v10989_v13 = vpop.f32.mrf.mxu1  ;;  %v24545_v16 = vpop.f32.mrf.mxu0 }
 0x433   : > { %v12365_v61 = vmul.f32 %v23185_v2, %v12177_v39  ;;  %v12551_v42 = vadd.f32 %v23229_v36, %v12363_v24  ;;  %v12714_v59 = vmax.f32 %v12552_v8, 0.0  ;;  %v12716_v22 = vmax.f32 %v12554_v58, 0.0  ;;  %v27290_v8 = vld [vmem:[#allocation84_spill] sm:$0xff] }
 0x434   : > { %v12369_v4 = vmul.f32 %v23138_v15, %v12181_v52  ;;  %v12555_v12 = vadd.f32 %v23229_v36, %v12367_v55  ;;  %v13751_v18 = vpack.c.bf16 %v13271_v9, %v13271_v9  ;;  %v14053_v52 = vshll.u32 %v24483_v41, 16  ;;  %v18318_v9 = vld [vmem:[#allocation8 + $0x60] sm:$0xff]  }
 0x435   : > { %v12553_v49 = vadd.f32 %v23201_v38, %v12365_v61  ;;  %v12713_v27 = vmax.f32 %v12551_v42, 0.0  ;;  %v11125_v55 = vadd.f32 %v24093_v7, %v23987_v63  ;;  %v11130_v58 = vadd.f32 %v24115_v31, %v27290_v8  ;;  %v17879_v7 = vpop.f32.mrf.mxu0  ;;  %17315 = vmatprep.subr.bf16.mxu0 %v18318_v9  ;;  %v27293_v42 = vld [vmem:[#allocation28_spill] sm:$0xff] }
 0x436   : > { %v24539_v39 = vadd.f32 %v23150_v17, %v12369_v4  ;;  %v12717_v24 = vmax.f32 %v12555_v12, 0.0  ;;  %v24549_v61 = vsel %vm23940_vm12, %v13751_v18, 0  ;;  %v18319_v4 = vld [vmem:[#allocation8 + $0x20] sm:$0xff]   ;;  %v14055_v13 = vrot.slane %v14053_v52, 1  ;;  %v18320_v52 = vld [vmem:[#allocation8 + $0x88] sm:$0xff]  }
 0x437   : > { %v12715_v3 = vmax.f32 %v12553_v49, 0.0  ;;  %v13355_v11 = vcombine.low %v12712_v25, %v12713_v27  ;;  %27289 = vst [vmem:[#allocation155_spill] sm:$0xff] %v24549_v61  ;;  %v14058_v63 = vshll.u32 %v24549_v61, 16  ;;  %v11657_v27 = vcombine.high %v11125_v55, %v11125_v55  ;;  %17316 = vmatpush3.bf16.msra.mxu0 %v18319_v4  ;;  %v11188_v7 = vpop.f32.mrf.mxu0  ;;  %17941 = vmatprep.subr.bf16.mxu1 %v18320_v52  ;;  %v18321_v4 = vld [vmem:[#allocation8 + $0x58] sm:$0xff]  }
 0x438   : > { %v13372_v28 = vcombine.low %v12716_v22, %v12717_v24  ;;  %v11664_v22 = vrot.slane %v11125_v55, %v22899_v46  ;;  %v11674_v24 = vcombine.high %v11130_v58, %v11130_v58  ;;  %v27291_v18 = vrot.slane %v24477_v45, %v22899_v46  ;;  %17942 = vmatpush3.bf16.msra.mxu1 %v18320_v52 }
 0x439   : > { %v13369_v25 = vrot.slane %v13355_v11, %v22899_v46  ;;  %v13371_v12 = vcombine.low %v12714_v59, %v12715_v3  ;;  %v27292_v11 = vshrl.u32 %v24483_v41, 16  ;;  %v14060_v3 = vrot.slane %v14058_v63, 1  ;;  %v17880_v63 = vpop.f32.mrf.mxu0  ;;  %v27300_v41 = vld [vmem:[#allocation31_spill] sm:$0xff]  ;;  %17317 = vmatprep.subr.bf16.mxu0 %v18321_v4 }
 0x43a   : > { %v13386_v49 = vrot.slane %v13372_v28, %v22899_v46  ;;  %v11671_v28 = vrot.slane %v11657_v27, %v22899_v46  ;;  %v11672_v57 = vcombine.high %v11664_v22, %v11664_v22  ;;  %v12182_v55 = vadd.f32 %v11664_v22, %v27293_v42  ;;  %v27296_v22 = vld [vmem:[#allocation33_spill] sm:$0xff] }
 0x43b   : > { %v13370_v31 = vcombine.low %v27291_v18, %v13369_v25  ;;  %v13379_v8 = vrot.slane %v13371_v12, %v22899_v46  ;;  %v14056_v59 = vor.u32 %v14055_v13, %v27292_v11  ;;  %v11681_v9 = vrot.slane %v11130_v58, %v22899_v46  ;;  %v27294_v12 = vld [vmem:[#allocation87_spill] sm:$0xff] }
 0x43c   : > { %v11688_v25 = vrot.slane %v11674_v24, %v22899_v46  ;;  %v24573_v13 = vadd.f32 %v24133_v62, %v27294_v12  ;;  %v11673_v27 = vcombine.high %v11671_v28, %v11671_v28  ;;  %v27295_v58 = vcombine.high %v27293_v42, %v27293_v42  ;;  %v18322_v62 = vld [vmem:[#allocation8 + $0x18] sm:$0xff]   ;;  %v27298_v12 = vld [vmem:[#allocation30_spill] sm:$0xff] }
 0x43d   : > { %v13387_v61 = vcombine.low %v13379_v8, %v13386_v49  ;;  %v24568_v45 = vsel %vm13965_vm13, %v14056_v59, %v14060_v3  ;;  %v12184_v18 = vadd.f32 %v11671_v28, %v27296_v22  ;;  %v24584_v24 = vsel %vm23929_vm11, %v24400_v29, 0  ;;  %17318 = vmatpush3.bf16.msra.mxu0 %v18322_v62 }
 0x43e   : > { %14424 = vmatprep.mubr.bf16.mxu1 %v24568_v45  ;;  %17906 = vmatmul.mubr.bf16.gmra.mxu0 %v24568_v45  ;;  %v12183_v49 = vadd.f32 %v11672_v57, %v27295_v58  ;;  %v12370_v11 = vmul.f32 %v23185_v2, %v12182_v55  ;;  %v11689_v59 = vcombine.high %v11681_v9, %v11681_v9  ;;  %v18323_v58 = vld [vmem:[#allocation8 + $0x50] sm:$0xff]   ;;  %v27302_v62 = vmax.f32 %v24539_v39, 0.0 }
 0x43f   : > { %v24586_v8 = vpack.c.bf16 %v13387_v61, %v13370_v31  ;;  %14425 = vmatmul.mubr.bf16.gmra.mxu1 %v24493_v35  ;;  %v11690_v3 = vcombine.high %v11688_v25, %v11688_v25  ;;  %v27297_v42 = vcombine.high %v27296_v22, %v27296_v22  ;;  %v12372_v28 = vmul.f32 %v23197_v30, %v12184_v18  ;;  %v18325_v61 = vld [vmem:[#allocation8 + $0x80] sm:$0xff]  }
 0x440   : > { %v12371_v7 = vmul.f32 %v23147_v0, %v12183_v49  ;;  %v12186_v63 = vadd.f32 %v11681_v9, %v27298_v12  ;;  %v12558_v31 = vadd.f32 %v23201_v38, %v12370_v11  ;;  %v27299_v35 = vcombine.high %v27298_v12, %v27298_v12  ;;  %v18324_v11 = vld [vmem:[#allocation8 + $0x10] sm:$0xff]   ;;  %17319 = vmatprep.subr.bf16.mxu0 %v18323_v58 }
 0x441   : > { %v12185_v57 = vadd.f32 %v11673_v27, %v27297_v42  ;;  %v12188_v29 = vadd.f32 %v11688_v25, %v27300_v41  ;;  %v27301_v27 = vcombine.high %v27300_v41, %v27300_v41  ;;  %v12560_v52 = vadd.f32 %v23229_v36, %v12372_v28  ;;  %17943 = vmatprep.subr.bf16.mxu1 %v18325_v61  ;;  %v18326_v41 = vld [vmem:[#allocation8 + $0x48] sm:$0xff]  }
 0x442   : > { %v12187_v55 = vadd.f32 %v11689_v59, %v27299_v35  ;;  %v12559_v9 = vadd.f32 %v23171_v60, %v12371_v7  ;;  %v12374_v18 = vmul.f32 %v23185_v2, %v12186_v63  ;;  %v12720_v42 = vmax.f32 %v12558_v31, 0.0  ;;  %17944 = vmatpush3.bf16.msra.mxu1 %v18325_v61  ;;  %17320 = vmatpush3.bf16.msra.mxu0 %v18324_v11 }
 0x443   : > { %v12189_v22 = vadd.f32 %v11690_v3, %v27301_v27  ;;  %v12373_v49 = vmul.f32 %v23138_v15, %v12185_v57  ;;  %v12376_v25 = vmul.f32 %v23197_v30, %v12188_v29  ;;  %v12722_v57 = vmax.f32 %v12560_v52, 0.0  ;;  %17321 = vmatprep.subr.bf16.mxu0 %v18326_v41 }
 0x444   : > { %v12375_v59 = vmul.f32 %v23147_v0, %v12187_v55  ;;  %v12721_v3 = vmax.f32 %v12559_v9, 0.0  ;;  %v12562_v7 = vadd.f32 %v23201_v38, %v12374_v18  ;;  %v13395_v28 = vcombine.low %v27302_v62, %v12720_v42 }
 0x445   : > { %v12377_v12 = vmul.f32 %v23138_v15, %v12189_v22  ;;  %v12561_v4 = vadd.f32 %v23150_v17, %v12373_v49  ;;  %v12564_v31 = vadd.f32 %v23229_v36, %v12376_v25  ;;  %v11691_v27 = vcombine.high %v24573_v13, %v24573_v13  ;;  %v18327_v25 = vld [vmem:[#allocation8 + $0x8] sm:$0xff]  }
 0x446   : > { %v12563_v63 = vadd.f32 %v23171_v60, %v12375_v59  ;;  %v13396_v58 = vcombine.low %v12721_v3, %v12722_v57  ;;  %v12724_v55 = vmax.f32 %v12562_v7, 0.0  ;;  %v13403_v22 = vrot.slane %v13395_v28, %v22899_v46  ;;  %v18328_v7 = vld [vmem:[#allocation8 + $0x40] sm:$0xff]   ;;  %v27305_v28 = vld [vmem:[#allocation32_spill] sm:$0xff]  ;;  %17322 = vmatpush3.bf16.msra.mxu0 %v18327_v25 }
 0x447   : > { %v24618_v29 = vadd.f32 %v23150_v17, %v12377_v12  ;;  %v12723_v35 = vmax.f32 %v12561_v4, 0.0  ;;  %v12726_v49 = vmax.f32 %v12564_v31, 0.0  ;;  %v11698_v39 = vrot.slane %v24573_v13, %v22899_v46  ;;  %v27304_v4 = vld [vmem:[#allocation34_spill] sm:$0xff]  ;;  %v18329_v31 = vld [vmem:[#allocation8] sm:$0xff]   ;;  %17323 = vmatprep.subr.bf16.mxu0 %v18328_v7 }
 0x448   : > { %v12725_v61 = vmax.f32 %v12563_v63, 0.0  ;;  %v13410_v9 = vrot.slane %v13396_v58, %v22899_v46  ;;  %v11705_v18 = vrot.slane %v11691_v27, %v22899_v46  ;;  %v27303_v42 = vmax.f32 %v24384_v14, 0.0 }
 0x449   : > { %v13412_v52 = vcombine.low %v12723_v35, %v12724_v55  ;;  %v11706_v11 = vcombine.high %v11698_v39, %v11698_v39  ;;  %v12190_v3 = vadd.f32 %v11698_v39, %v27304_v4  ;;  %v14063_v57 = vshrl.u32 %v24584_v24, 16 }
 0x44a   : > { %v13312_v59 = vrot.slane %v27303_v42, %v22899_v46  ;;  %v13413_v12 = vcombine.low %v12725_v61, %v12726_v49  ;;  %v13411_v62 = vcombine.low %v13403_v22, %v13410_v9  ;;  %v11707_v41 = vcombine.high %v11705_v18, %v11705_v18  ;;  %v27308_v9 = vld [vmem:[#allocation89_spill] sm:$0xff]  ;;  %17324 = vmatpush3.bf16.msra.mxu0 %v18329_v31  ;;  %v18330_v31 = vld [vmem:[#allocation8 + $0x1f8] sm:$0xff]  }
 0x44b   : > { %v13420_v13 = vrot.slane %v13412_v52, %v22899_v46  ;;  %v12192_v63 = vadd.f32 %v11705_v18, %v27305_v28  ;;  %v27306_v14 = vcombine.high %v27304_v4, %v27304_v4  ;;  %v12378_v55 = vmul.f32 %v23138_v15, %v12190_v3  ;;  %17445 = vmatprep.subr.bf16.mxu1 %v18330_v31 }
 0x44c   : > { %v13427_v58 = vrot.slane %v13413_v12, %v22899_v46  ;;  %v13753_v27 = vpack.c.bf16 %v13312_v59, %v13312_v59  ;;  %v27307_v22 = vcombine.high %v27305_v28, %v27305_v28  ;;  %v14065_v39 = vshll.u32 %v24584_v24, 16 }
 0x44d   : > { %v12191_v35 = vadd.f32 %v11706_v11, %v27306_v14  ;;  %v12380_v49 = vmul.f32 %v23147_v0, %v12192_v63  ;;  %v11138_v52 = vadd.f32 %v24158_v21, %v27308_v9  ;;  %v12566_v25 = vadd.f32 %v23150_v17, %v12378_v55  ;;  %v18332_v9 = vld [vmem:[#allocation8 + $0x238] sm:$0xff]  }
 0x44e   : > { %v12193_v61 = vadd.f32 %v11707_v41, %v27307_v22  ;;  %v13428_v18 = vcombine.low %v13420_v13, %v13427_v58  ;;  %v24650_v59 = vsel %vm23940_vm12, %v13753_v27, 0  ;;  %v14067_v4 = vrot.slane %v14065_v39, 1  ;;  %17977 = vmatprep.subr.bf16.mxu0 %v18332_v9 }
 0x44f   : > { %v12379_v42 = vmul.f32 %v23185_v2, %v12191_v35  ;;  %v12568_v11 = vadd.f32 %v23171_v60, %v12380_v49  ;;  %v14070_v3 = vshll.u32 %v24650_v59, 16  ;;  %v12728_v13 = vmax.f32 %v12566_v25, 0.0 }
 0x450   : > { %v12381_v12 = vmul.f32 %v23197_v30, %v12193_v61  ;;  %v24655_v7 = vpack.c.bf16 %v13428_v18, %v13411_v62  ;;  %v11708_v41 = vcombine.high %v11138_v52, %v11138_v52  ;;  %v14068_v58 = vor.u32 %v14067_v4, %v14063_v57 }
 0x451   : > { %v12567_v21 = vadd.f32 %v23201_v38, %v12379_v42  ;;  %v12730_v63 = vmax.f32 %v12568_v11, 0.0  ;;  %v14072_v14 = vrot.slane %v14070_v3, 1  ;;  %v11715_v55 = vrot.slane %v11138_v52, %v22899_v46 }
 0x452   : > { %v12569_v28 = vadd.f32 %v23229_v36, %v12381_v12  ;;  %v11722_v27 = vrot.slane %v11708_v41, %v22899_v46  ;;  %v11141_v22 = vadd.f32 %v24180_v6, %v24084_v20  ;;  %v27309_v49 = vmax.f32 %v24455_v5, 0.0  ;;  %v27310_v5 = vld [vmem:[#allocation40_spill] sm:$0xff]  ;;  %v27311_v12 = vld [vmem:[#allocation39_spill] sm:$0xff] }
 0x453   : > { %v12729_v35 = vmax.f32 %v12567_v21, 0.0  ;;  %v24664_v61 = vsel %vm13965_vm13, %v14068_v58, %v14072_v14  ;;  %v24672_v57 = vsel %vm23929_vm11, %v24490_v48, 0  ;;  %v11723_v20 = vcombine.high %v11715_v55, %v11715_v55 }
 0x454   : > { %v12731_v62 = vmax.f32 %v12569_v28, 0.0  ;;  %v13353_v39 = vrot.slane %v27309_v49, %v22899_v46  ;;  %14432 = vmatprep.mubr.bf16.mxu1 %v24664_v61  ;;  %17909 = vmatprep.mubr.bf16.mxu0 %v24664_v61  ;;  %v11724_v6 = vcombine.high %v11722_v27, %v11722_v27  ;;  %v14075_v18 = vshrl.u32 %v24672_v57, 16  ;;  %v27314_v49 = vld [vmem:[#allocation44_spill] sm:$0xff] }
 0x455   : > { %v13436_v52 = vcombine.low %v12728_v13, %v12729_v35  ;;  %14433 = vmatmul.mubr.bf16.gmra.mxu1 %v24568_v45  ;;  %v12194_v25 = vadd.f32 %v11715_v55, %v27310_v5  ;;  %v12196_v11 = vadd.f32 %v11722_v27, %v27311_v12  ;;  %v11725_v4 = vcombine.high %v11141_v22, %v11141_v22 }
 0x456   : > { %v13437_v42 = vcombine.low %v12730_v63, %v12731_v62  ;;  %v27312_v21 = vcombine.high %v27310_v5, %v27310_v5  ;;  %v27313_v41 = vcombine.high %v27311_v12, %v27311_v12  ;;  %v11732_v58 = vrot.slane %v11141_v22, %v22899_v46  ;;  %v27316_v12 = vld [vmem:[#allocation42_spill] sm:$0xff] }
 0x457   : > { %v13444_v3 = vrot.slane %v13436_v52, %v22899_v46  ;;  %v12382_v63 = vmul.f32 %v23138_v15, %v12194_v25  ;;  %v12384_v14 = vmul.f32 %v23147_v0, %v12196_v11  ;;  %v11739_v35 = vrot.slane %v11725_v4, %v22899_v46 }
 0x458   : > { %v12195_v13 = vadd.f32 %v11723_v20, %v27312_v21  ;;  %v12197_v28 = vadd.f32 %v11724_v6, %v27313_v41  ;;  %v13451_v45 = vrot.slane %v13437_v42, %v22899_v46  ;;  %v11740_v62 = vcombine.high %v11732_v58, %v11732_v58 }
 0x459   : > { %v12198_v52 = vadd.f32 %v11732_v58, %v27314_v49  ;;  %v12570_v22 = vadd.f32 %v23150_v17, %v12382_v63  ;;  %v12572_v31 = vadd.f32 %v23171_v60, %v12384_v14  ;;  %v11741_v6 = vcombine.high %v11739_v35, %v11739_v35 }
 0x45a   : > { %v12383_v55 = vmul.f32 %v23185_v2, %v12195_v13  ;;  %v12385_v27 = vmul.f32 %v23197_v30, %v12197_v28  ;;  %v13452_v20 = vcombine.low %v13444_v3, %v13451_v45  ;;  %v27315_v9 = vcombine.high %v27314_v49, %v27314_v49 }
 0x45b   : > { %v12200_v11 = vadd.f32 %v11739_v35, %v27316_v12  ;;  %v12732_v4 = vmax.f32 %v12570_v22, 0.0  ;;  %v12734_v21 = vmax.f32 %v12572_v31, 0.0  ;;  %v27317_v3 = vcombine.high %v27316_v12, %v27316_v12 }
 0x45c   : > { %v12571_v42 = vadd.f32 %v23201_v38, %v12383_v55  ;;  %v12573_v5 = vadd.f32 %v23229_v36, %v12385_v27  ;;  %v12199_v25 = vadd.f32 %v11740_v62, %v27315_v9  ;;  %v12386_v41 = vmul.f32 %v23138_v15, %v12198_v52 }
 0x45d   : > { %v12201_v13 = vadd.f32 %v11741_v6, %v27317_v3  ;;  %v12388_v63 = vmul.f32 %v23185_v2, %v12200_v11  ;;  %v13755_v35 = vpack.c.bf16 %v13353_v39, %v13353_v39  ;;  %v14077_v27 = vshll.u32 %v24672_v57, 16 }
 0x45e   : > { %v12733_v28 = vmax.f32 %v12571_v42, 0.0  ;;  %v12735_v58 = vmax.f32 %v12573_v5, 0.0  ;;  %v12387_v45 = vmul.f32 %v23138_v15, %v12199_v25  ;;  %v24711_v55 = vadd.f32 %v23150_v17, %v12386_v41 }
 0x45f   : > { %v12389_v14 = vmul.f32 %v23147_v0, %v12201_v13  ;;  %v12576_v52 = vadd.f32 %v23201_v38, %v12388_v63  ;;  %v24722_v42 = vsel %vm23940_vm12, %v13755_v35, 0  ;;  %v14079_v5 = vrot.slane %v14077_v27, 1 }
 0x460   : > { %v13453_v62 = vcombine.low %v12732_v4, %v12733_v28  ;;  %v13454_v49 = vcombine.low %v12734_v21, %v12735_v58  ;;  %v12575_v22 = vadd.f32 %v23150_v17, %v12387_v45  ;;  %v12736_v6 = vmax.f32 %v24711_v55, 0.0  ;;  %v27318_v28 = vld [vmem:[#allocation143_spill] sm:$0xff] }
 0x461   : > { %v24717_v31 = vadd.f32 %v23171_v60, %v12389_v14  ;;  %v12738_v12 = vmax.f32 %v12576_v52, 0.0  ;;  %v14080_v11 = vor.u32 %v14079_v5, %v14075_v18  ;;  %v14082_v4 = vshll.u32 %v24722_v42, 16  ;;  %v27320_v52 = vld [vmem:[#allocation43_spill] sm:$0xff] }
 0x462   : > { %v13461_v39 = vrot.slane %v13453_v62, %v22899_v46  ;;  %v13468_v9 = vrot.slane %v13454_v49, %v22899_v46  ;;  %v12737_v25 = vmax.f32 %v12575_v22, 0.0  ;;  %v11146_v21 = vadd.f32 %v24202_v10, %v24105_v1 }
 0x463   : > { %v12739_v3 = vmax.f32 %v24717_v31, 0.0  ;;  %v11149_v58 = vadd.f32 %v24220_v32, %v27318_v28  ;;  %v27319_v45 = vmax.f32 %v24535_v26, 0.0  ;;  %v14084_v14 = vrot.slane %v14082_v4, 1 }
 0x464   : > { %v13469_v13 = vcombine.low %v13461_v39, %v13468_v9  ;;  %v24730_v41 = vcombine.low %v12737_v25, %v12738_v12  ;;  %v11742_v35 = vcombine.high %v11146_v21, %v11146_v21  ;;  %v11749_v18 = vrot.slane %v11146_v21, %v22899_v46  ;;  %v27321_v39 = vld [vmem:[#allocation46_spill] sm:$0xff]  ;;  %v27323_v21 = vld [vmem:[#allocation45_spill] sm:$0xff] }
 0x465   : > { %v13394_v63 = vrot.slane %v27319_v45, %v22899_v46  ;;  %v24741_v1 = vsel %vm23929_vm11, %v24586_v8, 0  ;;  %v11759_v62 = vcombine.high %v11149_v58, %v11149_v58  ;;  %v11766_v32 = vrot.slane %v11149_v58, %v22899_v46 }
 0x466   : > { %v24743_v10 = vpack.c.bf16 %v13469_v13, %v13452_v20  ;;  %v13485_v27 = vrot.slane %v24730_v41, %v22899_v46  ;;  %v24749_v26 = vsel %vm13965_vm13, %v14080_v11, %v14084_v14  ;;  %v11756_v49 = vrot.slane %v11742_v35, %v22899_v46  ;;  %v27325_v14 = vld [vmem:[#allocation47_spill] sm:$0xff] }
 0x467   : > { %v11757_v22 = vcombine.high %v11749_v18, %v11749_v18  ;;  %v12202_v31 = vadd.f32 %v11749_v18, %v27320_v52  ;;  %14440 = vmatprep.mubr.bf16.mxu1 %v24749_v26  ;;  %17910 = vmatmul.mubr.bf16.gmra.mxu0 %v24749_v26  ;;  %v11773_v20 = vrot.slane %v11759_v62, %v22899_v46  ;;  %v14087_v25 = vshrl.u32 %v24741_v1, 16 }
 0x468   : > { %v11774_v5 = vcombine.high %v11766_v32, %v11766_v32  ;;  %v12206_v9 = vadd.f32 %v11766_v32, %v27321_v39  ;;  %14441 = vmatmul.mubr.bf16.gmra.mxu1 %v24664_v61  ;;  %v11758_v12 = vcombine.high %v11756_v49, %v11756_v49  ;;  %v27322_v11 = vcombine.high %v27320_v52, %v27320_v52 }
 0x469   : > { %v12204_v13 = vadd.f32 %v11756_v49, %v27323_v21  ;;  %v12390_v41 = vmul.f32 %v23197_v30, %v12202_v31  ;;  %v11775_v28 = vcombine.high %v11773_v20, %v11773_v20  ;;  %v27324_v58 = vcombine.high %v27321_v39, %v27321_v39 }
 0x46a   : > { %v12203_v4 = vadd.f32 %v11757_v22, %v27322_v11  ;;  %v12208_v35 = vadd.f32 %v11773_v20, %v27325_v14  ;;  %v12394_v18 = vmul.f32 %v23197_v30, %v12206_v9  ;;  %v27326_v61 = vcombine.high %v27323_v21, %v27323_v21 }
 0x46b   : > { %v12207_v45 = vadd.f32 %v11774_v5, %v27324_v58  ;;  %v12392_v22 = vmul.f32 %v23185_v2, %v12204_v13  ;;  %v12578_v49 = vadd.f32 %v23229_v36, %v12390_v41  ;;  %v27327_v52 = vcombine.high %v27325_v14, %v27325_v14 }
 0x46c   : > { %v12205_v62 = vadd.f32 %v11758_v12, %v27326_v61  ;;  %v12391_v32 = vmul.f32 %v23138_v15, %v12203_v4  ;;  %v12396_v20 = vmul.f32 %v23138_v15, %v12208_v35  ;;  %v12582_v39 = vadd.f32 %v23229_v36, %v12394_v18 }
 0x46d   : > { %v12209_v31 = vadd.f32 %v11775_v28, %v27327_v52  ;;  %v12395_v5 = vmul.f32 %v23138_v15, %v12207_v45  ;;  %v12580_v11 = vadd.f32 %v23201_v38, %v12392_v22  ;;  %v12740_v4 = vmax.f32 %v12578_v49, 0.0 }
 0x46e   : > { %v12393_v9 = vmul.f32 %v23147_v0, %v12205_v62  ;;  %v12579_v12 = vadd.f32 %v23150_v17, %v12391_v32  ;;  %v12584_v41 = vadd.f32 %v23150_v17, %v12396_v20  ;;  %v12744_v28 = vmax.f32 %v12582_v39, 0.0  ;;  %v27328_v39 = vld [vmem:[#allocation92_spill] sm:$0xff] }
 0x46f   : > { %v12397_v21 = vmul.f32 %v23185_v2, %v12209_v31  ;;  %v24786_v13 = vadd.f32 %v23150_v17, %v12395_v5  ;;  %v12742_v14 = vmax.f32 %v12580_v11, 0.0  ;;  %v13478_v35 = vcombine.low %v12739_v3, %v12740_v4 }
 0x470   : > { %v12581_v58 = vadd.f32 %v23171_v60, %v12393_v9  ;;  %v12741_v45 = vmax.f32 %v12579_v12, 0.0  ;;  %v12746_v62 = vmax.f32 %v12584_v41, 0.0  ;;  %v13757_v32 = vpack.c.bf16 %v13394_v63, %v13394_v63 }
 0x471   : > { %v12585_v18 = vadd.f32 %v23201_v38, %v12397_v21  ;;  %v12745_v61 = vmax.f32 %v24786_v13, 0.0  ;;  %v13492_v22 = vrot.slane %v13478_v35, %v22899_v46  ;;  %v14089_v31 = vshll.u32 %v24741_v1, 16 }
 0x472   : > { %v13494_v49 = vcombine.low %v12741_v45, %v12742_v14  ;;  %v12743_v52 = vmax.f32 %v12581_v58, 0.0  ;;  %v24796_v20 = vsel %vm23940_vm12, %v13757_v32, 0  ;;  %v11154_v3 = vadd.f32 %v24248_v34, %v27328_v39  ;;  %v27329_v32 = vld [vmem:[#allocation49_spill] sm:$0xff] }
 0x473   : > { %v12747_v5 = vmax.f32 %v12585_v18, 0.0  ;;  %v11157_v9 = vadd.f32 %v24284_v56, %v24207_v43  ;;  %v13493_v12 = vcombine.low %v13485_v27, %v13492_v22  ;;  %v14091_v4 = vrot.slane %v14089_v31, 1 }
 0x474   : > { %v13502_v63 = vrot.slane %v13494_v49, %v22899_v46  ;;  %v13495_v11 = vcombine.low %v12743_v52, %v12744_v28  ;;  %v14094_v41 = vshll.u32 %v24796_v20, 16  ;;  %v11776_v58 = vcombine.high %v11154_v3, %v11154_v3 }
 0x475   : > { %v24803_v21 = vcombine.low %v12746_v62, %v12747_v5  ;;  %v11783_v45 = vrot.slane %v11154_v3, %v22899_v46  ;;  %v14092_v35 = vor.u32 %v14091_v4, %v14087_v25  ;;  %v11793_v18 = vcombine.high %v11157_v9, %v11157_v9  ;;  %v27331_v3 = vld [vmem:[#allocation48_spill] sm:$0xff] }
 0x476   : > { %v13509_v14 = vrot.slane %v13495_v11, %v22899_v46  ;;  %v11800_v34 = vrot.slane %v11157_v9, %v22899_v46  ;;  %v14096_v56 = vrot.slane %v14094_v41, 1  ;;  %v11790_v27 = vrot.slane %v11776_v58, %v22899_v46 }
 0x477   : > { %v13526_v43 = vrot.slane %v24803_v21, %v22899_v46  ;;  %v11791_v28 = vcombine.high %v11783_v45, %v11783_v45  ;;  %v12210_v22 = vadd.f32 %v11783_v45, %v27329_v32  ;;  %v11807_v49 = vrot.slane %v11793_v18, %v22899_v46 }
 0x478   : > { %v13510_v62 = vcombine.low %v13502_v63, %v13509_v14  ;;  %v11808_v52 = vcombine.high %v11800_v34, %v11800_v34  ;;  %v24815_v31 = vsel %vm13965_vm13, %v14092_v35, %v14096_v56  ;;  %v11792_v25 = vcombine.high %v11790_v27, %v11790_v27 }
 0x479   : > { %v27330_v5 = vcombine.high %v27329_v32, %v27329_v32  ;;  %v12212_v9 = vadd.f32 %v11790_v27, %v27331_v3  ;;  %14448 = vmatprep.mubr.bf16.mxu1 %v24815_v31  ;;  %17913 = vmatprep.mubr.bf16.mxu0 %v24815_v31  ;;  %v12398_v63 = vmul.f32 %v23147_v0, %v12210_v22  ;;  %v12727_v21 = vmax.f32 %v24618_v29, 0.0 }
 0x47a   : > { %v24821_v11 = vpack.c.bf16 %v13510_v62, %v13493_v12  ;;  %v11809_v4 = vcombine.high %v11807_v49, %v11807_v49  ;;  %v27332_v41 = vcombine.high %v27331_v3, %v27331_v3  ;;  %14449 = vmatmul.mubr.bf16.gmra.mxu1 %v24749_v26  ;;  %v27333_v12 = vld [vmem:[#allocation52_spill] sm:$0xff] }
 0x47b   : > { %v12211_v39 = vadd.f32 %v11791_v28, %v27330_v5  ;;  %v12400_v14 = vmul.f32 %v23138_v15, %v12212_v9  ;;  %v12214_v35 = vadd.f32 %v11800_v34, %v27333_v12  ;;  %v12586_v18 = vadd.f32 %v23171_v60, %v12398_v63  ;;  %v27335_v28 = vld [vmem:[#allocation50_spill] sm:$0xff] }
 0x47c   : > { %v12213_v58 = vadd.f32 %v11792_v25, %v27332_v41  ;;  %v27334_v56 = vcombine.high %v27333_v12, %v27333_v12  ;;  %v12216_v29 = vadd.f32 %v11807_v49, %v27335_v28  ;;  %v27336_v62 = vcombine.high %v27335_v28, %v27335_v28 }
 0x47d   : > { %v12399_v45 = vmul.f32 %v23197_v30, %v12211_v39  ;;  %v12588_v26 = vadd.f32 %v23150_v17, %v12400_v14  ;;  %v12402_v34 = vmul.f32 %v23147_v0, %v12214_v35  ;;  %v12748_v5 = vmax.f32 %v12586_v18, 0.0 }
 0x47e   : > { %v12215_v27 = vadd.f32 %v11808_v52, %v27334_v56  ;;  %v12217_v32 = vadd.f32 %v11809_v4, %v27336_v62  ;;  %v12401_v22 = vmul.f32 %v23185_v2, %v12213_v58  ;;  %v12404_v3 = vmul.f32 %v23138_v15, %v12216_v29 }
 0x47f   : > { %v12587_v25 = vadd.f32 %v23229_v36, %v12399_v45  ;;  %v12750_v63 = vmax.f32 %v12588_v26, 0.0  ;;  %v12590_v4 = vadd.f32 %v23171_v60, %v12402_v34  ;;  %v13435_v14 = vrot.slane %v12727_v21, %v22899_v46 }
 0x480   : > { %v12403_v39 = vmul.f32 %v23197_v30, %v12215_v27  ;;  %v12405_v52 = vmul.f32 %v23138_v15, %v12217_v32  ;;  %v12589_v49 = vadd.f32 %v23201_v38, %v12401_v22  ;;  %v24853_v58 = vadd.f32 %v23150_v17, %v12404_v3 }
 0x481   : > { %v12749_v9 = vmax.f32 %v12587_v25, 0.0  ;;  %v12752_v18 = vmax.f32 %v12590_v4, 0.0  ;;  %v24862_v56 = vsel %vm23929_vm11, %v24655_v7, 0  ;;  %v13759_v29 = vpack.c.bf16 %v13435_v14, %v13435_v14 }
 0x482   : > { %v12591_v41 = vadd.f32 %v23229_v36, %v12403_v39  ;;  %v24856_v45 = vadd.f32 %v23150_v17, %v12405_v52  ;;  %v12751_v12 = vmax.f32 %v12589_v49, 0.0  ;;  %v12754_v28 = vmax.f32 %v24853_v58, 0.0  ;;  %v27337_v39 = vld [vmem:[#allocation105_spill] sm:$0xff]  ;;  %v27363_v58 = vld [vmem:[#allocation64_spill] sm:$0xff] }
 0x483   : > { %v13519_v35 = vcombine.low %v12748_v5, %v12749_v9  ;;  %v14099_v62 = vshrl.u32 %v24862_v56, 16  ;;  %v14101_v25 = vshll.u32 %v24862_v56, 16  ;;  %v11162_v21 = vadd.f32 %v24309_v23, %v24275_v37 }
 0x484   : > { %v12753_v27 = vmax.f32 %v12591_v41, 0.0  ;;  %v13535_v22 = vcombine.low %v12750_v63, %v12751_v12  ;;  %v24872_v34 = vsel %vm23940_vm12, %v13759_v29, 0  ;;  %v12755_v5 = vmax.f32 %v24856_v45, 0.0  ;;  %v27338_v45 = vld [vmem:[#allocation104_spill] sm:$0xff]  ;;  %v27339_v29 = vld [vmem:[#allocation51_spill] sm:$0xff] }
 0x485   : > { %v13533_v32 = vrot.slane %v13519_v35, %v22899_v46  ;;  %v11165_v3 = vadd.f32 %v27337_v39, %v24290_v44  ;;  %v14103_v9 = vrot.slane %v14101_v25, 1  ;;  %v14106_v63 = vshll.u32 %v24872_v34, 16 }
 0x486   : > { %v13536_v26 = vcombine.low %v12752_v18, %v12753_v27  ;;  %v13543_v49 = vrot.slane %v13535_v22, %v22899_v46  ;;  %v11810_v41 = vcombine.high %v11162_v21, %v11162_v21  ;;  %v11817_v37 = vrot.slane %v11162_v21, %v22899_v46 }
 0x487   : > { %v13534_v52 = vcombine.low %v13526_v43, %v13533_v32  ;;  %v11827_v23 = vcombine.high %v11165_v3, %v11165_v3  ;;  %v14104_v14 = vor.u32 %v14103_v9, %v14099_v62  ;;  %v14108_v12 = vrot.slane %v14106_v63, 1  ;;  %v27342_v63 = vld [vmem:[#allocation56_spill] sm:$0xff] }
 0x488   : > { %v13550_v4 = vrot.slane %v13536_v26, %v22899_v46  ;;  %v11834_v35 = vrot.slane %v11165_v3, %v22899_v46  ;;  %v11170_v18 = vadd.f32 %v24371_v50, %v27338_v45  ;;  %v11824_v43 = vrot.slane %v11810_v41, %v22899_v46  ;;  %v27340_v26 = vld [vmem:[#allocation55_spill] sm:$0xff]  ;;  %v27345_v45 = vld [vmem:[#allocation58_spill] sm:$0xff] }
 0x489   : > { %v11825_v27 = vcombine.high %v11817_v37, %v11817_v37  ;;  %v12218_v32 = vadd.f32 %v11817_v37, %v27339_v29  ;;  %v24887_v22 = vsel %vm13965_vm13, %v14104_v14, %v14108_v12  ;;  %v11841_v25 = vrot.slane %v11827_v23, %v22899_v46 }
 0x48a   : > { %v13551_v44 = vcombine.low %v13543_v49, %v13550_v4  ;;  %v11842_v21 = vcombine.high %v11834_v35, %v11834_v35  ;;  %v12222_v62 = vadd.f32 %v11834_v35, %v27340_v26  ;;  %14456 = vmatprep.mubr.bf16.mxu1 %v24887_v22  ;;  %17914 = vmatmul.mubr.bf16.gmra.mxu0 %v24887_v22  ;;  %v24901_v9 = vsel %vm23929_vm11, %v24743_v10, 0 }
 0x48b   : > { %v11826_v50 = vcombine.high %v11824_v43, %v11824_v43  ;;  %v27341_v3 = vcombine.high %v27339_v29, %v27339_v29  ;;  %v12220_v4 = vadd.f32 %v11824_v43, %v27342_v63  ;;  %v12406_v41 = vmul.f32 %v23185_v2, %v12218_v32  ;;  %14457 = vmatmul.mubr.bf16.gmra.mxu1 %v24815_v31 }
 0x48c   : > { %v24891_v39 = vpack.c.bf16 %v13551_v44, %v13534_v52  ;;  %v11843_v52 = vcombine.high %v11841_v25, %v11841_v25  ;;  %v27343_v37 = vcombine.high %v27340_v26, %v27340_v26  ;;  %v27344_v14 = vcombine.high %v27342_v63, %v27342_v63 }
 0x48d   : > { %v12219_v49 = vadd.f32 %v11825_v27, %v27341_v3  ;;  %v12224_v44 = vadd.f32 %v11841_v25, %v27345_v45  ;;  %v12410_v27 = vmul.f32 %v23185_v2, %v12222_v62  ;;  %v12408_v43 = vmul.f32 %v23197_v30, %v12220_v4 }
 0x48e   : > { %v12223_v23 = vadd.f32 %v11842_v21, %v27343_v37  ;;  %v12221_v12 = vadd.f32 %v11826_v50, %v27344_v14  ;;  %v12594_v29 = vadd.f32 %v23201_v38, %v12406_v41  ;;  %v27346_v31 = vcombine.high %v27345_v45, %v27345_v45 }
 0x48f   : > { %v12407_v35 = vmul.f32 %v23147_v0, %v12219_v49  ;;  %v12412_v3 = vmul.f32 %v23197_v30, %v12224_v44  ;;  %v12598_v25 = vadd.f32 %v23201_v38, %v12410_v27  ;;  %v12596_v62 = vadd.f32 %v23229_v36, %v12408_v43 }
 0x490   : > { %v12225_v32 = vadd.f32 %v11843_v52, %v27346_v31  ;;  %v12411_v21 = vmul.f32 %v23147_v0, %v12223_v23  ;;  %v12409_v26 = vmul.f32 %v23138_v15, %v12221_v12  ;;  %v12756_v49 = vmax.f32 %v12594_v29, 0.0 }
 0x491   : > { %v12595_v50 = vadd.f32 %v23171_v60, %v12407_v35  ;;  %v12600_v37 = vadd.f32 %v23229_v36, %v12412_v3  ;;  %v12760_v23 = vmax.f32 %v12598_v25, 0.0  ;;  %v12758_v14 = vmax.f32 %v12596_v62, 0.0 }
 0x492   : > { %v12413_v63 = vmul.f32 %v23138_v15, %v12225_v32  ;;  %v12599_v4 = vadd.f32 %v23171_v60, %v12411_v21  ;;  %v12597_v41 = vadd.f32 %v23150_v17, %v12409_v26  ;;  %v13559_v12 = vcombine.low %v12755_v5, %v12756_v49  ;;  %v27347_v49 = vld [vmem:[#allocation57_spill] sm:$0xff] }
 0x493   : > { %v12757_v52 = vmax.f32 %v12595_v50, 0.0  ;;  %v12762_v27 = vmax.f32 %v12600_v37, 0.0  ;;  %v11844_v43 = vcombine.high %v11170_v18, %v11170_v18  ;;  %v11851_v29 = vrot.slane %v11170_v18, %v22899_v46 }
 0x494   : > { %v24931_v35 = vadd.f32 %v23150_v17, %v12413_v63  ;;  %v12761_v45 = vmax.f32 %v12599_v4, 0.0  ;;  %v12759_v44 = vmax.f32 %v12597_v41, 0.0  ;;  %v13567_v32 = vrot.slane %v13559_v12, %v22899_v46 }
 0x495   : > { %v13560_v31 = vcombine.low %v12757_v52, %v12758_v14  ;;  %v13476_v21 = vrot.slane %v12736_v6, %v22899_v46  ;;  %v14111_v26 = vshrl.u32 %v24901_v9, 16  ;;  %v11858_v3 = vrot.slane %v11844_v43, %v22899_v46  ;;  %v27349_v14 = vld [vmem:[#allocation62_spill] sm:$0xff] }
 0x496   : > { %v13576_v50 = vcombine.low %v12759_v44, %v12760_v23  ;;  %v13577_v5 = vcombine.low %v12761_v45, %v12762_v27  ;;  %v11859_v25 = vcombine.high %v11851_v29, %v11851_v29  ;;  %v12226_v63 = vadd.f32 %v11851_v29, %v27347_v49 }
 0x497   : > { %v13574_v62 = vrot.slane %v13560_v31, %v22899_v46  ;;  %v13761_v4 = vpack.c.bf16 %v13476_v21, %v13476_v21  ;;  %v14113_v18 = vshll.u32 %v24901_v9, 16  ;;  %v11860_v55 = vcombine.high %v11858_v3, %v11858_v3 }
 0x498   : > { %v13584_v41 = vrot.slane %v13576_v50, %v22899_v46  ;;  %v13591_v52 = vrot.slane %v13577_v5, %v22899_v46  ;;  %v27348_v6 = vcombine.high %v27347_v49, %v27347_v49  ;;  %v12228_v12 = vadd.f32 %v11858_v3, %v27349_v14  ;;  %v27351_v3 = vld [vmem:[#allocation106_spill] sm:$0xff] }
 0x499   : > { %v13575_v23 = vcombine.low %v13567_v32, %v13574_v62  ;;  %v12414_v45 = vmul.f32 %v23138_v15, %v12226_v63  ;;  %v24952_v44 = vsel %vm23940_vm12, %v13761_v4, 0  ;;  %v27350_v43 = vcombine.high %v27349_v14, %v27349_v14 }
 0x49a   : > { %v12227_v37 = vadd.f32 %v11859_v25, %v27348_v6  ;;  %v13592_v27 = vcombine.low %v13584_v41, %v13591_v52  ;;  %v14115_v21 = vrot.slane %v14113_v18, 1  ;;  %v12416_v50 = vmul.f32 %v23147_v0, %v12228_v12  ;;  %v27352_v12 = vld [vmem:[#allocation200_spill] sm:$0xff] }
 0x49b   : > { %v12229_v29 = vadd.f32 %v11860_v55, %v27350_v43  ;;  %v12602_v32 = vadd.f32 %v23150_v17, %v12414_v45  ;;  %v14118_v5 = vshll.u32 %v24952_v44, 16  ;;  %v11173_v25 = vadd.f32 %v24436_v47, %v27351_v3 }
 0x49c   : > { %v12415_v31 = vmul.f32 %v23185_v2, %v12227_v37  ;;  %v24963_v62 = vpack.c.bf16 %v13592_v27, %v13575_v23  ;;  %v14116_v4 = vor.u32 %v14115_v21, %v14111_v26  ;;  %v12604_v41 = vadd.f32 %v23171_v60, %v12416_v50  ;;  %v27353_v21 = vld [vmem:[#allocation61_spill] sm:$0xff] }
 0x49d   : > { %v12417_v49 = vmul.f32 %v23197_v30, %v12229_v29  ;;  %v12764_v52 = vmax.f32 %v12602_v32, 0.0  ;;  %v14120_v18 = vrot.slane %v14118_v5, 1  ;;  %v11861_v55 = vcombine.high %v11173_v25, %v11173_v25  ;;  %v27354_v32 = vld [vmem:[#allocation63_spill] sm:$0xff] }
 0x49e   : > { %v12603_v63 = vadd.f32 %v23201_v38, %v12415_v31  ;;  %v11868_v14 = vrot.slane %v11173_v25, %v22899_v46  ;;  %v11178_v47 = vadd.f32 %v24468_v33, %v27352_v12  ;;  %v12766_v23 = vmax.f32 %v12604_v41, 0.0 }
 0x49f   : > { %v12605_v6 = vadd.f32 %v23229_v36, %v12417_v49  ;;  %v24973_v45 = vsel %vm13965_vm13, %v14116_v4, %v14120_v18  ;;  %v11875_v27 = vrot.slane %v11861_v55, %v22899_v46  ;;  %v13517_v26 = vrot.slane %v12745_v61, %v22899_v46 }
 0x4a0   : > { %v12765_v37 = vmax.f32 %v12603_v63, 0.0  ;;  %14464 = vmatprep.mubr.bf16.mxu1 %v24973_v45  ;;  %17917 = vmatprep.mubr.bf16.mxu0 %v24973_v45  ;;  %v11876_v31 = vcombine.high %v11868_v14, %v11868_v14  ;;  %v12230_v50 = vadd.f32 %v11868_v14, %v27353_v21  ;;  %v11878_v3 = vcombine.high %v11178_v47, %v11178_v47 }
 0x4a1   : > { %v12767_v43 = vmax.f32 %v12605_v6, 0.0  ;;  %14465 = vmatmul.mubr.bf16.gmra.mxu1 %v24887_v22  ;;  %v11877_v33 = vcombine.high %v11875_v27, %v11875_v27  ;;  %v12232_v5 = vadd.f32 %v11875_v27, %v27354_v32  ;;  %v11885_v25 = vrot.slane %v11178_v47, %v22899_v46  ;;  %v24995_v6 = vpop.f32.mrf.mxu1  ;;  %v27357_v47 = vld [vmem:[#allocation65_spill] sm:$0xff] }
 0x4a2   : > { %v13600_v29 = vcombine.low %v12764_v52, %v12765_v37  ;;  %v27355_v61 = vcombine.high %v27353_v21, %v27353_v21  ;;  %v12418_v4 = vmul.f32 %v23138_v15, %v12230_v50  ;;  %v27356_v41 = vcombine.high %v27354_v32, %v27354_v32 }
 0x4a3   : > { %v13601_v49 = vcombine.low %v12766_v23, %v12767_v43  ;;  %v12420_v22 = vmul.f32 %v23147_v0, %v12232_v5  ;;  %v11892_v18 = vrot.slane %v11878_v3, %v22899_v46  ;;  %v11893_v55 = vcombine.high %v11885_v25, %v11885_v25  ;;  %v27359_v5 = vld [vmem:[#allocation66_spill] sm:$0xff] }
 0x4a4   : > { %v13608_v13 = vrot.slane %v13600_v29, %v22899_v46  ;;  %v12231_v63 = vadd.f32 %v11876_v31, %v27355_v61  ;;  %v12233_v52 = vadd.f32 %v11877_v33, %v27356_v41  ;;  %v12606_v12 = vadd.f32 %v23150_v17, %v12418_v4  ;;  %v25015_v41 = vpop.f32.mrf.mxu1 }
 0x4a5   : > { %v13615_v37 = vrot.slane %v13601_v49, %v22899_v46  ;;  %v12234_v23 = vadd.f32 %v11885_v25, %v27357_v47  ;;  %v12608_v43 = vadd.f32 %v23171_v60, %v12420_v22  ;;  %v11894_v29 = vcombine.high %v11892_v18, %v11892_v18 }
 0x4a6   : > { %v12419_v14 = vmul.f32 %v23185_v2, %v12231_v63  ;;  %v12421_v27 = vmul.f32 %v23197_v30, %v12233_v52  ;;  %v27358_v31 = vcombine.high %v27357_v47, %v27357_v47  ;;  %v12768_v32 = vmax.f32 %v12606_v12, 0.0 }
 0x4a7   : > { %v25006_v50 = vcombine.low %v13608_v13, %v13615_v37  ;;  %v12236_v3 = vadd.f32 %v11892_v18, %v27359_v5  ;;  %v12770_v61 = vmax.f32 %v12608_v43, 0.0  ;;  %v27360_v25 = vcombine.high %v27359_v5, %v27359_v5 }
 0x4a8   : > { %v12235_v21 = vadd.f32 %v11893_v55, %v27358_v31  ;;  %v12607_v33 = vadd.f32 %v23201_v38, %v12419_v14  ;;  %v12609_v49 = vadd.f32 %v23229_v36, %v12421_v27  ;;  %v12422_v4 = vmul.f32 %v23138_v15, %v12234_v23 }
 0x4a9   : > { %v12237_v63 = vadd.f32 %v11894_v29, %v27360_v25  ;;  %v12424_v22 = vmul.f32 %v23185_v2, %v12236_v3  ;;  %v13763_v55 = vpack.c.bf16 %v13517_v26, %v13517_v26  ;;  %v25026_v12 = vsel %vm23929_vm11, %v24821_v11, 0 }
 0x4aa   : > { %v12769_v52 = vmax.f32 %v12607_v33, 0.0  ;;  %v12423_v13 = vmul.f32 %v23138_v15, %v12235_v21  ;;  %v12771_v37 = vmax.f32 %v12609_v49, 0.0  ;;  %v25021_v14 = vadd.f32 %v23150_v17, %v12422_v4  ;;  %v25039_v33 = vpop.f32.mrf.mxu1 }
 0x4ab   : > { %v12425_v18 = vmul.f32 %v23147_v0, %v12237_v63  ;;  %v12612_v27 = vadd.f32 %v23201_v38, %v12424_v22  ;;  %v25032_v43 = vsel %vm23940_vm12, %v13763_v55, 0  ;;  %v14123_v21 = vshrl.u32 %v25026_v12, 16  ;;  %27361 = vst [vmem:[#allocation202_spill] sm:$0xff] %v25039_v33 }
 0x4ac   : > { %v13617_v47 = vcombine.low %v12768_v32, %v12769_v52  ;;  %v12611_v23 = vadd.f32 %v23150_v17, %v12423_v13  ;;  %v13618_v26 = vcombine.low %v12770_v61, %v12771_v37  ;;  %v14125_v49 = vshll.u32 %v25026_v12, 16 }
 0x4ad   : > { %v25035_v29 = vadd.f32 %v23171_v60, %v12425_v18  ;;  %v12774_v3 = vmax.f32 %v12612_v27, 0.0  ;;  %v14130_v63 = vshll.u32 %v25032_v43, 16  ;;  %v11181_v61 = vadd.f32 %v24503_v53, %v24461_v19  ;;  %v25058_v27 = vpop.f32.mrf.mxu1 }
 0x4ae   : > { %v13625_v32 = vrot.slane %v13617_v47, %v22899_v46  ;;  %v12773_v5 = vmax.f32 %v12611_v23, 0.0  ;;  %v13632_v25 = vrot.slane %v13618_v26, %v22899_v46  ;;  %v14127_v13 = vrot.slane %v14125_v49, 1  ;;  %27362 = vst [vmem:[#allocation176_spill] sm:$0xff] %v25058_v27 }
 0x4af   : > { %v12775_v4 = vmax.f32 %v25035_v29, 0.0  ;;  %v11186_v22 = vadd.f32 %v24545_v16, %v24501_v40  ;;  %v13558_v55 = vrot.slane %v12754_v28, %v22899_v46  ;;  %v14132_v18 = vrot.slane %v14130_v63, 1 }
 0x4b0   : > { %v25048_v52 = vcombine.low %v12773_v5, %v12774_v3  ;;  %v25055_v37 = vcombine.low %v13625_v32, %v13632_v25  ;;  %v11895_v47 = vcombine.high %v11181_v61, %v11181_v61  ;;  %v11902_v23 = vrot.slane %v11181_v61, %v22899_v46  ;;  %v25070_v5 = vpop.f32.mrf.mxu1  ;;  %v27364_v25 = vld [vmem:[#allocation67_spill] sm:$0xff] }
 0x4b1   : > { %v14128_v53 = vor.u32 %v14127_v13, %v14123_v21  ;;  %v11918_v26 = vrot.slane %v11186_v22, %v22899_v46  ;;  %v13765_v29 = vpack.c.bf16 %v13558_v55, %v13558_v55  ;;  %v25068_v32 = vsel %vm23929_vm11, %v24891_v39, 0  ;;  %v27366_v55 = vld [vmem:[#allocation68_spill] sm:$0xff] }
 0x4b2   : > { %v11909_v40 = vrot.slane %v11895_v47, %v22899_v46  ;;  %v11910_v16 = vcombine.high %v11902_v23, %v11902_v23  ;;  %v12238_v28 = vadd.f32 %v11902_v23, %v27363_v58  ;;  %v27365_v13 = vcombine.high %v27363_v58, %v27363_v58  ;;  %v25096_v31 = vpop.f32.mrf.mxu1 }
 0x4b3   : > { %v14133_v3 = vsel %vm13965_vm13, %v14128_v53, %v14132_v18  ;;  %v11919_v49 = vcombine.high %v11918_v26, %v11918_v26  ;;  %v12242_v21 = vadd.f32 %v11918_v26, %v27364_v25  ;;  %v25076_v63 = vsel %vm23940_vm12, %v13765_v29, 0 }
 0x4b4   : > { %14472 = vmatprep.mubr.bf16.mxu1 %v14133_v3  ;;  %17918 = vmatmul.mubr.bf16.gmra.mxu0 %v14133_v3  ;;  %v11911_v61 = vcombine.high %v11909_v40, %v11909_v40  ;;  %v12239_v22 = vadd.f32 %v11910_v16, %v27365_v13  ;;  %v12240_v47 = vadd.f32 %v11909_v40, %v27366_v55  ;;  %v14135_v23 = vshrl.u32 %v25068_v32, 16 }
 0x4b5   : > { %14473 = vmatmul.mubr.bf16.gmra.mxu1 %v24973_v45  ;;  %v12426_v18 = vmul.f32 %v23197_v30, %v12238_v28  ;;  %v27367_v53 = vcombine.high %v27364_v25, %v27364_v25  ;;  %v12430_v29 = vmul.f32 %v23197_v30, %v12242_v21  ;;  %v14137_v19 = vshll.u32 %v25068_v32, 16 }
 0x4b6   : > { %v27368_v58 = vcombine.high %v27366_v55, %v27366_v55  ;;  %v12427_v40 = vmul.f32 %v23138_v15, %v12239_v22  ;;  %v12428_v13 = vmul.f32 %v23185_v2, %v12240_v47  ;;  %v14142_v45 = vshll.u32 %v25076_v63, 16 }
 0x4b7   : > { %v12243_v26 = vadd.f32 %v11919_v49, %v27367_v53  ;;  %v12614_v28 = vadd.f32 %v23229_v36, %v12426_v18  ;;  %v12618_v30 = vadd.f32 %v23229_v36, %v12430_v29  ;;  %v14139_v25 = vrot.slane %v14137_v19, 1  ;;  %v17198_v36 = vpop.f32.mrf.mxu1 }
 0x4b8   : > { %v12241_v16 = vadd.f32 %v11911_v61, %v27368_v58  ;;  %v12615_v55 = vadd.f32 %v23150_v17, %v12427_v40  ;;  %v12616_v61 = vadd.f32 %v23201_v38, %v12428_v13  ;;  %v14144_v22 = vrot.slane %v14142_v45, 1 }
 0x4b9   : > { %v12431_v49 = vmul.f32 %v23138_v15, %v12243_v26  ;;  %v12776_v53 = vmax.f32 %v12614_v28, 0.0  ;;  %v12780_v47 = vmax.f32 %v12618_v30, 0.0  ;;  %v14140_v58 = vor.u32 %v14139_v25, %v14135_v23  ;;  %v17899_v30 = vpop.f32.mrf.mxu0 }
 0x4ba   : > { %v12429_v21 = vmul.f32 %v23147_v0, %v12241_v16  ;;  %v12777_v18 = vmax.f32 %v12615_v55, 0.0  ;;  %v12778_v33 = vmax.f32 %v12616_v61, 0.0  ;;  %v12763_v15 = vmax.f32 %v24931_v35, 0.0 }
 0x4bb   : > { %v12619_v2 = vadd.f32 %v23150_v17, %v12431_v49  ;;  %v13642_v19 = vcombine.low %v12775_v4, %v12776_v53  ;;  %v14145_v0 = vsel %vm13965_vm13, %v14140_v58, %v14144_v22  ;;  %v25111_v38 = vsel %vm23929_vm11, %v24963_v62, 0  ;;  %v17199_v49 = vpop.f32.mrf.mxu1 }
 0x4bc   : > { %v12617_v27 = vadd.f32 %v23171_v60, %v12429_v21  ;;  %v13658_v29 = vcombine.low %v12777_v18, %v12778_v33  ;;  %14480 = vmatprep.mubr.bf16.mxu1 %v14145_v0  ;;  %17921 = vmatprep.mubr.bf16.mxu0 %v14145_v0  ;;  %v13599_v60 = vrot.slane %v12763_v15, %v22899_v46  ;;  %v14147_v23 = vshrl.u32 %v25111_v38, 16 }
 0x4bd   : > { %v12781_v26 = vmax.f32 %v12619_v2, 0.0  ;;  %v13656_v35 = vrot.slane %v13642_v19, %v22899_v46  ;;  %14481 = vmatmul.mubr.bf16.gmra.mxu1 %v14133_v3  ;;  %v14149_v4 = vshll.u32 %v25111_v38, 16  ;;  %v27369_v16 = vmax.f32 %v25021_v14, 0.0  ;;  %v17201_v19 = vpop.f32.mrf.mxu1 }
 0x4be   : > { %v12779_v17 = vmax.f32 %v12617_v27, 0.0  ;;  %v25122_v13 = vpack.c.bf16 %v25055_v37, %v25006_v50  ;;  %v13666_v33 = vrot.slane %v13658_v29, %v22899_v46  ;;  %v13767_v45 = vpack.c.bf16 %v13599_v60, %v13599_v60 }
 0x4bf   : > { %v13640_v40 = vrot.slane %v27369_v16, %v22899_v46  ;;  %v13681_v28 = vrot.slane %v12781_v26, %v22899_v46  ;;  %v27370_v3 = vrot.slane %v25048_v52, %v22899_v46  ;;  %v14151_v21 = vrot.slane %v14149_v4, 1  ;;  %v14539_v26 = vpop.f32.mrf.mxu0 }
 0x4c0   : > { %v13659_v27 = vcombine.low %v12779_v17, %v12780_v47  ;;  %v25132_v14 = vsel %vm23929_vm11, %v25122_v13, 0  ;;  %v25137_v37 = vsel %vm23940_vm12, %v13767_v45, 0  ;;  %v17191_v15 = vadd.f32 %v25015_v41, %v24995_v6 }
 0x4c1   : > { %v13657_v25 = vcombine.low %v27370_v3, %v13656_v35  ;;  %v13769_v55 = vpack.c.bf16 %v13640_v40, %v13640_v40  ;;  %v14159_v61 = vshrl.u32 %v25132_v14, 16  ;;  %v14161_v22 = vshll.u32 %v25132_v14, 16  ;;  %v17202_v40 = vpop.f32.mrf.mxu1 }
 0x4c2   : > { %v13673_v50 = vrot.slane %v13659_v27, %v22899_v46  ;;  %v14152_v53 = vor.u32 %v14151_v21, %v14147_v23  ;;  %v14154_v52 = vshll.u32 %v25137_v37, 16  ;;  %v13771_v47 = vpack.c.bf16 %v13681_v28, %v13681_v28 }
 0x4c3   : > { %v25144_v2 = vsel %vm23940_vm12, %v13769_v55, 0  ;;  %v14163_v18 = vrot.slane %v14161_v22, 1  ;;  %v17197_v16 = vadd.f32 %v25096_v31, %v25070_v5  ;;  %v17200_v28 = vadd.f32 %v17199_v49, %v17198_v36  ;;  %v25176_v22 = vpop.f32.mrf.mxu1  ;;  %v27372_v36 = vld [vmem:[#allocation163_spill] sm:$0xff]  ;;  %v27373_v49 = vld [vmem:[#allocation74_spill] sm:$0xff] }
 0x4c4   : > { %v13674_v58 = vcombine.low %v13666_v33, %v13673_v50  ;;  %v14166_v46 = vshll.u32 %v25144_v2, 16  ;;  %v14156_v29 = vrot.slane %v14154_v52, 1  ;;  %v25153_v54 = vsel %vm23682_vm10, %v13771_v47, 0  ;;  %v17900_v33 = vpop.f32.mrf.mxu0 }
 0x4c5   : > { %v14164_v17 = vor.u32 %v14163_v18, %v14159_v61  ;;  %v14178_v45 = vshll.u32 %v25153_v54, 16  ;;  %v25167_v5 = vadd.f32 %v17899_v30, %v17197_v16  ;;  %v25171_v21 = vadd.f32 %v17202_v40, %v17201_v19  ;;  %v25184_v30 = vpop.f32.mrf.mxu1  ;;  %v18334_v16 = vld [vmem:[#allocation8 + $0x1b0] sm:$0xff]   ;;  %v18335_v40 = vld [vmem:[#allocation8 + $0x1e8] sm:$0xff]  }
 0x4c6   : > { %v14168_v60 = vrot.slane %v14166_v46, 1  ;;  %v25149_v23 = vpack.c.bf16 %v13674_v58, %v13657_v25  ;;  %v14157_v4 = vsel %vm13965_vm13, %v14152_v53, %v14156_v29  ;;  %v25169_v25 = vadd.f32 %v17191_v15, %v14539_v26  ;;  %v18331_v26 = vld [vmem:[#allocation8 + $0x1b8] sm:$0xff]  }
 0x4c7   : > { %14488 = vmatprep.mubr.bf16.mxu1 %v14157_v4  ;;  %17922 = vmatmul.mubr.bf16.gmra.mxu0 %v14157_v4  ;;  %v25173_v55 = vadd.f32 %v17900_v33, %v17200_v28  ;;  %v15254_v53 = vrot.slane %v24901_v9, 1  ;;  %v15255_v52 = vrot.slane %v24952_v44, 1  ;;  %v15257_v47 = vrot.slane %v25026_v12, 1  ;;  %v18333_v12 = vld [vmem:[#allocation8 + $0x1f0] sm:$0xff]   ;;  %v18342_v33 = vld [vmem:[#allocation8 + $0x228] sm:$0xff]  }
 0x4c8   : > { %v14169_v6 = vsel %vm13965_vm13, %v14164_v17, %v14168_v60  ;;  %v25162_v41 = vsel %vm23682_vm10, %v25149_v23, 0  ;;  %14489 = vmatmul.mubr.bf16.gmra.mxu1 %v14145_v0  ;;  %v14180_v0 = vrot.slane %v14178_v45, 1  ;;  %v15258_v58 = vrot.slane %v25032_v43, 1  ;;  %v17207_v18 = vpop.f32.mrf.mxu1  ;;  %v27374_v60 = vld [vmem:[#allocation69_spill] sm:$0xff] }
 0x4c9   : > { %17925 = vmatprep.mubr.bf16.mxu0 %v14169_v6  ;;  %v14173_v27 = vshll.u32 %v25162_v41, 16  ;;  %14496 = vmatprep.mubr.bf16.mxu1 %v14169_v6  ;;  %v14171_v31 = vshrl.u32 %v25162_v41, 16  ;;  %v15260_v46 = vrot.slane %v25068_v32, 1  ;;  %v15261_v15 = vrot.slane %v25076_v63, 1  ;;  %v18337_v32 = vld [vmem:[#allocation8 + $0x230] sm:$0xff]   ;;  %v18354_v6 = vld [vmem:[#allocation8 + $0x238] sm:$0xff]  }
 0x4ca   : > { %v15263_v19 = vrot.slane %v25111_v38, 1  ;;  %v25194_v29 = vsel %vm15217_vm14, %v15254_v53, %v15255_v52  ;;  %v25197_v9 = vsel %vm15217_vm14, %v15257_v47, %v15258_v58  ;;  %v15264_v44 = vrot.slane %v25137_v37, 1  ;;  %v17208_v17 = vpop.f32.mrf.mxu1  ;;  %v27376_v37 = vld [vmem:[#allocation88_spill] sm:$0xff]  ;;  %v25235_v52 = vpop.f32.mrf.mxu0 }
 0x4cb   : > { %v14175_v3 = vrot.slane %v14173_v27, 1  ;;  %v25201_v43 = vsel %vm15217_vm14, %v15260_v46, %v15261_v15  ;;  %v17209_v63 = vadd.f32 %v17208_v17, %v17207_v18  ;;  %v18336_v27 = vld [vmem:[#allocation8 + $0x1a8] sm:$0xff]   ;;  %v15266_v28 = vrot.slane %v25132_v14, 1  ;;  %v18340_v53 = vld [vmem:[#allocation8 + $0x1d8] sm:$0xff]  }
 0x4cc   : > { %v25207_v38 = vsel %vm15217_vm14, %v15263_v19, %v15264_v44  ;;  %v17210_v45 = vpop.f32.mrf.mxu1  ;;  %v27378_v14 = vld [vmem:[#allocation146_spill] sm:$0xff]  ;;  %v18350_v47 = vld [vmem:[#allocation8 + $0x218] sm:$0xff]   ;;  %v15269_v19 = vrot.slane %v25162_v41, 1  ;;  %v18343_v44 = vld [vmem:[#allocation8 + $0x1d0] sm:$0xff]  }
 0x4cd   : > { %v14176_v50 = vor.u32 %v14175_v3, %v14171_v31  ;;  %v15267_v31 = vrot.slane %v25144_v2, 1  ;;  %v18338_v3 = vld [vmem:[#allocation8 + $0x1e0] sm:$0xff]   ;;  %v18341_v18 = vld [vmem:[#allocation8 + $0x198] sm:$0xff]  }
 0x4ce   : > { %v18339_v2 = vld [vmem:[#allocation8 + $0x1a0] sm:$0xff]  }
 0x4cf   : > { %v14181_v61 = vsel %vm13965_vm13, %v14176_v50, %v14180_v0  ;;  %v18347_v50 = vld [vmem:[#allocation8 + $0x220] sm:$0xff]   ;;  %v25224_v0 = vsel %vm15217_vm14, %v15266_v28, %v15267_v31 }
 0x4d0   : > { %17926 = vmatmul.mubr.bf16.gmra.mxu0 %v14181_v61  ;;  %14497 = vmatmul.mubr.bf16.gmra.mxu1 %v14157_v4  ;;  %v27375_v4 = vld [vmem:[#allocation130_spill] sm:$0xff]  ;;  %v27377_v61 = vld [vmem:[#allocation173_spill] sm:$0xff] }
 0x4d1   : > { %16769 = vmatprep.mubr.msk.bf16.mxu0 %vm23929_vm11, %v27372_v36  ;;  %17945 = vmatprep.mubr.msk.bf16.mxu1 %vm23929_vm11, %v27373_v49  ;;  %v27379_v41 = vld [vmem:[#allocation149_spill] sm:$0xff] }
 0x4d2   : > { %v18348_v28 = vld [vmem:[#allocation8 + $0x1c0] sm:$0xff]  }
 0x4d3   : > { %v18353_v31 = vld [vmem:[#allocation8 + $0x200] sm:$0xff]  }
 0x4d8   : > { %16770 = vmatmul.mubr.msk.bf16.vlgmr.msra.gmra.mxu0 %vm23682_vm10, %v27374_v60  ;;  %17946 = vmatmul.mubr.msk.bf16.vlgmr.msra.gmra.mxu1 %vm23929_vm11, %v27375_v4  ;;  %v17903_v58 = vpop.f32.mrf.mxu0 }
 0x4d9   : > { %16771 = vmatprep.mubr.msk.bf16.mxu0 %vm23929_vm11, %v27373_v49  ;;  %17949 = vmatprep.mubr.msk.bf16.mxu1 %vm23929_vm11, %v27376_v37  ;;  %v25237_v46 = vadd.f32 %v17903_v58, %v17209_v63  ;;  %v18351_v63 = vld [vmem:[#allocation8 + $0x210] sm:$0xff]  }
 0x4da   : > { %17446 = vmatpush3.bf16.msra.mxu1 %v18331_v26  ;;  %17978 = vmatpush3.bf16.msra.mxu0 %v18354_v6  ;;  %v15270_v26 = vrot.slane %v25153_v54, 1  ;;  %v27380_v6 = vld [vmem:[#allocation180_spill] sm:$0xff] }
 0x4db   : > { %17447 = vmatprep.subr.bf16.mxu1 %v18333_v12  ;;  %17979 = vmatprep.subr.bf16.mxu0 %v18337_v32  ;;  %v14555_v12 = vpop.f32.mrf.mxu0 }
 0x4dc   : > { %v25245_v60 = vadd.f32 %v25171_v21, %v14555_v12  ;;  %v18344_v21 = vld [vmem:[#allocation8 + $0x190] sm:$0xff]  }
 0x4de   : > { %17448 = vmatpush3.bf16.msra.mxu1 %v18334_v16  ;;  %17980 = vmatpush3.bf16.msra.mxu0 %v18337_v32  ;;  %v25248_v16 = vsel %vm15217_vm14, %v15269_v19, %v15270_v26 }
 0x4df   : > { %17449 = vmatprep.subr.bf16.mxu1 %v18335_v40  ;;  %17981 = vmatprep.subr.bf16.mxu0 %v18342_v33 }
 0x4e0   : > { %16772 = vmatmul.mubr.msk.bf16.gmra.mxu0 %vm23929_vm11, %v27372_v36  ;;  %17950 = vmatmul.mubr.msk.bf16.gmra.mxu1 %vm23929_vm11, %v27377_v61  ;;  %v17211_v36 = vpop.f32.mrf.mxu1 }
 0x4e1   : > { %16773 = vmatprep.mubr.msk.bf16.mxu0 %vm23929_vm11, %v27375_v4  ;;  %17953 = vmatprep.mubr.msk.bf16.mxu1 %vm23929_vm11, %v27378_v14  ;;  %v17212_v17 = vadd.f32 %v17211_v36, %v17210_v45  ;;  %v18346_v45 = vld [vmem:[#allocation8 + $0x188] sm:$0xff]  }
 0x4e2   : > { %17450 = vmatpush3.bf16.msra.mxu1 %v18336_v27  ;;  %17982 = vmatpush3.bf16.msra.mxu0 %v18342_v33  ;;  %v17213_v15 = vpop.f32.mrf.mxu1  ;;  %v18345_v33 = vld [vmem:[#allocation8 + $0x1c8] sm:$0xff]  }
 0x4e3   : > { %17451 = vmatprep.subr.bf16.mxu1 %v18338_v3  ;;  %17983 = vmatprep.subr.bf16.mxu0 %v18347_v50  ;;  %v18352_v27 = vld [vmem:[#allocation8 + $0x208] sm:$0xff]   ;;  %v18349_v3 = vld [vmem:[#allocation8 + $0x180] sm:$0xff]  }
 0x4e4   : > { %v17214_v32 = vpop.f32.mrf.mxu1 }
 0x4e5   : > { %v17215_v54 = vadd.f32 %v17214_v32, %v17213_v15 }
 0x4e6   : > { %17452 = vmatpush3.bf16.msra.mxu1 %v18339_v2  ;;  %17984 = vmatpush3.bf16.msra.mxu0 %v18347_v50  ;;  %v25273_v50 = vpop.f32.mrf.mxu1 }
 0x4e7   : > { %17453 = vmatprep.subr.bf16.mxu1 %v18340_v53  ;;  %17985 = vmatprep.subr.bf16.mxu0 %v18350_v47 }
 0x4e8   : > { %16774 = vmatmul.mubr.msk.bf16.gmra.mxu0 %vm23929_vm11, %v27373_v49  ;;  %17954 = vmatmul.mubr.msk.bf16.gmra.mxu1 %vm23929_vm11, %v27379_v41  ;;  %v17904_v49 = vpop.f32.mrf.mxu0 }
 0x4e9   : > { %16775 = vmatprep.mubr.msk.bf16.mxu0 %vm23929_vm11, %v27376_v37  ;;  %17957 = vmatprep.mubr.msk.bf16.mxu1 %vm23929_vm11, %v27380_v6  ;;  %v25259_v40 = vadd.f32 %v17904_v49, %v17212_v17 }
 0x4ea   : > { %17454 = vmatpush3.bf16.msra.mxu1 %v18341_v18  ;;  %17986 = vmatpush3.bf16.msra.mxu0 %v18350_v47  ;;  %v25301_v58 = vpop.f32.mrf.mxu0 }
 0x4eb   : > { %17455 = vmatprep.subr.bf16.mxu1 %v18343_v44  ;;  %17987 = vmatprep.subr.bf16.mxu0 %v18351_v63 }
 0x4ee   : > { %17456 = vmatpush3.bf16.msra.mxu1 %v18344_v21  ;;  %17988 = vmatpush3.bf16.msra.mxu0 %v18351_v63  ;;  %v27381_v63 = vld [vmem:[#allocation139_spill] sm:$0xff]  ;;  %v27382_v21 = vld [vmem:[#allocation86_spill] sm:$0xff] }
 0x4ef   : > { %17457 = vmatprep.subr.bf16.mxu1 %v18345_v33  ;;  %17989 = vmatprep.subr.bf16.mxu0 %v18352_v27  ;;  %v15221_v49 = vrot.slane %v27381_v63, 1  ;;  %v15222_v33 = vrot.slane %v27382_v21, 1  ;;  %v27389_v63 = vld [vmem:[#allocation175_spill] sm:$0xff]  ;;  %v27390_v21 = vld [vmem:[#allocation177_spill] sm:$0xff] }
 0x4f0   : > { %16776 = vmatmul.mubr.msk.bf16.gmra.mxu0 %vm23929_vm11, %v27375_v4  ;;  %17958 = vmatmul.mubr.msk.bf16.gmra.mxu1 %vm23929_vm11, %v24490_v48  ;;  %v25275_v4 = vpop.f32.mrf.mxu1 }
 0x4f1   : > { %16777 = vmatprep.mubr.msk.bf16.mxu0 %vm23929_vm11, %v27377_v61  ;;  %17961 = vmatprep.mubr.msk.bf16.mxu1 %vm23929_vm11, %v24586_v8 }
 0x4f2   : > { %17458 = vmatpush3.bf16.msra.mxu1 %v18346_v45  ;;  %17990 = vmatpush3.bf16.msra.mxu0 %v18352_v27  ;;  %v17219_v2 = vpop.f32.mrf.mxu1  ;;  %v27383_v27 = vld [vmem:[#allocation83_spill] sm:$0xff] }
 0x4f3   : > { %17459 = vmatprep.subr.bf16.mxu1 %v18348_v28  ;;  %17991 = vmatprep.subr.bf16.mxu0 %v18353_v31  ;;  %v15218_v45 = vrot.slane %v27383_v27, 1  ;;  %v27384_v28 = vld [vmem:[#allocation85_spill] sm:$0xff] }
 0x4f4   : > { %v17220_v36 = vpop.f32.mrf.mxu1 }
 0x4f5   : > { %v17221_v53 = vadd.f32 %v17220_v36, %v17219_v2  ;;  %v27386_v36 = vld [vmem:[#allocation171_spill] sm:$0xff] }
 0x4f6   : > { %17460 = vmatpush3.bf16.msra.mxu1 %v18349_v3  ;;  %17992 = vmatpush3.bf16.msra.mxu0 %v18353_v31  ;;  %v15224_v31 = vrot.slane %v27384_v28, 1  ;;  %v27385_v3 = vld [vmem:[#allocation70_spill] sm:$0xff]  ;;  %v27391_v28 = vld [vmem:[#allocation99_spill] sm:$0xff] }
 0x4f7   : > { %v15219_v2 = vrot.slane %v27385_v3, 1 }
 0x4f8   : > { %16778 = vmatmul.mubr.msk.bf16.gmra.mxu0 %vm23929_vm11, %v27376_v37  ;;  %17962 = vmatmul.mubr.msk.bf16.gmra.mxu1 %vm23929_vm11, %v24655_v7  ;;  %v17222_v37 = vpop.f32.mrf.mxu1 }
 0x4f9   : > { %16779 = vmatprep.mubr.msk.bf16.mxu0 %vm23929_vm11, %v27378_v14  ;;  %17965 = vmatprep.mubr.msk.bf16.mxu1 %vm23929_vm11, %v24743_v10  ;;  %v15220_v35 = vsel %vm15217_vm14, %v15218_v45, %v15219_v2  ;;  %v27392_v2 = vld [vmem:[#allocation103_spill] sm:$0xff] }
 0x4fa   : > { %v17223_v47 = vpop.f32.mrf.mxu1 }
 0x4fb   : > { %v17224_v26 = vadd.f32 %v17223_v47, %v17222_v37  ;;  %v27387_v47 = vld [vmem:[#allocation140_spill] sm:$0xff] }
 0x4fe   : > { %v17907_v18 = vpop.f32.mrf.mxu0 }
 0x4ff   : > { %v17225_v15 = vpop.f32.mrf.mxu1 }
 0x500   : > { %16780 = vmatmul.mubr.msk.bf16.gmra.mxu0 %vm23929_vm11, %v27377_v61  ;;  %17966 = vmatmul.mubr.msk.bf16.gmra.mxu1 %vm23929_vm11, %v24821_v11  ;;  %v25306_v61 = vadd.f32 %v17907_v18, %v17221_v53  ;;  %v14571_v19 = vpop.f32.mrf.mxu0  ;;  %v15225_v53 = vrot.slane %v27386_v36, 1  ;;  %v15227_v18 = vrot.slane %v27387_v47, 1  ;;  %v15234_v36 = vrot.slane %v27392_v2, 1 }
 0x501   : > { %16781 = vmatprep.mubr.msk.bf16.mxu0 %vm23929_vm11, %v27379_v41  ;;  %17969 = vmatprep.mubr.msk.bf16.mxu1 %vm23929_vm11, %v24891_v39  ;;  %v25317_v44 = vadd.f32 %v17215_v54, %v14571_v19  ;;  %v15223_v54 = vsel %vm15217_vm14, %v15221_v49, %v15222_v33  ;;  %v27388_v19 = vld [vmem:[#allocation81_spill] sm:$0xff]  ;;  %v15230_v49 = vrot.slane %v27389_v63, 1  ;;  %v15231_v33 = vrot.slane %v27390_v21, 1 }
 0x502   : > { %v17908_v17 = vpop.f32.mrf.mxu0 }
 0x503   : > { %v25319_v32 = vadd.f32 %v17908_v17, %v17224_v26  ;;  %v15228_v26 = vrot.slane %v27388_v19, 1 }
 0x504   : > { %v25377_v45 = vpop.f32.mrf.mxu0 }
 0x505   : > { %v25358_v17 = vsel %vm15217_vm14, %v15227_v18, %v15228_v26 }
 0x508   : > { %16782 = vmatmul.mubr.msk.bf16.gmra.mxu0 %vm23929_vm11, %v27378_v14  ;;  %17970 = vmatmul.mubr.msk.bf16.gmra.mxu1 %vm23929_vm11, %v24963_v62  ;;  %v17226_v14 = vpop.f32.mrf.mxu1 }
 0x509   : > { %16783 = vmatprep.mubr.msk.bf16.mxu0 %vm23929_vm11, %v27380_v6  ;;  %17973 = vmatprep.mubr.msk.bf16.mxu1 %vm23929_vm11, %v25122_v13  ;;  %v17227_v12 = vadd.f32 %v17226_v14, %v17225_v15 }
 0x510   : > { %16784 = vmatmul.mubr.msk.bf16.gmra.mxu0 %vm23929_vm11, %v27379_v41  ;;  %17974 = vmatmul.mubr.msk.bf16.gmra.mxu1 %vm23682_vm10, %v25149_v23  ;;  %v25337_v41 = vpop.f32.mrf.mxu1  ;;  %v25344_v23 = vsel %vm15217_vm14, %v15224_v31, %v15225_v53  ;;  %v15233_v31 = vrot.slane %v27391_v28, 1 }
 0x511   : > { %16785 = vmatprep.mubr.msk.bf16.mxu0 %vm23929_vm11, %v24490_v48  ;;  %15466 = vmatprep.mubr.bf16.mxu1 %v15223_v54 }
 0x512   : > { %v25350_v37 = vpop.f32.mrf.mxu1  ;;  %v25388_v47 = vsel %vm15217_vm14, %v15233_v31, %v15234_v36  ;;  %v27396_v31 = vld [vmem:[#allocation155_spill] sm:$0xff] }
 0x515   : > { %v17231_v15 = vpop.f32.mrf.mxu1 }
 0x517   : > { %v17232_v14 = vpop.f32.mrf.mxu1 }
 0x518   : > { %16786 = vmatmul.mubr.msk.bf16.gmra.mxu0 %vm23929_vm11, %v27380_v6  ;;  %15467 = vmatmul.mubr.bf16.vlgmr.msra.gmra.mxu1 %v15220_v35  ;;  %v17233_v6 = vadd.f32 %v17232_v14, %v17231_v15 }
 0x519   : > { %16787 = vmatprep.mubr.msk.bf16.mxu0 %vm23929_vm11, %v24586_v8  ;;  %15474 = vmatprep.mubr.bf16.mxu1 %v25344_v23  ;;  %v17234_v27 = vpop.f32.mrf.mxu1 }
 0x520   : > { %16788 = vmatmul.mubr.msk.bf16.gmra.mxu0 %vm23929_vm11, %v24490_v48  ;;  %15475 = vmatmul.mubr.bf16.gmra.mxu1 %v15223_v54  ;;  %v25371_v48 = vsel %vm15217_vm14, %v15230_v49, %v15231_v33  ;;  %v17235_v54 = vpop.f32.mrf.mxu1  ;;  %v27394_v49 = vld [vmem:[#allocation174_spill] sm:$0xff] }
 0x521   : > { %16789 = vmatprep.mubr.msk.bf16.mxu0 %vm23929_vm11, %v24655_v7  ;;  %15482 = vmatprep.mubr.bf16.mxu1 %v25358_v17  ;;  %v17236_v18 = vadd.f32 %v17235_v54, %v17234_v27  ;;  %v15237_v21 = vrot.slane %v27394_v49, 1  ;;  %v27395_v27 = vld [vmem:[#allocation187_spill] sm:$0xff] }
 0x522   : > { %v15239_v54 = vrot.slane %v27395_v27, 1 }
 0x527   : > { %v17911_v3 = vpop.f32.mrf.mxu0 }
 0x528   : > { %16790 = vmatmul.mubr.msk.bf16.gmra.mxu0 %vm23929_vm11, %v24586_v8  ;;  %15483 = vmatmul.mubr.bf16.gmra.mxu1 %v25344_v23  ;;  %v25381_v8 = vadd.f32 %v17911_v3, %v17233_v6  ;;  %v17237_v53 = vpop.f32.mrf.mxu1  ;;  %v15240_v3 = vrot.slane %v27396_v31, 1 }
 0x529   : > { %16791 = vmatprep.mubr.msk.bf16.mxu0 %vm23929_vm11, %v24743_v10  ;;  %15490 = vmatprep.mubr.bf16.mxu1 %v25371_v48  ;;  %v14587_v35 = vpop.f32.mrf.mxu0 }
 0x52a   : > { %v25393_v15 = vadd.f32 %v17227_v12, %v14587_v35  ;;  %v17238_v19 = vpop.f32.mrf.mxu1  ;;  %v15241_v2 = vsel %vm15217_vm14, %v15239_v54, %v15240_v3 }
 0x52b   : > { %v17239_v26 = vadd.f32 %v17238_v19, %v17237_v53  ;;  %v17912_v14 = vpop.f32.mrf.mxu0 }
 0x52c   : > { %v25396_v6 = vadd.f32 %v17912_v14, %v17236_v18  ;;  %v17240_v33 = vpop.f32.mrf.mxu1  ;;  %v15242_v18 = vrot.slane %v24584_v24, 1  ;;  %v15243_v14 = vrot.slane %v24650_v59, 1  ;;  %v15246_v24 = vrot.slane %v24722_v42, 1 }
 0x52d   : > { %v25428_v49 = vpop.f32.mrf.mxu0 }
 0x52e   : > { %v17241_v28 = vpop.f32.mrf.mxu1 }
 0x52f   : > { %v17242_v3 = vadd.f32 %v17241_v28, %v17240_v33  ;;  %v15251_v33 = vrot.slane %v24862_v56, 1  ;;  %v15252_v28 = vrot.slane %v24872_v34, 1 }
 0x530   : > { %16792 = vmatmul.mubr.msk.bf16.gmra.mxu0 %vm23929_vm11, %v24655_v7  ;;  %15491 = vmatmul.mubr.bf16.gmra.mxu1 %v25358_v17  ;;  %v27393_v7 = vld [vmem:[#allocation154_spill] sm:$0xff] }
 0x531   : > { %16793 = vmatprep.mubr.msk.bf16.mxu0 %vm23929_vm11, %v24821_v11  ;;  %15498 = vmatprep.mubr.bf16.mxu1 %v25388_v47  ;;  %v15236_v63 = vrot.slane %v27393_v7, 1 }
 0x533   : > { %v15238_v12 = vsel %vm15217_vm14, %v15236_v63, %v15237_v21  ;;  %v15245_v63 = vrot.slane %v24672_v57, 1 }
 0x535   : > { %v15247_v27 = vsel %vm15217_vm14, %v15245_v63, %v15246_v24 }
 0x538   : > { %16794 = vmatmul.mubr.msk.bf16.gmra.mxu0 %vm23929_vm11, %v24743_v10  ;;  %15499 = vmatmul.mubr.bf16.gmra.mxu1 %v25371_v48 }
 0x539   : > { %16795 = vmatprep.mubr.msk.bf16.mxu0 %vm23929_vm11, %v24891_v39  ;;  %15506 = vmatprep.mubr.bf16.mxu1 %v15238_v12 }
 0x53a   : > { %v17243_v10 = vpop.f32.mrf.mxu1 }
 0x53c   : > { %v17244_v36 = vpop.f32.mrf.mxu1 }
 0x53d   : > { %v17245_v53 = vadd.f32 %v17244_v36, %v17243_v10 }
 0x53e   : > { %v17246_v35 = vpop.f32.mrf.mxu1 }
 0x540   : > { %16796 = vmatmul.mubr.msk.bf16.gmra.mxu0 %vm23929_vm11, %v24821_v11  ;;  %15507 = vmatmul.mubr.bf16.gmra.mxu1 %v25388_v47  ;;  %v17247_v19 = vpop.f32.mrf.mxu1  ;;  %v15244_v11 = vsel %vm15217_vm14, %v15242_v18, %v15243_v14  ;;  %v15249_v18 = vrot.slane %v24796_v20, 1 }
 0x541   : > { %16797 = vmatprep.mubr.msk.bf16.mxu0 %vm23929_vm11, %v24963_v62  ;;  %15514 = vmatprep.mubr.bf16.mxu1 %v15241_v2  ;;  %v17248_v7 = vadd.f32 %v17247_v19, %v17246_v35 }
 0x548   : > { %16798 = vmatmul.mubr.msk.bf16.gmra.mxu0 %vm23929_vm11, %v24891_v39  ;;  %15515 = vmatmul.mubr.bf16.gmra.mxu1 %v15238_v12 }
 0x549   : > { %16799 = vmatprep.mubr.msk.bf16.mxu0 %vm23929_vm11, %v25122_v13  ;;  %15522 = vmatprep.mubr.bf16.mxu1 %v15244_v11 }
 0x54a   : > { %v17915_v59 = vpop.f32.mrf.mxu0 }
 0x54b   : > { %v25434_v39 = vadd.f32 %v17915_v59, %v17245_v53  ;;  %v17249_v21 = vpop.f32.mrf.mxu1 }
 0x54c   : > { %v14603_v13 = vpop.f32.mrf.mxu0 }
 0x54d   : > { %v25438_v57 = vadd.f32 %v17239_v26, %v14603_v13  ;;  %v17250_v54 = vpop.f32.mrf.mxu1 }
 0x54e   : > { %v17251_v31 = vadd.f32 %v17250_v54, %v17249_v21  ;;  %v17916_v42 = vpop.f32.mrf.mxu0 }
 0x54f   : > { %v25440_v10 = vadd.f32 %v17916_v42, %v17248_v7  ;;  %v17252_v51 = vpop.f32.mrf.mxu1 }
 0x550   : > { %16800 = vmatmul.mubr.msk.bf16.gmra.mxu0 %vm23929_vm11, %v24963_v62  ;;  %15523 = vmatmul.mubr.bf16.gmra.mxu1 %v15241_v2  ;;  %v15248_v62 = vrot.slane %v24741_v1, 1  ;;  %v14606_v36 = vpop.f32.mrf.mxu0  ;;  %v15253_v1 = vsel %vm15217_vm14, %v15251_v33, %v15252_v28 }
 0x551   : > { %17993 = vmatprep.mubr.bf16.mxu0 %v25344_v23  ;;  %15530 = vmatprep.mubr.bf16.mxu1 %v15247_v27  ;;  %v25443_v53 = vadd.f32 %v17242_v3, %v14606_v36  ;;  %v17253_v35 = vpop.f32.mrf.mxu1 }
 0x552   : > { %v17254_v23 = vadd.f32 %v17253_v35, %v17252_v51  ;;  %v15250_v26 = vsel %vm15217_vm14, %v15248_v62, %v15249_v18 }
 0x558   : > { %17994 = vmatmul.mubr.bf16.vlgmr.msra.gmra.mxu0 %v25358_v17  ;;  %15531 = vmatmul.mubr.bf16.gmra.mxu1 %v15244_v11 }
 0x559   : > { %17997 = vmatprep.mubr.bf16.mxu0 %v25371_v48  ;;  %15538 = vmatprep.mubr.bf16.mxu1 %v15250_v26 }
 0x560   : > { %17998 = vmatmul.mubr.bf16.gmra.mxu0 %v25388_v47  ;;  %15539 = vmatmul.mubr.bf16.gmra.mxu1 %v15247_v27 }
 0x561   : > { %18001 = vmatprep.mubr.bf16.mxu0 %v15238_v12  ;;  %15546 = vmatprep.mubr.bf16.mxu1 %v15253_v1  ;;  %v17255_v20 = vpop.f32.mrf.mxu1 }
 0x563   : > { %v17256_v19 = vpop.f32.mrf.mxu1 }
 0x564   : > { %v17257_v17 = vadd.f32 %v17256_v19, %v17255_v20 }
 0x565   : > { %v17258_v14 = vpop.f32.mrf.mxu1 }
 0x567   : > { %v17259_v48 = vpop.f32.mrf.mxu1 }
 0x568   : > { %18002 = vmatmul.mubr.bf16.gmra.mxu0 %v15241_v2  ;;  %15547 = vmatmul.mubr.bf16.gmra.mxu1 %v15250_v26  ;;  %v17260_v56 = vadd.f32 %v17259_v48, %v17258_v14 }
 0x569   : > { %18005 = vmatprep.mubr.bf16.mxu0 %v15244_v11  ;;  %15554 = vmatprep.mubr.bf16.mxu1 %v25194_v29 }
 0x570   : > { %18006 = vmatmul.mubr.bf16.gmra.mxu0 %v15247_v27  ;;  %15555 = vmatmul.mubr.bf16.gmra.mxu1 %v15253_v1 }
 0x571   : > { %18009 = vmatprep.mubr.bf16.mxu0 %v15250_v26  ;;  %15562 = vmatprep.mubr.bf16.mxu1 %v25197_v9 }
 0x574   : > { %v17919_v34 = vpop.f32.mrf.mxu0 }
 0x575   : > { %v25455_v47 = vadd.f32 %v17919_v34, %v17257_v17  ;;  %v17261_v12 = vpop.f32.mrf.mxu1 }
 0x576   : > { %v14619_v7 = vpop.f32.mrf.mxu0 }
 0x577   : > { %v25457_v63 = vadd.f32 %v17251_v31, %v14619_v7  ;;  %v17262_v2 = vpop.f32.mrf.mxu1 }
 0x578   : > { %18010 = vmatmul.mubr.bf16.gmra.mxu0 %v15253_v1  ;;  %15563 = vmatmul.mubr.bf16.gmra.mxu1 %v25194_v29  ;;  %v17263_v11 = vadd.f32 %v17262_v2, %v17261_v12  ;;  %v17920_v24 = vpop.f32.mrf.mxu0 }
 0x579   : > { %18013 = vmatprep.mubr.bf16.mxu0 %v25194_v29  ;;  %15570 = vmatprep.mubr.bf16.mxu1 %v25201_v43  ;;  %v25462_v59 = vadd.f32 %v17920_v24, %v17260_v56  ;;  %v17264_v21 = vpop.f32.mrf.mxu1 }
 0x57a   : > { %v14622_v27 = vpop.f32.mrf.mxu0 }
 0x57b   : > { %v25464_v13 = vadd.f32 %v17254_v23, %v14622_v27  ;;  %v17265_v54 = vpop.f32.mrf.mxu1 }
 0x57c   : > { %v17266_v42 = vadd.f32 %v17265_v54, %v17264_v21 }
 0x57d   : > { %v17267_v3 = vpop.f32.mrf.mxu1 }
 0x57f   : > { %v17268_v31 = vpop.f32.mrf.mxu1 }
 0x580   : > { %18014 = vmatmul.mubr.bf16.gmra.mxu0 %v25197_v9  ;;  %15571 = vmatmul.mubr.bf16.gmra.mxu1 %v25197_v9  ;;  %v17269_v29 = vadd.f32 %v17268_v31, %v17267_v3 }
 0x581   : > { %18017 = vmatprep.mubr.bf16.mxu0 %v25201_v43  ;;  %15578 = vmatprep.mubr.bf16.mxu1 %v25207_v38  ;;  %v17270_v51 = vpop.f32.mrf.mxu1 }
 0x583   : > { %v17271_v62 = vpop.f32.mrf.mxu1 }
 0x584   : > { %v17272_v36 = vadd.f32 %v17271_v62, %v17270_v51 }
 0x587   : > { %v17923_v35 = vpop.f32.mrf.mxu0 }
 0x588   : > { %18018 = vmatmul.mubr.bf16.gmra.mxu0 %v25207_v38  ;;  %v25471_v18 = vadd.f32 %v17923_v35, %v17269_v29  ;;  %v17273_v23 = vpop.f32.mrf.mxu1  ;;  %15579 = vmatmul.mubr.bf16.gmra.mxu1 %v25201_v43  ;;  %v27397_v35 = vld [vmem:[#allocation202_spill] sm:$0xff] }
 0x589   : > { %18021 = vmatprep.mubr.bf16.mxu0 %v25224_v0  ;;  %v14635_v26 = vpop.f32.mrf.mxu0  ;;  %15586 = vmatprep.mubr.bf16.mxu1 %v25224_v0 }
 0x58a   : > { %v25476_v9 = vadd.f32 %v17263_v11, %v14635_v26  ;;  %v17274_v33 = vpop.f32.mrf.mxu1 }
 0x58b   : > { %v17275_v28 = vadd.f32 %v17274_v33, %v17273_v23  ;;  %v17924_v1 = vpop.f32.mrf.mxu0  ;;  %v27398_v23 = vld [vmem:[#allocation176_spill] sm:$0xff] }
 0x58c   : > { %v25478_v20 = vadd.f32 %v17924_v1, %v17272_v36  ;;  %v17276_v19 = vpop.f32.mrf.mxu1  ;;  %v17194_v26 = vadd.f32 %v27398_v23, %v27397_v35 }
 0x58d   : > { %v14638_v17 = vpop.f32.mrf.mxu0 }
 0x58e   : > { %v25480_v14 = vadd.f32 %v17266_v42, %v14638_v17  ;;  %v17277_v48 = vpop.f32.mrf.mxu1 }
 0x58f   : > { %v17278_v56 = vadd.f32 %v17277_v48, %v17276_v19  ;;  %v14543_v19 = vadd.f32 %v17194_v26, %v25235_v52 }
 0x590   : > { %v17927_v34 = vpop.f32.mrf.mxu0  ;;  %18022 = vmatmul.mubr.bf16.gmra.mxu0 %v25248_v16  ;;  %v17279_v43 = vpop.f32.mrf.mxu1  ;;  %15587 = vmatmul.mubr.bf16.gmra.mxu1 %v25207_v38 }
 0x592   : > { %v14651_v0 = vpop.f32.mrf.mxu0  ;;  %v17280_v12 = vpop.f32.mrf.mxu1 }
 0x593   : > { %v25484_v7 = vadd.f32 %v17275_v28, %v14651_v0  ;;  %v17281_v2 = vadd.f32 %v17280_v12, %v17279_v43 }
 0x594   : > { %v17928_v11 = vpop.f32.mrf.mxu0  ;;  %v17282_v24 = vpop.f32.mrf.mxu1 }
 0x595   : > { %v25486_v21 = vadd.f32 %v17927_v34, %v17281_v2 }
 0x596   : > { %v14654_v27 = vpop.f32.mrf.mxu0  ;;  %v17283_v54 = vpop.f32.mrf.mxu1 }
 0x597   : > { %v25488_v42 = vadd.f32 %v17278_v56, %v14654_v27  ;;  %v17284_v3 = vadd.f32 %v17283_v54, %v17282_v24 }
 0x598   : > { %v17325_v31 = vpop.f32.mrf.mxu0  ;;  %v17947_v29 = vpop.f32.mrf.mxu1 }
 0x599   : > { %v25490_v16 = vadd.f32 %v17928_v11, %v17284_v3 }
 0x59a   : > { %v17326_v51 = vpop.f32.mrf.mxu0  ;;  %v15005_v38 = vpop.f32.mrf.mxu1 }
 0x59b   : > { %v17327_v62 = vadd.f32 %v17326_v51, %v17325_v31 }
 0x59c   : > { %v17328_v36 = vpop.f32.mrf.mxu0  ;;  %v17948_v33 = vpop.f32.mrf.mxu1 }
 0x59d   : > { %v14845_v28 = vadd.f32 %v17327_v62, %v25169_v25 }
 0x59e   : > { %v17329_v1 = vpop.f32.mrf.mxu0  ;;  %v15008_v17 = vpop.f32.mrf.mxu1 }
 0x59f   : > { %v17330_v48 = vadd.f32 %v17329_v1, %v17328_v36  ;;  %v25496_v11 = vadd.f32 %v15005_v38, %v14845_v28 }
 0x5a0   : > { %v17331_v56 = vpop.f32.mrf.mxu0  ;;  %v17951_v34 = vpop.f32.mrf.mxu1 }
 0x5a1   : > { %v14848_v43 = vadd.f32 %v17330_v48, %v14543_v19 }
 0x5a2   : > { %v17332_v0 = vpop.f32.mrf.mxu0  ;;  %v15021_v12 = vpop.f32.mrf.mxu1 }
 0x5a3   : > { %v17333_v2 = vadd.f32 %v17332_v0, %v17331_v56  ;;  %v25504_v38 = vadd.f32 %v15008_v17, %v14848_v43 }
 0x5a4   : > { %v17334_v24 = vpop.f32.mrf.mxu0  ;;  %v17952_v27 = vpop.f32.mrf.mxu1 }
 0x5a5   : > { %v14853_v54 = vadd.f32 %v17333_v2, %v25167_v5  ;;  %v17206_v5 = vadd.f32 %v25184_v30, %v25176_v22 }
 0x5a6   : > { %v17335_v3 = vpop.f32.mrf.mxu0  ;;  %v15024_v31 = vpop.f32.mrf.mxu1 }
 0x5a7   : > { %v17336_v25 = vadd.f32 %v17335_v3, %v17334_v24  ;;  %v25499_v51 = vadd.f32 %v17947_v29, %v14853_v54  ;;  %v14559_v56 = vadd.f32 %v17206_v5, %v25301_v58 }
 0x5a8   : > { %v17337_v52 = vpop.f32.mrf.mxu0  ;;  %v17955_v62 = vpop.f32.mrf.mxu1 }
 0x5a9   : > { %v14856_v36 = vadd.f32 %v17336_v25, %v25173_v55 }
 0x5aa   : > { %v17338_v35 = vpop.f32.mrf.mxu0  ;;  %v15037_v23 = vpop.f32.mrf.mxu1 }
 0x5ab   : > { %v17339_v26 = vadd.f32 %v17338_v35, %v17337_v52  ;;  %v25502_v1 = vadd.f32 %v17948_v33, %v14856_v36 }
 0x5ac   : > { %v17340_v28 = vpop.f32.mrf.mxu0  ;;  %v17956_v19 = vpop.f32.mrf.mxu1 }
 0x5ad   : > { %v14861_v48 = vadd.f32 %v17339_v26, %v25245_v60 }
 0x5ae   : > { %v17341_v29 = vpop.f32.mrf.mxu0  ;;  %v15040_v0 = vpop.f32.mrf.mxu1 }
 0x5af   : > { %v17342_v2 = vadd.f32 %v17341_v29, %v17340_v28  ;;  %v25510_v55 = vadd.f32 %v15021_v12, %v14861_v48 }
 0x5b0   : > { %v17343_v24 = vpop.f32.mrf.mxu0  ;;  %v25512_v54 = vpop.f32.mrf.mxu1 }
 0x5b1   : > { %v14864_v33 = vadd.f32 %v17342_v2, %v14559_v56 }
 0x5b2   : > { %v17344_v17 = vpop.f32.mrf.mxu0  ;;  %v15053_v43 = vpop.f32.mrf.mxu1 }
 0x5b3   : > { %v17345_v3 = vadd.f32 %v17344_v17, %v17343_v24  ;;  %v25514_v25 = vadd.f32 %v15024_v31, %v14864_v33 }
 0x5b4   : > { %v17346_v22 = vpop.f32.mrf.mxu0  ;;  %v25516_v30 = vpop.f32.mrf.mxu1 }
 0x5b5   : > { %v14869_v60 = vadd.f32 %v17345_v3, %v25237_v46  ;;  %v17218_v46 = vadd.f32 %v25275_v4, %v25273_v50 }
 0x5b6   : > { %v17347_v52 = vpop.f32.mrf.mxu0  ;;  %v15056_v58 = vpop.f32.mrf.mxu1 }
 0x5b7   : > { %v17348_v36 = vadd.f32 %v17347_v52, %v17346_v22  ;;  %v25519_v35 = vadd.f32 %v17951_v34, %v14869_v60  ;;  %v14575_v33 = vadd.f32 %v17218_v46, %v25377_v45 }
 0x5b8   : > { %v17349_v12 = vpop.f32.mrf.mxu0  ;;  %v25521_v26 = vpop.f32.mrf.mxu1 }
 0x5b9   : > { %v14872_v28 = vadd.f32 %v17348_v36, %v25259_v40 }
 0x5ba   : > { %v17350_v5 = vpop.f32.mrf.mxu0  ;;  %v25524_v48 = vpop.f32.mrf.mxu1 }
 0x5bb   : > { %v17351_v31 = vadd.f32 %v17350_v5, %v17349_v12  ;;  %v25526_v29 = vadd.f32 %v17952_v27, %v14872_v28 }
 0x5bc   : > { %v17352_v56 = vpop.f32.mrf.mxu0  ;;  %v25530_v2 = vpop.f32.mrf.mxu1 }
 0x5bd   : > { %v14877_v34 = vadd.f32 %v17351_v31, %v25317_v44 }
 0x5be   : > { %v17353_v24 = vpop.f32.mrf.mxu0  ;;  %v25534_v17 = vpop.f32.mrf.mxu1 }
 0x5bf   : > { %v17354_v40 = vadd.f32 %v17353_v24, %v17352_v56  ;;  %v25536_v3 = vadd.f32 %v15037_v23, %v14877_v34 }
 0x5c0   : > { %v17355_v22 = vpop.f32.mrf.mxu0  ;;  %v25538_v60 = vpop.f32.mrf.mxu1 }
 0x5c1   : > { %v14880_v27 = vadd.f32 %v17354_v40, %v14575_v33 }
 0x5c2   : > { %v17356_v52 = vpop.f32.mrf.mxu0  ;;  %v25540_v36 = vpop.f32.mrf.mxu1 }
 0x5c3   : > { %v17357_v50 = vadd.f32 %v17356_v52, %v17355_v22  ;;  %v25542_v4 = vadd.f32 %v15040_v0, %v14880_v27 }
 0x5c4   : > { %v17358_v12 = vpop.f32.mrf.mxu0  ;;  %v25544_v44 = vpop.f32.mrf.mxu1 }
 0x5c5   : > { %v14885_v45 = vadd.f32 %v17357_v50, %v25306_v61  ;;  %v17230_v61 = vadd.f32 %v25350_v37, %v25337_v41 }
 0x5c6   : > { %v17359_v28 = vpop.f32.mrf.mxu0  ;;  %v25547_v5 = vpop.f32.mrf.mxu1 }
 0x5c7   : > { %v17360_v23 = vadd.f32 %v17359_v28, %v17358_v12  ;;  %v25549_v31 = vadd.f32 %v17955_v62, %v14885_v45  ;;  %v14591_v50 = vadd.f32 %v17230_v61, %v25428_v49 }
 0x5c8   : > { %v17361_v56 = vpop.f32.mrf.mxu0  ;;  %v25551_v46 = vpop.f32.mrf.mxu1 }
 0x5c9   : > { %v14888_v34 = vadd.f32 %v17360_v23, %v25319_v32 }
 0x5ca   : > { %v17362_v24 = vpop.f32.mrf.mxu0  ;;  %v25554_v33 = vpop.f32.mrf.mxu1 }
 0x5cb   : > { %v17363_v0 = vadd.f32 %v17362_v24, %v17361_v56  ;;  %v25556_v40 = vadd.f32 %v17956_v19, %v14888_v34 }
 0x5cc   : > { %v17364_v22 = vpop.f32.mrf.mxu0  ;;  %v25560_v27 = vpop.f32.mrf.mxu1 }
 0x5cd   : > { %v14893_v62 = vadd.f32 %v17363_v0, %v25393_v15 }
 0x5ce   : > { %v17365_v52 = vpop.f32.mrf.mxu0  ;;  %v25564_v12 = vpop.f32.mrf.mxu1 }
 0x5cf   : > { %v17366_v32 = vadd.f32 %v17365_v52, %v17364_v22  ;;  %v25566_v45 = vadd.f32 %v15053_v43, %v14893_v62 }
 0x5d0   : > { %v17367_v28 = vpop.f32.mrf.mxu0  ;;  %v25568_v23 = vpop.f32.mrf.mxu1 }
 0x5d1   : > { %27399 = vst [vmem:[#allocation107_spill] sm:$0xff] %v25568_v23  ;;  %v14896_v19 = vadd.f32 %v17366_v32, %v14591_v50 }
 0x5d2   : > { %v17368_v56 = vpop.f32.mrf.mxu0  ;;  %v25570_v34 = vpop.f32.mrf.mxu1 }
 0x5d3   : > { %v17369_v41 = vadd.f32 %v17368_v56, %v17367_v28  ;;  %v25572_v37 = vadd.f32 %v15056_v58, %v14896_v19 }
 0x5d4   : > { %v17370_v24 = vpop.f32.mrf.mxu0  ;;  %v25574_v15 = vpop.f32.mrf.mxu1 }
 0x5d5   : > { %27400 = vst [vmem:[#allocation109_spill] sm:$0xff] %v25572_v37  ;;  %27401 = vst [vmem:[#allocation110_spill] sm:$0xff] %v25574_v15  ;;  %v14901_v49 = vadd.f32 %v17369_v41, %v25381_v8 }
 0x5d6   : > { %v17371_v0 = vpop.f32.mrf.mxu0  ;;  %v25577_v61 = vpop.f32.mrf.mxu1 }
 0x5d7   : > { %v17372_v43 = vadd.f32 %v17371_v0, %v17370_v24  ;;  %v25580_v22 = vadd.f32 %v25512_v54, %v14901_v49 }
 0x5d8   : > { %v17373_v62 = vpop.f32.mrf.mxu0  ;;  %v17461_v52 = vpop.f32.mrf.mxu1 }
 0x5d9   : > { %v14904_v50 = vadd.f32 %v17372_v43, %v25396_v6 }
 0x5da   : > { %v17374_v32 = vpop.f32.mrf.mxu0  ;;  %v17462_v28 = vpop.f32.mrf.mxu1 }
 0x5db   : > { %v17375_v58 = vadd.f32 %v17374_v32, %v17373_v62  ;;  %v25584_v19 = vadd.f32 %v25516_v30, %v14904_v50  ;;  %v25586_v56 = vadd.f32 %v17462_v28, %v17461_v52 }
 0x5dc   : > { %v17376_v8 = vpop.f32.mrf.mxu0  ;;  %v25588_v41 = vpop.f32.mrf.mxu1 }
 0x5dd   : > { %v14909_v24 = vadd.f32 %v17375_v58, %v25438_v57 }
 0x5de   : > { %v17377_v0 = vpop.f32.mrf.mxu0  ;;  %v25591_v54 = vpop.f32.mrf.mxu1 }
 0x5df   : > { %v17378_v49 = vadd.f32 %v17377_v0, %v17376_v8  ;;  %v25594_v15 = vadd.f32 %v25524_v48, %v14909_v24 }
 0x5e0   : > { %v17379_v6 = vpop.f32.mrf.mxu0  ;;  %v25596_v43 = vpop.f32.mrf.mxu1 }
 0x5e1   : > { %27402 = vst [vmem:[#allocation113_spill] sm:$0xff] %v25594_v15  ;;  %v14912_v30 = vadd.f32 %v17378_v49, %v25443_v53 }
 0x5e2   : > { %v17380_v62 = vpop.f32.mrf.mxu0  ;;  %v25599_v52 = vpop.f32.mrf.mxu1 }
 0x5e3   : > { %v17381_v50 = vadd.f32 %v17380_v62, %v17379_v6  ;;  %v25602_v32 = vadd.f32 %v25534_v17, %v14912_v30 }
 0x5e4   : > { %v17382_v57 = vpop.f32.mrf.mxu0  ;;  %v25604_v28 = vpop.f32.mrf.mxu1 }
 0x5e5   : > { %27403 = vst [vmem:[#allocation111_spill] sm:$0xff] %v25602_v32  ;;  %v14917_v58 = vadd.f32 %v17381_v50, %v25434_v39 }
 0x5e6   : > { %v17383_v8 = vpop.f32.mrf.mxu0  ;;  %v25607_v48 = vpop.f32.mrf.mxu1 }
 0x5e7   : > { %v17384_v24 = vadd.f32 %v17383_v8, %v17382_v57  ;;  %v25610_v0 = vadd.f32 %v25521_v26, %v14917_v58 }
 0x5e8   : > { %v17385_v53 = vpop.f32.mrf.mxu0  ;;  %v25612_v49 = vpop.f32.mrf.mxu1 }
 0x5e9   : > { %27404 = vst [vmem:[#allocation193_spill] sm:$0xff] %v25610_v0  ;;  %v14920_v6 = vadd.f32 %v17384_v24, %v25440_v10 }
 0x5ea   : > { %v17386_v62 = vpop.f32.mrf.mxu0  ;;  %v25615_v17 = vpop.f32.mrf.mxu1 }
 0x5eb   : > { %v17387_v30 = vadd.f32 %v17386_v62, %v17385_v53  ;;  %v25618_v23 = vadd.f32 %v25530_v2, %v14920_v6 }
 0x5ec   : > { %v17388_v39 = vpop.f32.mrf.mxu0  ;;  %v25620_v50 = vpop.f32.mrf.mxu1 }
 0x5ed   : > { %27405 = vst [vmem:[#allocation159_spill] sm:$0xff] %v25618_v23  ;;  %v14925_v57 = vadd.f32 %v17387_v30, %v25457_v63 }
 0x5ee   : > { %v17389_v8 = vpop.f32.mrf.mxu0  ;;  %v25623_v26 = vpop.f32.mrf.mxu1 }
 0x5ef   : > { %v17390_v58 = vadd.f32 %v17389_v8, %v17388_v39  ;;  %v25626_v32 = vadd.f32 %v25540_v36, %v14925_v57 }
 0x5f0   : > { %v17391_v10 = vpop.f32.mrf.mxu0  ;;  %v25628_v24 = vpop.f32.mrf.mxu1 }
 0x5f1   : > { %27406 = vst [vmem:[#allocation203_spill] sm:$0xff] %v25626_v32  ;;  %v14928_v53 = vadd.f32 %v17390_v58, %v25464_v13 }
 0x5f2   : > { %v17392_v62 = vpop.f32.mrf.mxu0  ;;  %v25631_v2 = vpop.f32.mrf.mxu1 }
 0x5f3   : > { %v17393_v6 = vadd.f32 %v17392_v62, %v17391_v10  ;;  %v25634_v23 = vadd.f32 %v25547_v5, %v14928_v53 }
 0x5f4   : > { %v17394_v63 = vpop.f32.mrf.mxu0  ;;  %v25636_v30 = vpop.f32.mrf.mxu1 }
 0x5f5   : > { %27407 = vst [vmem:[#allocation190_spill] sm:$0xff] %v25634_v23  ;;  %v14933_v39 = vadd.f32 %v17393_v6, %v25455_v47 }
 0x5f6   : > { %v17395_v8 = vpop.f32.mrf.mxu0  ;;  %v25639_v36 = vpop.f32.mrf.mxu1 }
 0x5f7   : > { %v17396_v57 = vadd.f32 %v17395_v8, %v17394_v63  ;;  %v25642_v32 = vadd.f32 %v25538_v60, %v14933_v39 }
 0x5f8   : > { %v17397_v13 = vpop.f32.mrf.mxu0  ;;  %v25644_v58 = vpop.f32.mrf.mxu1 }
 0x5f9   : > { %27408 = vst [vmem:[#allocation197_spill] sm:$0xff] %v25642_v32  ;;  %v14936_v10 = vadd.f32 %v17396_v57, %v25462_v59 }
 0x5fa   : > { %v17398_v62 = vpop.f32.mrf.mxu0  ;;  %v25647_v5 = vpop.f32.mrf.mxu1 }
 0x5fb   : > { %v17399_v53 = vadd.f32 %v17398_v62, %v17397_v13  ;;  %v25650_v23 = vadd.f32 %v25544_v44, %v14936_v10 }
 0x5fc   : > { %v17400_v47 = vpop.f32.mrf.mxu0  ;;  %v25652_v6 = vpop.f32.mrf.mxu1 }
 0x5fd   : > { %27409 = vst [vmem:[#allocation165_spill] sm:$0xff] %v25650_v23  ;;  %v14941_v63 = vadd.f32 %v17399_v53, %v25476_v9 }
 0x5fe   : > { %v17401_v8 = vpop.f32.mrf.mxu0  ;;  %v25655_v60 = vpop.f32.mrf.mxu1 }
 0x5ff   : > { %v17402_v39 = vadd.f32 %v17401_v8, %v17400_v47  ;;  %v25658_v32 = vadd.f32 %v25554_v33, %v14941_v63 }
 0x600   : > { %v17403_v59 = vpop.f32.mrf.mxu0  ;;  %v25660_v57 = vpop.f32.mrf.mxu1 }
 0x601   : > { %27410 = vst [vmem:[#allocation21_spill] sm:$0xff] %v25658_v32  ;;  %v14944_v13 = vadd.f32 %v17402_v39, %v25480_v14 }
 0x602   : > { %v17404_v62 = vpop.f32.mrf.mxu0  ;;  %v25663_v44 = vpop.f32.mrf.mxu1 }
 0x603   : > { %v17405_v10 = vadd.f32 %v17404_v62, %v17403_v59  ;;  %v25666_v23 = vadd.f32 %v25564_v12, %v14944_v13 }
 0x604   : > { %v17406_v9 = vpop.f32.mrf.mxu0  ;;  %v25668_v53 = vpop.f32.mrf.mxu1 }
 0x605   : > { %27411 = vst [vmem:[#allocation196_spill] sm:$0xff] %v25666_v23  ;;  %v14949_v47 = vadd.f32 %v17405_v10, %v25471_v18 }
 0x606   : > { %v17407_v8 = vpop.f32.mrf.mxu0  ;;  %v25671_v33 = vpop.f32.mrf.mxu1 }
 0x607   : > { %v17408_v63 = vadd.f32 %v17407_v8, %v17406_v9  ;;  %v25674_v32 = vadd.f32 %v25551_v46, %v14949_v47 }
 0x608   : > { %v17409_v14 = vpop.f32.mrf.mxu0  ;;  %v25676_v39 = vpop.f32.mrf.mxu1 }
 0x609   : > { %27412 = vst [vmem:[#allocation119_spill] sm:$0xff] %v25674_v32  ;;  %v14952_v59 = vadd.f32 %v17408_v63, %v25478_v20 }
 0x60a   : > { %v17410_v62 = vpop.f32.mrf.mxu0  ;;  %v25679_v12 = vpop.f32.mrf.mxu1 }
 0x60b   : > { %v17411_v13 = vadd.f32 %v17410_v62, %v17409_v14  ;;  %v25682_v23 = vadd.f32 %v25560_v27, %v14952_v59 }
 0x60c   : > { %v17412_v18 = vpop.f32.mrf.mxu0  ;;  %v25684_v10 = vpop.f32.mrf.mxu1 }
 0x60d   : > { %27413 = vst [vmem:[#allocation118_spill] sm:$0xff] %v25682_v23  ;;  %v14957_v9 = vadd.f32 %v17411_v13, %v25484_v7 }
 0x60e   : > { %v17413_v8 = vpop.f32.mrf.mxu0  ;;  %v25687_v46 = vpop.f32.mrf.mxu1 }
 0x60f   : > { %v17414_v47 = vadd.f32 %v17413_v8, %v17412_v18  ;;  %v25690_v32 = vadd.f32 %v25570_v34, %v14957_v9  ;;  %v27417_v18 = vld [vmem:[#allocation13_spill] sm:$0xff] }
 0x610   : > { %v17415_v20 = vpop.f32.mrf.mxu0  ;;  %v25692_v63 = vpop.f32.mrf.mxu1  ;;  %v15854_v9 = vsub.s32 2, %v27417_v18 }
 0x611   : > { %27414 = vst [vmem:[#allocation123_spill] sm:$0xff] %v25690_v32  ;;  %v14960_v14 = vadd.f32 %v17414_v47, %v25488_v42  ;;  %v17469_v42 = vadd.f32 %v25599_v52, %v25596_v43  ;;  %v18355_v43 = vld [vmem:[%s26086_s3] sm:$0xf]  ;;  %v17472_v32 = vadd.f32 %v25607_v48, %v25604_v28 }
 0x612   : > { %v17416_v27 = vpop.f32.mrf.mxu0  ;;  %v25695_v59 = vpop.f32.mrf.mxu1  ;;  %v25722_v52 = vrot.slane %v18355_v43, %v15854_v9 }
 0x613   : > { %v17417_v62 = vadd.f32 %v17416_v27, %v17415_v20  ;;  %v25698_v23 = vadd.f32 %v25577_v61, %v14960_v14  ;;  %v25711_v27 = vld [vmem:[%s18687_s8 + $0x8] sm:$0xff]   ;;  %v15890_v61 = vsub.s32 3, %v27417_v18 }
 0x614   : > { %v17418_v7 = vpop.f32.mrf.mxu0  ;;  %v25700_v13 = vpop.f32.mrf.mxu1  ;;  %v16918_v18 = vunpack.c.l.bf16 %v25711_v27  ;;  %v16919_v37 = vunpack.c.h.bf16 %v25711_v27 }
 0x615   : > { %27415 = vst [vmem:[#allocation121_spill] sm:$0xff] %v25698_v23  ;;  %v25703_v34 = vadd.f32 %v17417_v62, %v25486_v21 }
 0x616   : > { %v17419_v8 = vpop.f32.mrf.mxu0  ;;  %v25708_v47 = vpop.f32.mrf.mxu1 }
 0x617   : > { %27416 = vst [vmem:[#allocation124_spill] sm:$0xff] %v25703_v34  ;;  %v17420_v20 = vadd.f32 %v17419_v8, %v17418_v7  ;;  %v25725_v7 = vld [vmem:[%s18687_s8] sm:$0xff]   ;;  %v25728_v8 = vld [vmem:[%s18687_s8 + $0x18] sm:$0xff]  }
 0x618   : > { %v17995_v14 = vpop.f32.mrf.mxu0  ;;  %v25714_v23 = vpop.f32.mrf.mxu1  ;;  %v16915_v28 = vunpack.c.h.bf16 %v25725_v7 }
 0x619   : > { %27418 = vst [vmem:[#allocation204_spill] sm:$0xff] %v25714_v23  ;;  %v25717_v21 = vadd.f32 %v17420_v20, %v25490_v16  ;;  %v15638_v62 = vadd.f32 %v17995_v14, %v17469_v42  ;;  %v25736_v42 = vrot.slane %v18355_v43, %v15890_v61  ;;  %v25740_v20 = vld [vmem:[%s18687_s8 + $0x10] sm:$0xff]   ;;  %v25743_v14 = vld [vmem:[%s18687_s8 + $0x28] sm:$0xff]   ;;  %v25756_v43 = vld [vmem:[%s18687_s8 + $0x20] sm:$0xff]  }
 0x61a   : > { %v15629_v34 = vpop.f32.mrf.mxu0  ;;  %v25733_v15 = vpop.f32.mrf.mxu1 }
 0x61b   : > { %27419 = vst [vmem:[#allocation198_spill] sm:$0xff] %v25717_v21  ;;  %27420 = vst [vmem:[#allocation35_spill] sm:$0xff] %v25733_v15  ;;  %v15758_v16 = vadd.f32 %v15638_v62, %v25499_v51  ;;  %v15630_v9 = vadd.f32 %v25586_v56, %v15629_v34  ;;  %v16914_v21 = vunpack.c.l.bf16 %v25725_v7  ;;  %v17466_v51 = vadd.f32 %v25591_v54, %v25588_v41  ;;  %v25763_v41 = vld [vmem:[%s18687_s8 + $0x38] sm:$0xff]  }
 0x61c   : > { %v17996_v0 = vpop.f32.mrf.mxu0  ;;  %v25751_v61 = vpop.f32.mrf.mxu1  ;;  %v17481_v7 = vadd.f32 %v25631_v2, %v25628_v24  ;;  %v17475_v24 = vadd.f32 %v25615_v17, %v25612_v49 }
 0x61d   : > { %27421 = vst [vmem:[#allocation201_spill] sm:$0xff] %v25751_v61  ;;  %v15858_v56 = vmul.f32 %v25722_v52, %v15758_v16  ;;  %v15756_v34 = vadd.f32 %v15630_v9, %v25496_v11  ;;  %v15641_v62 = vadd.f32 %v17996_v0, %v17472_v32  ;;  %v25771_v9 = vld [vmem:[%s18687_s8 + $0x30] sm:$0xff]   ;;  %v17484_v61 = vadd.f32 %v25639_v36, %v25636_v30 }
 0x61e   : > { %v15632_v15 = vpop.f32.mrf.mxu0  ;;  %v25765_v54 = vpop.f32.mrf.mxu1  ;;  %v16938_v48 = vunpack.c.l.bf16 %v25771_v9 }
 0x61f   : > { %27422 = vst [vmem:[#allocation126_spill] sm:$0xff] %v25765_v54  ;;  %v15894_v16 = vadd.f32 %v25736_v42, %v15858_v56  ;;  %v15856_v11 = vmul.f32 %v25722_v52, %v15756_v34  ;;  %v15759_v32 = vadd.f32 %v15641_v62, %v25502_v1  ;;  %v15633_v0 = vadd.f32 %v17466_v51, %v15632_v15 }
 0x620   : > { %v17999_v27 = vpop.f32.mrf.mxu0  ;;  %v25778_v54 = vpop.f32.mrf.mxu1 }
 0x621   : > { %v15892_v56 = vadd.f32 %v25736_v42, %v15856_v11  ;;  %v15859_v34 = vmul.f32 %v25722_v52, %v15759_v32  ;;  %v15757_v1 = vadd.f32 %v15633_v0, %v25504_v38  ;;  %v15926_v2 = vadd.f32 %v16918_v18, %v15894_v16 }
 0x622   : > { %v15654_v51 = vadd.f32 %v17999_v27, %v17481_v7  ;;  %v15645_v62 = vpop.f32.mrf.mxu0  ;;  %v25789_v23 = vpop.f32.mrf.mxu1  ;;  %v16943_v38 = vunpack.c.h.bf16 %v25763_v41  ;;  %v16939_v18 = vunpack.c.h.bf16 %v25771_v9  ;;  %v17478_v27 = vadd.f32 %v25623_v26, %v25620_v50 }
 0x623   : > { %v15895_v11 = vadd.f32 %v25736_v42, %v15859_v34  ;;  %v15857_v32 = vmul.f32 %v25722_v52, %v15757_v1  ;;  %v15924_v0 = vadd.f32 %v16914_v21, %v15892_v56  ;;  %v15646_v49 = vadd.f32 %v17475_v24, %v15645_v62 }
 0x624   : > { %v15762_v15 = vadd.f32 %v15654_v51, %v25519_v35  ;;  %v18000_v17 = vpop.f32.mrf.mxu0  ;;  %v25798_v30 = vpop.f32.mrf.mxu1  ;;  %v17487_v34 = vadd.f32 %v25647_v5, %v25644_v58  ;;  %v15958_v1 = vmax.f32 %v15926_v2, 0.0 }
 0x625   : > { %v15927_v7 = vadd.f32 %v16919_v37, %v15895_v11  ;;  %v15893_v36 = vadd.f32 %v25736_v42, %v15857_v32  ;;  %v15657_v16 = vadd.f32 %v18000_v17, %v17484_v61  ;;  %v15760_v35 = vadd.f32 %v15646_v49, %v25510_v55  ;;  %v25820_v49 = vld [vmem:[%s18687_s8 + $0x40] sm:$0xff]  }
 0x626   : > { %v15862_v21 = vmul.f32 %v25722_v52, %v15762_v15  ;;  %v15648_v56 = vpop.f32.mrf.mxu0  ;;  %v25805_v50 = vpop.f32.mrf.mxu1  ;;  %v17493_v61 = vadd.f32 %v25663_v44, %v25660_v57  ;;  %v15956_v62 = vmax.f32 %v15924_v0, 0.0  ;;  %v17496_v57 = vadd.f32 %v25671_v33, %v25668_v53 }
 0x627   : > { %v15959_v24 = vmax.f32 %v15927_v7, 0.0  ;;  %v15925_v51 = vadd.f32 %v16915_v28, %v15893_v36  ;;  %v15763_v37 = vadd.f32 %v15657_v16, %v25526_v29  ;;  %v15649_v26 = vadd.f32 %v17478_v27, %v15648_v56  ;;  %v25817_v29 = vld [vmem:[%s18687_s8 + $0x48] sm:$0xff]  }
 0x628   : > { %v15898_v58 = vadd.f32 %v25736_v42, %v15862_v21  ;;  %v15860_v5 = vmul.f32 %v25722_v52, %v15760_v35  ;;  %v18003_v55 = vpop.f32.mrf.mxu0  ;;  %v25812_v11 = vpop.f32.mrf.mxu1  ;;  %v27423_v44 = vunpack.c.l.bf16 %v25728_v8 }
 0x629   : > { %v16984_v15 = vpack.c.bf16 %v15959_v24, %v15958_v1  ;;  %v15957_v2 = vmax.f32 %v15925_v51, 0.0  ;;  %v15863_v28 = vmul.f32 %v25722_v52, %v15763_v37  ;;  %v15761_v32 = vadd.f32 %v15649_v26, %v25514_v25 }
 0x62a   : > { %v15930_v0 = vadd.f32 %v27423_v44, %v15898_v58  ;;  %v15896_v17 = vadd.f32 %v25736_v42, %v15860_v5  ;;  %v15670_v27 = vadd.f32 %v18003_v55, %v17493_v61  ;;  %v15661_v7 = vpop.f32.mrf.mxu0  ;;  %v25832_v36 = vpop.f32.mrf.mxu1  ;;  %v27424_v1 = vunpack.c.l.bf16 %v25740_v20 }
 0x62b   : > { %17071 = vst [vmem:[%s25829_s29 + $0x8] sm:$0xff] %v16984_v15   ;;  %v16979_v25 = vpack.c.bf16 %v15957_v2, %v15956_v62  ;;  %v15899_v16 = vadd.f32 %v25736_v42, %v15863_v28  ;;  %v15861_v53 = vmul.f32 %v25722_v52, %v15761_v32  ;;  %v15662_v33 = vadd.f32 %v17487_v34, %v15661_v7 }
 0x62c   : > { %v15928_v21 = vadd.f32 %v27424_v1, %v15896_v17  ;;  %v15766_v35 = vadd.f32 %v15670_v27, %v25549_v31  ;;  %v18004_v56 = vpop.f32.mrf.mxu0  ;;  %v16950_v24 = vunpack.c.l.bf16 %v25817_v29  ;;  %v16946_v51 = vunpack.c.l.bf16 %v25820_v49  ;;  %v25844_v61 = vpop.f32.mrf.mxu1 }
 0x62d   : > { %16980 = vst [vmem:[%s25829_s29] sm:$0xff] %v16979_v25   ;;  %v27425_v37 = vunpack.c.h.bf16 %v25728_v8  ;;  %v15897_v62 = vadd.f32 %v25736_v42, %v15861_v53  ;;  %v15764_v34 = vadd.f32 %v15662_v33, %v25536_v3  ;;  %v15673_v58 = vadd.f32 %v18004_v56, %v17496_v57  ;;  %v25867_v33 = vld [vmem:[%s18687_s8 + $0x58] sm:$0xff]  }
 0x62e   : > { %v17490_v5 = vadd.f32 %v25655_v60, %v25652_v6  ;;  %v15962_v31 = vmax.f32 %v15930_v0, 0.0  ;;  %v15866_v55 = vmul.f32 %v25722_v52, %v15766_v35  ;;  %v15664_v15 = vpop.f32.mrf.mxu0  ;;  %v16951_v2 = vunpack.c.h.bf16 %v25817_v29  ;;  %v25854_v44 = vpop.f32.mrf.mxu1 }
 0x62f   : > { %v15931_v26 = vadd.f32 %v27425_v37, %v15899_v16  ;;  %v27426_v8 = vunpack.c.h.bf16 %v25740_v20  ;;  %v15864_v17 = vmul.f32 %v25722_v52, %v15764_v34  ;;  %v15767_v3 = vadd.f32 %v15673_v58, %v25556_v40 }
 0x630   : > { %v17499_v6 = vadd.f32 %v25679_v12, %v25676_v39  ;;  %v17505_v60 = vadd.f32 %v25695_v59, %v25692_v63  ;;  %v15902_v57 = vadd.f32 %v25736_v42, %v15866_v55  ;;  %v15665_v0 = vadd.f32 %v17490_v5, %v15664_v15  ;;  %v18007_v27 = vpop.f32.mrf.mxu0  ;;  %v25863_v16 = vpop.f32.mrf.mxu1 }
 0x631   : > { %v15963_v28 = vmax.f32 %v15931_v26, 0.0  ;;  %v15929_v32 = vadd.f32 %v27426_v8, %v15897_v62  ;;  %v15960_v7 = vmax.f32 %v15928_v21, 0.0  ;;  %v15867_v53 = vmul.f32 %v25722_v52, %v15767_v3 }
 0x632   : > { %v27427_v40 = vunpack.c.l.bf16 %v25743_v14  ;;  %v15900_v12 = vadd.f32 %v25736_v42, %v15864_v17  ;;  %v15765_v63 = vadd.f32 %v15665_v0, %v25542_v4  ;;  %v15686_v59 = vadd.f32 %v18007_v27, %v17505_v60  ;;  %v15677_v1 = vpop.f32.mrf.mxu0  ;;  %v25876_v56 = vpop.f32.mrf.mxu1  ;;  %v27430_v0 = vld [vmem:[#allocation204_spill] sm:$0xff] }
 0x633   : > { %v16994_v20 = vpack.c.bf16 %v15963_v28, %v15962_v31  ;;  %v15961_v25 = vmax.f32 %v15929_v32, 0.0  ;;  %v17508_v21 = vadd.f32 %v25708_v47, %v25700_v13  ;;  %v15903_v37 = vadd.f32 %v25736_v42, %v15867_v53 }
 0x634   : > { %v15934_v39 = vadd.f32 %v27427_v40, %v15902_v57  ;;  %v15678_v26 = vadd.f32 %v17499_v6, %v15677_v1  ;;  %v15865_v62 = vmul.f32 %v25722_v52, %v15765_v63  ;;  %v15770_v34 = vadd.f32 %v15686_v59, %v25580_v22  ;;  %v18008_v58 = vpop.f32.mrf.mxu0  ;;  %v25888_v55 = vpop.f32.mrf.mxu1  ;;  %v27433_v1 = vld [vmem:[#allocation109_spill] sm:$0xff] }
 0x635   : > { %17073 = vst [vmem:[%s25829_s29 + $0x18] sm:$0xff] %v16994_v20   ;;  %v16989_v35 = vpack.c.bf16 %v15961_v25, %v15960_v7  ;;  %v16947_v5 = vunpack.c.h.bf16 %v25820_v49  ;;  %v16958_v4 = vunpack.c.l.bf16 %v25867_v33  ;;  %v17502_v31 = vadd.f32 %v25687_v46, %v25684_v10 }
 0x636   : > { %v27428_v13 = vunpack.c.h.bf16 %v25743_v14  ;;  %v15768_v15 = vadd.f32 %v15678_v26, %v25566_v45  ;;  %v15689_v28 = vadd.f32 %v18008_v58, %v17508_v21  ;;  %v15966_v8 = vmax.f32 %v15934_v39, 0.0  ;;  %v15680_v6 = vpop.f32.mrf.mxu0  ;;  %v17531_v46 = vpop.f32.mrf.mxu1  ;;  %v27431_v45 = vld [vmem:[#allocation35_spill] sm:$0xff] }
 0x637   : > { %17072 = vst [vmem:[%s25829_s29 + $0x10] sm:$0xff] %v16989_v35   ;;  %v27429_v22 = vunpack.c.l.bf16 %v25756_v43  ;;  %v15901_v17 = vadd.f32 %v25736_v42, %v15865_v62  ;;  %v15870_v3 = vmul.f32 %v25722_v52, %v15770_v34  ;;  %v15681_v57 = vadd.f32 %v17502_v31, %v15680_v6  ;;  %v25905_v39 = vld [vmem:[%s18687_s8 + $0x50] sm:$0xff]  }
 0x638   : > { %v15935_v47 = vadd.f32 %v27428_v13, %v15903_v37  ;;  %v15868_v14 = vmul.f32 %v25722_v52, %v15768_v15  ;;  %v15771_v60 = vadd.f32 %v15689_v28, %v25584_v19  ;;  %v17511_v27 = vadd.f32 %v27431_v45, %v27430_v0  ;;  %v18011_v40 = vpop.f32.mrf.mxu0  ;;  %v25907_v63 = vpop.f32.mrf.mxu1 }
 0x639   : > { %v15932_v32 = vadd.f32 %v27429_v22, %v15900_v12  ;;  %v17517_v7 = vadd.f32 %v25789_v23, %v25778_v54  ;;  %v27432_v20 = vunpack.c.h.bf16 %v25756_v43  ;;  %v15906_v53 = vadd.f32 %v25736_v42, %v15870_v3  ;;  %v27437_v3 = vld [vmem:[#allocation126_spill] sm:$0xff] }
 0x63a   : > { %v15967_v10 = vmax.f32 %v15935_v47, 0.0  ;;  %v15904_v19 = vadd.f32 %v25736_v42, %v15868_v14  ;;  %v15871_v59 = vmul.f32 %v25722_v52, %v15771_v60  ;;  %v15769_v21 = vadd.f32 %v15681_v57, %v27433_v1  ;;  %v15693_v26 = vpop.f32.mrf.mxu0  ;;  %v25915_v62 = vpop.f32.mrf.mxu1  ;;  %v27438_v57 = vld [vmem:[#allocation113_spill] sm:$0xff] }
 0x63b   : > { %v15933_v25 = vadd.f32 %v27432_v20, %v15901_v17  ;;  %v15964_v35 = vmax.f32 %v15932_v32, 0.0  ;;  %v27434_v23 = vunpack.c.l.bf16 %v25763_v41  ;;  %v15702_v54 = vadd.f32 %v18011_v40, %v17517_v7  ;;  %v27436_v17 = vld [vmem:[#allocation201_spill] sm:$0xff]  ;;  %v27439_v40 = vld [vmem:[#allocation159_spill] sm:$0xff] }
 0x63c   : > { %v17004_v12 = vpack.c.bf16 %v15967_v10, %v15966_v8  ;;  %v15907_v34 = vadd.f32 %v25736_v42, %v15871_v59  ;;  %v15869_v58 = vmul.f32 %v25722_v52, %v15769_v21  ;;  %v15694_v31 = vadd.f32 %v17511_v27, %v15693_v26  ;;  %v27435_v8 = vld [vmem:[#allocation193_spill] sm:$0xff]  ;;  %v18012_v32 = vpop.f32.mrf.mxu0  ;;  %v25929_v14 = vpop.f32.mrf.mxu1  ;;  %v27440_v21 = vld [vmem:[#allocation111_spill] sm:$0xff] }
 0x63d   : > { %v15965_v37 = vmax.f32 %v15933_v25, 0.0  ;;  %v15938_v43 = vadd.f32 %v27434_v23, %v15906_v53  ;;  %v16954_v13 = vunpack.c.l.bf16 %v25905_v39  ;;  %v17520_v47 = vadd.f32 %v25805_v50, %v25798_v30 }
 0x63e   : > { %17075 = vst [vmem:[%s25829_s29 + $0x28] sm:$0xff] %v17004_v12   ;;  %v15936_v28 = vadd.f32 %v16938_v48, %v15904_v19  ;;  %v15774_v22 = vadd.f32 %v15702_v54, %v27435_v8  ;;  %v17514_v6 = vadd.f32 %v27437_v3, %v27436_v17  ;;  %v15939_v10 = vadd.f32 %v16943_v38, %v15907_v34  ;;  %v15696_v27 = vpop.f32.mrf.mxu0  ;;  %v25939_v38 = vpop.f32.mrf.mxu1  ;;  %v27442_v3 = vld [vmem:[#allocation203_spill] sm:$0xff] }
 0x63f   : > { %v16999_v15 = vpack.c.bf16 %v15965_v37, %v15964_v35  ;;  %v15905_v60 = vadd.f32 %v25736_v42, %v15869_v58  ;;  %v15772_v0 = vadd.f32 %v15694_v31, %v27438_v57  ;;  %v17523_v30 = vadd.f32 %v25832_v36, %v25812_v11 }
 0x640   : > { %v15970_v48 = vmax.f32 %v15938_v43, 0.0  ;;  %v15874_v50 = vmul.f32 %v25722_v52, %v15774_v22  ;;  %v15705_v45 = vadd.f32 %v18012_v32, %v17520_v47  ;;  %v15971_v7 = vmax.f32 %v15939_v10, 0.0  ;;  %v18015_v19 = vpop.f32.mrf.mxu0  ;;  %v17539_v9 = vpop.f32.mrf.mxu1  ;;  %v25956_v47 = vld [vmem:[%s18687_s8 + $0x68] sm:$0xff]  }
 0x641   : > { %17074 = vst [vmem:[%s25829_s29 + $0x20] sm:$0xff] %v16999_v15   ;;  %v15937_v41 = vadd.f32 %v16939_v18, %v15905_v60  ;;  %v15872_v20 = vmul.f32 %v25722_v52, %v15772_v0  ;;  %v15697_v25 = vadd.f32 %v17514_v6, %v15696_v27  ;;  %v17529_v53 = vadd.f32 %v25876_v56, %v25863_v16 }
 0x642   : > { %v15968_v11 = vmax.f32 %v15936_v28, 0.0  ;;  %v15910_v36 = vadd.f32 %v25736_v42, %v15874_v50  ;;  %v15775_v12 = vadd.f32 %v15705_v45, %v27439_v40  ;;  %v17014_v59 = vpack.c.bf16 %v15971_v7, %v15970_v48  ;;  %v15709_v23 = vpop.f32.mrf.mxu0  ;;  %v17540_v34 = vpop.f32.mrf.mxu1  ;;  %v27441_v28 = vld [vmem:[#allocation197_spill] sm:$0xff] }
 0x643   : > { %v15969_v1 = vmax.f32 %v15937_v41, 0.0  ;;  %v15908_v18 = vadd.f32 %v25736_v42, %v15872_v20  ;;  %v15773_v35 = vadd.f32 %v15697_v25, %v27440_v21  ;;  %v15718_v56 = vadd.f32 %v18015_v19, %v17529_v53  ;;  %v27443_v50 = vld [vmem:[#allocation165_spill] sm:$0xff] }
 0x644   : > { %v15942_v37 = vadd.f32 %v16950_v24, %v15910_v36  ;;  %v15875_v16 = vmul.f32 %v25722_v52, %v15775_v12  ;;  %v16959_v43 = vunpack.c.h.bf16 %v25867_v33  ;;  %v17532_v54 = vadd.f32 %v17531_v46, %v25888_v55  ;;  %17077 = vst [vmem:[%s25829_s29 + $0x38] sm:$0xff] %v17014_v59   ;;  %v18016_v22 = vpop.f32.mrf.mxu0  ;;  %v17542_v46 = vpop.f32.mrf.mxu1  ;;  %v25981_v40 = vld [vmem:[%s18687_s8 + $0x60] sm:$0xff]  }
 0x645   : > { %v17009_v26 = vpack.c.bf16 %v15969_v1, %v15968_v11  ;;  %v15873_v58 = vmul.f32 %v25722_v52, %v15773_v35  ;;  %v15710_v31 = vadd.f32 %v17523_v30, %v15709_v23  ;;  %v15940_v24 = vadd.f32 %v16946_v51, %v15908_v18  ;;  %v27445_v23 = vld [vmem:[#allocation119_spill] sm:$0xff] }
 0x646   : > { %v15911_v15 = vadd.f32 %v25736_v42, %v15875_v16  ;;  %v15778_v8 = vadd.f32 %v15718_v56, %v27441_v28  ;;  %v16955_v32 = vunpack.c.h.bf16 %v25905_v39  ;;  %v17526_v55 = vadd.f32 %v25854_v44, %v25844_v61  ;;  %v15712_v0 = vpop.f32.mrf.mxu0  ;;  %v17543_v44 = vpop.f32.mrf.mxu1  ;;  %v27446_v39 = vld [vmem:[#allocation21_spill] sm:$0xff] }
 0x647   : > { %17076 = vst [vmem:[%s25829_s29 + $0x30] sm:$0xff] %v17009_v26   ;;  %v15909_v17 = vadd.f32 %v25736_v42, %v15873_v58  ;;  %v15776_v6 = vadd.f32 %v15710_v31, %v27442_v3  ;;  %v15721_v10 = vadd.f32 %v18016_v22, %v17532_v54  ;;  %v15974_v60 = vmax.f32 %v15942_v37, 0.0 }
 0x648   : > { %v15943_v51 = vadd.f32 %v16951_v2, %v15911_v15  ;;  %v15878_v57 = vmul.f32 %v25722_v52, %v15778_v8  ;;  %v16966_v30 = vunpack.c.l.bf16 %v25956_v47  ;;  %v15713_v27 = vadd.f32 %v17526_v55, %v15712_v0  ;;  %v18019_v2 = vpop.f32.mrf.mxu0  ;;  %v17545_v53 = vpop.f32.mrf.mxu1 }
 0x649   : > { %v15941_v61 = vadd.f32 %v16947_v5, %v15909_v17  ;;  %v15876_v48 = vmul.f32 %v25722_v52, %v15776_v6  ;;  %v15779_v45 = vadd.f32 %v15721_v10, %v27443_v50  ;;  %v15972_v7 = vmax.f32 %v15940_v24, 0.0  ;;  %v27444_v5 = vld [vmem:[#allocation190_spill] sm:$0xff] }
 0x64a   : > { %v17541_v41 = vadd.f32 %v17540_v34, %v17539_v9  ;;  %v15975_v20 = vmax.f32 %v15943_v51, 0.0  ;;  %v15914_v29 = vadd.f32 %v25736_v42, %v15878_v57  ;;  %v15777_v36 = vadd.f32 %v15713_v27, %v27444_v5  ;;  %v15725_v9 = vpop.f32.mrf.mxu0  ;;  %v17546_v35 = vpop.f32.mrf.mxu1  ;;  %v27447_v17 = vld [vmem:[#allocation118_spill] sm:$0xff] }
 0x64b   : > { %v15973_v25 = vmax.f32 %v15941_v61, 0.0  ;;  %v15912_v11 = vadd.f32 %v25736_v42, %v15876_v48  ;;  %v15879_v49 = vmul.f32 %v25722_v52, %v15779_v45  ;;  %v17535_v12 = vadd.f32 %v25915_v62, %v25907_v63  ;;  %v27448_v61 = vld [vmem:[#allocation196_spill] sm:$0xff] }
 0x64c   : > { %v17024_v19 = vpack.c.bf16 %v15975_v20, %v15974_v60  ;;  %v15946_v59 = vadd.f32 %v16958_v4, %v15914_v29  ;;  %v15734_v1 = vadd.f32 %v18019_v2, %v17541_v41  ;;  %v17544_v21 = vadd.f32 %v17543_v44, %v17542_v46  ;;  %v18020_v54 = vpop.f32.mrf.mxu0  ;;  %v17548_v34 = vpop.f32.mrf.mxu1 }
 0x64d   : > { %v17019_v18 = vpack.c.bf16 %v15973_v25, %v15972_v7  ;;  %v15915_v37 = vadd.f32 %v25736_v42, %v15879_v49  ;;  %v15877_v16 = vmul.f32 %v25722_v52, %v15777_v36  ;;  %v15944_v56 = vadd.f32 %v16954_v13, %v15912_v11  ;;  %v27449_v36 = vld [vmem:[#allocation123_spill] sm:$0xff] }
 0x64e   : > { %17079 = vst [vmem:[%s25829_s29 + $0x48] sm:$0xff] %v17024_v19   ;;  %v15782_v63 = vadd.f32 %v15734_v1, %v27445_v23  ;;  %v15726_v62 = vadd.f32 %v17535_v12, %v15725_v9  ;;  %v16962_v33 = vunpack.c.l.bf16 %v25981_v40  ;;  %v17538_v4 = vadd.f32 %v25939_v38, %v25929_v14  ;;  %v15728_v8 = vpop.f32.mrf.mxu0  ;;  %v17549_v46 = vpop.f32.mrf.mxu1  ;;  %v17069_v12 = vld [vmem:[%s18687_s8 + $0x70] sm:$0xff]  }
 0x64f   : > { %17078 = vst [vmem:[%s25829_s29 + $0x40] sm:$0xff] %v17019_v18   ;;  %v15947_v26 = vadd.f32 %v16959_v43, %v15915_v37  ;;  %v15913_v58 = vadd.f32 %v25736_v42, %v15877_v16  ;;  %v15737_v31 = vadd.f32 %v18020_v54, %v17544_v21  ;;  %v15978_v24 = vmax.f32 %v15946_v59, 0.0  ;;  %v27450_v59 = vld [vmem:[#allocation124_spill] sm:$0xff]  ;;  %v27451_v1 = vld [vmem:[#allocation107_spill] sm:$0xff] }
 0x650   : > { %v15882_v15 = vmul.f32 %v25722_v52, %v15782_v63  ;;  %v15780_v13 = vadd.f32 %v15726_v62, %v27446_v39  ;;  %v16967_v28 = vunpack.c.h.bf16 %v25956_v47  ;;  %v15729_v14 = vadd.f32 %v17538_v4, %v15728_v8  ;;  %v18023_v60 = vpop.f32.mrf.mxu0  ;;  %v17551_v0 = vpop.f32.mrf.mxu1  ;;  %v27453_v39 = vld [vmem:[#allocation198_spill] sm:$0xff] }
 0x651   : > { %v15979_v22 = vmax.f32 %v15947_v26, 0.0  ;;  %v15945_v55 = vadd.f32 %v16955_v32, %v15913_v58  ;;  %v15783_v3 = vadd.f32 %v15737_v31, %v27447_v17  ;;  %v15976_v38 = vmax.f32 %v15944_v56, 0.0  ;;  %v27452_v31 = vld [vmem:[#allocation121_spill] sm:$0xff] }
 0x652   : > { %v17547_v43 = vadd.f32 %v17546_v35, %v17545_v53  ;;  %v15918_v6 = vadd.f32 %v25736_v42, %v15882_v15  ;;  %v15880_v10 = vmul.f32 %v25722_v52, %v15780_v13  ;;  %v15781_v32 = vadd.f32 %v15729_v14, %v27448_v61  ;;  %v15741_v45 = vpop.f32.mrf.mxu0  ;;  %v17552_v7 = vpop.f32.mrf.mxu1  ;;  %v27454_v13 = vld [vmem:[#allocation110_spill] sm:$0xff] }
 0x653   : > { %v17034_v51 = vpack.c.bf16 %v15979_v22, %v15978_v24  ;;  %v15977_v57 = vmax.f32 %v15945_v55, 0.0  ;;  %v15883_v47 = vmul.f32 %v25722_v52, %v15783_v3  ;;  %v16963_v50 = vunpack.c.h.bf16 %v25981_v40 }
 0x654   : > { %v15950_v44 = vadd.f32 %v16966_v30, %v15918_v6  ;;  %v15916_v48 = vadd.f32 %v25736_v42, %v15880_v10  ;;  %v15881_v20 = vmul.f32 %v25722_v52, %v15781_v32  ;;  %v15742_v29 = vadd.f32 %v17547_v43, %v15741_v45  ;;  %v18024_v53 = vpop.f32.mrf.mxu0  ;;  %v17554_v49 = vpop.f32.mrf.mxu1 }
 0x655   : > { %17081 = vst [vmem:[%s25829_s29 + $0x58] sm:$0xff] %v17034_v51   ;;  %v17029_v27 = vpack.c.bf16 %v15977_v57, %v15976_v38  ;;  %v15919_v41 = vadd.f32 %v25736_v42, %v15883_v47  ;;  %v17553_v25 = vadd.f32 %v17552_v7, %v17551_v0  ;;  %v17550_v11 = vadd.f32 %v17549_v46, %v17548_v34  ;;  %v17070_v34 = vld [vmem:[%s18687_s8 + $0x78] sm:$0xff]  }
 0x656   : > { %v15948_v2 = vadd.f32 %v16962_v33, %v15916_v48  ;;  %v15917_v5 = vadd.f32 %v25736_v42, %v15881_v20  ;;  %v15784_v40 = vadd.f32 %v15742_v29, %v27449_v36  ;;  %v15982_v19 = vmax.f32 %v15950_v44, 0.0  ;;  %v15744_v21 = vpop.f32.mrf.mxu0  ;;  %v17555_v16 = vpop.f32.mrf.mxu1 }
 0x657   : > { %17080 = vst [vmem:[%s25829_s29 + $0x50] sm:$0xff] %v17029_v27   ;;  %v15951_v30 = vadd.f32 %v16967_v28, %v15919_v41  ;;  %v15126_v9 = vadd.f32 %v27451_v1, %v27450_v59  ;;  %v15750_v18 = vadd.f32 %v18023_v60, %v17553_v25  ;;  %v15745_v23 = vadd.f32 %v17550_v11, %v15744_v21 }
 0x658   : > { %v15949_v37 = vadd.f32 %v16963_v50, %v15917_v5  ;;  %v15884_v56 = vmul.f32 %v25722_v52, %v15784_v40  ;;  %v15980_v63 = vmax.f32 %v15948_v2, 0.0  ;;  %v17556_v62 = vadd.f32 %v17555_v16, %v17554_v49 }
 0x659   : > { %v15983_v35 = vmax.f32 %v15951_v30, 0.0  ;;  %v15786_v33 = vadd.f32 %v15750_v18, %v15126_v9  ;;  %v16970_v54 = vunpack.c.l.bf16 %v17069_v12  ;;  %v15785_v24 = vadd.f32 %v15745_v23, %v27452_v31 }
 0x65a   : > { %v15981_v26 = vmax.f32 %v15949_v37, 0.0  ;;  %v15920_v58 = vadd.f32 %v25736_v42, %v15884_v56  ;;  %v15129_v28 = vadd.f32 %v27454_v13, %v27453_v39  ;;  %v15753_v8 = vadd.f32 %v18024_v53, %v17556_v62 }
 0x65b   : > { %v17044_v4 = vpack.c.bf16 %v15983_v35, %v15982_v19  ;;  %v15886_v15 = vmul.f32 %v25722_v52, %v15786_v33  ;;  %v16971_v55 = vunpack.c.h.bf16 %v17069_v12  ;;  %v15885_v46 = vmul.f32 %v25722_v52, %v15785_v24 }
 0x65c   : > { %v17039_v22 = vpack.c.bf16 %v15981_v26, %v15980_v63  ;;  %v16974_v17 = vunpack.c.l.bf16 %v17070_v34  ;;  %v15787_v14 = vadd.f32 %v15753_v8, %v15129_v28  ;;  %v15952_v38 = vadd.f32 %v16970_v54, %v15920_v58 }
 0x65d   : > { %17083 = vst [vmem:[%s25829_s29 + $0x68] sm:$0xff] %v17044_v4   ;;  %v15922_v3 = vadd.f32 %v25736_v42, %v15886_v15  ;;  %v15921_v43 = vadd.f32 %v25736_v42, %v15885_v46  ;;  %v16975_v6 = vunpack.c.h.bf16 %v17070_v34 }
 0x65e   : > { %17082 = vst [vmem:[%s25829_s29 + $0x60] sm:$0xff] %v17039_v22   ;;  %v15887_v10 = vmul.f32 %v25722_v52, %v15787_v14  ;;  %v15984_v0 = vmax.f32 %v15952_v38, 0.0 }
 0x65f   : > { %v15953_v60 = vadd.f32 %v16971_v55, %v15921_v43  ;;  %v15954_v51 = vadd.f32 %v16974_v17, %v15922_v3 }
 0x660   : > { %v15923_v57 = vadd.f32 %v25736_v42, %v15887_v10 }
 0x661   : > { %v15985_v47 = vmax.f32 %v15953_v60, 0.0  ;;  %v15986_v44 = vmax.f32 %v15954_v51, 0.0 }
 0x662   : > { %v15955_v61 = vadd.f32 %v16975_v6, %v15923_v57 }
 0x663   : > { %v17049_v32 = vpack.c.bf16 %v15985_v47, %v15984_v0 }
 0x664   : > { %v15987_v48 = vmax.f32 %v15955_v61, 0.0 }
 0x665   : > { %17084 = vst [vmem:[%s25829_s29 + $0x70] sm:$0xff] %v17049_v32  }
 0x666   : > { %v17054_v52 = vpack.c.bf16 %v15987_v48, %v15986_v44 }
 0x668   : > { %17085 = vst [vmem:[%s25829_s29 + $0x78] sm:$0xff] %v17054_v52  }
 0x669   : > { %18449 = shalt.err (!%p18446_p3)
}
 0x66a   : > { %s18450_s25 = scalar_lea.hbm %s26037_s24, 2048  ;;  %s18454_s23 = scalar_lea.hbm %s26087_s4, 4096 }
 0x66b   : > { %p18451_p11 = scmp.ne.s32.totalorder %s26037_s24, %s18450_s25  ;;  %p18455_p4 = scmp.lt.s32.totalorder %s26037_s24, %s26087_s4 }
 0x66c   : > { %p18456_p6 = scmp.lt.s32.totalorder %s18454_s23, %s18450_s25 }
 0x66d   : > { %p18452_p9 = pnand %p18451_p11, %p27455_p2 }
 0x66e   : > { %p18457_p8 = por %p18456_p6, %p18455_p4 }
 0x66f   : > { %p18453_p1 = pneg %p18452_p9 }
 0x671   : > { %p18458_p5 = pnand %p18457_p8, %p18453_p1 }
 0x673   : > { %18461 = shalt.err (!%p18458_p5)
}
 0x674   : > { %s18518_s29 = smov 64   ;;  %s18519_s7 = smov 4  }
 0x675   : > { %18035 = dma.vmem_to_hbm [thread:$0]  (%p27455_p2), %s26039_s9, 2048, %s26037_s24, %s16149_s28, %s18518_s29, %s18518_s29, %s18519_s7  }
 0x676 PF: > { %s16177_s26 = sand.u32 1, %s18492_s15   ;;  %p27456_p7 = scmp.ne.s32.totalorder %s26536_s22, 0 }
 0x677   : > { %p27457_p12 = scmp.ge.s32.totalorder %s18504_s18, 2  ;;  %s16178_s27 = scalar_lea.sflag [#allocation5], %s16177_s26 }
 0x679   : > { %p18049_p13 = pnand %p27457_p12, %p27456_p7 }
 0x67b   : > { %p18050_p0 = pneg %p18049_p13 }
 0x67d   : > { %18487 = dma.done.wait (%p18050_p0), %s16178_s27, 2048  }
 0x67e   : > { %18489 = vsyncadd (%p18050_p0), %s16178_s27, 4294965248  ;;  %p18_p10 = scmp.ge.s32.totalorder %s18623_s11, 4   ;;  %s27458_s15 = smov %s18496_s16 }
 0x67f   : > { %s27459_s16 = smov %s18500_s17  ;;  %s27460_s17 = smov %s18639_s20 }
 0x680   : > { %s27461_s18 = smov %s18623_s11  ;;  %20 = sbr.rel (!%p18_p10) target bundleno = 6 (0x6), region = 95 }
 0x685   :  { %16183 = vsyncpa [#allocation4], 1 }
 0x686   :  { %16185 = vsyncpa [#allocation4 + $0x1], 1 }
 0x687   :  { %16186 = vsyncpa [#allocation7], 1 }
 0x688   :  { %16187 = vsyncpa [#allocation5], 1 }
 0x689   :  { %16189 = vsyncpa [#allocation5 + $0x1], 1 }

</bundles_post_ra>
